<compile_context>
chip_gen: v7x
topology: tpu7x:2x2x1
jax: 0.10.0
libtpu: 0.0.40
codegen_flags: <defaults>
</compile_context>

<pallas_src>
import functools
import math

import jax
import jax.numpy as jnp
from jax.experimental import pallas as pl
from jax.experimental.pallas import tpu as pltpu

LN_EPS = 1e-5          # matches PyTorch nn.LayerNorm default
LANE = 128


def _round_up(n, m):
    return ((n + m - 1) // m) * m


# ------------------------- in-kernel helpers -------------------------

def _ln(x, g, b, d):
    """LayerNorm over the true feature width `d` of a zero-lane-padded block.

    x: (rows, P) f32 with lanes [d, P) exactly zero, so the lane sums over all P
    lanes equal the sums over the true d features; padded lanes of the result stay
    zero because gamma/beta are zero there.
    """
    inv_d = 1.0 / d
    mu = jnp.sum(x, axis=-1, keepdims=True) * inv_d
    var = jnp.sum(x * x, axis=-1, keepdims=True) * inv_d - mu * mu
    return (x - mu) * jax.lax.rsqrt(var + LN_EPS) * g + b


def _mha_proj(q, k, v, wo, h, dk):
    """Multi-head attention fused with the output projection.

    q: (Sq, P), k/v: (Sk, P) f32 with head data in lanes [0, h*dk); wo: (P, P) f32.
    Returns concat_h(softmax(q_h k_h^T / sqrt(dk)) v_h) @ Wo, accumulated head by
    head through the matching Wo row-slice (no concatenate / context relayout).
    """
    scale = 1.0 / math.sqrt(dk)
    out = None
    for hh in range(h):                         # static unroll; dk is tiny here
        lo = hh * dk
        qh = q[:, lo:lo + dk].astype(jnp.bfloat16)
        kh = k[:, lo:lo + dk].astype(jnp.bfloat16)
        vh = v[:, lo:lo + dk].astype(jnp.bfloat16)
        s = jax.lax.dot_general(qh, kh, (((1,), (1,)), ((), ())),
                                preferred_element_type=jnp.float32) * scale
        m = jnp.max(s, axis=-1, keepdims=True)
        p = jnp.exp(s - m)
        p = p * pl.reciprocal(jnp.sum(p, axis=-1, keepdims=True), approx=True)
        ctx = jnp.dot(p.astype(jnp.bfloat16), vh, preferred_element_type=jnp.float32)
        proj = jnp.dot(ctx.astype(jnp.bfloat16),
                       wo[lo:lo + dk, :].astype(jnp.bfloat16),
                       preferred_element_type=jnp.float32)
        out = proj if out is None else out + proj
    return out
    # TODO(synk): for realistic configs (dk >= 128) replace the sub-128 per-head
    # lane slices with lane-aligned head tiles / a batched head einsum.


# ------------------------- fused Pallas kernels -------------------------

def _encoder_layer_kernel(x_ref, g1_ref, b1_ref, wqkv_ref, bqkv_ref, wo_ref, bo_ref,
                          g2_ref, b2_ref, w1_ref, b1f_ref, w2_ref, b2f_ref, o_ref,
                          *, h, dk, d, p):
    x = x_ref[...]                                                   # (S, P) f32
    # --- self-attention block (pre-norm) ---
    xn = _ln(x, g1_ref[...], b1_ref[...], d).astype(jnp.bfloat16)
    qkv = jnp.dot(xn, wqkv_ref[...], preferred_element_type=jnp.float32) + bqkv_ref[...]
    q, k, v = qkv[:, :p], qkv[:, p:2 * p], qkv[:, 2 * p:]            # 128-aligned splits
    x = x + _mha_proj(q, k, v, wo_ref[...], h, dk) + bo_ref[...]
    # --- feed-forward block (pre-norm) ---
    xn = _ln(x, g2_ref[...], b2_ref[...], d).astype(jnp.bfloat16)
    hdn = jnp.maximum(
        jnp.dot(xn, w1_ref[...], preferred_element_type=jnp.float32) + b1f_ref[...], 0.0)
    x = x + jnp.dot(hdn.astype(jnp.bfloat16), w2_ref[...],
                    preferred_element_type=jnp.float32) + b2f_ref[...]
    o_ref[...] = x


def _decoder_layer_kernel(x_ref, enc_ref,
                          g1_ref, b1_ref, wqkv_ref, bqkv_ref, wos_ref, bos_ref,
                          g2_ref, b2_ref, wqc_ref, bqc_ref, wkv_ref, bkv_ref,
                          woc_ref, boc_ref,
                          g3_ref, b3_ref, w1_ref, b1f_ref, w2_ref, b2f_ref,
                          o_ref, *, h, dk, d, p):
    x = x_ref[...]                                                   # (St, P) f32
    enc = enc_ref[...]                                               # (Se, P) f32
    # --- self-attention (unmasked; reference forward passes no tgt mask) ---
    xn = _ln(x, g1_ref[...], b1_ref[...], d).astype(jnp.bfloat16)
    qkv = jnp.dot(xn, wqkv_ref[...], preferred_element_type=jnp.float32) + bqkv_ref[...]
    q, k, v = qkv[:, :p], qkv[:, p:2 * p], qkv[:, 2 * p:]
    x = x + _mha_proj(q, k, v, wos_ref[...], h, dk) + bos_ref[...]
    # --- cross-attention (queries from decoder stream, K/V from encoder memory) ---
    xn = _ln(x, g2_ref[...], b2_ref[...], d).astype(jnp.bfloat16)
    q = jnp.dot(xn, wqc_ref[...], preferred_element_type=jnp.float32) + bqc_ref[...]
    kv = jnp.dot(enc.astype(jnp.bfloat16), wkv_ref[...],
                 preferred_element_type=jnp.float32) + bkv_ref[...]
    k, v = kv[:, :p], kv[:, p:]
    x = x + _mha_proj(q, k, v, woc_ref[...], h, dk) + boc_ref[...]
    # --- feed-forward ---
    xn = _ln(x, g3_ref[...], b3_ref[...], d).astype(jnp.bfloat16)
    hdn = jnp.maximum(
        jnp.dot(xn, w1_ref[...], preferred_element_type=jnp.float32) + b1f_ref[...], 0.0)
    x = x + jnp.dot(hdn.astype(jnp.bfloat16), w2_ref[...],
                    preferred_element_type=jnp.float32) + b2f_ref[...]
    o_ref[...] = x


def _layernorm_kernel(x_ref, g_ref, b_ref, o_ref, *, d):
    o_ref[...] = _ln(x_ref[...], g_ref[...], b_ref[...], d)


def _head_kernel(x_ref, g_ref, b_ref, w_ref, bias_ref, o_ref, *, d):
    # final LayerNorm + output Linear + softmax; vocab padded to 128 lanes,
    # padded columns carry a -1e30 f32 bias so their probability is exactly 0.
    xn = _ln(x_ref[...], g_ref[...], b_ref[...], d).astype(jnp.bfloat16)
    logits = jnp.dot(xn, w_ref[...], preferred_element_type=jnp.float32) + bias_ref[...]
    m = jnp.max(logits, axis=-1, keepdims=True)
    e = jnp.exp(logits - m)
    o_ref[...] = e / jnp.sum(e, axis=-1, keepdims=True)   # exact division: rows sum to 1


# ------------------------- pallas_call wrappers -------------------------

def _batched_spec(s, w):
    # squeezed leading batch dim -> kernel sees a clean 2-D (s, w) tile
    return pl.BlockSpec((None, s, w), lambda bi: (bi, 0, 0))


def _whole_spec(a):
    zeros = (0,) * a.ndim
    return pl.BlockSpec(a.shape, lambda bi, _z=zeros: _z)
    # TODO(synk): for scaled-up configs, single-buffer these grid-invariant weight
    # blocks (pipeline_mode=pl.Buffered) and tile d_ff / vocab with a VMEM
    # accumulator + vmem_limit_bytes to stay inside v7x's 64 MiB VMEM.


_PARALLEL = pltpu.CompilerParams(dimension_semantics=("parallel",))


def pl_encoder_layer(x, layer, *, h, dk, d, p):
    B, S, P = x.shape
    kernel = functools.partial(_encoder_layer_kernel, h=h, dk=dk, d=d, p=p)
    return pl.pallas_call(
        kernel,
        out_shape=jax.ShapeDtypeStruct((B, S, P), jnp.float32),
        grid=(B,),
        in_specs=[_batched_spec(S, P)] + [_whole_spec(a) for a in layer],
        out_specs=_batched_spec(S, P),
        compiler_params=_PARALLEL,
    )(x, *layer)


def pl_decoder_layer(x, enc, layer, *, h, dk, d, p):
    B, St, P = x.shape
    Se = enc.shape[1]
    kernel = functools.partial(_decoder_layer_kernel, h=h, dk=dk, d=d, p=p)
    return pl.pallas_call(
        kernel,
        out_shape=jax.ShapeDtypeStruct((B, St, P), jnp.float32),
        grid=(B,),
        in_specs=[_batched_spec(St, P), _batched_spec(Se, P)] +
                 [_whole_spec(a) for a in layer],
        out_specs=_batched_spec(St, P),
        compiler_params=_PARALLEL,
    )(x, enc, *layer)


def pl_layernorm(x, g, b, *, d):
    B, S, P = x.shape
    kernel = functools.partial(_layernorm_kernel, d=d)
    return pl.pallas_call(
        kernel,
        out_shape=jax.ShapeDtypeStruct((B, S, P), jnp.float32),
        grid=(B,),
        in_specs=[_batched_spec(S, P), _whole_spec(g), _whole_spec(b)],
        out_specs=_batched_spec(S, P),
        compiler_params=_PARALLEL,
    )(x, g, b)


def pl_head(x, g, b, w, bias, *, d):
    B, S, P = x.shape
    VP = w.shape[1]
    kernel = functools.partial(_head_kernel, d=d)
    return pl.pallas_call(
        kernel,
        out_shape=jax.ShapeDtypeStruct((B, S, VP), jnp.float32),
        grid=(B,),
        in_specs=[_batched_spec(S, P), _whole_spec(g), _whole_spec(b),
                  _whole_spec(w), _whole_spec(bias)],
        out_specs=_batched_spec(S, VP),
        compiler_params=_PARALLEL,
    )(x, g, b, w, bias)


# ------------------------- model glue (plain JAX) -------------------------

def sinusoidal_pe(max_len, d_model, p):
    pos = jnp.arange(max_len, dtype=jnp.float32)[:, None]
    i = jnp.arange(0, d_model, 2, dtype=jnp.float32)[None, :]
    angle = pos / jnp.power(10000.0, i / d_model)
    pe = jnp.zeros((max_len, d_model), jnp.float32)
    pe = pe.at[:, 0::2].set(jnp.sin(angle))
    pe = pe.at[:, 1::2].set(jnp.cos(angle))
    return jnp.zeros((max_len, p), jnp.float32).at[:, :d_model].set(pe)


def transformer_forward(params, src, tgt, *, d_model, h, p, tgt_vocab):
    dk = d_model // h
    Ss = src.shape[1]
    St = tgt.shape[1]
    scale = math.sqrt(d_model)
    # ---- encoder ----
    # TODO(synk): embedding lookup is a data-dependent gather; kept in plain JAX.
    x = jnp.take(params['enc_embed'], src, axis=0) * scale + params['pe_enc'][:Ss][None]
    for layer in params['enc_layers']:
        x = pl_encoder_layer(x, layer, h=h, dk=dk, d=d_model, p=p)
    enc = pl_layernorm(x, params['enc_norm'][0], params['enc_norm'][1], d=d_model)
    # ---- decoder ----
    y = jnp.take(params['dec_embed'], tgt, axis=0) * scale + params['pe_dec'][:St][None]
    for layer in params['dec_layers']:
        y = pl_decoder_layer(y, enc, layer, h=h, dk=dk, d=d_model, p=p)
    # ---- final LN + output Linear + softmax ----
    probs = pl_head(y, params['dec_norm'][0], params['dec_norm'][1],
                    params['out_w'], params['out_b'], d=d_model)
    return probs[..., :tgt_vocab]


# ------------------------- deterministic parameter init -------------------------

def init_params(key, src_vocab, tgt_vocab, d_model, n_layers, h, d_ff, max_len):
    P = max(LANE, _round_up(d_model, LANE))
    PF = max(LANE, _round_up(d_ff, LANE))
    VP = max(LANE, _round_up(tgt_vocab, LANE))

    keys = iter(jax.random.split(key, 512))

    def w(din, dout):
        return 0.05 * jax.random.normal(next(keys), (din, dout), jnp.float32)

    def pad_mat(m, rows, cols):
        return jnp.zeros((rows, cols), jnp.float32).at[:m.shape[0], :m.shape[1]].set(m)

    def ln():
        g = jnp.zeros((1, P), jnp.float32).at[0, :d_model].set(1.0)   # gamma=1 on real lanes
        b = jnp.zeros((1, P), jnp.float32)                            # beta=0 everywhere
        return g, b

    def qkv_block():
        wqkv = jnp.concatenate(
            [pad_mat(w(d_model, d_model), P, P) for _ in range(3)],
            axis=1).astype(jnp.bfloat16)                              # (P, 3P) bf16
        bqkv = jnp.zeros((1, 3 * P), jnp.float32)
        wo = pad_mat(w(d_model, d_model), P, P)                       # f32: row-sliced per head
        bo = jnp.zeros((1, P), jnp.float32)
        return wqkv, bqkv, wo, bo

    def ffn_block():
        w1 = pad_mat(w(d_model, d_ff), P, PF).astype(jnp.bfloat16)
        b1 = jnp.zeros((1, PF), jnp.float32)
        w2 = pad_mat(w(d_ff, d_model), PF, P).astype(jnp.bfloat16)
        b2 = jnp.zeros((1, P), jnp.float32)
        return w1, b1, w2, b2

    def enc_layer():
        g1, b1 = ln()
        wqkv, bqkv, wo, bo = qkv_block()
        g2, b2 = ln()
        w1, b1f, w2, b2f = ffn_block()
        return [g1, b1, wqkv, bqkv, wo, bo, g2, b2, w1, b1f, w2, b2f]

    def dec_layer():
        g1, b1 = ln()
        wqkv, bqkv, wos, bos = qkv_block()
        g2, b2 = ln()
        wqc = pad_mat(w(d_model, d_model), P, P).astype(jnp.bfloat16)
        bqc = jnp.zeros((1, P), jnp.float32)
        wkv = jnp.concatenate(
            [pad_mat(w(d_model, d_model), P, P) for _ in range(2)],
            axis=1).astype(jnp.bfloat16)                              # (P, 2P) bf16
        bkv = jnp.zeros((1, 2 * P), jnp.float32)
        woc = pad_mat(w(d_model, d_model), P, P)
        boc = jnp.zeros((1, P), jnp.float32)
        g3, b3 = ln()
        w1, b1f, w2, b2f = ffn_block()
        return [g1, b1, wqkv, bqkv, wos, bos, g2, b2, wqc, bqc, wkv, bkv, woc, boc,
                g3, b3, w1, b1f, w2, b2f]

    # output head: lane-padded vocab; padded columns get -1e30 f32 bias -> prob exactly 0
    out_w = pad_mat(w(d_model, tgt_vocab), P, VP).astype(jnp.bfloat16)
    out_b = jnp.full((1, VP), -1e30, jnp.float32).at[0, :tgt_vocab].set(0.0)

    params = {
        'enc_embed': pad_mat(0.05 * jax.random.normal(next(keys), (src_vocab, d_model),
                                                      jnp.float32), src_vocab, P),
        'dec_embed': pad_mat(0.05 * jax.random.normal(next(keys), (tgt_vocab, d_model),
                                                      jnp.float32), tgt_vocab, P),
        'pe_enc': sinusoidal_pe(max_len, d_model, P),
        'pe_dec': sinusoidal_pe(max_len, d_model, P),
        'enc_layers': [enc_layer() for _ in range(n_layers)],
        'enc_norm': list(ln()),
        'dec_layers': [dec_layer() for _ in range(n_layers)],
        'dec_norm': list(ln()),
        'out_w': out_w,
        'out_b': out_b,
    }
    cfg = {'p': P}
    return params, cfg


# ------------------------- main -------------------------

if __name__ == "__main__":
    B, S_src, S_tgt = 2, 8, 8
    src_vocab, tgt_vocab = 16, 16
    d_model, n_layers, h, d_ff = 32, 2, 4, 64
    max_len = 100

    key = jax.random.PRNGKey(0)
    pkey, skey, tkey = jax.random.split(key, 3)
    params, cfg = init_params(pkey, src_vocab, tgt_vocab, d_model, n_layers, h, d_ff, max_len)

    src = jax.random.randint(skey, (B, S_src), 0, src_vocab, dtype=jnp.int32)
    tgt = jax.random.randint(tkey, (B, S_tgt), 0, tgt_vocab, dtype=jnp.int32)

    fwd = jax.jit(functools.partial(transformer_forward, d_model=d_model, h=h,
                                    p=cfg['p'], tgt_vocab=tgt_vocab))
    out = jax.block_until_ready(fwd(params, src, tgt))

    assert out.shape == (B, S_tgt, tgt_vocab)
    assert bool(jnp.all(jnp.isfinite(out)))
    # softmax rows sum to 1 (padded vocab columns contribute exactly 0)
    assert bool(jnp.allclose(out.sum(axis=-1), 1.0, atol=1e-3))
    print("KERNEL_OK")
</pallas_src>

<mosaic_0001>
module attributes {stable_mosaic.version = 11 : i64} {
  func.func @_layernorm_kernel(%arg0: i32, %arg1: memref<1x8x128xf32, #tpu.memory_space<vmem>>, %arg2: memref<1x128xf32, #tpu.memory_space<vmem>>, %arg3: memref<1x128xf32, #tpu.memory_space<vmem>>, %arg4: memref<1x8x128xf32, #tpu.memory_space<vmem>>) attributes {dimension_semantics = [#tpu.dimension_semantics<parallel>], iteration_bounds = array<i64: 2>, scalar_prefetch = 0 : i64, scratch_operands = 0 : i64, tpu.core_type = #tpu.core_type<tc>, window_params = [{transform_indices = @transform_0, window_bounds = array<i64: 1, 8, 128>}, {pipeline_mode = #tpu.pipeline_mode<synchronous>, transform_indices = @transform_1, window_bounds = array<i64: 1, 128>}, {pipeline_mode = #tpu.pipeline_mode<synchronous>, transform_indices = @transform_2, window_bounds = array<i64: 1, 128>}, {transform_indices = @transform_3, window_bounds = array<i64: 1, 8, 128>}]} {
    %c0 = arith.constant 0 : index
    %c0_0 = arith.constant 0 : index
    %c0_1 = arith.constant 0 : index
    %0 = vector.load %arg1[%c0, %c0_0, %c0_1] : memref<1x8x128xf32, #tpu.memory_space<vmem>>, vector<1x8x128xf32>
    %1 = vector.shape_cast %0 : vector<1x8x128xf32> to vector<8x128xf32>
    %c0_2 = arith.constant 0 : index
    %c0_3 = arith.constant 0 : index
    %2 = vector.load %arg2[%c0_2, %c0_3] : memref<1x128xf32, #tpu.memory_space<vmem>>, vector<1x128xf32>
    %c0_4 = arith.constant 0 : index
    %c0_5 = arith.constant 0 : index
    %3 = vector.load %arg3[%c0_4, %c0_5] : memref<1x128xf32, #tpu.memory_space<vmem>>, vector<1x128xf32>
    %cst = arith.constant dense<0.000000e+00> : vector<8xf32>
    %4 = vector.multi_reduction <add>, %1, %cst [1] : vector<8x128xf32> to vector<8xf32>
    %5 = vector.shape_cast %4 : vector<8xf32> to vector<8x1xf32>
    %cst_6 = arith.constant 3.125000e-02 : f32
    %6 = vector.broadcast %cst_6 : f32 to vector<8x1xf32>
    %7 = arith.mulf %5, %6 : vector<8x1xf32>
    %8 = arith.mulf %1, %1 : vector<8x128xf32>
    %cst_7 = arith.constant dense<0.000000e+00> : vector<8xf32>
    %9 = vector.multi_reduction <add>, %8, %cst_7 [1] : vector<8x128xf32> to vector<8xf32>
    %10 = vector.shape_cast %9 : vector<8xf32> to vector<8x1xf32>
    %cst_8 = arith.constant 3.125000e-02 : f32
    %11 = vector.broadcast %cst_8 : f32 to vector<8x1xf32>
    %12 = arith.mulf %10, %11 : vector<8x1xf32>
    %13 = arith.mulf %7, %7 : vector<8x1xf32>
    %14 = arith.subf %12, %13 : vector<8x1xf32>
    %15 = vector.broadcast %7 : vector<8x1xf32> to vector<8x128xf32>
    %16 = arith.subf %1, %15 : vector<8x128xf32>
    %cst_9 = arith.constant 9.99999974E-6 : f32
    %17 = vector.broadcast %cst_9 : f32 to vector<8x1xf32>
    %18 = arith.addf %14, %17 : vector<8x1xf32>
    %19 = math.rsqrt %18 : vector<8x1xf32>
    %20 = vector.broadcast %19 : vector<8x1xf32> to vector<8x128xf32>
    %21 = arith.mulf %16, %20 : vector<8x128xf32>
    %22 = vector.broadcast %2 : vector<1x128xf32> to vector<8x128xf32>
    %23 = arith.mulf %21, %22 : vector<8x128xf32>
    %24 = vector.broadcast %3 : vector<1x128xf32> to vector<8x128xf32>
    %25 = arith.addf %23, %24 : vector<8x128xf32>
    %c0_10 = arith.constant 0 : index
    %c0_11 = arith.constant 0 : index
    %c0_12 = arith.constant 0 : index
    %26 = vector.load %arg4[%c0_10, %c0_11, %c0_12] : memref<1x8x128xf32, #tpu.memory_space<vmem>>, vector<1x8x128xf32>
    %27 = vector.shape_cast %26 : vector<1x8x128xf32> to vector<8x128xf32>
    %28 = vector.shape_cast %25 : vector<8x128xf32> to vector<1x8x128xf32>
    tpu.vector_store %arg4[%c0_10, %c0_11, %c0_12], %28 {strides = array<i32>} : memref<1x8x128xf32, #tpu.memory_space<vmem>>, vector<1x8x128xf32>,
    return
  }
  func.func @transform_0(%arg0: i32) -> (i32, i32, i32) {
    %c0_i32 = arith.constant 0 : i32
    %c0_i32_0 = arith.constant 0 : i32
    %c0_i32_1 = arith.constant 0 : i32
    return %arg0, %c0_i32, %c0_i32_0 : i32, i32, i32
  }
  func.func @transform_1(%arg0: i32) -> (i32, i32) {
    %c0_i32 = arith.constant 0 : i32
    %c0_i32_0 = arith.constant 0 : i32
    %c0_i32_1 = arith.constant 0 : i32
    return %c0_i32, %c0_i32_0 : i32, i32
  }
  func.func @transform_2(%arg0: i32) -> (i32, i32) {
    %c0_i32 = arith.constant 0 : i32
    %c0_i32_0 = arith.constant 0 : i32
    %c0_i32_1 = arith.constant 0 : i32
    return %c0_i32, %c0_i32_0 : i32, i32
  }
  func.func @transform_3(%arg0: i32) -> (i32, i32, i32) {
    %c0_i32 = arith.constant 0 : i32
    %c0_i32_0 = arith.constant 0 : i32
    %c0_i32_1 = arith.constant 0 : i32
    return %arg0, %c0_i32, %c0_i32_0 : i32, i32, i32
  }
}

module attributes {stable_mosaic.version = 11 : i64} {
  func.func @_encoder_layer_kernel(%arg0: i32, %arg1: memref<1x8x128xf32, #tpu.memory_space<vmem>>, %arg2: memref<1x128xf32, #tpu.memory_space<vmem>>, %arg3: memref<1x128xf32, #tpu.memory_space<vmem>>, %arg4: memref<128x384xbf16, #tpu.memory_space<vmem>>, %arg5: memref<1x384xf32, #tpu.memory_space<vmem>>, %arg6: memref<128x128xf32, #tpu.memory_space<vmem>>, %arg7: memref<1x128xf32, #tpu.memory_space<vmem>>, %arg8: memref<1x128xf32, #tpu.memory_space<vmem>>, %arg9: memref<1x128xf32, #tpu.memory_space<vmem>>, %arg10: memref<128x128xbf16, #tpu.memory_space<vmem>>, %arg11: memref<1x128xf32, #tpu.memory_space<vmem>>, %arg12: memref<128x128xbf16, #tpu.memory_space<vmem>>, %arg13: memref<1x128xf32, #tpu.memory_space<vmem>>, %arg14: memref<1x8x128xf32, #tpu.memory_space<vmem>>) attributes {dimension_semantics = [#tpu.dimension_semantics<parallel>], iteration_bounds = array<i64: 2>, scalar_prefetch = 0 : i64, scratch_operands = 0 : i64, tpu.core_type = #tpu.core_type<tc>, window_params = [{transform_indices = @transform_0, window_bounds = array<i64: 1, 8, 128>}, {pipeline_mode = #tpu.pipeline_mode<synchronous>, transform_indices = @transform_1, window_bounds = array<i64: 1, 128>}, {pipeline_mode = #tpu.pipeline_mode<synchronous>, transform_indices = @transform_2, window_bounds = array<i64: 1, 128>}, {pipeline_mode = #tpu.pipeline_mode<synchronous>, transform_indices = @transform_3, window_bounds = array<i64: 128, 384>}, {pipeline_mode = #tpu.pipeline_mode<synchronous>, transform_indices = @transform_4, window_bounds = array<i64: 1, 384>}, {pipeline_mode = #tpu.pipeline_mode<synchronous>, transform_indices = @transform_5, window_bounds = array<i64: 128, 128>}, {pipeline_mode = #tpu.pipeline_mode<synchronous>, transform_indices = @transform_6, window_bounds = array<i64: 1, 128>}, {pipeline_mode = #tpu.pipeline_mode<synchronous>, transform_indices = @transform_7, window_bounds = array<i64: 1, 128>}, {pipeline_mode = #tpu.pipeline_mode<synchronous>, transform_indices = @transform_8, window_bounds = array<i64: 1, 128>}, {pipeline_mode = #tpu.pipeline_mode<synchronous>, transform_indices = @transform_9, window_bounds = array<i64: 128, 128>}, {pipeline_mode = #tpu.pipeline_mode<synchronous>, transform_indices = @transform_10, window_bounds = array<i64: 1, 128>}, {pipeline_mode = #tpu.pipeline_mode<synchronous>, transform_indices = @transform_11, window_bounds = array<i64: 128, 128>}, {pipeline_mode = #tpu.pipeline_mode<synchronous>, transform_indices = @transform_12, window_bounds = array<i64: 1, 128>}, {transform_indices = @transform_13, window_bounds = array<i64: 1, 8, 128>}]} {
    %c0 = arith.constant 0 : index
    %c0_0 = arith.constant 0 : index
    %c0_1 = arith.constant 0 : index
    %0 = vector.load %arg1[%c0, %c0_0, %c0_1] : memref<1x8x128xf32, #tpu.memory_space<vmem>>, vector<1x8x128xf32>
    %1 = vector.shape_cast %0 : vector<1x8x128xf32> to vector<8x128xf32>
    %c0_2 = arith.constant 0 : index
    %c0_3 = arith.constant 0 : index
    %2 = vector.load %arg2[%c0_2, %c0_3] : memref<1x128xf32, #tpu.memory_space<vmem>>, vector<1x128xf32>
    %c0_4 = arith.constant 0 : index
    %c0_5 = arith.constant 0 : index
    %3 = vector.load %arg3[%c0_4, %c0_5] : memref<1x128xf32, #tpu.memory_space<vmem>>, vector<1x128xf32>
    %cst = arith.constant dense<0.000000e+00> : vector<8xf32>
    %4 = vector.multi_reduction <add>, %1, %cst [1] : vector<8x128xf32> to vector<8xf32>
    %5 = vector.shape_cast %4 : vector<8xf32> to vector<8x1xf32>
    %cst_6 = arith.constant 3.125000e-02 : f32
    %6 = vector.broadcast %cst_6 : f32 to vector<8x1xf32>
    %7 = arith.mulf %5, %6 : vector<8x1xf32>
    %8 = arith.mulf %1, %1 : vector<8x128xf32>
    %cst_7 = arith.constant dense<0.000000e+00> : vector<8xf32>
    %9 = vector.multi_reduction <add>, %8, %cst_7 [1] : vector<8x128xf32> to vector<8xf32>
    %10 = vector.shape_cast %9 : vector<8xf32> to vector<8x1xf32>
    %cst_8 = arith.constant 3.125000e-02 : f32
    %11 = vector.broadcast %cst_8 : f32 to vector<8x1xf32>
    %12 = arith.mulf %10, %11 : vector<8x1xf32>
    %13 = arith.mulf %7, %7 : vector<8x1xf32>
    %14 = arith.subf %12, %13 : vector<8x1xf32>
    %15 = vector.broadcast %7 : vector<8x1xf32> to vector<8x128xf32>
    %16 = arith.subf %1, %15 : vector<8x128xf32>
    %cst_9 = arith.constant 9.99999974E-6 : f32
    %17 = vector.broadcast %cst_9 : f32 to vector<8x1xf32>
    %18 = arith.addf %14, %17 : vector<8x1xf32>
    %19 = math.rsqrt %18 : vector<8x1xf32>
    %20 = vector.broadcast %19 : vector<8x1xf32> to vector<8x128xf32>
    %21 = arith.mulf %16, %20 : vector<8x128xf32>
    %22 = vector.broadcast %2 : vector<1x128xf32> to vector<8x128xf32>
    %23 = arith.mulf %21, %22 : vector<8x128xf32>
    %24 = vector.broadcast %3 : vector<1x128xf32> to vector<8x128xf32>
    %25 = arith.addf %23, %24 : vector<8x128xf32>
    %26 = arith.truncf %25 : vector<8x128xf32> to vector<8x128xbf16>
    %c0_10 = arith.constant 0 : index
    %c0_11 = arith.constant 0 : index
    %27 = vector.load %arg4[%c0_10, %c0_11] : memref<128x384xbf16, #tpu.memory_space<vmem>>, vector<128x384xbf16>
    %cst_12 = arith.constant dense<0.000000e+00> : vector<8x384xf32>
    %28 = tpu.matmul %26, %27, %cst_12 {dimension_numbers = #tpu.dot_dimension_numbers<[1], [0], [0], [1], [0, 0, 1, 1], [], []>} : vector<8x128xbf16>, vector<128x384xbf16>, vector<8x384xf32> -> vector<8x384xf32>
    %c0_13 = arith.constant 0 : index
    %c0_14 = arith.constant 0 : index
    %29 = vector.load %arg5[%c0_13, %c0_14] : memref<1x384xf32, #tpu.memory_space<vmem>>, vector<1x384xf32>
    %30 = vector.broadcast %29 : vector<1x384xf32> to vector<8x384xf32>
    %31 = arith.addf %28, %30 : vector<8x384xf32>
    %32 = vector.extract_strided_slice %31 {offsets = [0, 0], sizes = [8, 128], strides = [1, 1]} : vector<8x384xf32> to vector<8x128xf32>
    %33 = vector.extract_strided_slice %31 {offsets = [0, 128], sizes = [8, 128], strides = [1, 1]} : vector<8x384xf32> to vector<8x128xf32>
    %34 = vector.extract_strided_slice %31 {offsets = [0, 256], sizes = [8, 128], strides = [1, 1]} : vector<8x384xf32> to vector<8x128xf32>
    %c0_15 = arith.constant 0 : index
    %c0_16 = arith.constant 0 : index
    %35 = vector.load %arg6[%c0_15, %c0_16] : memref<128x128xf32, #tpu.memory_space<vmem>>, vector<128x128xf32>
    %36 = vector.extract_strided_slice %32 {offsets = [0, 0], sizes = [8, 8], strides = [1, 1]} : vector<8x128xf32> to vector<8x8xf32>
    %37 = arith.truncf %36 : vector<8x8xf32> to vector<8x8xbf16>
    %38 = vector.extract_strided_slice %33 {offsets = [0, 0], sizes = [8, 8], strides = [1, 1]} : vector<8x128xf32> to vector<8x8xf32>
    %39 = arith.truncf %38 : vector<8x8xf32> to vector<8x8xbf16>
    %40 = vector.extract_strided_slice %34 {offsets = [0, 0], sizes = [8, 8], strides = [1, 1]} : vector<8x128xf32> to vector<8x8xf32>
    %41 = arith.truncf %40 : vector<8x8xf32> to vector<8x8xbf16>
    %cst_17 = arith.constant dense<0.000000e+00> : vector<8x8xf32>
    %42 = tpu.matmul %37, %39, %cst_17 {dimension_numbers = #tpu.dot_dimension_numbers<[1], [1], [0], [0], [0, 0, 1, 0], [], []>} : vector<8x8xbf16>, vector<8x8xbf16>, vector<8x8xf32> -> vector<8x8xf32>
    %cst_18 = arith.constant 0.353553385 : f32
    %43 = vector.broadcast %cst_18 : f32 to vector<8x8xf32>
    %44 = arith.mulf %42, %43 : vector<8x8xf32>
    %cst_19 = arith.constant dense<0xFF800000> : vector<8xf32>
    %45 = vector.multi_reduction <maximumf>, %44, %cst_19 [1] : vector<8x8xf32> to vector<8xf32>
    %46 = vector.shape_cast %45 : vector<8xf32> to vector<8x1xf32>
    %47 = vector.broadcast %46 : vector<8x1xf32> to vector<8x8xf32>
    %48 = arith.subf %44, %47 : vector<8x8xf32>
    %49 = math.exp %48 : vector<8x8xf32>
    %cst_20 = arith.constant dense<0.000000e+00> : vector<8xf32>
    %50 = vector.multi_reduction <add>, %49, %cst_20 [1] : vector<8x8xf32> to vector<8xf32>
    %51 = vector.shape_cast %50 : vector<8xf32> to vector<8x1xf32>
    %52 = tpu.reciprocal %51 {approx = true} : vector<8x1xf32> -> vector<8x1xf32>
    %53 = vector.broadcast %52 : vector<8x1xf32> to vector<8x8xf32>
    %54 = arith.mulf %49, %53 : vector<8x8xf32>
    %55 = arith.truncf %54 : vector<8x8xf32> to vector<8x8xbf16>
    %cst_21 = arith.constant dense<0.000000e+00> : vector<8x8xf32>
    %56 = tpu.matmul %55, %41, %cst_21 {dimension_numbers = #tpu.dot_dimension_numbers<[1], [0], [0], [1], [0, 0, 1, 1], [], []>} : vector<8x8xbf16>, vector<8x8xbf16>, vector<8x8xf32> -> vector<8x8xf32>
    %57 = arith.truncf %56 : vector<8x8xf32> to vector<8x8xbf16>
    %58 = vector.extract_strided_slice %35 {offsets = [0, 0], sizes = [8, 128], strides = [1, 1]} : vector<128x128xf32> to vector<8x128xf32>
    %59 = arith.truncf %58 : vector<8x128xf32> to vector<8x128xbf16>
    %cst_22 = arith.constant dense<0.000000e+00> : vector<8x128xf32>
    %60 = tpu.matmul %57, %59, %cst_22 {dimension_numbers = #tpu.dot_dimension_numbers<[1], [0], [0], [1], [0, 0, 1, 1], [], []>} : vector<8x8xbf16>, vector<8x128xbf16>, vector<8x128xf32> -> vector<8x128xf32>
    %61 = vector.extract_strided_slice %32 {offsets = [0, 8], sizes = [8, 8], strides = [1, 1]} : vector<8x128xf32> to vector<8x8xf32>
    %62 = arith.truncf %61 : vector<8x8xf32> to vector<8x8xbf16>
    %63 = vector.extract_strided_slice %33 {offsets = [0, 8], sizes = [8, 8], strides = [1, 1]} : vector<8x128xf32> to vector<8x8xf32>
    %64 = arith.truncf %63 : vector<8x8xf32> to vector<8x8xbf16>
    %65 = vector.extract_strided_slice %34 {offsets = [0, 8], sizes = [8, 8], strides = [1, 1]} : vector<8x128xf32> to vector<8x8xf32>
    %66 = arith.truncf %65 : vector<8x8xf32> to vector<8x8xbf16>
    %cst_23 = arith.constant dense<0.000000e+00> : vector<8x8xf32>
    %67 = tpu.matmul %62, %64, %cst_23 {dimension_numbers = #tpu.dot_dimension_numbers<[1], [1], [0], [0], [0, 0, 1, 0], [], []>} : vector<8x8xbf16>, vector<8x8xbf16>, vector<8x8xf32> -> vector<8x8xf32>
    %cst_24 = arith.constant 0.353553385 : f32
    %68 = vector.broadcast %cst_24 : f32 to vector<8x8xf32>
    %69 = arith.mulf %67, %68 : vector<8x8xf32>
    %cst_25 = arith.constant dense<0xFF800000> : vector<8xf32>
    %70 = vector.multi_reduction <maximumf>, %69, %cst_25 [1] : vector<8x8xf32> to vector<8xf32>
    %71 = vector.shape_cast %70 : vector<8xf32> to vector<8x1xf32>
    %72 = vector.broadcast %71 : vector<8x1xf32> to vector<8x8xf32>
    %73 = arith.subf %69, %72 : vector<8x8xf32>
    %74 = math.exp %73 : vector<8x8xf32>
    %cst_26 = arith.constant dense<0.000000e+00> : vector<8xf32>
    %75 = vector.multi_reduction <add>, %74, %cst_26 [1] : vector<8x8xf32> to vector<8xf32>
    %76 = vector.shape_cast %75 : vector<8xf32> to vector<8x1xf32>
    %77 = tpu.reciprocal %76 {approx = true} : vector<8x1xf32> -> vector<8x1xf32>
    %78 = vector.broadcast %77 : vector<8x1xf32> to vector<8x8xf32>
    %79 = arith.mulf %74, %78 : vector<8x8xf32>
    %80 = arith.truncf %79 : vector<8x8xf32> to vector<8x8xbf16>
    %cst_27 = arith.constant dense<0.000000e+00> : vector<8x8xf32>
    %81 = tpu.matmul %80, %66, %cst_27 {dimension_numbers = #tpu.dot_dimension_numbers<[1], [0], [0], [1], [0, 0, 1, 1], [], []>} : vector<8x8xbf16>, vector<8x8xbf16>, vector<8x8xf32> -> vector<8x8xf32>
    %82 = arith.truncf %81 : vector<8x8xf32> to vector<8x8xbf16>
    %83 = vector.extract_strided_slice %35 {offsets = [8, 0], sizes = [8, 128], strides = [1, 1]} : vector<128x128xf32> to vector<8x128xf32>
    %84 = arith.truncf %83 : vector<8x128xf32> to vector<8x128xbf16>
    %cst_28 = arith.constant dense<0.000000e+00> : vector<8x128xf32>
    %85 = tpu.matmul %82, %84, %cst_28 {dimension_numbers = #tpu.dot_dimension_numbers<[1], [0], [0], [1], [0, 0, 1, 1], [], []>} : vector<8x8xbf16>, vector<8x128xbf16>, vector<8x128xf32> -> vector<8x128xf32>
    %86 = arith.addf %60, %85 : vector<8x128xf32>
    %87 = vector.extract_strided_slice %32 {offsets = [0, 16], sizes = [8, 8], strides = [1, 1]} : vector<8x128xf32> to vector<8x8xf32>
    %88 = arith.truncf %87 : vector<8x8xf32> to vector<8x8xbf16>
    %89 = vector.extract_strided_slice %33 {offsets = [0, 16], sizes = [8, 8], strides = [1, 1]} : vector<8x128xf32> to vector<8x8xf32>
    %90 = arith.truncf %89 : vector<8x8xf32> to vector<8x8xbf16>
    %91 = vector.extract_strided_slice %34 {offsets = [0, 16], sizes = [8, 8], strides = [1, 1]} : vector<8x128xf32> to vector<8x8xf32>
    %92 = arith.truncf %91 : vector<8x8xf32> to vector<8x8xbf16>
    %cst_29 = arith.constant dense<0.000000e+00> : vector<8x8xf32>
    %93 = tpu.matmul %88, %90, %cst_29 {dimension_numbers = #tpu.dot_dimension_numbers<[1], [1], [0], [0], [0, 0, 1, 0], [], []>} : vector<8x8xbf16>, vector<8x8xbf16>, vector<8x8xf32> -> vector<8x8xf32>
    %cst_30 = arith.constant 0.353553385 : f32
    %94 = vector.broadcast %cst_30 : f32 to vector<8x8xf32>
    %95 = arith.mulf %93, %94 : vector<8x8xf32>
    %cst_31 = arith.constant dense<0xFF800000> : vector<8xf32>
    %96 = vector.multi_reduction <maximumf>, %95, %cst_31 [1] : vector<8x8xf32> to vector<8xf32>
    %97 = vector.shape_cast %96 : vector<8xf32> to vector<8x1xf32>
    %98 = vector.broadcast %97 : vector<8x1xf32> to vector<8x8xf32>
    %99 = arith.subf %95, %98 : vector<8x8xf32>
    %100 = math.exp %99 : vector<8x8xf32>
    %cst_32 = arith.constant dense<0.000000e+00> : vector<8xf32>
    %101 = vector.multi_reduction <add>, %100, %cst_32 [1] : vector<8x8xf32> to vector<8xf32>
    %102 = vector.shape_cast %101 : vector<8xf32> to vector<8x1xf32>
    %103 = tpu.reciprocal %102 {approx = true} : vector<8x1xf32> -> vector<8x1xf32>
    %104 = vector.broadcast %103 : vector<8x1xf32> to vector<8x8xf32>
    %105 = arith.mulf %100, %104 : vector<8x8xf32>
    %106 = arith.truncf %105 : vector<8x8xf32> to vector<8x8xbf16>
    %cst_33 = arith.constant dense<0.000000e+00> : vector<8x8xf32>
    %107 = tpu.matmul %106, %92, %cst_33 {dimension_numbers = #tpu.dot_dimension_numbers<[1], [0], [0], [1], [0, 0, 1, 1], [], []>} : vector<8x8xbf16>, vector<8x8xbf16>, vector<8x8xf32> -> vector<8x8xf32>
    %108 = arith.truncf %107 : vector<8x8xf32> to vector<8x8xbf16>
    %109 = vector.extract_strided_slice %35 {offsets = [16, 0], sizes = [8, 128], strides = [1, 1]} : vector<128x128xf32> to vector<8x128xf32>
    %110 = arith.truncf %109 : vector<8x128xf32> to vector<8x128xbf16>
    %cst_34 = arith.constant dense<0.000000e+00> : vector<8x128xf32>
    %111 = tpu.matmul %108, %110, %cst_34 {dimension_numbers = #tpu.dot_dimension_numbers<[1], [0], [0], [1], [0, 0, 1, 1], [], []>} : vector<8x8xbf16>, vector<8x128xbf16>, vector<8x128xf32> -> vector<8x128xf32>
    %112 = arith.addf %86, %111 : vector<8x128xf32>
    %113 = vector.extract_strided_slice %32 {offsets = [0, 24], sizes = [8, 8], strides = [1, 1]} : vector<8x128xf32> to vector<8x8xf32>
    %114 = arith.truncf %113 : vector<8x8xf32> to vector<8x8xbf16>
    %115 = vector.extract_strided_slice %33 {offsets = [0, 24], sizes = [8, 8], strides = [1, 1]} : vector<8x128xf32> to vector<8x8xf32>
    %116 = arith.truncf %115 : vector<8x8xf32> to vector<8x8xbf16>
    %117 = vector.extract_strided_slice %34 {offsets = [0, 24], sizes = [8, 8], strides = [1, 1]} : vector<8x128xf32> to vector<8x8xf32>
    %118 = arith.truncf %117 : vector<8x8xf32> to vector<8x8xbf16>
    %cst_35 = arith.constant dense<0.000000e+00> : vector<8x8xf32>
    %119 = tpu.matmul %114, %116, %cst_35 {dimension_numbers = #tpu.dot_dimension_numbers<[1], [1], [0], [0], [0, 0, 1, 0], [], []>} : vector<8x8xbf16>, vector<8x8xbf16>, vector<8x8xf32> -> vector<8x8xf32>
    %cst_36 = arith.constant 0.353553385 : f32
    %120 = vector.broadcast %cst_36 : f32 to vector<8x8xf32>
    %121 = arith.mulf %119, %120 : vector<8x8xf32>
    %cst_37 = arith.constant dense<0xFF800000> : vector<8xf32>
    %122 = vector.multi_reduction <maximumf>, %121, %cst_37 [1] : vector<8x8xf32> to vector<8xf32>
    %123 = vector.shape_cast %122 : vector<8xf32> to vector<8x1xf32>
    %124 = vector.broadcast %123 : vector<8x1xf32> to vector<8x8xf32>
    %125 = arith.subf %121, %124 : vector<8x8xf32>
    %126 = math.exp %125 : vector<8x8xf32>
    %cst_38 = arith.constant dense<0.000000e+00> : vector<8xf32>
    %127 = vector.multi_reduction <add>, %126, %cst_38 [1] : vector<8x8xf32> to vector<8xf32>
    %128 = vector.shape_cast %127 : vector<8xf32> to vector<8x1xf32>
    %129 = tpu.reciprocal %128 {approx = true} : vector<8x1xf32> -> vector<8x1xf32>
    %130 = vector.broadcast %129 : vector<8x1xf32> to vector<8x8xf32>
    %131 = arith.mulf %126, %130 : vector<8x8xf32>
    %132 = arith.truncf %131 : vector<8x8xf32> to vector<8x8xbf16>
    %cst_39 = arith.constant dense<0.000000e+00> : vector<8x8xf32>
    %133 = tpu.matmul %132, %118, %cst_39 {dimension_numbers = #tpu.dot_dimension_numbers<[1], [0], [0], [1], [0, 0, 1, 1], [], []>} : vector<8x8xbf16>, vector<8x8xbf16>, vector<8x8xf32> -> vector<8x8xf32>
    %134 = arith.truncf %133 : vector<8x8xf32> to vector<8x8xbf16>
    %135 = vector.extract_strided_slice %35 {offsets = [24, 0], sizes = [8, 128], strides = [1, 1]} : vector<128x128xf32> to vector<8x128xf32>
    %136 = arith.truncf %135 : vector<8x128xf32> to vector<8x128xbf16>
    %cst_40 = arith.constant dense<0.000000e+00> : vector<8x128xf32>
    %137 = tpu.matmul %134, %136, %cst_40 {dimension_numbers = #tpu.dot_dimension_numbers<[1], [0], [0], [1], [0, 0, 1, 1], [], []>} : vector<8x8xbf16>, vector<8x128xbf16>, vector<8x128xf32> -> vector<8x128xf32>
    %138 = arith.addf %112, %137 : vector<8x128xf32>
    %139 = arith.addf %1, %138 : vector<8x128xf32>
    %c0_41 = arith.constant 0 : index
    %c0_42 = arith.constant 0 : index
    %140 = vector.load %arg7[%c0_41, %c0_42] : memref<1x128xf32, #tpu.memory_space<vmem>>, vector<1x128xf32>
    %141 = vector.broadcast %140 : vector<1x128xf32> to vector<8x128xf32>
    %142 = arith.addf %139, %141 : vector<8x128xf32>
    %c0_43 = arith.constant 0 : index
    %c0_44 = arith.constant 0 : index
    %143 = vector.load %arg8[%c0_43, %c0_44] : memref<1x128xf32, #tpu.memory_space<vmem>>, vector<1x128xf32>
    %c0_45 = arith.constant 0 : index
    %c0_46 = arith.constant 0 : index
    %144 = vector.load %arg9[%c0_45, %c0_46] : memref<1x128xf32, #tpu.memory_space<vmem>>, vector<1x128xf32>
    %cst_47 = arith.constant dense<0.000000e+00> : vector<8xf32>
    %145 = vector.multi_reduction <add>, %142, %cst_47 [1] : vector<8x128xf32> to vector<8xf32>
    %146 = vector.shape_cast %145 : vector<8xf32> to vector<8x1xf32>
    %cst_48 = arith.constant 3.125000e-02 : f32
    %147 = vector.broadcast %cst_48 : f32 to vector<8x1xf32>
    %148 = arith.mulf %146, %147 : vector<8x1xf32>
    %149 = arith.mulf %142, %142 : vector<8x128xf32>
    %cst_49 = arith.constant dense<0.000000e+00> : vector<8xf32>
    %150 = vector.multi_reduction <add>, %149, %cst_49 [1] : vector<8x128xf32> to vector<8xf32>
    %151 = vector.shape_cast %150 : vector<8xf32> to vector<8x1xf32>
    %cst_50 = arith.constant 3.125000e-02 : f32
    %152 = vector.broadcast %cst_50 : f32 to vector<8x1xf32>
    %153 = arith.mulf %151, %152 : vector<8x1xf32>
    %154 = arith.mulf %148, %148 : vector<8x1xf32>
    %155 = arith.subf %153, %154 : vector<8x1xf32>
    %156 = vector.broadcast %148 : vector<8x1xf32> to vector<8x128xf32>
    %157 = arith.subf %142, %156 : vector<8x128xf32>
    %cst_51 = arith.constant 9.99999974E-6 : f32
    %158 = vector.broadcast %cst_51 : f32 to vector<8x1xf32>
    %159 = arith.addf %155, %158 : vector<8x1xf32>
    %160 = math.rsqrt %159 : vector<8x1xf32>
    %161 = vector.broadcast %160 : vector<8x1xf32> to vector<8x128xf32>
    %162 = arith.mulf %157, %161 : vector<8x128xf32>
    %163 = vector.broadcast %143 : vector<1x128xf32> to vector<8x128xf32>
    %164 = arith.mulf %162, %163 : vector<8x128xf32>
    %165 = vector.broadcast %144 : vector<1x128xf32> to vector<8x128xf32>
    %166 = arith.addf %164, %165 : vector<8x128xf32>
    %167 = arith.truncf %166 : vector<8x128xf32> to vector<8x128xbf16>
    %c0_52 = arith.constant 0 : index
    %c0_53 = arith.constant 0 : index
    %168 = vector.load %arg10[%c0_52, %c0_53] : memref<128x128xbf16, #tpu.memory_space<vmem>>, vector<128x128xbf16>
    %cst_54 = arith.constant dense<0.000000e+00> : vector<8x128xf32>
    %169 = tpu.matmul %167, %168, %cst_54 {dimension_numbers = #tpu.dot_dimension_numbers<[1], [0], [0], [1], [0, 0, 1, 1], [], []>} : vector<8x128xbf16>, vector<128x128xbf16>, vector<8x128xf32> -> vector<8x128xf32>
    %c0_55 = arith.constant 0 : index
    %c0_56 = arith.constant 0 : index
    %170 = vector.load %arg11[%c0_55, %c0_56] : memref<1x128xf32, #tpu.memory_space<vmem>>, vector<1x128xf32>
    %171 = vector.broadcast %170 : vector<1x128xf32> to vector<8x128xf32>
    %172 = arith.addf %169, %171 : vector<8x128xf32>
    %cst_57 = arith.constant 0.000000e+00 : f32
    %173 = vector.broadcast %cst_57 : f32 to vector<8x128xf32>
    %174 = arith.maximumf %172, %173 : vector<8x128xf32>
    %175 = arith.truncf %174 : vector<8x128xf32> to vector<8x128xbf16>
    %c0_58 = arith.constant 0 : index
    %c0_59 = arith.constant 0 : index
    %176 = vector.load %arg12[%c0_58, %c0_59] : memref<128x128xbf16, #tpu.memory_space<vmem>>, vector<128x128xbf16>
    %cst_60 = arith.constant dense<0.000000e+00> : vector<8x128xf32>
    %177 = tpu.matmul %175, %176, %cst_60 {dimension_numbers = #tpu.dot_dimension_numbers<[1], [0], [0], [1], [0, 0, 1, 1], [], []>} : vector<8x128xbf16>, vector<128x128xbf16>, vector<8x128xf32> -> vector<8x128xf32>
    %178 = arith.addf %142, %177 : vector<8x128xf32>
    %c0_61 = arith.constant 0 : index
    %c0_62 = arith.constant 0 : index
    %179 = vector.load %arg13[%c0_61, %c0_62] : memref<1x128xf32, #tpu.memory_space<vmem>>, vector<1x128xf32>
    %180 = vector.broadcast %179 : vector<1x128xf32> to vector<8x128xf32>
    %181 = arith.addf %178, %180 : vector<8x128xf32>
    %c0_63 = arith.constant 0 : index
    %c0_64 = arith.constant 0 : index
    %c0_65 = arith.constant 0 : index
    %182 = vector.load %arg14[%c0_63, %c0_64, %c0_65] : memref<1x8x128xf32, #tpu.memory_space<vmem>>, vector<1x8x128xf32>
    %183 = vector.shape_cast %182 : vector<1x8x128xf32> to vector<8x128xf32>
    %184 = vector.shape_cast %181 : vector<8x128xf32> to vector<1x8x128xf32>
    tpu.vector_store %arg14[%c0_63, %c0_64, %c0_65], %184 {strides = array<i32>} : memref<1x8x128xf32, #tpu.memory_space<vmem>>, vector<1x8x128xf32>,
    return
  }
  func.func @transform_0(%arg0: i32) -> (i32, i32, i32) {
    %c0_i32 = arith.constant 0 : i32
    %c0_i32_0 = arith.constant 0 : i32
    %c0_i32_1 = arith.constant 0 : i32
    return %arg0, %c0_i32, %c0_i32_0 : i32, i32, i32
  }
  func.func @transform_1(%arg0: i32) -> (i32, i32) {
    %c0_i32 = arith.constant 0 : i32
    %c0_i32_0 = arith.constant 0 : i32
    %c0_i32_1 = arith.constant 0 : i32
    return %c0_i32, %c0_i32_0 : i32, i32
  }
  func.func @transform_2(%arg0: i32) -> (i32, i32) {
    %c0_i32 = arith.constant 0 : i32
    %c0_i32_0 = arith.constant 0 : i32
    %c0_i32_1 = arith.constant 0 : i32
    return %c0_i32, %c0_i32_0 : i32, i32
  }
  func.func @transform_3(%arg0: i32) -> (i32, i32) {
    %c0_i32 = arith.constant 0 : i32
    %c0_i32_0 = arith.constant 0 : i32
    %c0_i32_1 = arith.constant 0 : i32
    return %c0_i32, %c0_i32_0 : i32, i32
  }
  func.func @transform_4(%arg0: i32) -> (i32, i32) {
    %c0_i32 = arith.constant 0 : i32
    %c0_i32_0 = arith.constant 0 : i32
    %c0_i32_1 = arith.constant 0 : i32
    return %c0_i32, %c0_i32_0 : i32, i32
  }
  func.func @transform_5(%arg0: i32) -> (i32, i32) {
    %c0_i32 = arith.constant 0 : i32
    %c0_i32_0 = arith.constant 0 : i32
    %c0_i32_1 = arith.constant 0 : i32
    return %c0_i32, %c0_i32_0 : i32, i32
  }
  func.func @transform_6(%arg0: i32) -> (i32, i32) {
    %c0_i32 = arith.constant 0 : i32
    %c0_i32_0 = arith.constant 0 : i32
    %c0_i32_1 = arith.constant 0 : i32
    return %c0_i32, %c0_i32_0 : i32, i32
  }
  func.func @transform_7(%arg0: i32) -> (i32, i32) {
    %c0_i32 = arith.constant 0 : i32
    %c0_i32_0 = arith.constant 0 : i32
    %c0_i32_1 = arith.constant 0 : i32
    return %c0_i32, %c0_i32_0 : i32, i32
  }
  func.func @transform_8(%arg0: i32) -> (i32, i32) {
    %c0_i32 = arith.constant 0 : i32
    %c0_i32_0 = arith.constant 0 : i32
    %c0_i32_1 = arith.constant 0 : i32
    return %c0_i32, %c0_i32_0 : i32, i32
  }
  func.func @transform_9(%arg0: i32) -> (i32, i32) {
    %c0_i32 = arith.constant 0 : i32
    %c0_i32_0 = arith.constant 0 : i32
    %c0_i32_1 = arith.constant 0 : i32
    return %c0_i32, %c0_i32_0 : i32, i32
  }
  func.func @transform_10(%arg0: i32) -> (i32, i32) {
    %c0_i32 = arith.constant 0 : i32
    %c0_i32_0 = arith.constant 0 : i32
    %c0_i32_1 = arith.constant 0 : i32
    return %c0_i32, %c0_i32_0 : i32, i32
  }
  func.func @transform_11(%arg0: i32) -> (i32, i32) {
    %c0_i32 = arith.constant 0 : i32
    %c0_i32_0 = arith.constant 0 : i32
    %c0_i32_1 = arith.constant 0 : i32
    return %c0_i32, %c0_i32_0 : i32, i32
  }
  func.func @transform_12(%arg0: i32) -> (i32, i32) {
    %c0_i32 = arith.constant 0 : i32
    %c0_i32_0 = arith.constant 0 : i32
    %c0_i32_1 = arith.constant 0 : i32
    return %c0_i32, %c0_i32_0 : i32, i32
  }
  func.func @transform_13(%arg0: i32) -> (i32, i32, i32) {
    %c0_i32 = arith.constant 0 : i32
    %c0_i32_0 = arith.constant 0 : i32
    %c0_i32_1 = arith.constant 0 : i32
    return %arg0, %c0_i32, %c0_i32_0 : i32, i32, i32
  }
}

module attributes {stable_mosaic.version = 11 : i64} {
  func.func @_encoder_layer_kernel(%arg0: i32, %arg1: memref<1x8x128xf32, #tpu.memory_space<vmem>>, %arg2: memref<1x128xf32, #tpu.memory_space<vmem>>, %arg3: memref<1x128xf32, #tpu.memory_space<vmem>>, %arg4: memref<128x384xbf16, #tpu.memory_space<vmem>>, %arg5: memref<1x384xf32, #tpu.memory_space<vmem>>, %arg6: memref<128x128xf32, #tpu.memory_space<vmem>>, %arg7: memref<1x128xf32, #tpu.memory_space<vmem>>, %arg8: memref<1x128xf32, #tpu.memory_space<vmem>>, %arg9: memref<1x128xf32, #tpu.memory_space<vmem>>, %arg10: memref<128x128xbf16, #tpu.memory_space<vmem>>, %arg11: memref<1x128xf32, #tpu.memory_space<vmem>>, %arg12: memref<128x128xbf16, #tpu.memory_space<vmem>>, %arg13: memref<1x128xf32, #tpu.memory_space<vmem>>, %arg14: memref<1x8x128xf32, #tpu.memory_space<vmem>>) attributes {dimension_semantics = [#tpu.dimension_semantics<parallel>], iteration_bounds = array<i64: 2>, scalar_prefetch = 0 : i64, scratch_operands = 0 : i64, tpu.core_type = #tpu.core_type<tc>, window_params = [{transform_indices = @transform_0, window_bounds = array<i64: 1, 8, 128>}, {pipeline_mode = #tpu.pipeline_mode<synchronous>, transform_indices = @transform_1, window_bounds = array<i64: 1, 128>}, {pipeline_mode = #tpu.pipeline_mode<synchronous>, transform_indices = @transform_2, window_bounds = array<i64: 1, 128>}, {pipeline_mode = #tpu.pipeline_mode<synchronous>, transform_indices = @transform_3, window_bounds = array<i64: 128, 384>}, {pipeline_mode = #tpu.pipeline_mode<synchronous>, transform_indices = @transform_4, window_bounds = array<i64: 1, 384>}, {pipeline_mode = #tpu.pipeline_mode<synchronous>, transform_indices = @transform_5, window_bounds = array<i64: 128, 128>}, {pipeline_mode = #tpu.pipeline_mode<synchronous>, transform_indices = @transform_6, window_bounds = array<i64: 1, 128>}, {pipeline_mode = #tpu.pipeline_mode<synchronous>, transform_indices = @transform_7, window_bounds = array<i64: 1, 128>}, {pipeline_mode = #tpu.pipeline_mode<synchronous>, transform_indices = @transform_8, window_bounds = array<i64: 1, 128>}, {pipeline_mode = #tpu.pipeline_mode<synchronous>, transform_indices = @transform_9, window_bounds = array<i64: 128, 128>}, {pipeline_mode = #tpu.pipeline_mode<synchronous>, transform_indices = @transform_10, window_bounds = array<i64: 1, 128>}, {pipeline_mode = #tpu.pipeline_mode<synchronous>, transform_indices = @transform_11, window_bounds = array<i64: 128, 128>}, {pipeline_mode = #tpu.pipeline_mode<synchronous>, transform_indices = @transform_12, window_bounds = array<i64: 1, 128>}, {transform_indices = @transform_13, window_bounds = array<i64: 1, 8, 128>}]} {
    %c0 = arith.constant 0 : index
    %c0_0 = arith.constant 0 : index
    %c0_1 = arith.constant 0 : index
    %0 = vector.load %arg1[%c0, %c0_0, %c0_1] : memref<1x8x128xf32, #tpu.memory_space<vmem>>, vector<1x8x128xf32>
    %1 = vector.shape_cast %0 : vector<1x8x128xf32> to vector<8x128xf32>
    %c0_2 = arith.constant 0 : index
    %c0_3 = arith.constant 0 : index
    %2 = vector.load %arg2[%c0_2, %c0_3] : memref<1x128xf32, #tpu.memory_space<vmem>>, vector<1x128xf32>
    %c0_4 = arith.constant 0 : index
    %c0_5 = arith.constant 0 : index
    %3 = vector.load %arg3[%c0_4, %c0_5] : memref<1x128xf32, #tpu.memory_space<vmem>>, vector<1x128xf32>
    %cst = arith.constant dense<0.000000e+00> : vector<8xf32>
    %4 = vector.multi_reduction <add>, %1, %cst [1] : vector<8x128xf32> to vector<8xf32>
    %5 = vector.shape_cast %4 : vector<8xf32> to vector<8x1xf32>
    %cst_6 = arith.constant 3.125000e-02 : f32
    %6 = vector.broadcast %cst_6 : f32 to vector<8x1xf32>
    %7 = arith.mulf %5, %6 : vector<8x1xf32>
    %8 = arith.mulf %1, %1 : vector<8x128xf32>
    %cst_7 = arith.constant dense<0.000000e+00> : vector<8xf32>
    %9 = vector.multi_reduction <add>, %8, %cst_7 [1] : vector<8x128xf32> to vector<8xf32>
    %10 = vector.shape_cast %9 : vector<8xf32> to vector<8x1xf32>
    %cst_8 = arith.constant 3.125000e-02 : f32
    %11 = vector.broadcast %cst_8 : f32 to vector<8x1xf32>
    %12 = arith.mulf %10, %11 : vector<8x1xf32>
    %13 = arith.mulf %7, %7 : vector<8x1xf32>
    %14 = arith.subf %12, %13 : vector<8x1xf32>
    %15 = vector.broadcast %7 : vector<8x1xf32> to vector<8x128xf32>
    %16 = arith.subf %1, %15 : vector<8x128xf32>
    %cst_9 = arith.constant 9.99999974E-6 : f32
    %17 = vector.broadcast %cst_9 : f32 to vector<8x1xf32>
    %18 = arith.addf %14, %17 : vector<8x1xf32>
    %19 = math.rsqrt %18 : vector<8x1xf32>
    %20 = vector.broadcast %19 : vector<8x1xf32> to vector<8x128xf32>
    %21 = arith.mulf %16, %20 : vector<8x128xf32>
    %22 = vector.broadcast %2 : vector<1x128xf32> to vector<8x128xf32>
    %23 = arith.mulf %21, %22 : vector<8x128xf32>
    %24 = vector.broadcast %3 : vector<1x128xf32> to vector<8x128xf32>
    %25 = arith.addf %23, %24 : vector<8x128xf32>
    %26 = arith.truncf %25 : vector<8x128xf32> to vector<8x128xbf16>
    %c0_10 = arith.constant 0 : index
    %c0_11 = arith.constant 0 : index
    %27 = vector.load %arg4[%c0_10, %c0_11] : memref<128x384xbf16, #tpu.memory_space<vmem>>, vector<128x384xbf16>
    %cst_12 = arith.constant dense<0.000000e+00> : vector<8x384xf32>
    %28 = tpu.matmul %26, %27, %cst_12 {dimension_numbers = #tpu.dot_dimension_numbers<[1], [0], [0], [1], [0, 0, 1, 1], [], []>} : vector<8x128xbf16>, vector<128x384xbf16>, vector<8x384xf32> -> vector<8x384xf32>
    %c0_13 = arith.constant 0 : index
    %c0_14 = arith.constant 0 : index
    %29 = vector.load %arg5[%c0_13, %c0_14] : memref<1x384xf32, #tpu.memory_space<vmem>>, vector<1x384xf32>
    %30 = vector.broadcast %29 : vector<1x384xf32> to vector<8x384xf32>
    %31 = arith.addf %28, %30 : vector<8x384xf32>
    %32 = vector.extract_strided_slice %31 {offsets = [0, 0], sizes = [8, 128], strides = [1, 1]} : vector<8x384xf32> to vector<8x128xf32>
    %33 = vector.extract_strided_slice %31 {offsets = [0, 128], sizes = [8, 128], strides = [1, 1]} : vector<8x384xf32> to vector<8x128xf32>
    %34 = vector.extract_strided_slice %31 {offsets = [0, 256], sizes = [8, 128], strides = [1, 1]} : vector<8x384xf32> to vector<8x128xf32>
    %c0_15 = arith.constant 0 : index
    %c0_16 = arith.constant 0 : index
    %35 = vector.load %arg6[%c0_15, %c0_16] : memref<128x128xf32, #tpu.memory_space<vmem>>, vector<128x128xf32>
    %36 = vector.extract_strided_slice %32 {offsets = [0, 0], sizes = [8, 8], strides = [1, 1]} : vector<8x128xf32> to vector<8x8xf32>
    %37 = arith.truncf %36 : vector<8x8xf32> to vector<8x8xbf16>
    %38 = vector.extract_strided_slice %33 {offsets = [0, 0], sizes = [8, 8], strides = [1, 1]} : vector<8x128xf32> to vector<8x8xf32>
    %39 = arith.truncf %38 : vector<8x8xf32> to vector<8x8xbf16>
    %40 = vector.extract_strided_slice %34 {offsets = [0, 0], sizes = [8, 8], strides = [1, 1]} : vector<8x128xf32> to vector<8x8xf32>
    %41 = arith.truncf %40 : vector<8x8xf32> to vector<8x8xbf16>
    %cst_17 = arith.constant dense<0.000000e+00> : vector<8x8xf32>
    %42 = tpu.matmul %37, %39, %cst_17 {dimension_numbers = #tpu.dot_dimension_numbers<[1], [1], [0], [0], [0, 0, 1, 0], [], []>} : vector<8x8xbf16>, vector<8x8xbf16>, vector<8x8xf32> -> vector<8x8xf32>
    %cst_18 = arith.constant 0.353553385 : f32
    %43 = vector.broadcast %cst_18 : f32 to vector<8x8xf32>
    %44 = arith.mulf %42, %43 : vector<8x8xf32>
    %cst_19 = arith.constant dense<0xFF800000> : vector<8xf32>
    %45 = vector.multi_reduction <maximumf>, %44, %cst_19 [1] : vector<8x8xf32> to vector<8xf32>
    %46 = vector.shape_cast %45 : vector<8xf32> to vector<8x1xf32>
    %47 = vector.broadcast %46 : vector<8x1xf32> to vector<8x8xf32>
    %48 = arith.subf %44, %47 : vector<8x8xf32>
    %49 = math.exp %48 : vector<8x8xf32>
    %cst_20 = arith.constant dense<0.000000e+00> : vector<8xf32>
    %50 = vector.multi_reduction <add>, %49, %cst_20 [1] : vector<8x8xf32> to vector<8xf32>
    %51 = vector.shape_cast %50 : vector<8xf32> to vector<8x1xf32>
    %52 = tpu.reciprocal %51 {approx = true} : vector<8x1xf32> -> vector<8x1xf32>
    %53 = vector.broadcast %52 : vector<8x1xf32> to vector<8x8xf32>
    %54 = arith.mulf %49, %53 : vector<8x8xf32>
    %55 = arith.truncf %54 : vector<8x8xf32> to vector<8x8xbf16>
    %cst_21 = arith.constant dense<0.000000e+00> : vector<8x8xf32>
    %56 = tpu.matmul %55, %41, %cst_21 {dimension_numbers = #tpu.dot_dimension_numbers<[1], [0], [0], [1], [0, 0, 1, 1], [], []>} : vector<8x8xbf16>, vector<8x8xbf16>, vector<8x8xf32> -> vector<8x8xf32>
    %57 = arith.truncf %56 : vector<8x8xf32> to vector<8x8xbf16>
    %58 = vector.extract_strided_slice %35 {offsets = [0, 0], sizes = [8, 128], strides = [1, 1]} : vector<128x128xf32> to vector<8x128xf32>
    %59 = arith.truncf %58 : vector<8x128xf32> to vector<8x128xbf16>
    %cst_22 = arith.constant dense<0.000000e+00> : vector<8x128xf32>
    %60 = tpu.matmul %57, %59, %cst_22 {dimension_numbers = #tpu.dot_dimension_numbers<[1], [0], [0], [1], [0, 0, 1, 1], [], []>} : vector<8x8xbf16>, vector<8x128xbf16>, vector<8x128xf32> -> vector<8x128xf32>
    %61 = vector.extract_strided_slice %32 {offsets = [0, 8], sizes = [8, 8], strides = [1, 1]} : vector<8x128xf32> to vector<8x8xf32>
    %62 = arith.truncf %61 : vector<8x8xf32> to vector<8x8xbf16>
    %63 = vector.extract_strided_slice %33 {offsets = [0, 8], sizes = [8, 8], strides = [1, 1]} : vector<8x128xf32> to vector<8x8xf32>
    %64 = arith.truncf %63 : vector<8x8xf32> to vector<8x8xbf16>
    %65 = vector.extract_strided_slice %34 {offsets = [0, 8], sizes = [8, 8], strides = [1, 1]} : vector<8x128xf32> to vector<8x8xf32>
    %66 = arith.truncf %65 : vector<8x8xf32> to vector<8x8xbf16>
    %cst_23 = arith.constant dense<0.000000e+00> : vector<8x8xf32>
    %67 = tpu.matmul %62, %64, %cst_23 {dimension_numbers = #tpu.dot_dimension_numbers<[1], [1], [0], [0], [0, 0, 1, 0], [], []>} : vector<8x8xbf16>, vector<8x8xbf16>, vector<8x8xf32> -> vector<8x8xf32>
    %cst_24 = arith.constant 0.353553385 : f32
    %68 = vector.broadcast %cst_24 : f32 to vector<8x8xf32>
    %69 = arith.mulf %67, %68 : vector<8x8xf32>
    %cst_25 = arith.constant dense<0xFF800000> : vector<8xf32>
    %70 = vector.multi_reduction <maximumf>, %69, %cst_25 [1] : vector<8x8xf32> to vector<8xf32>
    %71 = vector.shape_cast %70 : vector<8xf32> to vector<8x1xf32>
    %72 = vector.broadcast %71 : vector<8x1xf32> to vector<8x8xf32>
    %73 = arith.subf %69, %72 : vector<8x8xf32>
    %74 = math.exp %73 : vector<8x8xf32>
    %cst_26 = arith.constant dense<0.000000e+00> : vector<8xf32>
    %75 = vector.multi_reduction <add>, %74, %cst_26 [1] : vector<8x8xf32> to vector<8xf32>
    %76 = vector.shape_cast %75 : vector<8xf32> to vector<8x1xf32>
    %77 = tpu.reciprocal %76 {approx = true} : vector<8x1xf32> -> vector<8x1xf32>
    %78 = vector.broadcast %77 : vector<8x1xf32> to vector<8x8xf32>
    %79 = arith.mulf %74, %78 : vector<8x8xf32>
    %80 = arith.truncf %79 : vector<8x8xf32> to vector<8x8xbf16>
    %cst_27 = arith.constant dense<0.000000e+00> : vector<8x8xf32>
    %81 = tpu.matmul %80, %66, %cst_27 {dimension_numbers = #tpu.dot_dimension_numbers<[1], [0], [0], [1], [0, 0, 1, 1], [], []>} : vector<8x8xbf16>, vector<8x8xbf16>, vector<8x8xf32> -> vector<8x8xf32>
    %82 = arith.truncf %81 : vector<8x8xf32> to vector<8x8xbf16>
    %83 = vector.extract_strided_slice %35 {offsets = [8, 0], sizes = [8, 128], strides = [1, 1]} : vector<128x128xf32> to vector<8x128xf32>
    %84 = arith.truncf %83 : vector<8x128xf32> to vector<8x128xbf16>
    %cst_28 = arith.constant dense<0.000000e+00> : vector<8x128xf32>
    %85 = tpu.matmul %82, %84, %cst_28 {dimension_numbers = #tpu.dot_dimension_numbers<[1], [0], [0], [1], [0, 0, 1, 1], [], []>} : vector<8x8xbf16>, vector<8x128xbf16>, vector<8x128xf32> -> vector<8x128xf32>
    %86 = arith.addf %60, %85 : vector<8x128xf32>
    %87 = vector.extract_strided_slice %32 {offsets = [0, 16], sizes = [8, 8], strides = [1, 1]} : vector<8x128xf32> to vector<8x8xf32>
    %88 = arith.truncf %87 : vector<8x8xf32> to vector<8x8xbf16>
    %89 = vector.extract_strided_slice %33 {offsets = [0, 16], sizes = [8, 8], strides = [1, 1]} : vector<8x128xf32> to vector<8x8xf32>
    %90 = arith.truncf %89 : vector<8x8xf32> to vector<8x8xbf16>
    %91 = vector.extract_strided_slice %34 {offsets = [0, 16], sizes = [8, 8], strides = [1, 1]} : vector<8x128xf32> to vector<8x8xf32>
    %92 = arith.truncf %91 : vector<8x8xf32> to vector<8x8xbf16>
    %cst_29 = arith.constant dense<0.000000e+00> : vector<8x8xf32>
    %93 = tpu.matmul %88, %90, %cst_29 {dimension_numbers = #tpu.dot_dimension_numbers<[1], [1], [0], [0], [0, 0, 1, 0], [], []>} : vector<8x8xbf16>, vector<8x8xbf16>, vector<8x8xf32> -> vector<8x8xf32>
    %cst_30 = arith.constant 0.353553385 : f32
    %94 = vector.broadcast %cst_30 : f32 to vector<8x8xf32>
    %95 = arith.mulf %93, %94 : vector<8x8xf32>
    %cst_31 = arith.constant dense<0xFF800000> : vector<8xf32>
    %96 = vector.multi_reduction <maximumf>, %95, %cst_31 [1] : vector<8x8xf32> to vector<8xf32>
    %97 = vector.shape_cast %96 : vector<8xf32> to vector<8x1xf32>
    %98 = vector.broadcast %97 : vector<8x1xf32> to vector<8x8xf32>
    %99 = arith.subf %95, %98 : vector<8x8xf32>
    %100 = math.exp %99 : vector<8x8xf32>
    %cst_32 = arith.constant dense<0.000000e+00> : vector<8xf32>
    %101 = vector.multi_reduction <add>, %100, %cst_32 [1] : vector<8x8xf32> to vector<8xf32>
    %102 = vector.shape_cast %101 : vector<8xf32> to vector<8x1xf32>
    %103 = tpu.reciprocal %102 {approx = true} : vector<8x1xf32> -> vector<8x1xf32>
    %104 = vector.broadcast %103 : vector<8x1xf32> to vector<8x8xf32>
    %105 = arith.mulf %100, %104 : vector<8x8xf32>
    %106 = arith.truncf %105 : vector<8x8xf32> to vector<8x8xbf16>
    %cst_33 = arith.constant dense<0.000000e+00> : vector<8x8xf32>
    %107 = tpu.matmul %106, %92, %cst_33 {dimension_numbers = #tpu.dot_dimension_numbers<[1], [0], [0], [1], [0, 0, 1, 1], [], []>} : vector<8x8xbf16>, vector<8x8xbf16>, vector<8x8xf32> -> vector<8x8xf32>
    %108 = arith.truncf %107 : vector<8x8xf32> to vector<8x8xbf16>
    %109 = vector.extract_strided_slice %35 {offsets = [16, 0], sizes = [8, 128], strides = [1, 1]} : vector<128x128xf32> to vector<8x128xf32>
    %110 = arith.truncf %109 : vector<8x128xf32> to vector<8x128xbf16>
    %cst_34 = arith.constant dense<0.000000e+00> : vector<8x128xf32>
    %111 = tpu.matmul %108, %110, %cst_34 {dimension_numbers = #tpu.dot_dimension_numbers<[1], [0], [0], [1], [0, 0, 1, 1], [], []>} : vector<8x8xbf16>, vector<8x128xbf16>, vector<8x128xf32> -> vector<8x128xf32>
    %112 = arith.addf %86, %111 : vector<8x128xf32>
    %113 = vector.extract_strided_slice %32 {offsets = [0, 24], sizes = [8, 8], strides = [1, 1]} : vector<8x128xf32> to vector<8x8xf32>
    %114 = arith.truncf %113 : vector<8x8xf32> to vector<8x8xbf16>
    %115 = vector.extract_strided_slice %33 {offsets = [0, 24], sizes = [8, 8], strides = [1, 1]} : vector<8x128xf32> to vector<8x8xf32>
    %116 = arith.truncf %115 : vector<8x8xf32> to vector<8x8xbf16>
    %117 = vector.extract_strided_slice %34 {offsets = [0, 24], sizes = [8, 8], strides = [1, 1]} : vector<8x128xf32> to vector<8x8xf32>
    %118 = arith.truncf %117 : vector<8x8xf32> to vector<8x8xbf16>
    %cst_35 = arith.constant dense<0.000000e+00> : vector<8x8xf32>
    %119 = tpu.matmul %114, %116, %cst_35 {dimension_numbers = #tpu.dot_dimension_numbers<[1], [1], [0], [0], [0, 0, 1, 0], [], []>} : vector<8x8xbf16>, vector<8x8xbf16>, vector<8x8xf32> -> vector<8x8xf32>
    %cst_36 = arith.constant 0.353553385 : f32
    %120 = vector.broadcast %cst_36 : f32 to vector<8x8xf32>
    %121 = arith.mulf %119, %120 : vector<8x8xf32>
    %cst_37 = arith.constant dense<0xFF800000> : vector<8xf32>
    %122 = vector.multi_reduction <maximumf>, %121, %cst_37 [1] : vector<8x8xf32> to vector<8xf32>
    %123 = vector.shape_cast %122 : vector<8xf32> to vector<8x1xf32>
    %124 = vector.broadcast %123 : vector<8x1xf32> to vector<8x8xf32>
    %125 = arith.subf %121, %124 : vector<8x8xf32>
    %126 = math.exp %125 : vector<8x8xf32>
    %cst_38 = arith.constant dense<0.000000e+00> : vector<8xf32>
    %127 = vector.multi_reduction <add>, %126, %cst_38 [1] : vector<8x8xf32> to vector<8xf32>
    %128 = vector.shape_cast %127 : vector<8xf32> to vector<8x1xf32>
    %129 = tpu.reciprocal %128 {approx = true} : vector<8x1xf32> -> vector<8x1xf32>
    %130 = vector.broadcast %129 : vector<8x1xf32> to vector<8x8xf32>
    %131 = arith.mulf %126, %130 : vector<8x8xf32>
    %132 = arith.truncf %131 : vector<8x8xf32> to vector<8x8xbf16>
    %cst_39 = arith.constant dense<0.000000e+00> : vector<8x8xf32>
    %133 = tpu.matmul %132, %118, %cst_39 {dimension_numbers = #tpu.dot_dimension_numbers<[1], [0], [0], [1], [0, 0, 1, 1], [], []>} : vector<8x8xbf16>, vector<8x8xbf16>, vector<8x8xf32> -> vector<8x8xf32>
    %134 = arith.truncf %133 : vector<8x8xf32> to vector<8x8xbf16>
    %135 = vector.extract_strided_slice %35 {offsets = [24, 0], sizes = [8, 128], strides = [1, 1]} : vector<128x128xf32> to vector<8x128xf32>
    %136 = arith.truncf %135 : vector<8x128xf32> to vector<8x128xbf16>
    %cst_40 = arith.constant dense<0.000000e+00> : vector<8x128xf32>
    %137 = tpu.matmul %134, %136, %cst_40 {dimension_numbers = #tpu.dot_dimension_numbers<[1], [0], [0], [1], [0, 0, 1, 1], [], []>} : vector<8x8xbf16>, vector<8x128xbf16>, vector<8x128xf32> -> vector<8x128xf32>
    %138 = arith.addf %112, %137 : vector<8x128xf32>
    %139 = arith.addf %1, %138 : vector<8x128xf32>
    %c0_41 = arith.constant 0 : index
    %c0_42 = arith.constant 0 : index
    %140 = vector.load %arg7[%c0_41, %c0_42] : memref<1x128xf32, #tpu.memory_space<vmem>>, vector<1x128xf32>
    %141 = vector.broadcast %140 : vector<1x128xf32> to vector<8x128xf32>
    %142 = arith.addf %139, %141 : vector<8x128xf32>
    %c0_43 = arith.constant 0 : index
    %c0_44 = arith.constant 0 : index
    %143 = vector.load %arg8[%c0_43, %c0_44] : memref<1x128xf32, #tpu.memory_space<vmem>>, vector<1x128xf32>
    %c0_45 = arith.constant 0 : index
    %c0_46 = arith.constant 0 : index
    %144 = vector.load %arg9[%c0_45, %c0_46] : memref<1x128xf32, #tpu.memory_space<vmem>>, vector<1x128xf32>
    %cst_47 = arith.constant dense<0.000000e+00> : vector<8xf32>
    %145 = vector.multi_reduction <add>, %142, %cst_47 [1] : vector<8x128xf32> to vector<8xf32>
    %146 = vector.shape_cast %145 : vector<8xf32> to vector<8x1xf32>
    %cst_48 = arith.constant 3.125000e-02 : f32
    %147 = vector.broadcast %cst_48 : f32 to vector<8x1xf32>
    %148 = arith.mulf %146, %147 : vector<8x1xf32>
    %149 = arith.mulf %142, %142 : vector<8x128xf32>
    %cst_49 = arith.constant dense<0.000000e+00> : vector<8xf32>
    %150 = vector.multi_reduction <add>, %149, %cst_49 [1] : vector<8x128xf32> to vector<8xf32>
    %151 = vector.shape_cast %150 : vector<8xf32> to vector<8x1xf32>
    %cst_50 = arith.constant 3.125000e-02 : f32
    %152 = vector.broadcast %cst_50 : f32 to vector<8x1xf32>
    %153 = arith.mulf %151, %152 : vector<8x1xf32>
    %154 = arith.mulf %148, %148 : vector<8x1xf32>
    %155 = arith.subf %153, %154 : vector<8x1xf32>
    %156 = vector.broadcast %148 : vector<8x1xf32> to vector<8x128xf32>
    %157 = arith.subf %142, %156 : vector<8x128xf32>
    %cst_51 = arith.constant 9.99999974E-6 : f32
    %158 = vector.broadcast %cst_51 : f32 to vector<8x1xf32>
    %159 = arith.addf %155, %158 : vector<8x1xf32>
    %160 = math.rsqrt %159 : vector<8x1xf32>
    %161 = vector.broadcast %160 : vector<8x1xf32> to vector<8x128xf32>
    %162 = arith.mulf %157, %161 : vector<8x128xf32>
    %163 = vector.broadcast %143 : vector<1x128xf32> to vector<8x128xf32>
    %164 = arith.mulf %162, %163 : vector<8x128xf32>
    %165 = vector.broadcast %144 : vector<1x128xf32> to vector<8x128xf32>
    %166 = arith.addf %164, %165 : vector<8x128xf32>
    %167 = arith.truncf %166 : vector<8x128xf32> to vector<8x128xbf16>
    %c0_52 = arith.constant 0 : index
    %c0_53 = arith.constant 0 : index
    %168 = vector.load %arg10[%c0_52, %c0_53] : memref<128x128xbf16, #tpu.memory_space<vmem>>, vector<128x128xbf16>
    %cst_54 = arith.constant dense<0.000000e+00> : vector<8x128xf32>
    %169 = tpu.matmul %167, %168, %cst_54 {dimension_numbers = #tpu.dot_dimension_numbers<[1], [0], [0], [1], [0, 0, 1, 1], [], []>} : vector<8x128xbf16>, vector<128x128xbf16>, vector<8x128xf32> -> vector<8x128xf32>
    %c0_55 = arith.constant 0 : index
    %c0_56 = arith.constant 0 : index
    %170 = vector.load %arg11[%c0_55, %c0_56] : memref<1x128xf32, #tpu.memory_space<vmem>>, vector<1x128xf32>
    %171 = vector.broadcast %170 : vector<1x128xf32> to vector<8x128xf32>
    %172 = arith.addf %169, %171 : vector<8x128xf32>
    %cst_57 = arith.constant 0.000000e+00 : f32
    %173 = vector.broadcast %cst_57 : f32 to vector<8x128xf32>
    %174 = arith.maximumf %172, %173 : vector<8x128xf32>
    %175 = arith.truncf %174 : vector<8x128xf32> to vector<8x128xbf16>
    %c0_58 = arith.constant 0 : index
    %c0_59 = arith.constant 0 : index
    %176 = vector.load %arg12[%c0_58, %c0_59] : memref<128x128xbf16, #tpu.memory_space<vmem>>, vector<128x128xbf16>
    %cst_60 = arith.constant dense<0.000000e+00> : vector<8x128xf32>
    %177 = tpu.matmul %175, %176, %cst_60 {dimension_numbers = #tpu.dot_dimension_numbers<[1], [0], [0], [1], [0, 0, 1, 1], [], []>} : vector<8x128xbf16>, vector<128x128xbf16>, vector<8x128xf32> -> vector<8x128xf32>
    %178 = arith.addf %142, %177 : vector<8x128xf32>
    %c0_61 = arith.constant 0 : index
    %c0_62 = arith.constant 0 : index
    %179 = vector.load %arg13[%c0_61, %c0_62] : memref<1x128xf32, #tpu.memory_space<vmem>>, vector<1x128xf32>
    %180 = vector.broadcast %179 : vector<1x128xf32> to vector<8x128xf32>
    %181 = arith.addf %178, %180 : vector<8x128xf32>
    %c0_63 = arith.constant 0 : index
    %c0_64 = arith.constant 0 : index
    %c0_65 = arith.constant 0 : index
    %182 = vector.load %arg14[%c0_63, %c0_64, %c0_65] : memref<1x8x128xf32, #tpu.memory_space<vmem>>, vector<1x8x128xf32>
    %183 = vector.shape_cast %182 : vector<1x8x128xf32> to vector<8x128xf32>
    %184 = vector.shape_cast %181 : vector<8x128xf32> to vector<1x8x128xf32>
    tpu.vector_store %arg14[%c0_63, %c0_64, %c0_65], %184 {strides = array<i32>} : memref<1x8x128xf32, #tpu.memory_space<vmem>>, vector<1x8x128xf32>,
    return
  }
  func.func @transform_0(%arg0: i32) -> (i32, i32, i32) {
    %c0_i32 = arith.constant 0 : i32
    %c0_i32_0 = arith.constant 0 : i32
    %c0_i32_1 = arith.constant 0 : i32
    return %arg0, %c0_i32, %c0_i32_0 : i32, i32, i32
  }
  func.func @transform_1(%arg0: i32) -> (i32, i32) {
    %c0_i32 = arith.constant 0 : i32
    %c0_i32_0 = arith.constant 0 : i32
    %c0_i32_1 = arith.constant 0 : i32
    return %c0_i32, %c0_i32_0 : i32, i32
  }
  func.func @transform_2(%arg0: i32) -> (i32, i32) {
    %c0_i32 = arith.constant 0 : i32
    %c0_i32_0 = arith.constant 0 : i32
    %c0_i32_1 = arith.constant 0 : i32
    return %c0_i32, %c0_i32_0 : i32, i32
  }
  func.func @transform_3(%arg0: i32) -> (i32, i32) {
    %c0_i32 = arith.constant 0 : i32
    %c0_i32_0 = arith.constant 0 : i32
    %c0_i32_1 = arith.constant 0 : i32
    return %c0_i32, %c0_i32_0 : i32, i32
  }
  func.func @transform_4(%arg0: i32) -> (i32, i32) {
    %c0_i32 = arith.constant 0 : i32
    %c0_i32_0 = arith.constant 0 : i32
    %c0_i32_1 = arith.constant 0 : i32
    return %c0_i32, %c0_i32_0 : i32, i32
  }
  func.func @transform_5(%arg0: i32) -> (i32, i32) {
    %c0_i32 = arith.constant 0 : i32
    %c0_i32_0 = arith.constant 0 : i32
    %c0_i32_1 = arith.constant 0 : i32
    return %c0_i32, %c0_i32_0 : i32, i32
  }
  func.func @transform_6(%arg0: i32) -> (i32, i32) {
    %c0_i32 = arith.constant 0 : i32
    %c0_i32_0 = arith.constant 0 : i32
    %c0_i32_1 = arith.constant 0 : i32
    return %c0_i32, %c0_i32_0 : i32, i32
  }
  func.func @transform_7(%arg0: i32) -> (i32, i32) {
    %c0_i32 = arith.constant 0 : i32
    %c0_i32_0 = arith.constant 0 : i32
    %c0_i32_1 = arith.constant 0 : i32
    return %c0_i32, %c0_i32_0 : i32, i32
  }
  func.func @transform_8(%arg0: i32) -> (i32, i32) {
    %c0_i32 = arith.constant 0 : i32
    %c0_i32_0 = arith.constant 0 : i32
    %c0_i32_1 = arith.constant 0 : i32
    return %c0_i32, %c0_i32_0 : i32, i32
  }
  func.func @transform_9(%arg0: i32) -> (i32, i32) {
    %c0_i32 = arith.constant 0 : i32
    %c0_i32_0 = arith.constant 0 : i32
    %c0_i32_1 = arith.constant 0 : i32
    return %c0_i32, %c0_i32_0 : i32, i32
  }
  func.func @transform_10(%arg0: i32) -> (i32, i32) {
    %c0_i32 = arith.constant 0 : i32
    %c0_i32_0 = arith.constant 0 : i32
    %c0_i32_1 = arith.constant 0 : i32
    return %c0_i32, %c0_i32_0 : i32, i32
  }
  func.func @transform_11(%arg0: i32) -> (i32, i32) {
    %c0_i32 = arith.constant 0 : i32
    %c0_i32_0 = arith.constant 0 : i32
    %c0_i32_1 = arith.constant 0 : i32
    return %c0_i32, %c0_i32_0 : i32, i32
  }
  func.func @transform_12(%arg0: i32) -> (i32, i32) {
    %c0_i32 = arith.constant 0 : i32
    %c0_i32_0 = arith.constant 0 : i32
    %c0_i32_1 = arith.constant 0 : i32
    return %c0_i32, %c0_i32_0 : i32, i32
  }
  func.func @transform_13(%arg0: i32) -> (i32, i32, i32) {
    %c0_i32 = arith.constant 0 : i32
    %c0_i32_0 = arith.constant 0 : i32
    %c0_i32_1 = arith.constant 0 : i32
    return %arg0, %c0_i32, %c0_i32_0 : i32, i32, i32
  }
}

module attributes {stable_mosaic.version = 11 : i64} {
  func.func @_decoder_layer_kernel(%arg0: i32, %arg1: memref<1x8x128xf32, #tpu.memory_space<vmem>>, %arg2: memref<1x8x128xf32, #tpu.memory_space<vmem>>, %arg3: memref<1x128xf32, #tpu.memory_space<vmem>>, %arg4: memref<1x128xf32, #tpu.memory_space<vmem>>, %arg5: memref<128x384xbf16, #tpu.memory_space<vmem>>, %arg6: memref<1x384xf32, #tpu.memory_space<vmem>>, %arg7: memref<128x128xf32, #tpu.memory_space<vmem>>, %arg8: memref<1x128xf32, #tpu.memory_space<vmem>>, %arg9: memref<1x128xf32, #tpu.memory_space<vmem>>, %arg10: memref<1x128xf32, #tpu.memory_space<vmem>>, %arg11: memref<128x128xbf16, #tpu.memory_space<vmem>>, %arg12: memref<1x128xf32, #tpu.memory_space<vmem>>, %arg13: memref<128x256xbf16, #tpu.memory_space<vmem>>, %arg14: memref<1x256xf32, #tpu.memory_space<vmem>>, %arg15: memref<128x128xf32, #tpu.memory_space<vmem>>, %arg16: memref<1x128xf32, #tpu.memory_space<vmem>>, %arg17: memref<1x128xf32, #tpu.memory_space<vmem>>, %arg18: memref<1x128xf32, #tpu.memory_space<vmem>>, %arg19: memref<128x128xbf16, #tpu.memory_space<vmem>>, %arg20: memref<1x128xf32, #tpu.memory_space<vmem>>, %arg21: memref<128x128xbf16, #tpu.memory_space<vmem>>, %arg22: memref<1x128xf32, #tpu.memory_space<vmem>>, %arg23: memref<1x8x128xf32, #tpu.memory_space<vmem>>) attributes {dimension_semantics = [#tpu.dimension_semantics<parallel>], iteration_bounds = array<i64: 2>, scalar_prefetch = 0 : i64, scratch_operands = 0 : i64, tpu.core_type = #tpu.core_type<tc>, window_params = [{transform_indices = @transform_0, window_bounds = array<i64: 1, 8, 128>}, {transform_indices = @transform_1, window_bounds = array<i64: 1, 8, 128>}, {pipeline_mode = #tpu.pipeline_mode<synchronous>, transform_indices = @transform_2, window_bounds = array<i64: 1, 128>}, {pipeline_mode = #tpu.pipeline_mode<synchronous>, transform_indices = @transform_3, window_bounds = array<i64: 1, 128>}, {pipeline_mode = #tpu.pipeline_mode<synchronous>, transform_indices = @transform_4, window_bounds = array<i64: 128, 384>}, {pipeline_mode = #tpu.pipeline_mode<synchronous>, transform_indices = @transform_5, window_bounds = array<i64: 1, 384>}, {pipeline_mode = #tpu.pipeline_mode<synchronous>, transform_indices = @transform_6, window_bounds = array<i64: 128, 128>}, {pipeline_mode = #tpu.pipeline_mode<synchronous>, transform_indices = @transform_7, window_bounds = array<i64: 1, 128>}, {pipeline_mode = #tpu.pipeline_mode<synchronous>, transform_indices = @transform_8, window_bounds = array<i64: 1, 128>}, {pipeline_mode = #tpu.pipeline_mode<synchronous>, transform_indices = @transform_9, window_bounds = array<i64: 1, 128>}, {pipeline_mode = #tpu.pipeline_mode<synchronous>, transform_indices = @transform_10, window_bounds = array<i64: 128, 128>}, {pipeline_mode = #tpu.pipeline_mode<synchronous>, transform_indices = @transform_11, window_bounds = array<i64: 1, 128>}, {pipeline_mode = #tpu.pipeline_mode<synchronous>, transform_indices = @transform_12, window_bounds = array<i64: 128, 256>}, {pipeline_mode = #tpu.pipeline_mode<synchronous>, transform_indices = @transform_13, window_bounds = array<i64: 1, 256>}, {pipeline_mode = #tpu.pipeline_mode<synchronous>, transform_indices = @transform_14, window_bounds = array<i64: 128, 128>}, {pipeline_mode = #tpu.pipeline_mode<synchronous>, transform_indices = @transform_15, window_bounds = array<i64: 1, 128>}, {pipeline_mode = #tpu.pipeline_mode<synchronous>, transform_indices = @transform_16, window_bounds = array<i64: 1, 128>}, {pipeline_mode = #tpu.pipeline_mode<synchronous>, transform_indices = @transform_17, window_bounds = array<i64: 1, 128>}, {pipeline_mode = #tpu.pipeline_mode<synchronous>, transform_indices = @transform_18, window_bounds = array<i64: 128, 128>}, {pipeline_mode = #tpu.pipeline_mode<synchronous>, transform_indices = @transform_19, window_bounds = array<i64: 1, 128>}, {pipeline_mode = #tpu.pipeline_mode<synchronous>, transform_indices = @transform_20, window_bounds = array<i64: 128, 128>}, {pipeline_mode = #tpu.pipeline_mode<synchronous>, transform_indices = @transform_21, window_bounds = array<i64: 1, 128>}, {transform_indices = @transform_22, window_bounds = array<i64: 1, 8, 128>}]} {
    %c0 = arith.constant 0 : index
    %c0_0 = arith.constant 0 : index
    %c0_1 = arith.constant 0 : index
    %0 = vector.load %arg1[%c0, %c0_0, %c0_1] : memref<1x8x128xf32, #tpu.memory_space<vmem>>, vector<1x8x128xf32>
    %1 = vector.shape_cast %0 : vector<1x8x128xf32> to vector<8x128xf32>
    %c0_2 = arith.constant 0 : index
    %c0_3 = arith.constant 0 : index
    %c0_4 = arith.constant 0 : index
    %2 = vector.load %arg2[%c0_2, %c0_3, %c0_4] : memref<1x8x128xf32, #tpu.memory_space<vmem>>, vector<1x8x128xf32>
    %3 = vector.shape_cast %2 : vector<1x8x128xf32> to vector<8x128xf32>
    %c0_5 = arith.constant 0 : index
    %c0_6 = arith.constant 0 : index
    %4 = vector.load %arg3[%c0_5, %c0_6] : memref<1x128xf32, #tpu.memory_space<vmem>>, vector<1x128xf32>
    %c0_7 = arith.constant 0 : index
    %c0_8 = arith.constant 0 : index
    %5 = vector.load %arg4[%c0_7, %c0_8] : memref<1x128xf32, #tpu.memory_space<vmem>>, vector<1x128xf32>
    %cst = arith.constant dense<0.000000e+00> : vector<8xf32>
    %6 = vector.multi_reduction <add>, %1, %cst [1] : vector<8x128xf32> to vector<8xf32>
    %7 = vector.shape_cast %6 : vector<8xf32> to vector<8x1xf32>
    %cst_9 = arith.constant 3.125000e-02 : f32
    %8 = vector.broadcast %cst_9 : f32 to vector<8x1xf32>
    %9 = arith.mulf %7, %8 : vector<8x1xf32>
    %10 = arith.mulf %1, %1 : vector<8x128xf32>
    %cst_10 = arith.constant dense<0.000000e+00> : vector<8xf32>
    %11 = vector.multi_reduction <add>, %10, %cst_10 [1] : vector<8x128xf32> to vector<8xf32>
    %12 = vector.shape_cast %11 : vector<8xf32> to vector<8x1xf32>
    %cst_11 = arith.constant 3.125000e-02 : f32
    %13 = vector.broadcast %cst_11 : f32 to vector<8x1xf32>
    %14 = arith.mulf %12, %13 : vector<8x1xf32>
    %15 = arith.mulf %9, %9 : vector<8x1xf32>
    %16 = arith.subf %14, %15 : vector<8x1xf32>
    %17 = vector.broadcast %9 : vector<8x1xf32> to vector<8x128xf32>
    %18 = arith.subf %1, %17 : vector<8x128xf32>
    %cst_12 = arith.constant 9.99999974E-6 : f32
    %19 = vector.broadcast %cst_12 : f32 to vector<8x1xf32>
    %20 = arith.addf %16, %19 : vector<8x1xf32>
    %21 = math.rsqrt %20 : vector<8x1xf32>
    %22 = vector.broadcast %21 : vector<8x1xf32> to vector<8x128xf32>
    %23 = arith.mulf %18, %22 : vector<8x128xf32>
    %24 = vector.broadcast %4 : vector<1x128xf32> to vector<8x128xf32>
    %25 = arith.mulf %23, %24 : vector<8x128xf32>
    %26 = vector.broadcast %5 : vector<1x128xf32> to vector<8x128xf32>
    %27 = arith.addf %25, %26 : vector<8x128xf32>
    %28 = arith.truncf %27 : vector<8x128xf32> to vector<8x128xbf16>
    %c0_13 = arith.constant 0 : index
    %c0_14 = arith.constant 0 : index
    %29 = vector.load %arg5[%c0_13, %c0_14] : memref<128x384xbf16, #tpu.memory_space<vmem>>, vector<128x384xbf16>
    %cst_15 = arith.constant dense<0.000000e+00> : vector<8x384xf32>
    %30 = tpu.matmul %28, %29, %cst_15 {dimension_numbers = #tpu.dot_dimension_numbers<[1], [0], [0], [1], [0, 0, 1, 1], [], []>} : vector<8x128xbf16>, vector<128x384xbf16>, vector<8x384xf32> -> vector<8x384xf32>
    %c0_16 = arith.constant 0 : index
    %c0_17 = arith.constant 0 : index
    %31 = vector.load %arg6[%c0_16, %c0_17] : memref<1x384xf32, #tpu.memory_space<vmem>>, vector<1x384xf32>
    %32 = vector.broadcast %31 : vector<1x384xf32> to vector<8x384xf32>
    %33 = arith.addf %30, %32 : vector<8x384xf32>
    %34 = vector.extract_strided_slice %33 {offsets = [0, 0], sizes = [8, 128], strides = [1, 1]} : vector<8x384xf32> to vector<8x128xf32>
    %35 = vector.extract_strided_slice %33 {offsets = [0, 128], sizes = [8, 128], strides = [1, 1]} : vector<8x384xf32> to vector<8x128xf32>
    %36 = vector.extract_strided_slice %33 {offsets = [0, 256], sizes = [8, 128], strides = [1, 1]} : vector<8x384xf32> to vector<8x128xf32>
    %c0_18 = arith.constant 0 : index
    %c0_19 = arith.constant 0 : index
    %37 = vector.load %arg7[%c0_18, %c0_19] : memref<128x128xf32, #tpu.memory_space<vmem>>, vector<128x128xf32>
    %38 = vector.extract_strided_slice %34 {offsets = [0, 0], sizes = [8, 8], strides = [1, 1]} : vector<8x128xf32> to vector<8x8xf32>
    %39 = arith.truncf %38 : vector<8x8xf32> to vector<8x8xbf16>
    %40 = vector.extract_strided_slice %35 {offsets = [0, 0], sizes = [8, 8], strides = [1, 1]} : vector<8x128xf32> to vector<8x8xf32>
    %41 = arith.truncf %40 : vector<8x8xf32> to vector<8x8xbf16>
    %42 = vector.extract_strided_slice %36 {offsets = [0, 0], sizes = [8, 8], strides = [1, 1]} : vector<8x128xf32> to vector<8x8xf32>
    %43 = arith.truncf %42 : vector<8x8xf32> to vector<8x8xbf16>
    %cst_20 = arith.constant dense<0.000000e+00> : vector<8x8xf32>
    %44 = tpu.matmul %39, %41, %cst_20 {dimension_numbers = #tpu.dot_dimension_numbers<[1], [1], [0], [0], [0, 0, 1, 0], [], []>} : vector<8x8xbf16>, vector<8x8xbf16>, vector<8x8xf32> -> vector<8x8xf32>
    %cst_21 = arith.constant 0.353553385 : f32
    %45 = vector.broadcast %cst_21 : f32 to vector<8x8xf32>
    %46 = arith.mulf %44, %45 : vector<8x8xf32>
    %cst_22 = arith.constant dense<0xFF800000> : vector<8xf32>
    %47 = vector.multi_reduction <maximumf>, %46, %cst_22 [1] : vector<8x8xf32> to vector<8xf32>
    %48 = vector.shape_cast %47 : vector<8xf32> to vector<8x1xf32>
    %49 = vector.broadcast %48 : vector<8x1xf32> to vector<8x8xf32>
    %50 = arith.subf %46, %49 : vector<8x8xf32>
    %51 = math.exp %50 : vector<8x8xf32>
    %cst_23 = arith.constant dense<0.000000e+00> : vector<8xf32>
    %52 = vector.multi_reduction <add>, %51, %cst_23 [1] : vector<8x8xf32> to vector<8xf32>
    %53 = vector.shape_cast %52 : vector<8xf32> to vector<8x1xf32>
    %54 = tpu.reciprocal %53 {approx = true} : vector<8x1xf32> -> vector<8x1xf32>
    %55 = vector.broadcast %54 : vector<8x1xf32> to vector<8x8xf32>
    %56 = arith.mulf %51, %55 : vector<8x8xf32>
    %57 = arith.truncf %56 : vector<8x8xf32> to vector<8x8xbf16>
    %cst_24 = arith.constant dense<0.000000e+00> : vector<8x8xf32>
    %58 = tpu.matmul %57, %43, %cst_24 {dimension_numbers = #tpu.dot_dimension_numbers<[1], [0], [0], [1], [0, 0, 1, 1], [], []>} : vector<8x8xbf16>, vector<8x8xbf16>, vector<8x8xf32> -> vector<8x8xf32>
    %59 = arith.truncf %58 : vector<8x8xf32> to vector<8x8xbf16>
    %60 = vector.extract_strided_slice %37 {offsets = [0, 0], sizes = [8, 128], strides = [1, 1]} : vector<128x128xf32> to vector<8x128xf32>
    %61 = arith.truncf %60 : vector<8x128xf32> to vector<8x128xbf16>
    %cst_25 = arith.constant dense<0.000000e+00> : vector<8x128xf32>
    %62 = tpu.matmul %59, %61, %cst_25 {dimension_numbers = #tpu.dot_dimension_numbers<[1], [0], [0], [1], [0, 0, 1, 1], [], []>} : vector<8x8xbf16>, vector<8x128xbf16>, vector<8x128xf32> -> vector<8x128xf32>
    %63 = vector.extract_strided_slice %34 {offsets = [0, 8], sizes = [8, 8], strides = [1, 1]} : vector<8x128xf32> to vector<8x8xf32>
    %64 = arith.truncf %63 : vector<8x8xf32> to vector<8x8xbf16>
    %65 = vector.extract_strided_slice %35 {offsets = [0, 8], sizes = [8, 8], strides = [1, 1]} : vector<8x128xf32> to vector<8x8xf32>
    %66 = arith.truncf %65 : vector<8x8xf32> to vector<8x8xbf16>
    %67 = vector.extract_strided_slice %36 {offsets = [0, 8], sizes = [8, 8], strides = [1, 1]} : vector<8x128xf32> to vector<8x8xf32>
    %68 = arith.truncf %67 : vector<8x8xf32> to vector<8x8xbf16>
    %cst_26 = arith.constant dense<0.000000e+00> : vector<8x8xf32>
    %69 = tpu.matmul %64, %66, %cst_26 {dimension_numbers = #tpu.dot_dimension_numbers<[1], [1], [0], [0], [0, 0, 1, 0], [], []>} : vector<8x8xbf16>, vector<8x8xbf16>, vector<8x8xf32> -> vector<8x8xf32>
    %cst_27 = arith.constant 0.353553385 : f32
    %70 = vector.broadcast %cst_27 : f32 to vector<8x8xf32>
    %71 = arith.mulf %69, %70 : vector<8x8xf32>
    %cst_28 = arith.constant dense<0xFF800000> : vector<8xf32>
    %72 = vector.multi_reduction <maximumf>, %71, %cst_28 [1] : vector<8x8xf32> to vector<8xf32>
    %73 = vector.shape_cast %72 : vector<8xf32> to vector<8x1xf32>
    %74 = vector.broadcast %73 : vector<8x1xf32> to vector<8x8xf32>
    %75 = arith.subf %71, %74 : vector<8x8xf32>
    %76 = math.exp %75 : vector<8x8xf32>
    %cst_29 = arith.constant dense<0.000000e+00> : vector<8xf32>
    %77 = vector.multi_reduction <add>, %76, %cst_29 [1] : vector<8x8xf32> to vector<8xf32>
    %78 = vector.shape_cast %77 : vector<8xf32> to vector<8x1xf32>
    %79 = tpu.reciprocal %78 {approx = true} : vector<8x1xf32> -> vector<8x1xf32>
    %80 = vector.broadcast %79 : vector<8x1xf32> to vector<8x8xf32>
    %81 = arith.mulf %76, %80 : vector<8x8xf32>
    %82 = arith.truncf %81 : vector<8x8xf32> to vector<8x8xbf16>
    %cst_30 = arith.constant dense<0.000000e+00> : vector<8x8xf32>
    %83 = tpu.matmul %82, %68, %cst_30 {dimension_numbers = #tpu.dot_dimension_numbers<[1], [0], [0], [1], [0, 0, 1, 1], [], []>} : vector<8x8xbf16>, vector<8x8xbf16>, vector<8x8xf32> -> vector<8x8xf32>
    %84 = arith.truncf %83 : vector<8x8xf32> to vector<8x8xbf16>
    %85 = vector.extract_strided_slice %37 {offsets = [8, 0], sizes = [8, 128], strides = [1, 1]} : vector<128x128xf32> to vector<8x128xf32>
    %86 = arith.truncf %85 : vector<8x128xf32> to vector<8x128xbf16>
    %cst_31 = arith.constant dense<0.000000e+00> : vector<8x128xf32>
    %87 = tpu.matmul %84, %86, %cst_31 {dimension_numbers = #tpu.dot_dimension_numbers<[1], [0], [0], [1], [0, 0, 1, 1], [], []>} : vector<8x8xbf16>, vector<8x128xbf16>, vector<8x128xf32> -> vector<8x128xf32>
    %88 = arith.addf %62, %87 : vector<8x128xf32>
    %89 = vector.extract_strided_slice %34 {offsets = [0, 16], sizes = [8, 8], strides = [1, 1]} : vector<8x128xf32> to vector<8x8xf32>
    %90 = arith.truncf %89 : vector<8x8xf32> to vector<8x8xbf16>
    %91 = vector.extract_strided_slice %35 {offsets = [0, 16], sizes = [8, 8], strides = [1, 1]} : vector<8x128xf32> to vector<8x8xf32>
    %92 = arith.truncf %91 : vector<8x8xf32> to vector<8x8xbf16>
    %93 = vector.extract_strided_slice %36 {offsets = [0, 16], sizes = [8, 8], strides = [1, 1]} : vector<8x128xf32> to vector<8x8xf32>
    %94 = arith.truncf %93 : vector<8x8xf32> to vector<8x8xbf16>
    %cst_32 = arith.constant dense<0.000000e+00> : vector<8x8xf32>
    %95 = tpu.matmul %90, %92, %cst_32 {dimension_numbers = #tpu.dot_dimension_numbers<[1], [1], [0], [0], [0, 0, 1, 0], [], []>} : vector<8x8xbf16>, vector<8x8xbf16>, vector<8x8xf32> -> vector<8x8xf32>
    %cst_33 = arith.constant 0.353553385 : f32
    %96 = vector.broadcast %cst_33 : f32 to vector<8x8xf32>
    %97 = arith.mulf %95, %96 : vector<8x8xf32>
    %cst_34 = arith.constant dense<0xFF800000> : vector<8xf32>
    %98 = vector.multi_reduction <maximumf>, %97, %cst_34 [1] : vector<8x8xf32> to vector<8xf32>
    %99 = vector.shape_cast %98 : vector<8xf32> to vector<8x1xf32>
    %100 = vector.broadcast %99 : vector<8x1xf32> to vector<8x8xf32>
    %101 = arith.subf %97, %100 : vector<8x8xf32>
    %102 = math.exp %101 : vector<8x8xf32>
    %cst_35 = arith.constant dense<0.000000e+00> : vector<8xf32>
    %103 = vector.multi_reduction <add>, %102, %cst_35 [1] : vector<8x8xf32> to vector<8xf32>
    %104 = vector.shape_cast %103 : vector<8xf32> to vector<8x1xf32>
    %105 = tpu.reciprocal %104 {approx = true} : vector<8x1xf32> -> vector<8x1xf32>
    %106 = vector.broadcast %105 : vector<8x1xf32> to vector<8x8xf32>
    %107 = arith.mulf %102, %106 : vector<8x8xf32>
    %108 = arith.truncf %107 : vector<8x8xf32> to vector<8x8xbf16>
    %cst_36 = arith.constant dense<0.000000e+00> : vector<8x8xf32>
    %109 = tpu.matmul %108, %94, %cst_36 {dimension_numbers = #tpu.dot_dimension_numbers<[1], [0], [0], [1], [0, 0, 1, 1], [], []>} : vector<8x8xbf16>, vector<8x8xbf16>, vector<8x8xf32> -> vector<8x8xf32>
    %110 = arith.truncf %109 : vector<8x8xf32> to vector<8x8xbf16>
    %111 = vector.extract_strided_slice %37 {offsets = [16, 0], sizes = [8, 128], strides = [1, 1]} : vector<128x128xf32> to vector<8x128xf32>
    %112 = arith.truncf %111 : vector<8x128xf32> to vector<8x128xbf16>
    %cst_37 = arith.constant dense<0.000000e+00> : vector<8x128xf32>
    %113 = tpu.matmul %110, %112, %cst_37 {dimension_numbers = #tpu.dot_dimension_numbers<[1], [0], [0], [1], [0, 0, 1, 1], [], []>} : vector<8x8xbf16>, vector<8x128xbf16>, vector<8x128xf32> -> vector<8x128xf32>
    %114 = arith.addf %88, %113 : vector<8x128xf32>
    %115 = vector.extract_strided_slice %34 {offsets = [0, 24], sizes = [8, 8], strides = [1, 1]} : vector<8x128xf32> to vector<8x8xf32>
    %116 = arith.truncf %115 : vector<8x8xf32> to vector<8x8xbf16>
    %117 = vector.extract_strided_slice %35 {offsets = [0, 24], sizes = [8, 8], strides = [1, 1]} : vector<8x128xf32> to vector<8x8xf32>
    %118 = arith.truncf %117 : vector<8x8xf32> to vector<8x8xbf16>
    %119 = vector.extract_strided_slice %36 {offsets = [0, 24], sizes = [8, 8], strides = [1, 1]} : vector<8x128xf32> to vector<8x8xf32>
    %120 = arith.truncf %119 : vector<8x8xf32> to vector<8x8xbf16>
    %cst_38 = arith.constant dense<0.000000e+00> : vector<8x8xf32>
    %121 = tpu.matmul %116, %118, %cst_38 {dimension_numbers = #tpu.dot_dimension_numbers<[1], [1], [0], [0], [0, 0, 1, 0], [], []>} : vector<8x8xbf16>, vector<8x8xbf16>, vector<8x8xf32> -> vector<8x8xf32>
    %cst_39 = arith.constant 0.353553385 : f32
    %122 = vector.broadcast %cst_39 : f32 to vector<8x8xf32>
    %123 = arith.mulf %121, %122 : vector<8x8xf32>
    %cst_40 = arith.constant dense<0xFF800000> : vector<8xf32>
    %124 = vector.multi_reduction <maximumf>, %123, %cst_40 [1] : vector<8x8xf32> to vector<8xf32>
    %125 = vector.shape_cast %124 : vector<8xf32> to vector<8x1xf32>
    %126 = vector.broadcast %125 : vector<8x1xf32> to vector<8x8xf32>
    %127 = arith.subf %123, %126 : vector<8x8xf32>
    %128 = math.exp %127 : vector<8x8xf32>
    %cst_41 = arith.constant dense<0.000000e+00> : vector<8xf32>
    %129 = vector.multi_reduction <add>, %128, %cst_41 [1] : vector<8x8xf32> to vector<8xf32>
    %130 = vector.shape_cast %129 : vector<8xf32> to vector<8x1xf32>
    %131 = tpu.reciprocal %130 {approx = true} : vector<8x1xf32> -> vector<8x1xf32>
    %132 = vector.broadcast %131 : vector<8x1xf32> to vector<8x8xf32>
    %133 = arith.mulf %128, %132 : vector<8x8xf32>
    %134 = arith.truncf %133 : vector<8x8xf32> to vector<8x8xbf16>
    %cst_42 = arith.constant dense<0.000000e+00> : vector<8x8xf32>
    %135 = tpu.matmul %134, %120, %cst_42 {dimension_numbers = #tpu.dot_dimension_numbers<[1], [0], [0], [1], [0, 0, 1, 1], [], []>} : vector<8x8xbf16>, vector<8x8xbf16>, vector<8x8xf32> -> vector<8x8xf32>
    %136 = arith.truncf %135 : vector<8x8xf32> to vector<8x8xbf16>
    %137 = vector.extract_strided_slice %37 {offsets = [24, 0], sizes = [8, 128], strides = [1, 1]} : vector<128x128xf32> to vector<8x128xf32>
    %138 = arith.truncf %137 : vector<8x128xf32> to vector<8x128xbf16>
    %cst_43 = arith.constant dense<0.000000e+00> : vector<8x128xf32>
    %139 = tpu.matmul %136, %138, %cst_43 {dimension_numbers = #tpu.dot_dimension_numbers<[1], [0], [0], [1], [0, 0, 1, 1], [], []>} : vector<8x8xbf16>, vector<8x128xbf16>, vector<8x128xf32> -> vector<8x128xf32>
    %140 = arith.addf %114, %139 : vector<8x128xf32>
    %141 = arith.addf %1, %140 : vector<8x128xf32>
    %c0_44 = arith.constant 0 : index
    %c0_45 = arith.constant 0 : index
    %142 = vector.load %arg8[%c0_44, %c0_45] : memref<1x128xf32, #tpu.memory_space<vmem>>, vector<1x128xf32>
    %143 = vector.broadcast %142 : vector<1x128xf32> to vector<8x128xf32>
    %144 = arith.addf %141, %143 : vector<8x128xf32>
    %c0_46 = arith.constant 0 : index
    %c0_47 = arith.constant 0 : index
    %145 = vector.load %arg9[%c0_46, %c0_47] : memref<1x128xf32, #tpu.memory_space<vmem>>, vector<1x128xf32>
    %c0_48 = arith.constant 0 : index
    %c0_49 = arith.constant 0 : index
    %146 = vector.load %arg10[%c0_48, %c0_49] : memref<1x128xf32, #tpu.memory_space<vmem>>, vector<1x128xf32>
    %cst_50 = arith.constant dense<0.000000e+00> : vector<8xf32>
    %147 = vector.multi_reduction <add>, %144, %cst_50 [1] : vector<8x128xf32> to vector<8xf32>
    %148 = vector.shape_cast %147 : vector<8xf32> to vector<8x1xf32>
    %cst_51 = arith.constant 3.125000e-02 : f32
    %149 = vector.broadcast %cst_51 : f32 to vector<8x1xf32>
    %150 = arith.mulf %148, %149 : vector<8x1xf32>
    %151 = arith.mulf %144, %144 : vector<8x128xf32>
    %cst_52 = arith.constant dense<0.000000e+00> : vector<8xf32>
    %152 = vector.multi_reduction <add>, %151, %cst_52 [1] : vector<8x128xf32> to vector<8xf32>
    %153 = vector.shape_cast %152 : vector<8xf32> to vector<8x1xf32>
    %cst_53 = arith.constant 3.125000e-02 : f32
    %154 = vector.broadcast %cst_53 : f32 to vector<8x1xf32>
    %155 = arith.mulf %153, %154 : vector<8x1xf32>
    %156 = arith.mulf %150, %150 : vector<8x1xf32>
    %157 = arith.subf %155, %156 : vector<8x1xf32>
    %158 = vector.broadcast %150 : vector<8x1xf32> to vector<8x128xf32>
    %159 = arith.subf %144, %158 : vector<8x128xf32>
    %cst_54 = arith.constant 9.99999974E-6 : f32
    %160 = vector.broadcast %cst_54 : f32 to vector<8x1xf32>
    %161 = arith.addf %157, %160 : vector<8x1xf32>
    %162 = math.rsqrt %161 : vector<8x1xf32>
    %163 = vector.broadcast %162 : vector<8x1xf32> to vector<8x128xf32>
    %164 = arith.mulf %159, %163 : vector<8x128xf32>
    %165 = vector.broadcast %145 : vector<1x128xf32> to vector<8x128xf32>
    %166 = arith.mulf %164, %165 : vector<8x128xf32>
    %167 = vector.broadcast %146 : vector<1x128xf32> to vector<8x128xf32>
    %168 = arith.addf %166, %167 : vector<8x128xf32>
    %169 = arith.truncf %168 : vector<8x128xf32> to vector<8x128xbf16>
    %c0_55 = arith.constant 0 : index
    %c0_56 = arith.constant 0 : index
    %170 = vector.load %arg11[%c0_55, %c0_56] : memref<128x128xbf16, #tpu.memory_space<vmem>>, vector<128x128xbf16>
    %cst_57 = arith.constant dense<0.000000e+00> : vector<8x128xf32>
    %171 = tpu.matmul %169, %170, %cst_57 {dimension_numbers = #tpu.dot_dimension_numbers<[1], [0], [0], [1], [0, 0, 1, 1], [], []>} : vector<8x128xbf16>, vector<128x128xbf16>, vector<8x128xf32> -> vector<8x128xf32>
    %c0_58 = arith.constant 0 : index
    %c0_59 = arith.constant 0 : index
    %172 = vector.load %arg12[%c0_58, %c0_59] : memref<1x128xf32, #tpu.memory_space<vmem>>, vector<1x128xf32>
    %173 = vector.broadcast %172 : vector<1x128xf32> to vector<8x128xf32>
    %174 = arith.addf %171, %173 : vector<8x128xf32>
    %175 = arith.truncf %3 : vector<8x128xf32> to vector<8x128xbf16>
    %c0_60 = arith.constant 0 : index
    %c0_61 = arith.constant 0 : index
    %176 = vector.load %arg13[%c0_60, %c0_61] : memref<128x256xbf16, #tpu.memory_space<vmem>>, vector<128x256xbf16>
    %cst_62 = arith.constant dense<0.000000e+00> : vector<8x256xf32>
    %177 = tpu.matmul %175, %176, %cst_62 {dimension_numbers = #tpu.dot_dimension_numbers<[1], [0], [0], [1], [0, 0, 1, 1], [], []>} : vector<8x128xbf16>, vector<128x256xbf16>, vector<8x256xf32> -> vector<8x256xf32>
    %c0_63 = arith.constant 0 : index
    %c0_64 = arith.constant 0 : index
    %178 = vector.load %arg14[%c0_63, %c0_64] : memref<1x256xf32, #tpu.memory_space<vmem>>, vector<1x256xf32>
    %179 = vector.broadcast %178 : vector<1x256xf32> to vector<8x256xf32>
    %180 = arith.addf %177, %179 : vector<8x256xf32>
    %181 = vector.extract_strided_slice %180 {offsets = [0, 0], sizes = [8, 128], strides = [1, 1]} : vector<8x256xf32> to vector<8x128xf32>
    %182 = vector.extract_strided_slice %180 {offsets = [0, 128], sizes = [8, 128], strides = [1, 1]} : vector<8x256xf32> to vector<8x128xf32>
    %c0_65 = arith.constant 0 : index
    %c0_66 = arith.constant 0 : index
    %183 = vector.load %arg15[%c0_65, %c0_66] : memref<128x128xf32, #tpu.memory_space<vmem>>, vector<128x128xf32>
    %184 = vector.extract_strided_slice %174 {offsets = [0, 0], sizes = [8, 8], strides = [1, 1]} : vector<8x128xf32> to vector<8x8xf32>
    %185 = arith.truncf %184 : vector<8x8xf32> to vector<8x8xbf16>
    %186 = vector.extract_strided_slice %181 {offsets = [0, 0], sizes = [8, 8], strides = [1, 1]} : vector<8x128xf32> to vector<8x8xf32>
    %187 = arith.truncf %186 : vector<8x8xf32> to vector<8x8xbf16>
    %188 = vector.extract_strided_slice %182 {offsets = [0, 0], sizes = [8, 8], strides = [1, 1]} : vector<8x128xf32> to vector<8x8xf32>
    %189 = arith.truncf %188 : vector<8x8xf32> to vector<8x8xbf16>
    %cst_67 = arith.constant dense<0.000000e+00> : vector<8x8xf32>
    %190 = tpu.matmul %185, %187, %cst_67 {dimension_numbers = #tpu.dot_dimension_numbers<[1], [1], [0], [0], [0, 0, 1, 0], [], []>} : vector<8x8xbf16>, vector<8x8xbf16>, vector<8x8xf32> -> vector<8x8xf32>
    %cst_68 = arith.constant 0.353553385 : f32
    %191 = vector.broadcast %cst_68 : f32 to vector<8x8xf32>
    %192 = arith.mulf %190, %191 : vector<8x8xf32>
    %cst_69 = arith.constant dense<0xFF800000> : vector<8xf32>
    %193 = vector.multi_reduction <maximumf>, %192, %cst_69 [1] : vector<8x8xf32> to vector<8xf32>
    %194 = vector.shape_cast %193 : vector<8xf32> to vector<8x1xf32>
    %195 = vector.broadcast %194 : vector<8x1xf32> to vector<8x8xf32>
    %196 = arith.subf %192, %195 : vector<8x8xf32>
    %197 = math.exp %196 : vector<8x8xf32>
    %cst_70 = arith.constant dense<0.000000e+00> : vector<8xf32>
    %198 = vector.multi_reduction <add>, %197, %cst_70 [1] : vector<8x8xf32> to vector<8xf32>
    %199 = vector.shape_cast %198 : vector<8xf32> to vector<8x1xf32>
    %200 = tpu.reciprocal %199 {approx = true} : vector<8x1xf32> -> vector<8x1xf32>
    %201 = vector.broadcast %200 : vector<8x1xf32> to vector<8x8xf32>
    %202 = arith.mulf %197, %201 : vector<8x8xf32>
    %203 = arith.truncf %202 : vector<8x8xf32> to vector<8x8xbf16>
    %cst_71 = arith.constant dense<0.000000e+00> : vector<8x8xf32>
    %204 = tpu.matmul %203, %189, %cst_71 {dimension_numbers = #tpu.dot_dimension_numbers<[1], [0], [0], [1], [0, 0, 1, 1], [], []>} : vector<8x8xbf16>, vector<8x8xbf16>, vector<8x8xf32> -> vector<8x8xf32>
    %205 = arith.truncf %204 : vector<8x8xf32> to vector<8x8xbf16>
    %206 = vector.extract_strided_slice %183 {offsets = [0, 0], sizes = [8, 128], strides = [1, 1]} : vector<128x128xf32> to vector<8x128xf32>
    %207 = arith.truncf %206 : vector<8x128xf32> to vector<8x128xbf16>
    %cst_72 = arith.constant dense<0.000000e+00> : vector<8x128xf32>
    %208 = tpu.matmul %205, %207, %cst_72 {dimension_numbers = #tpu.dot_dimension_numbers<[1], [0], [0], [1], [0, 0, 1, 1], [], []>} : vector<8x8xbf16>, vector<8x128xbf16>, vector<8x128xf32> -> vector<8x128xf32>
    %209 = vector.extract_strided_slice %174 {offsets = [0, 8], sizes = [8, 8], strides = [1, 1]} : vector<8x128xf32> to vector<8x8xf32>
    %210 = arith.truncf %209 : vector<8x8xf32> to vector<8x8xbf16>
    %211 = vector.extract_strided_slice %181 {offsets = [0, 8], sizes = [8, 8], strides = [1, 1]} : vector<8x128xf32> to vector<8x8xf32>
    %212 = arith.truncf %211 : vector<8x8xf32> to vector<8x8xbf16>
    %213 = vector.extract_strided_slice %182 {offsets = [0, 8], sizes = [8, 8], strides = [1, 1]} : vector<8x128xf32> to vector<8x8xf32>
    %214 = arith.truncf %213 : vector<8x8xf32> to vector<8x8xbf16>
    %cst_73 = arith.constant dense<0.000000e+00> : vector<8x8xf32>
    %215 = tpu.matmul %210, %212, %cst_73 {dimension_numbers = #tpu.dot_dimension_numbers<[1], [1], [0], [0], [0, 0, 1, 0], [], []>} : vector<8x8xbf16>, vector<8x8xbf16>, vector<8x8xf32> -> vector<8x8xf32>
    %cst_74 = arith.constant 0.353553385 : f32
    %216 = vector.broadcast %cst_74 : f32 to vector<8x8xf32>
    %217 = arith.mulf %215, %216 : vector<8x8xf32>
    %cst_75 = arith.constant dense<0xFF800000> : vector<8xf32>
    %218 = vector.multi_reduction <maximumf>, %217, %cst_75 [1] : vector<8x8xf32> to vector<8xf32>
    %219 = vector.shape_cast %218 : vector<8xf32> to vector<8x1xf32>
    %220 = vector.broadcast %219 : vector<8x1xf32> to vector<8x8xf32>
    %221 = arith.subf %217, %220 : vector<8x8xf32>
    %222 = math.exp %221 : vector<8x8xf32>
    %cst_76 = arith.constant dense<0.000000e+00> : vector<8xf32>
    %223 = vector.multi_reduction <add>, %222, %cst_76 [1] : vector<8x8xf32> to vector<8xf32>
    %224 = vector.shape_cast %223 : vector<8xf32> to vector<8x1xf32>
    %225 = tpu.reciprocal %224 {approx = true} : vector<8x1xf32> -> vector<8x1xf32>
    %226 = vector.broadcast %225 : vector<8x1xf32> to vector<8x8xf32>
    %227 = arith.mulf %222, %226 : vector<8x8xf32>
    %228 = arith.truncf %227 : vector<8x8xf32> to vector<8x8xbf16>
    %cst_77 = arith.constant dense<0.000000e+00> : vector<8x8xf32>
    %229 = tpu.matmul %228, %214, %cst_77 {dimension_numbers = #tpu.dot_dimension_numbers<[1], [0], [0], [1], [0, 0, 1, 1], [], []>} : vector<8x8xbf16>, vector<8x8xbf16>, vector<8x8xf32> -> vector<8x8xf32>
    %230 = arith.truncf %229 : vector<8x8xf32> to vector<8x8xbf16>
    %231 = vector.extract_strided_slice %183 {offsets = [8, 0], sizes = [8, 128], strides = [1, 1]} : vector<128x128xf32> to vector<8x128xf32>
    %232 = arith.truncf %231 : vector<8x128xf32> to vector<8x128xbf16>
    %cst_78 = arith.constant dense<0.000000e+00> : vector<8x128xf32>
    %233 = tpu.matmul %230, %232, %cst_78 {dimension_numbers = #tpu.dot_dimension_numbers<[1], [0], [0], [1], [0, 0, 1, 1], [], []>} : vector<8x8xbf16>, vector<8x128xbf16>, vector<8x128xf32> -> vector<8x128xf32>
    %234 = arith.addf %208, %233 : vector<8x128xf32>
    %235 = vector.extract_strided_slice %174 {offsets = [0, 16], sizes = [8, 8], strides = [1, 1]} : vector<8x128xf32> to vector<8x8xf32>
    %236 = arith.truncf %235 : vector<8x8xf32> to vector<8x8xbf16>
    %237 = vector.extract_strided_slice %181 {offsets = [0, 16], sizes = [8, 8], strides = [1, 1]} : vector<8x128xf32> to vector<8x8xf32>
    %238 = arith.truncf %237 : vector<8x8xf32> to vector<8x8xbf16>
    %239 = vector.extract_strided_slice %182 {offsets = [0, 16], sizes = [8, 8], strides = [1, 1]} : vector<8x128xf32> to vector<8x8xf32>
    %240 = arith.truncf %239 : vector<8x8xf32> to vector<8x8xbf16>
    %cst_79 = arith.constant dense<0.000000e+00> : vector<8x8xf32>
    %241 = tpu.matmul %236, %238, %cst_79 {dimension_numbers = #tpu.dot_dimension_numbers<[1], [1], [0], [0], [0, 0, 1, 0], [], []>} : vector<8x8xbf16>, vector<8x8xbf16>, vector<8x8xf32> -> vector<8x8xf32>
    %cst_80 = arith.constant 0.353553385 : f32
    %242 = vector.broadcast %cst_80 : f32 to vector<8x8xf32>
    %243 = arith.mulf %241, %242 : vector<8x8xf32>
    %cst_81 = arith.constant dense<0xFF800000> : vector<8xf32>
    %244 = vector.multi_reduction <maximumf>, %243, %cst_81 [1] : vector<8x8xf32> to vector<8xf32>
    %245 = vector.shape_cast %244 : vector<8xf32> to vector<8x1xf32>
    %246 = vector.broadcast %245 : vector<8x1xf32> to vector<8x8xf32>
    %247 = arith.subf %243, %246 : vector<8x8xf32>
    %248 = math.exp %247 : vector<8x8xf32>
    %cst_82 = arith.constant dense<0.000000e+00> : vector<8xf32>
    %249 = vector.multi_reduction <add>, %248, %cst_82 [1] : vector<8x8xf32> to vector<8xf32>
    %250 = vector.shape_cast %249 : vector<8xf32> to vector<8x1xf32>
    %251 = tpu.reciprocal %250 {approx = true} : vector<8x1xf32> -> vector<8x1xf32>
    %252 = vector.broadcast %251 : vector<8x1xf32> to vector<8x8xf32>
    %253 = arith.mulf %248, %252 : vector<8x8xf32>
    %254 = arith.truncf %253 : vector<8x8xf32> to vector<8x8xbf16>
    %cst_83 = arith.constant dense<0.000000e+00> : vector<8x8xf32>
    %255 = tpu.matmul %254, %240, %cst_83 {dimension_numbers = #tpu.dot_dimension_numbers<[1], [0], [0], [1], [0, 0, 1, 1], [], []>} : vector<8x8xbf16>, vector<8x8xbf16>, vector<8x8xf32> -> vector<8x8xf32>
    %256 = arith.truncf %255 : vector<8x8xf32> to vector<8x8xbf16>
    %257 = vector.extract_strided_slice %183 {offsets = [16, 0], sizes = [8, 128], strides = [1, 1]} : vector<128x128xf32> to vector<8x128xf32>
    %258 = arith.truncf %257 : vector<8x128xf32> to vector<8x128xbf16>
    %cst_84 = arith.constant dense<0.000000e+00> : vector<8x128xf32>
    %259 = tpu.matmul %256, %258, %cst_84 {dimension_numbers = #tpu.dot_dimension_numbers<[1], [0], [0], [1], [0, 0, 1, 1], [], []>} : vector<8x8xbf16>, vector<8x128xbf16>, vector<8x128xf32> -> vector<8x128xf32>
    %260 = arith.addf %234, %259 : vector<8x128xf32>
    %261 = vector.extract_strided_slice %174 {offsets = [0, 24], sizes = [8, 8], strides = [1, 1]} : vector<8x128xf32> to vector<8x8xf32>
    %262 = arith.truncf %261 : vector<8x8xf32> to vector<8x8xbf16>
    %263 = vector.extract_strided_slice %181 {offsets = [0, 24], sizes = [8, 8], strides = [1, 1]} : vector<8x128xf32> to vector<8x8xf32>
    %264 = arith.truncf %263 : vector<8x8xf32> to vector<8x8xbf16>
    %265 = vector.extract_strided_slice %182 {offsets = [0, 24], sizes = [8, 8], strides = [1, 1]} : vector<8x128xf32> to vector<8x8xf32>
    %266 = arith.truncf %265 : vector<8x8xf32> to vector<8x8xbf16>
    %cst_85 = arith.constant dense<0.000000e+00> : vector<8x8xf32>
    %267 = tpu.matmul %262, %264, %cst_85 {dimension_numbers = #tpu.dot_dimension_numbers<[1], [1], [0], [0], [0, 0, 1, 0], [], []>} : vector<8x8xbf16>, vector<8x8xbf16>, vector<8x8xf32> -> vector<8x8xf32>
    %cst_86 = arith.constant 0.353553385 : f32
    %268 = vector.broadcast %cst_86 : f32 to vector<8x8xf32>
    %269 = arith.mulf %267, %268 : vector<8x8xf32>
    %cst_87 = arith.constant dense<0xFF800000> : vector<8xf32>
    %270 = vector.multi_reduction <maximumf>, %269, %cst_87 [1] : vector<8x8xf32> to vector<8xf32>
    %271 = vector.shape_cast %270 : vector<8xf32> to vector<8x1xf32>
    %272 = vector.broadcast %271 : vector<8x1xf32> to vector<8x8xf32>
    %273 = arith.subf %269, %272 : vector<8x8xf32>
    %274 = math.exp %273 : vector<8x8xf32>
    %cst_88 = arith.constant dense<0.000000e+00> : vector<8xf32>
    %275 = vector.multi_reduction <add>, %274, %cst_88 [1] : vector<8x8xf32> to vector<8xf32>
    %276 = vector.shape_cast %275 : vector<8xf32> to vector<8x1xf32>
    %277 = tpu.reciprocal %276 {approx = true} : vector<8x1xf32> -> vector<8x1xf32>
    %278 = vector.broadcast %277 : vector<8x1xf32> to vector<8x8xf32>
    %279 = arith.mulf %274, %278 : vector<8x8xf32>
    %280 = arith.truncf %279 : vector<8x8xf32> to vector<8x8xbf16>
    %cst_89 = arith.constant dense<0.000000e+00> : vector<8x8xf32>
    %281 = tpu.matmul %280, %266, %cst_89 {dimension_numbers = #tpu.dot_dimension_numbers<[1], [0], [0], [1], [0, 0, 1, 1], [], []>} : vector<8x8xbf16>, vector<8x8xbf16>, vector<8x8xf32> -> vector<8x8xf32>
    %282 = arith.truncf %281 : vector<8x8xf32> to vector<8x8xbf16>
    %283 = vector.extract_strided_slice %183 {offsets = [24, 0], sizes = [8, 128], strides = [1, 1]} : vector<128x128xf32> to vector<8x128xf32>
    %284 = arith.truncf %283 : vector<8x128xf32> to vector<8x128xbf16>
    %cst_90 = arith.constant dense<0.000000e+00> : vector<8x128xf32>
    %285 = tpu.matmul %282, %284, %cst_90 {dimension_numbers = #tpu.dot_dimension_numbers<[1], [0], [0], [1], [0, 0, 1, 1], [], []>} : vector<8x8xbf16>, vector<8x128xbf16>, vector<8x128xf32> -> vector<8x128xf32>
    %286 = arith.addf %260, %285 : vector<8x128xf32>
    %287 = arith.addf %144, %286 : vector<8x128xf32>
    %c0_91 = arith.constant 0 : index
    %c0_92 = arith.constant 0 : index
    %288 = vector.load %arg16[%c0_91, %c0_92] : memref<1x128xf32, #tpu.memory_space<vmem>>, vector<1x128xf32>
    %289 = vector.broadcast %288 : vector<1x128xf32> to vector<8x128xf32>
    %290 = arith.addf %287, %289 : vector<8x128xf32>
    %c0_93 = arith.constant 0 : index
    %c0_94 = arith.constant 0 : index
    %291 = vector.load %arg17[%c0_93, %c0_94] : memref<1x128xf32, #tpu.memory_space<vmem>>, vector<1x128xf32>
    %c0_95 = arith.constant 0 : index
    %c0_96 = arith.constant 0 : index
    %292 = vector.load %arg18[%c0_95, %c0_96] : memref<1x128xf32, #tpu.memory_space<vmem>>, vector<1x128xf32>
    %cst_97 = arith.constant dense<0.000000e+00> : vector<8xf32>
    %293 = vector.multi_reduction <add>, %290, %cst_97 [1] : vector<8x128xf32> to vector<8xf32>
    %294 = vector.shape_cast %293 : vector<8xf32> to vector<8x1xf32>
    %cst_98 = arith.constant 3.125000e-02 : f32
    %295 = vector.broadcast %cst_98 : f32 to vector<8x1xf32>
    %296 = arith.mulf %294, %295 : vector<8x1xf32>
    %297 = arith.mulf %290, %290 : vector<8x128xf32>
    %cst_99 = arith.constant dense<0.000000e+00> : vector<8xf32>
    %298 = vector.multi_reduction <add>, %297, %cst_99 [1] : vector<8x128xf32> to vector<8xf32>
    %299 = vector.shape_cast %298 : vector<8xf32> to vector<8x1xf32>
    %cst_100 = arith.constant 3.125000e-02 : f32
    %300 = vector.broadcast %cst_100 : f32 to vector<8x1xf32>
    %301 = arith.mulf %299, %300 : vector<8x1xf32>
    %302 = arith.mulf %296, %296 : vector<8x1xf32>
    %303 = arith.subf %301, %302 : vector<8x1xf32>
    %304 = vector.broadcast %296 : vector<8x1xf32> to vector<8x128xf32>
    %305 = arith.subf %290, %304 : vector<8x128xf32>
    %cst_101 = arith.constant 9.99999974E-6 : f32
    %306 = vector.broadcast %cst_101 : f32 to vector<8x1xf32>
    %307 = arith.addf %303, %306 : vector<8x1xf32>
    %308 = math.rsqrt %307 : vector<8x1xf32>
    %309 = vector.broadcast %308 : vector<8x1xf32> to vector<8x128xf32>
    %310 = arith.mulf %305, %309 : vector<8x128xf32>
    %311 = vector.broadcast %291 : vector<1x128xf32> to vector<8x128xf32>
    %312 = arith.mulf %310, %311 : vector<8x128xf32>
    %313 = vector.broadcast %292 : vector<1x128xf32> to vector<8x128xf32>
    %314 = arith.addf %312, %313 : vector<8x128xf32>
    %315 = arith.truncf %314 : vector<8x128xf32> to vector<8x128xbf16>
    %c0_102 = arith.constant 0 : index
    %c0_103 = arith.constant 0 : index
    %316 = vector.load %arg19[%c0_102, %c0_103] : memref<128x128xbf16, #tpu.memory_space<vmem>>, vector<128x128xbf16>
    %cst_104 = arith.constant dense<0.000000e+00> : vector<8x128xf32>
    %317 = tpu.matmul %315, %316, %cst_104 {dimension_numbers = #tpu.dot_dimension_numbers<[1], [0], [0], [1], [0, 0, 1, 1], [], []>} : vector<8x128xbf16>, vector<128x128xbf16>, vector<8x128xf32> -> vector<8x128xf32>
    %c0_105 = arith.constant 0 : index
    %c0_106 = arith.constant 0 : index
    %318 = vector.load %arg20[%c0_105, %c0_106] : memref<1x128xf32, #tpu.memory_space<vmem>>, vector<1x128xf32>
    %319 = vector.broadcast %318 : vector<1x128xf32> to vector<8x128xf32>
    %320 = arith.addf %317, %319 : vector<8x128xf32>
    %cst_107 = arith.constant 0.000000e+00 : f32
    %321 = vector.broadcast %cst_107 : f32 to vector<8x128xf32>
    %322 = arith.maximumf %320, %321 : vector<8x128xf32>
    %323 = arith.truncf %322 : vector<8x128xf32> to vector<8x128xbf16>
    %c0_108 = arith.constant 0 : index
    %c0_109 = arith.constant 0 : index
    %324 = vector.load %arg21[%c0_108, %c0_109] : memref<128x128xbf16, #tpu.memory_space<vmem>>, vector<128x128xbf16>
    %cst_110 = arith.constant dense<0.000000e+00> : vector<8x128xf32>
    %325 = tpu.matmul %323, %324, %cst_110 {dimension_numbers = #tpu.dot_dimension_numbers<[1], [0], [0], [1], [0, 0, 1, 1], [], []>} : vector<8x128xbf16>, vector<128x128xbf16>, vector<8x128xf32> -> vector<8x128xf32>
    %326 = arith.addf %290, %325 : vector<8x128xf32>
    %c0_111 = arith.constant 0 : index
    %c0_112 = arith.constant 0 : index
    %327 = vector.load %arg22[%c0_111, %c0_112] : memref<1x128xf32, #tpu.memory_space<vmem>>, vector<1x128xf32>
    %328 = vector.broadcast %327 : vector<1x128xf32> to vector<8x128xf32>
    %329 = arith.addf %326, %328 : vector<8x128xf32>
    %c0_113 = arith.constant 0 : index
    %c0_114 = arith.constant 0 : index
    %c0_115 = arith.constant 0 : index
    %330 = vector.load %arg23[%c0_113, %c0_114, %c0_115] : memref<1x8x128xf32, #tpu.memory_space<vmem>>, vector<1x8x128xf32>
    %331 = vector.shape_cast %330 : vector<1x8x128xf32> to vector<8x128xf32>
    %332 = vector.shape_cast %329 : vector<8x128xf32> to vector<1x8x128xf32>
    tpu.vector_store %arg23[%c0_113, %c0_114, %c0_115], %332 {strides = array<i32>} : memref<1x8x128xf32, #tpu.memory_space<vmem>>, vector<1x8x128xf32>,
    return
  }
  func.func @transform_0(%arg0: i32) -> (i32, i32, i32) {
    %c0_i32 = arith.constant 0 : i32
    %c0_i32_0 = arith.constant 0 : i32
    %c0_i32_1 = arith.constant 0 : i32
    return %arg0, %c0_i32, %c0_i32_0 : i32, i32, i32
  }
  func.func @transform_1(%arg0: i32) -> (i32, i32, i32) {
    %c0_i32 = arith.constant 0 : i32
    %c0_i32_0 = arith.constant 0 : i32
    %c0_i32_1 = arith.constant 0 : i32
    return %arg0, %c0_i32, %c0_i32_0 : i32, i32, i32
  }
  func.func @transform_2(%arg0: i32) -> (i32, i32) {
    %c0_i32 = arith.constant 0 : i32
    %c0_i32_0 = arith.constant 0 : i32
    %c0_i32_1 = arith.constant 0 : i32
    return %c0_i32, %c0_i32_0 : i32, i32
  }
  func.func @transform_3(%arg0: i32) -> (i32, i32) {
    %c0_i32 = arith.constant 0 : i32
    %c0_i32_0 = arith.constant 0 : i32
    %c0_i32_1 = arith.constant 0 : i32
    return %c0_i32, %c0_i32_0 : i32, i32
  }
  func.func @transform_4(%arg0: i32) -> (i32, i32) {
    %c0_i32 = arith.constant 0 : i32
    %c0_i32_0 = arith.constant 0 : i32
    %c0_i32_1 = arith.constant 0 : i32
    return %c0_i32, %c0_i32_0 : i32, i32
  }
  func.func @transform_5(%arg0: i32) -> (i32, i32) {
    %c0_i32 = arith.constant 0 : i32
    %c0_i32_0 = arith.constant 0 : i32
    %c0_i32_1 = arith.constant 0 : i32
    return %c0_i32, %c0_i32_0 : i32, i32
  }
  func.func @transform_6(%arg0: i32) -> (i32, i32) {
    %c0_i32 = arith.constant 0 : i32
    %c0_i32_0 = arith.constant 0 : i32
    %c0_i32_1 = arith.constant 0 : i32
    return %c0_i32, %c0_i32_0 : i32, i32
  }
  func.func @transform_7(%arg0: i32) -> (i32, i32) {
    %c0_i32 = arith.constant 0 : i32
    %c0_i32_0 = arith.constant 0 : i32
    %c0_i32_1 = arith.constant 0 : i32
    return %c0_i32, %c0_i32_0 : i32, i32
  }
  func.func @transform_8(%arg0: i32) -> (i32, i32) {
    %c0_i32 = arith.constant 0 : i32
    %c0_i32_0 = arith.constant 0 : i32
    %c0_i32_1 = arith.constant 0 : i32
    return %c0_i32, %c0_i32_0 : i32, i32
  }
  func.func @transform_9(%arg0: i32) -> (i32, i32) {
    %c0_i32 = arith.constant 0 : i32
    %c0_i32_0 = arith.constant 0 : i32
    %c0_i32_1 = arith.constant 0 : i32
    return %c0_i32, %c0_i32_0 : i32, i32
  }
  func.func @transform_10(%arg0: i32) -> (i32, i32) {
    %c0_i32 = arith.constant 0 : i32
    %c0_i32_0 = arith.constant 0 : i32
    %c0_i32_1 = arith.constant 0 : i32
    return %c0_i32, %c0_i32_0 : i32, i32
  }
  func.func @transform_11(%arg0: i32) -> (i32, i32) {
    %c0_i32 = arith.constant 0 : i32
    %c0_i32_0 = arith.constant 0 : i32
    %c0_i32_1 = arith.constant 0 : i32
    return %c0_i32, %c0_i32_0 : i32, i32
  }
  func.func @transform_12(%arg0: i32) -> (i32, i32) {
    %c0_i32 = arith.constant 0 : i32
    %c0_i32_0 = arith.constant 0 : i32
    %c0_i32_1 = arith.constant 0 : i32
    return %c0_i32, %c0_i32_0 : i32, i32
  }
  func.func @transform_13(%arg0: i32) -> (i32, i32) {
    %c0_i32 = arith.constant 0 : i32
    %c0_i32_0 = arith.constant 0 : i32
    %c0_i32_1 = arith.constant 0 : i32
    return %c0_i32, %c0_i32_0 : i32, i32
  }
  func.func @transform_14(%arg0: i32) -> (i32, i32) {
    %c0_i32 = arith.constant 0 : i32
    %c0_i32_0 = arith.constant 0 : i32
    %c0_i32_1 = arith.constant 0 : i32
    return %c0_i32, %c0_i32_0 : i32, i32
  }
  func.func @transform_15(%arg0: i32) -> (i32, i32) {
    %c0_i32 = arith.constant 0 : i32
    %c0_i32_0 = arith.constant 0 : i32
    %c0_i32_1 = arith.constant 0 : i32
    return %c0_i32, %c0_i32_0 : i32, i32
  }
  func.func @transform_16(%arg0: i32) -> (i32, i32) {
    %c0_i32 = arith.constant 0 : i32
    %c0_i32_0 = arith.constant 0 : i32
    %c0_i32_1 = arith.constant 0 : i32
    return %c0_i32, %c0_i32_0 : i32, i32
  }
  func.func @transform_17(%arg0: i32) -> (i32, i32) {
    %c0_i32 = arith.constant 0 : i32
    %c0_i32_0 = arith.constant 0 : i32
    %c0_i32_1 = arith.constant 0 : i32
    return %c0_i32, %c0_i32_0 : i32, i32
  }
  func.func @transform_18(%arg0: i32) -> (i32, i32) {
    %c0_i32 = arith.constant 0 : i32
    %c0_i32_0 = arith.constant 0 : i32
    %c0_i32_1 = arith.constant 0 : i32
    return %c0_i32, %c0_i32_0 : i32, i32
  }
  func.func @transform_19(%arg0: i32) -> (i32, i32) {
    %c0_i32 = arith.constant 0 : i32
    %c0_i32_0 = arith.constant 0 : i32
    %c0_i32_1 = arith.constant 0 : i32
    return %c0_i32, %c0_i32_0 : i32, i32
  }
  func.func @transform_20(%arg0: i32) -> (i32, i32) {
    %c0_i32 = arith.constant 0 : i32
    %c0_i32_0 = arith.constant 0 : i32
    %c0_i32_1 = arith.constant 0 : i32
    return %c0_i32, %c0_i32_0 : i32, i32
  }
  func.func @transform_21(%arg0: i32) -> (i32, i32) {
    %c0_i32 = arith.constant 0 : i32
    %c0_i32_0 = arith.constant 0 : i32
    %c0_i32_1 = arith.constant 0 : i32
    return %c0_i32, %c0_i32_0 : i32, i32
  }
  func.func @transform_22(%arg0: i32) -> (i32, i32, i32) {
    %c0_i32 = arith.constant 0 : i32
    %c0_i32_0 = arith.constant 0 : i32
    %c0_i32_1 = arith.constant 0 : i32
    return %arg0, %c0_i32, %c0_i32_0 : i32, i32, i32
  }
}

module attributes {stable_mosaic.version = 11 : i64} {
  func.func @_decoder_layer_kernel(%arg0: i32, %arg1: memref<1x8x128xf32, #tpu.memory_space<vmem>>, %arg2: memref<1x8x128xf32, #tpu.memory_space<vmem>>, %arg3: memref<1x128xf32, #tpu.memory_space<vmem>>, %arg4: memref<1x128xf32, #tpu.memory_space<vmem>>, %arg5: memref<128x384xbf16, #tpu.memory_space<vmem>>, %arg6: memref<1x384xf32, #tpu.memory_space<vmem>>, %arg7: memref<128x128xf32, #tpu.memory_space<vmem>>, %arg8: memref<1x128xf32, #tpu.memory_space<vmem>>, %arg9: memref<1x128xf32, #tpu.memory_space<vmem>>, %arg10: memref<1x128xf32, #tpu.memory_space<vmem>>, %arg11: memref<128x128xbf16, #tpu.memory_space<vmem>>, %arg12: memref<1x128xf32, #tpu.memory_space<vmem>>, %arg13: memref<128x256xbf16, #tpu.memory_space<vmem>>, %arg14: memref<1x256xf32, #tpu.memory_space<vmem>>, %arg15: memref<128x128xf32, #tpu.memory_space<vmem>>, %arg16: memref<1x128xf32, #tpu.memory_space<vmem>>, %arg17: memref<1x128xf32, #tpu.memory_space<vmem>>, %arg18: memref<1x128xf32, #tpu.memory_space<vmem>>, %arg19: memref<128x128xbf16, #tpu.memory_space<vmem>>, %arg20: memref<1x128xf32, #tpu.memory_space<vmem>>, %arg21: memref<128x128xbf16, #tpu.memory_space<vmem>>, %arg22: memref<1x128xf32, #tpu.memory_space<vmem>>, %arg23: memref<1x8x128xf32, #tpu.memory_space<vmem>>) attributes {dimension_semantics = [#tpu.dimension_semantics<parallel>], iteration_bounds = array<i64: 2>, scalar_prefetch = 0 : i64, scratch_operands = 0 : i64, tpu.core_type = #tpu.core_type<tc>, window_params = [{transform_indices = @transform_0, window_bounds = array<i64: 1, 8, 128>}, {transform_indices = @transform_1, window_bounds = array<i64: 1, 8, 128>}, {pipeline_mode = #tpu.pipeline_mode<synchronous>, transform_indices = @transform_2, window_bounds = array<i64: 1, 128>}, {pipeline_mode = #tpu.pipeline_mode<synchronous>, transform_indices = @transform_3, window_bounds = array<i64: 1, 128>}, {pipeline_mode = #tpu.pipeline_mode<synchronous>, transform_indices = @transform_4, window_bounds = array<i64: 128, 384>}, {pipeline_mode = #tpu.pipeline_mode<synchronous>, transform_indices = @transform_5, window_bounds = array<i64: 1, 384>}, {pipeline_mode = #tpu.pipeline_mode<synchronous>, transform_indices = @transform_6, window_bounds = array<i64: 128, 128>}, {pipeline_mode = #tpu.pipeline_mode<synchronous>, transform_indices = @transform_7, window_bounds = array<i64: 1, 128>}, {pipeline_mode = #tpu.pipeline_mode<synchronous>, transform_indices = @transform_8, window_bounds = array<i64: 1, 128>}, {pipeline_mode = #tpu.pipeline_mode<synchronous>, transform_indices = @transform_9, window_bounds = array<i64: 1, 128>}, {pipeline_mode = #tpu.pipeline_mode<synchronous>, transform_indices = @transform_10, window_bounds = array<i64: 128, 128>}, {pipeline_mode = #tpu.pipeline_mode<synchronous>, transform_indices = @transform_11, window_bounds = array<i64: 1, 128>}, {pipeline_mode = #tpu.pipeline_mode<synchronous>, transform_indices = @transform_12, window_bounds = array<i64: 128, 256>}, {pipeline_mode = #tpu.pipeline_mode<synchronous>, transform_indices = @transform_13, window_bounds = array<i64: 1, 256>}, {pipeline_mode = #tpu.pipeline_mode<synchronous>, transform_indices = @transform_14, window_bounds = array<i64: 128, 128>}, {pipeline_mode = #tpu.pipeline_mode<synchronous>, transform_indices = @transform_15, window_bounds = array<i64: 1, 128>}, {pipeline_mode = #tpu.pipeline_mode<synchronous>, transform_indices = @transform_16, window_bounds = array<i64: 1, 128>}, {pipeline_mode = #tpu.pipeline_mode<synchronous>, transform_indices = @transform_17, window_bounds = array<i64: 1, 128>}, {pipeline_mode = #tpu.pipeline_mode<synchronous>, transform_indices = @transform_18, window_bounds = array<i64: 128, 128>}, {pipeline_mode = #tpu.pipeline_mode<synchronous>, transform_indices = @transform_19, window_bounds = array<i64: 1, 128>}, {pipeline_mode = #tpu.pipeline_mode<synchronous>, transform_indices = @transform_20, window_bounds = array<i64: 128, 128>}, {pipeline_mode = #tpu.pipeline_mode<synchronous>, transform_indices = @transform_21, window_bounds = array<i64: 1, 128>}, {transform_indices = @transform_22, window_bounds = array<i64: 1, 8, 128>}]} {
    %c0 = arith.constant 0 : index
    %c0_0 = arith.constant 0 : index
    %c0_1 = arith.constant 0 : index
    %0 = vector.load %arg1[%c0, %c0_0, %c0_1] : memref<1x8x128xf32, #tpu.memory_space<vmem>>, vector<1x8x128xf32>
    %1 = vector.shape_cast %0 : vector<1x8x128xf32> to vector<8x128xf32>
    %c0_2 = arith.constant 0 : index
    %c0_3 = arith.constant 0 : index
    %c0_4 = arith.constant 0 : index
    %2 = vector.load %arg2[%c0_2, %c0_3, %c0_4] : memref<1x8x128xf32, #tpu.memory_space<vmem>>, vector<1x8x128xf32>
    %3 = vector.shape_cast %2 : vector<1x8x128xf32> to vector<8x128xf32>
    %c0_5 = arith.constant 0 : index
    %c0_6 = arith.constant 0 : index
    %4 = vector.load %arg3[%c0_5, %c0_6] : memref<1x128xf32, #tpu.memory_space<vmem>>, vector<1x128xf32>
    %c0_7 = arith.constant 0 : index
    %c0_8 = arith.constant 0 : index
    %5 = vector.load %arg4[%c0_7, %c0_8] : memref<1x128xf32, #tpu.memory_space<vmem>>, vector<1x128xf32>
    %cst = arith.constant dense<0.000000e+00> : vector<8xf32>
    %6 = vector.multi_reduction <add>, %1, %cst [1] : vector<8x128xf32> to vector<8xf32>
    %7 = vector.shape_cast %6 : vector<8xf32> to vector<8x1xf32>
    %cst_9 = arith.constant 3.125000e-02 : f32
    %8 = vector.broadcast %cst_9 : f32 to vector<8x1xf32>
    %9 = arith.mulf %7, %8 : vector<8x1xf32>
    %10 = arith.mulf %1, %1 : vector<8x128xf32>
    %cst_10 = arith.constant dense<0.000000e+00> : vector<8xf32>
    %11 = vector.multi_reduction <add>, %10, %cst_10 [1] : vector<8x128xf32> to vector<8xf32>
    %12 = vector.shape_cast %11 : vector<8xf32> to vector<8x1xf32>
    %cst_11 = arith.constant 3.125000e-02 : f32
    %13 = vector.broadcast %cst_11 : f32 to vector<8x1xf32>
    %14 = arith.mulf %12, %13 : vector<8x1xf32>
    %15 = arith.mulf %9, %9 : vector<8x1xf32>
    %16 = arith.subf %14, %15 : vector<8x1xf32>
    %17 = vector.broadcast %9 : vector<8x1xf32> to vector<8x128xf32>
    %18 = arith.subf %1, %17 : vector<8x128xf32>
    %cst_12 = arith.constant 9.99999974E-6 : f32
    %19 = vector.broadcast %cst_12 : f32 to vector<8x1xf32>
    %20 = arith.addf %16, %19 : vector<8x1xf32>
    %21 = math.rsqrt %20 : vector<8x1xf32>
    %22 = vector.broadcast %21 : vector<8x1xf32> to vector<8x128xf32>
    %23 = arith.mulf %18, %22 : vector<8x128xf32>
    %24 = vector.broadcast %4 : vector<1x128xf32> to vector<8x128xf32>
    %25 = arith.mulf %23, %24 : vector<8x128xf32>
    %26 = vector.broadcast %5 : vector<1x128xf32> to vector<8x128xf32>
    %27 = arith.addf %25, %26 : vector<8x128xf32>
    %28 = arith.truncf %27 : vector<8x128xf32> to vector<8x128xbf16>
    %c0_13 = arith.constant 0 : index
    %c0_14 = arith.constant 0 : index
    %29 = vector.load %arg5[%c0_13, %c0_14] : memref<128x384xbf16, #tpu.memory_space<vmem>>, vector<128x384xbf16>
    %cst_15 = arith.constant dense<0.000000e+00> : vector<8x384xf32>
    %30 = tpu.matmul %28, %29, %cst_15 {dimension_numbers = #tpu.dot_dimension_numbers<[1], [0], [0], [1], [0, 0, 1, 1], [], []>} : vector<8x128xbf16>, vector<128x384xbf16>, vector<8x384xf32> -> vector<8x384xf32>
    %c0_16 = arith.constant 0 : index
    %c0_17 = arith.constant 0 : index
    %31 = vector.load %arg6[%c0_16, %c0_17] : memref<1x384xf32, #tpu.memory_space<vmem>>, vector<1x384xf32>
    %32 = vector.broadcast %31 : vector<1x384xf32> to vector<8x384xf32>
    %33 = arith.addf %30, %32 : vector<8x384xf32>
    %34 = vector.extract_strided_slice %33 {offsets = [0, 0], sizes = [8, 128], strides = [1, 1]} : vector<8x384xf32> to vector<8x128xf32>
    %35 = vector.extract_strided_slice %33 {offsets = [0, 128], sizes = [8, 128], strides = [1, 1]} : vector<8x384xf32> to vector<8x128xf32>
    %36 = vector.extract_strided_slice %33 {offsets = [0, 256], sizes = [8, 128], strides = [1, 1]} : vector<8x384xf32> to vector<8x128xf32>
    %c0_18 = arith.constant 0 : index
    %c0_19 = arith.constant 0 : index
    %37 = vector.load %arg7[%c0_18, %c0_19] : memref<128x128xf32, #tpu.memory_space<vmem>>, vector<128x128xf32>
    %38 = vector.extract_strided_slice %34 {offsets = [0, 0], sizes = [8, 8], strides = [1, 1]} : vector<8x128xf32> to vector<8x8xf32>
    %39 = arith.truncf %38 : vector<8x8xf32> to vector<8x8xbf16>
    %40 = vector.extract_strided_slice %35 {offsets = [0, 0], sizes = [8, 8], strides = [1, 1]} : vector<8x128xf32> to vector<8x8xf32>
    %41 = arith.truncf %40 : vector<8x8xf32> to vector<8x8xbf16>
    %42 = vector.extract_strided_slice %36 {offsets = [0, 0], sizes = [8, 8], strides = [1, 1]} : vector<8x128xf32> to vector<8x8xf32>
    %43 = arith.truncf %42 : vector<8x8xf32> to vector<8x8xbf16>
    %cst_20 = arith.constant dense<0.000000e+00> : vector<8x8xf32>
    %44 = tpu.matmul %39, %41, %cst_20 {dimension_numbers = #tpu.dot_dimension_numbers<[1], [1], [0], [0], [0, 0, 1, 0], [], []>} : vector<8x8xbf16>, vector<8x8xbf16>, vector<8x8xf32> -> vector<8x8xf32>
    %cst_21 = arith.constant 0.353553385 : f32
    %45 = vector.broadcast %cst_21 : f32 to vector<8x8xf32>
    %46 = arith.mulf %44, %45 : vector<8x8xf32>
    %cst_22 = arith.constant dense<0xFF800000> : vector<8xf32>
    %47 = vector.multi_reduction <maximumf>, %46, %cst_22 [1] : vector<8x8xf32> to vector<8xf32>
    %48 = vector.shape_cast %47 : vector<8xf32> to vector<8x1xf32>
    %49 = vector.broadcast %48 : vector<8x1xf32> to vector<8x8xf32>
    %50 = arith.subf %46, %49 : vector<8x8xf32>
    %51 = math.exp %50 : vector<8x8xf32>
    %cst_23 = arith.constant dense<0.000000e+00> : vector<8xf32>
    %52 = vector.multi_reduction <add>, %51, %cst_23 [1] : vector<8x8xf32> to vector<8xf32>
    %53 = vector.shape_cast %52 : vector<8xf32> to vector<8x1xf32>
    %54 = tpu.reciprocal %53 {approx = true} : vector<8x1xf32> -> vector<8x1xf32>
    %55 = vector.broadcast %54 : vector<8x1xf32> to vector<8x8xf32>
    %56 = arith.mulf %51, %55 : vector<8x8xf32>
    %57 = arith.truncf %56 : vector<8x8xf32> to vector<8x8xbf16>
    %cst_24 = arith.constant dense<0.000000e+00> : vector<8x8xf32>
    %58 = tpu.matmul %57, %43, %cst_24 {dimension_numbers = #tpu.dot_dimension_numbers<[1], [0], [0], [1], [0, 0, 1, 1], [], []>} : vector<8x8xbf16>, vector<8x8xbf16>, vector<8x8xf32> -> vector<8x8xf32>
    %59 = arith.truncf %58 : vector<8x8xf32> to vector<8x8xbf16>
    %60 = vector.extract_strided_slice %37 {offsets = [0, 0], sizes = [8, 128], strides = [1, 1]} : vector<128x128xf32> to vector<8x128xf32>
    %61 = arith.truncf %60 : vector<8x128xf32> to vector<8x128xbf16>
    %cst_25 = arith.constant dense<0.000000e+00> : vector<8x128xf32>
    %62 = tpu.matmul %59, %61, %cst_25 {dimension_numbers = #tpu.dot_dimension_numbers<[1], [0], [0], [1], [0, 0, 1, 1], [], []>} : vector<8x8xbf16>, vector<8x128xbf16>, vector<8x128xf32> -> vector<8x128xf32>
    %63 = vector.extract_strided_slice %34 {offsets = [0, 8], sizes = [8, 8], strides = [1, 1]} : vector<8x128xf32> to vector<8x8xf32>
    %64 = arith.truncf %63 : vector<8x8xf32> to vector<8x8xbf16>
    %65 = vector.extract_strided_slice %35 {offsets = [0, 8], sizes = [8, 8], strides = [1, 1]} : vector<8x128xf32> to vector<8x8xf32>
    %66 = arith.truncf %65 : vector<8x8xf32> to vector<8x8xbf16>
    %67 = vector.extract_strided_slice %36 {offsets = [0, 8], sizes = [8, 8], strides = [1, 1]} : vector<8x128xf32> to vector<8x8xf32>
    %68 = arith.truncf %67 : vector<8x8xf32> to vector<8x8xbf16>
    %cst_26 = arith.constant dense<0.000000e+00> : vector<8x8xf32>
    %69 = tpu.matmul %64, %66, %cst_26 {dimension_numbers = #tpu.dot_dimension_numbers<[1], [1], [0], [0], [0, 0, 1, 0], [], []>} : vector<8x8xbf16>, vector<8x8xbf16>, vector<8x8xf32> -> vector<8x8xf32>
    %cst_27 = arith.constant 0.353553385 : f32
    %70 = vector.broadcast %cst_27 : f32 to vector<8x8xf32>
    %71 = arith.mulf %69, %70 : vector<8x8xf32>
    %cst_28 = arith.constant dense<0xFF800000> : vector<8xf32>
    %72 = vector.multi_reduction <maximumf>, %71, %cst_28 [1] : vector<8x8xf32> to vector<8xf32>
    %73 = vector.shape_cast %72 : vector<8xf32> to vector<8x1xf32>
    %74 = vector.broadcast %73 : vector<8x1xf32> to vector<8x8xf32>
    %75 = arith.subf %71, %74 : vector<8x8xf32>
    %76 = math.exp %75 : vector<8x8xf32>
    %cst_29 = arith.constant dense<0.000000e+00> : vector<8xf32>
    %77 = vector.multi_reduction <add>, %76, %cst_29 [1] : vector<8x8xf32> to vector<8xf32>
    %78 = vector.shape_cast %77 : vector<8xf32> to vector<8x1xf32>
    %79 = tpu.reciprocal %78 {approx = true} : vector<8x1xf32> -> vector<8x1xf32>
    %80 = vector.broadcast %79 : vector<8x1xf32> to vector<8x8xf32>
    %81 = arith.mulf %76, %80 : vector<8x8xf32>
    %82 = arith.truncf %81 : vector<8x8xf32> to vector<8x8xbf16>
    %cst_30 = arith.constant dense<0.000000e+00> : vector<8x8xf32>
    %83 = tpu.matmul %82, %68, %cst_30 {dimension_numbers = #tpu.dot_dimension_numbers<[1], [0], [0], [1], [0, 0, 1, 1], [], []>} : vector<8x8xbf16>, vector<8x8xbf16>, vector<8x8xf32> -> vector<8x8xf32>
    %84 = arith.truncf %83 : vector<8x8xf32> to vector<8x8xbf16>
    %85 = vector.extract_strided_slice %37 {offsets = [8, 0], sizes = [8, 128], strides = [1, 1]} : vector<128x128xf32> to vector<8x128xf32>
    %86 = arith.truncf %85 : vector<8x128xf32> to vector<8x128xbf16>
    %cst_31 = arith.constant dense<0.000000e+00> : vector<8x128xf32>
    %87 = tpu.matmul %84, %86, %cst_31 {dimension_numbers = #tpu.dot_dimension_numbers<[1], [0], [0], [1], [0, 0, 1, 1], [], []>} : vector<8x8xbf16>, vector<8x128xbf16>, vector<8x128xf32> -> vector<8x128xf32>
    %88 = arith.addf %62, %87 : vector<8x128xf32>
    %89 = vector.extract_strided_slice %34 {offsets = [0, 16], sizes = [8, 8], strides = [1, 1]} : vector<8x128xf32> to vector<8x8xf32>
    %90 = arith.truncf %89 : vector<8x8xf32> to vector<8x8xbf16>
    %91 = vector.extract_strided_slice %35 {offsets = [0, 16], sizes = [8, 8], strides = [1, 1]} : vector<8x128xf32> to vector<8x8xf32>
    %92 = arith.truncf %91 : vector<8x8xf32> to vector<8x8xbf16>
    %93 = vector.extract_strided_slice %36 {offsets = [0, 16], sizes = [8, 8], strides = [1, 1]} : vector<8x128xf32> to vector<8x8xf32>
    %94 = arith.truncf %93 : vector<8x8xf32> to vector<8x8xbf16>
    %cst_32 = arith.constant dense<0.000000e+00> : vector<8x8xf32>
    %95 = tpu.matmul %90, %92, %cst_32 {dimension_numbers = #tpu.dot_dimension_numbers<[1], [1], [0], [0], [0, 0, 1, 0], [], []>} : vector<8x8xbf16>, vector<8x8xbf16>, vector<8x8xf32> -> vector<8x8xf32>
    %cst_33 = arith.constant 0.353553385 : f32
    %96 = vector.broadcast %cst_33 : f32 to vector<8x8xf32>
    %97 = arith.mulf %95, %96 : vector<8x8xf32>
    %cst_34 = arith.constant dense<0xFF800000> : vector<8xf32>
    %98 = vector.multi_reduction <maximumf>, %97, %cst_34 [1] : vector<8x8xf32> to vector<8xf32>
    %99 = vector.shape_cast %98 : vector<8xf32> to vector<8x1xf32>
    %100 = vector.broadcast %99 : vector<8x1xf32> to vector<8x8xf32>
    %101 = arith.subf %97, %100 : vector<8x8xf32>
    %102 = math.exp %101 : vector<8x8xf32>
    %cst_35 = arith.constant dense<0.000000e+00> : vector<8xf32>
    %103 = vector.multi_reduction <add>, %102, %cst_35 [1] : vector<8x8xf32> to vector<8xf32>
    %104 = vector.shape_cast %103 : vector<8xf32> to vector<8x1xf32>
    %105 = tpu.reciprocal %104 {approx = true} : vector<8x1xf32> -> vector<8x1xf32>
    %106 = vector.broadcast %105 : vector<8x1xf32> to vector<8x8xf32>
    %107 = arith.mulf %102, %106 : vector<8x8xf32>
    %108 = arith.truncf %107 : vector<8x8xf32> to vector<8x8xbf16>
    %cst_36 = arith.constant dense<0.000000e+00> : vector<8x8xf32>
    %109 = tpu.matmul %108, %94, %cst_36 {dimension_numbers = #tpu.dot_dimension_numbers<[1], [0], [0], [1], [0, 0, 1, 1], [], []>} : vector<8x8xbf16>, vector<8x8xbf16>, vector<8x8xf32> -> vector<8x8xf32>
    %110 = arith.truncf %109 : vector<8x8xf32> to vector<8x8xbf16>
    %111 = vector.extract_strided_slice %37 {offsets = [16, 0], sizes = [8, 128], strides = [1, 1]} : vector<128x128xf32> to vector<8x128xf32>
    %112 = arith.truncf %111 : vector<8x128xf32> to vector<8x128xbf16>
    %cst_37 = arith.constant dense<0.000000e+00> : vector<8x128xf32>
    %113 = tpu.matmul %110, %112, %cst_37 {dimension_numbers = #tpu.dot_dimension_numbers<[1], [0], [0], [1], [0, 0, 1, 1], [], []>} : vector<8x8xbf16>, vector<8x128xbf16>, vector<8x128xf32> -> vector<8x128xf32>
    %114 = arith.addf %88, %113 : vector<8x128xf32>
    %115 = vector.extract_strided_slice %34 {offsets = [0, 24], sizes = [8, 8], strides = [1, 1]} : vector<8x128xf32> to vector<8x8xf32>
    %116 = arith.truncf %115 : vector<8x8xf32> to vector<8x8xbf16>
    %117 = vector.extract_strided_slice %35 {offsets = [0, 24], sizes = [8, 8], strides = [1, 1]} : vector<8x128xf32> to vector<8x8xf32>
    %118 = arith.truncf %117 : vector<8x8xf32> to vector<8x8xbf16>
    %119 = vector.extract_strided_slice %36 {offsets = [0, 24], sizes = [8, 8], strides = [1, 1]} : vector<8x128xf32> to vector<8x8xf32>
    %120 = arith.truncf %119 : vector<8x8xf32> to vector<8x8xbf16>
    %cst_38 = arith.constant dense<0.000000e+00> : vector<8x8xf32>
    %121 = tpu.matmul %116, %118, %cst_38 {dimension_numbers = #tpu.dot_dimension_numbers<[1], [1], [0], [0], [0, 0, 1, 0], [], []>} : vector<8x8xbf16>, vector<8x8xbf16>, vector<8x8xf32> -> vector<8x8xf32>
    %cst_39 = arith.constant 0.353553385 : f32
    %122 = vector.broadcast %cst_39 : f32 to vector<8x8xf32>
    %123 = arith.mulf %121, %122 : vector<8x8xf32>
    %cst_40 = arith.constant dense<0xFF800000> : vector<8xf32>
    %124 = vector.multi_reduction <maximumf>, %123, %cst_40 [1] : vector<8x8xf32> to vector<8xf32>
    %125 = vector.shape_cast %124 : vector<8xf32> to vector<8x1xf32>
    %126 = vector.broadcast %125 : vector<8x1xf32> to vector<8x8xf32>
    %127 = arith.subf %123, %126 : vector<8x8xf32>
    %128 = math.exp %127 : vector<8x8xf32>
    %cst_41 = arith.constant dense<0.000000e+00> : vector<8xf32>
    %129 = vector.multi_reduction <add>, %128, %cst_41 [1] : vector<8x8xf32> to vector<8xf32>
    %130 = vector.shape_cast %129 : vector<8xf32> to vector<8x1xf32>
    %131 = tpu.reciprocal %130 {approx = true} : vector<8x1xf32> -> vector<8x1xf32>
    %132 = vector.broadcast %131 : vector<8x1xf32> to vector<8x8xf32>
    %133 = arith.mulf %128, %132 : vector<8x8xf32>
    %134 = arith.truncf %133 : vector<8x8xf32> to vector<8x8xbf16>
    %cst_42 = arith.constant dense<0.000000e+00> : vector<8x8xf32>
    %135 = tpu.matmul %134, %120, %cst_42 {dimension_numbers = #tpu.dot_dimension_numbers<[1], [0], [0], [1], [0, 0, 1, 1], [], []>} : vector<8x8xbf16>, vector<8x8xbf16>, vector<8x8xf32> -> vector<8x8xf32>
    %136 = arith.truncf %135 : vector<8x8xf32> to vector<8x8xbf16>
    %137 = vector.extract_strided_slice %37 {offsets = [24, 0], sizes = [8, 128], strides = [1, 1]} : vector<128x128xf32> to vector<8x128xf32>
    %138 = arith.truncf %137 : vector<8x128xf32> to vector<8x128xbf16>
    %cst_43 = arith.constant dense<0.000000e+00> : vector<8x128xf32>
    %139 = tpu.matmul %136, %138, %cst_43 {dimension_numbers = #tpu.dot_dimension_numbers<[1], [0], [0], [1], [0, 0, 1, 1], [], []>} : vector<8x8xbf16>, vector<8x128xbf16>, vector<8x128xf32> -> vector<8x128xf32>
    %140 = arith.addf %114, %139 : vector<8x128xf32>
    %141 = arith.addf %1, %140 : vector<8x128xf32>
    %c0_44 = arith.constant 0 : index
    %c0_45 = arith.constant 0 : index
    %142 = vector.load %arg8[%c0_44, %c0_45] : memref<1x128xf32, #tpu.memory_space<vmem>>, vector<1x128xf32>
    %143 = vector.broadcast %142 : vector<1x128xf32> to vector<8x128xf32>
    %144 = arith.addf %141, %143 : vector<8x128xf32>
    %c0_46 = arith.constant 0 : index
    %c0_47 = arith.constant 0 : index
    %145 = vector.load %arg9[%c0_46, %c0_47] : memref<1x128xf32, #tpu.memory_space<vmem>>, vector<1x128xf32>
    %c0_48 = arith.constant 0 : index
    %c0_49 = arith.constant 0 : index
    %146 = vector.load %arg10[%c0_48, %c0_49] : memref<1x128xf32, #tpu.memory_space<vmem>>, vector<1x128xf32>
    %cst_50 = arith.constant dense<0.000000e+00> : vector<8xf32>
    %147 = vector.multi_reduction <add>, %144, %cst_50 [1] : vector<8x128xf32> to vector<8xf32>
    %148 = vector.shape_cast %147 : vector<8xf32> to vector<8x1xf32>
    %cst_51 = arith.constant 3.125000e-02 : f32
    %149 = vector.broadcast %cst_51 : f32 to vector<8x1xf32>
    %150 = arith.mulf %148, %149 : vector<8x1xf32>
    %151 = arith.mulf %144, %144 : vector<8x128xf32>
    %cst_52 = arith.constant dense<0.000000e+00> : vector<8xf32>
    %152 = vector.multi_reduction <add>, %151, %cst_52 [1] : vector<8x128xf32> to vector<8xf32>
    %153 = vector.shape_cast %152 : vector<8xf32> to vector<8x1xf32>
    %cst_53 = arith.constant 3.125000e-02 : f32
    %154 = vector.broadcast %cst_53 : f32 to vector<8x1xf32>
    %155 = arith.mulf %153, %154 : vector<8x1xf32>
    %156 = arith.mulf %150, %150 : vector<8x1xf32>
    %157 = arith.subf %155, %156 : vector<8x1xf32>
    %158 = vector.broadcast %150 : vector<8x1xf32> to vector<8x128xf32>
    %159 = arith.subf %144, %158 : vector<8x128xf32>
    %cst_54 = arith.constant 9.99999974E-6 : f32
    %160 = vector.broadcast %cst_54 : f32 to vector<8x1xf32>
    %161 = arith.addf %157, %160 : vector<8x1xf32>
    %162 = math.rsqrt %161 : vector<8x1xf32>
    %163 = vector.broadcast %162 : vector<8x1xf32> to vector<8x128xf32>
    %164 = arith.mulf %159, %163 : vector<8x128xf32>
    %165 = vector.broadcast %145 : vector<1x128xf32> to vector<8x128xf32>
    %166 = arith.mulf %164, %165 : vector<8x128xf32>
    %167 = vector.broadcast %146 : vector<1x128xf32> to vector<8x128xf32>
    %168 = arith.addf %166, %167 : vector<8x128xf32>
    %169 = arith.truncf %168 : vector<8x128xf32> to vector<8x128xbf16>
    %c0_55 = arith.constant 0 : index
    %c0_56 = arith.constant 0 : index
    %170 = vector.load %arg11[%c0_55, %c0_56] : memref<128x128xbf16, #tpu.memory_space<vmem>>, vector<128x128xbf16>
    %cst_57 = arith.constant dense<0.000000e+00> : vector<8x128xf32>
    %171 = tpu.matmul %169, %170, %cst_57 {dimension_numbers = #tpu.dot_dimension_numbers<[1], [0], [0], [1], [0, 0, 1, 1], [], []>} : vector<8x128xbf16>, vector<128x128xbf16>, vector<8x128xf32> -> vector<8x128xf32>
    %c0_58 = arith.constant 0 : index
    %c0_59 = arith.constant 0 : index
    %172 = vector.load %arg12[%c0_58, %c0_59] : memref<1x128xf32, #tpu.memory_space<vmem>>, vector<1x128xf32>
    %173 = vector.broadcast %172 : vector<1x128xf32> to vector<8x128xf32>
    %174 = arith.addf %171, %173 : vector<8x128xf32>
    %175 = arith.truncf %3 : vector<8x128xf32> to vector<8x128xbf16>
    %c0_60 = arith.constant 0 : index
    %c0_61 = arith.constant 0 : index
    %176 = vector.load %arg13[%c0_60, %c0_61] : memref<128x256xbf16, #tpu.memory_space<vmem>>, vector<128x256xbf16>
    %cst_62 = arith.constant dense<0.000000e+00> : vector<8x256xf32>
    %177 = tpu.matmul %175, %176, %cst_62 {dimension_numbers = #tpu.dot_dimension_numbers<[1], [0], [0], [1], [0, 0, 1, 1], [], []>} : vector<8x128xbf16>, vector<128x256xbf16>, vector<8x256xf32> -> vector<8x256xf32>
    %c0_63 = arith.constant 0 : index
    %c0_64 = arith.constant 0 : index
    %178 = vector.load %arg14[%c0_63, %c0_64] : memref<1x256xf32, #tpu.memory_space<vmem>>, vector<1x256xf32>
    %179 = vector.broadcast %178 : vector<1x256xf32> to vector<8x256xf32>
    %180 = arith.addf %177, %179 : vector<8x256xf32>
    %181 = vector.extract_strided_slice %180 {offsets = [0, 0], sizes = [8, 128], strides = [1, 1]} : vector<8x256xf32> to vector<8x128xf32>
    %182 = vector.extract_strided_slice %180 {offsets = [0, 128], sizes = [8, 128], strides = [1, 1]} : vector<8x256xf32> to vector<8x128xf32>
    %c0_65 = arith.constant 0 : index
    %c0_66 = arith.constant 0 : index
    %183 = vector.load %arg15[%c0_65, %c0_66] : memref<128x128xf32, #tpu.memory_space<vmem>>, vector<128x128xf32>
    %184 = vector.extract_strided_slice %174 {offsets = [0, 0], sizes = [8, 8], strides = [1, 1]} : vector<8x128xf32> to vector<8x8xf32>
    %185 = arith.truncf %184 : vector<8x8xf32> to vector<8x8xbf16>
    %186 = vector.extract_strided_slice %181 {offsets = [0, 0], sizes = [8, 8], strides = [1, 1]} : vector<8x128xf32> to vector<8x8xf32>
    %187 = arith.truncf %186 : vector<8x8xf32> to vector<8x8xbf16>
    %188 = vector.extract_strided_slice %182 {offsets = [0, 0], sizes = [8, 8], strides = [1, 1]} : vector<8x128xf32> to vector<8x8xf32>
    %189 = arith.truncf %188 : vector<8x8xf32> to vector<8x8xbf16>
    %cst_67 = arith.constant dense<0.000000e+00> : vector<8x8xf32>
    %190 = tpu.matmul %185, %187, %cst_67 {dimension_numbers = #tpu.dot_dimension_numbers<[1], [1], [0], [0], [0, 0, 1, 0], [], []>} : vector<8x8xbf16>, vector<8x8xbf16>, vector<8x8xf32> -> vector<8x8xf32>
    %cst_68 = arith.constant 0.353553385 : f32
    %191 = vector.broadcast %cst_68 : f32 to vector<8x8xf32>
    %192 = arith.mulf %190, %191 : vector<8x8xf32>
    %cst_69 = arith.constant dense<0xFF800000> : vector<8xf32>
    %193 = vector.multi_reduction <maximumf>, %192, %cst_69 [1] : vector<8x8xf32> to vector<8xf32>
    %194 = vector.shape_cast %193 : vector<8xf32> to vector<8x1xf32>
    %195 = vector.broadcast %194 : vector<8x1xf32> to vector<8x8xf32>
    %196 = arith.subf %192, %195 : vector<8x8xf32>
    %197 = math.exp %196 : vector<8x8xf32>
    %cst_70 = arith.constant dense<0.000000e+00> : vector<8xf32>
    %198 = vector.multi_reduction <add>, %197, %cst_70 [1] : vector<8x8xf32> to vector<8xf32>
    %199 = vector.shape_cast %198 : vector<8xf32> to vector<8x1xf32>
    %200 = tpu.reciprocal %199 {approx = true} : vector<8x1xf32> -> vector<8x1xf32>
    %201 = vector.broadcast %200 : vector<8x1xf32> to vector<8x8xf32>
    %202 = arith.mulf %197, %201 : vector<8x8xf32>
    %203 = arith.truncf %202 : vector<8x8xf32> to vector<8x8xbf16>
    %cst_71 = arith.constant dense<0.000000e+00> : vector<8x8xf32>
    %204 = tpu.matmul %203, %189, %cst_71 {dimension_numbers = #tpu.dot_dimension_numbers<[1], [0], [0], [1], [0, 0, 1, 1], [], []>} : vector<8x8xbf16>, vector<8x8xbf16>, vector<8x8xf32> -> vector<8x8xf32>
    %205 = arith.truncf %204 : vector<8x8xf32> to vector<8x8xbf16>
    %206 = vector.extract_strided_slice %183 {offsets = [0, 0], sizes = [8, 128], strides = [1, 1]} : vector<128x128xf32> to vector<8x128xf32>
    %207 = arith.truncf %206 : vector<8x128xf32> to vector<8x128xbf16>
    %cst_72 = arith.constant dense<0.000000e+00> : vector<8x128xf32>
    %208 = tpu.matmul %205, %207, %cst_72 {dimension_numbers = #tpu.dot_dimension_numbers<[1], [0], [0], [1], [0, 0, 1, 1], [], []>} : vector<8x8xbf16>, vector<8x128xbf16>, vector<8x128xf32> -> vector<8x128xf32>
    %209 = vector.extract_strided_slice %174 {offsets = [0, 8], sizes = [8, 8], strides = [1, 1]} : vector<8x128xf32> to vector<8x8xf32>
    %210 = arith.truncf %209 : vector<8x8xf32> to vector<8x8xbf16>
    %211 = vector.extract_strided_slice %181 {offsets = [0, 8], sizes = [8, 8], strides = [1, 1]} : vector<8x128xf32> to vector<8x8xf32>
    %212 = arith.truncf %211 : vector<8x8xf32> to vector<8x8xbf16>
    %213 = vector.extract_strided_slice %182 {offsets = [0, 8], sizes = [8, 8], strides = [1, 1]} : vector<8x128xf32> to vector<8x8xf32>
    %214 = arith.truncf %213 : vector<8x8xf32> to vector<8x8xbf16>
    %cst_73 = arith.constant dense<0.000000e+00> : vector<8x8xf32>
    %215 = tpu.matmul %210, %212, %cst_73 {dimension_numbers = #tpu.dot_dimension_numbers<[1], [1], [0], [0], [0, 0, 1, 0], [], []>} : vector<8x8xbf16>, vector<8x8xbf16>, vector<8x8xf32> -> vector<8x8xf32>
    %cst_74 = arith.constant 0.353553385 : f32
    %216 = vector.broadcast %cst_74 : f32 to vector<8x8xf32>
    %217 = arith.mulf %215, %216 : vector<8x8xf32>
    %cst_75 = arith.constant dense<0xFF800000> : vector<8xf32>
    %218 = vector.multi_reduction <maximumf>, %217, %cst_75 [1] : vector<8x8xf32> to vector<8xf32>
    %219 = vector.shape_cast %218 : vector<8xf32> to vector<8x1xf32>
    %220 = vector.broadcast %219 : vector<8x1xf32> to vector<8x8xf32>
    %221 = arith.subf %217, %220 : vector<8x8xf32>
    %222 = math.exp %221 : vector<8x8xf32>
    %cst_76 = arith.constant dense<0.000000e+00> : vector<8xf32>
    %223 = vector.multi_reduction <add>, %222, %cst_76 [1] : vector<8x8xf32> to vector<8xf32>
    %224 = vector.shape_cast %223 : vector<8xf32> to vector<8x1xf32>
    %225 = tpu.reciprocal %224 {approx = true} : vector<8x1xf32> -> vector<8x1xf32>
    %226 = vector.broadcast %225 : vector<8x1xf32> to vector<8x8xf32>
    %227 = arith.mulf %222, %226 : vector<8x8xf32>
    %228 = arith.truncf %227 : vector<8x8xf32> to vector<8x8xbf16>
    %cst_77 = arith.constant dense<0.000000e+00> : vector<8x8xf32>
    %229 = tpu.matmul %228, %214, %cst_77 {dimension_numbers = #tpu.dot_dimension_numbers<[1], [0], [0], [1], [0, 0, 1, 1], [], []>} : vector<8x8xbf16>, vector<8x8xbf16>, vector<8x8xf32> -> vector<8x8xf32>
    %230 = arith.truncf %229 : vector<8x8xf32> to vector<8x8xbf16>
    %231 = vector.extract_strided_slice %183 {offsets = [8, 0], sizes = [8, 128], strides = [1, 1]} : vector<128x128xf32> to vector<8x128xf32>
    %232 = arith.truncf %231 : vector<8x128xf32> to vector<8x128xbf16>
    %cst_78 = arith.constant dense<0.000000e+00> : vector<8x128xf32>
    %233 = tpu.matmul %230, %232, %cst_78 {dimension_numbers = #tpu.dot_dimension_numbers<[1], [0], [0], [1], [0, 0, 1, 1], [], []>} : vector<8x8xbf16>, vector<8x128xbf16>, vector<8x128xf32> -> vector<8x128xf32>
    %234 = arith.addf %208, %233 : vector<8x128xf32>
    %235 = vector.extract_strided_slice %174 {offsets = [0, 16], sizes = [8, 8], strides = [1, 1]} : vector<8x128xf32> to vector<8x8xf32>
    %236 = arith.truncf %235 : vector<8x8xf32> to vector<8x8xbf16>
    %237 = vector.extract_strided_slice %181 {offsets = [0, 16], sizes = [8, 8], strides = [1, 1]} : vector<8x128xf32> to vector<8x8xf32>
    %238 = arith.truncf %237 : vector<8x8xf32> to vector<8x8xbf16>
    %239 = vector.extract_strided_slice %182 {offsets = [0, 16], sizes = [8, 8], strides = [1, 1]} : vector<8x128xf32> to vector<8x8xf32>
    %240 = arith.truncf %239 : vector<8x8xf32> to vector<8x8xbf16>
    %cst_79 = arith.constant dense<0.000000e+00> : vector<8x8xf32>
    %241 = tpu.matmul %236, %238, %cst_79 {dimension_numbers = #tpu.dot_dimension_numbers<[1], [1], [0], [0], [0, 0, 1, 0], [], []>} : vector<8x8xbf16>, vector<8x8xbf16>, vector<8x8xf32> -> vector<8x8xf32>
    %cst_80 = arith.constant 0.353553385 : f32
    %242 = vector.broadcast %cst_80 : f32 to vector<8x8xf32>
    %243 = arith.mulf %241, %242 : vector<8x8xf32>
    %cst_81 = arith.constant dense<0xFF800000> : vector<8xf32>
    %244 = vector.multi_reduction <maximumf>, %243, %cst_81 [1] : vector<8x8xf32> to vector<8xf32>
    %245 = vector.shape_cast %244 : vector<8xf32> to vector<8x1xf32>
    %246 = vector.broadcast %245 : vector<8x1xf32> to vector<8x8xf32>
    %247 = arith.subf %243, %246 : vector<8x8xf32>
    %248 = math.exp %247 : vector<8x8xf32>
    %cst_82 = arith.constant dense<0.000000e+00> : vector<8xf32>
    %249 = vector.multi_reduction <add>, %248, %cst_82 [1] : vector<8x8xf32> to vector<8xf32>
    %250 = vector.shape_cast %249 : vector<8xf32> to vector<8x1xf32>
    %251 = tpu.reciprocal %250 {approx = true} : vector<8x1xf32> -> vector<8x1xf32>
    %252 = vector.broadcast %251 : vector<8x1xf32> to vector<8x8xf32>
    %253 = arith.mulf %248, %252 : vector<8x8xf32>
    %254 = arith.truncf %253 : vector<8x8xf32> to vector<8x8xbf16>
    %cst_83 = arith.constant dense<0.000000e+00> : vector<8x8xf32>
    %255 = tpu.matmul %254, %240, %cst_83 {dimension_numbers = #tpu.dot_dimension_numbers<[1], [0], [0], [1], [0, 0, 1, 1], [], []>} : vector<8x8xbf16>, vector<8x8xbf16>, vector<8x8xf32> -> vector<8x8xf32>
    %256 = arith.truncf %255 : vector<8x8xf32> to vector<8x8xbf16>
    %257 = vector.extract_strided_slice %183 {offsets = [16, 0], sizes = [8, 128], strides = [1, 1]} : vector<128x128xf32> to vector<8x128xf32>
    %258 = arith.truncf %257 : vector<8x128xf32> to vector<8x128xbf16>
    %cst_84 = arith.constant dense<0.000000e+00> : vector<8x128xf32>
    %259 = tpu.matmul %256, %258, %cst_84 {dimension_numbers = #tpu.dot_dimension_numbers<[1], [0], [0], [1], [0, 0, 1, 1], [], []>} : vector<8x8xbf16>, vector<8x128xbf16>, vector<8x128xf32> -> vector<8x128xf32>
    %260 = arith.addf %234, %259 : vector<8x128xf32>
    %261 = vector.extract_strided_slice %174 {offsets = [0, 24], sizes = [8, 8], strides = [1, 1]} : vector<8x128xf32> to vector<8x8xf32>
    %262 = arith.truncf %261 : vector<8x8xf32> to vector<8x8xbf16>
    %263 = vector.extract_strided_slice %181 {offsets = [0, 24], sizes = [8, 8], strides = [1, 1]} : vector<8x128xf32> to vector<8x8xf32>
    %264 = arith.truncf %263 : vector<8x8xf32> to vector<8x8xbf16>
    %265 = vector.extract_strided_slice %182 {offsets = [0, 24], sizes = [8, 8], strides = [1, 1]} : vector<8x128xf32> to vector<8x8xf32>
    %266 = arith.truncf %265 : vector<8x8xf32> to vector<8x8xbf16>
    %cst_85 = arith.constant dense<0.000000e+00> : vector<8x8xf32>
    %267 = tpu.matmul %262, %264, %cst_85 {dimension_numbers = #tpu.dot_dimension_numbers<[1], [1], [0], [0], [0, 0, 1, 0], [], []>} : vector<8x8xbf16>, vector<8x8xbf16>, vector<8x8xf32> -> vector<8x8xf32>
    %cst_86 = arith.constant 0.353553385 : f32
    %268 = vector.broadcast %cst_86 : f32 to vector<8x8xf32>
    %269 = arith.mulf %267, %268 : vector<8x8xf32>
    %cst_87 = arith.constant dense<0xFF800000> : vector<8xf32>
    %270 = vector.multi_reduction <maximumf>, %269, %cst_87 [1] : vector<8x8xf32> to vector<8xf32>
    %271 = vector.shape_cast %270 : vector<8xf32> to vector<8x1xf32>
    %272 = vector.broadcast %271 : vector<8x1xf32> to vector<8x8xf32>
    %273 = arith.subf %269, %272 : vector<8x8xf32>
    %274 = math.exp %273 : vector<8x8xf32>
    %cst_88 = arith.constant dense<0.000000e+00> : vector<8xf32>
    %275 = vector.multi_reduction <add>, %274, %cst_88 [1] : vector<8x8xf32> to vector<8xf32>
    %276 = vector.shape_cast %275 : vector<8xf32> to vector<8x1xf32>
    %277 = tpu.reciprocal %276 {approx = true} : vector<8x1xf32> -> vector<8x1xf32>
    %278 = vector.broadcast %277 : vector<8x1xf32> to vector<8x8xf32>
    %279 = arith.mulf %274, %278 : vector<8x8xf32>
    %280 = arith.truncf %279 : vector<8x8xf32> to vector<8x8xbf16>
    %cst_89 = arith.constant dense<0.000000e+00> : vector<8x8xf32>
    %281 = tpu.matmul %280, %266, %cst_89 {dimension_numbers = #tpu.dot_dimension_numbers<[1], [0], [0], [1], [0, 0, 1, 1], [], []>} : vector<8x8xbf16>, vector<8x8xbf16>, vector<8x8xf32> -> vector<8x8xf32>
    %282 = arith.truncf %281 : vector<8x8xf32> to vector<8x8xbf16>
    %283 = vector.extract_strided_slice %183 {offsets = [24, 0], sizes = [8, 128], strides = [1, 1]} : vector<128x128xf32> to vector<8x128xf32>
    %284 = arith.truncf %283 : vector<8x128xf32> to vector<8x128xbf16>
    %cst_90 = arith.constant dense<0.000000e+00> : vector<8x128xf32>
    %285 = tpu.matmul %282, %284, %cst_90 {dimension_numbers = #tpu.dot_dimension_numbers<[1], [0], [0], [1], [0, 0, 1, 1], [], []>} : vector<8x8xbf16>, vector<8x128xbf16>, vector<8x128xf32> -> vector<8x128xf32>
    %286 = arith.addf %260, %285 : vector<8x128xf32>
    %287 = arith.addf %144, %286 : vector<8x128xf32>
    %c0_91 = arith.constant 0 : index
    %c0_92 = arith.constant 0 : index
    %288 = vector.load %arg16[%c0_91, %c0_92] : memref<1x128xf32, #tpu.memory_space<vmem>>, vector<1x128xf32>
    %289 = vector.broadcast %288 : vector<1x128xf32> to vector<8x128xf32>
    %290 = arith.addf %287, %289 : vector<8x128xf32>
    %c0_93 = arith.constant 0 : index
    %c0_94 = arith.constant 0 : index
    %291 = vector.load %arg17[%c0_93, %c0_94] : memref<1x128xf32, #tpu.memory_space<vmem>>, vector<1x128xf32>
    %c0_95 = arith.constant 0 : index
    %c0_96 = arith.constant 0 : index
    %292 = vector.load %arg18[%c0_95, %c0_96] : memref<1x128xf32, #tpu.memory_space<vmem>>, vector<1x128xf32>
    %cst_97 = arith.constant dense<0.000000e+00> : vector<8xf32>
    %293 = vector.multi_reduction <add>, %290, %cst_97 [1] : vector<8x128xf32> to vector<8xf32>
    %294 = vector.shape_cast %293 : vector<8xf32> to vector<8x1xf32>
    %cst_98 = arith.constant 3.125000e-02 : f32
    %295 = vector.broadcast %cst_98 : f32 to vector<8x1xf32>
    %296 = arith.mulf %294, %295 : vector<8x1xf32>
    %297 = arith.mulf %290, %290 : vector<8x128xf32>
    %cst_99 = arith.constant dense<0.000000e+00> : vector<8xf32>
    %298 = vector.multi_reduction <add>, %297, %cst_99 [1] : vector<8x128xf32> to vector<8xf32>
    %299 = vector.shape_cast %298 : vector<8xf32> to vector<8x1xf32>
    %cst_100 = arith.constant 3.125000e-02 : f32
    %300 = vector.broadcast %cst_100 : f32 to vector<8x1xf32>
    %301 = arith.mulf %299, %300 : vector<8x1xf32>
    %302 = arith.mulf %296, %296 : vector<8x1xf32>
    %303 = arith.subf %301, %302 : vector<8x1xf32>
    %304 = vector.broadcast %296 : vector<8x1xf32> to vector<8x128xf32>
    %305 = arith.subf %290, %304 : vector<8x128xf32>
    %cst_101 = arith.constant 9.99999974E-6 : f32
    %306 = vector.broadcast %cst_101 : f32 to vector<8x1xf32>
    %307 = arith.addf %303, %306 : vector<8x1xf32>
    %308 = math.rsqrt %307 : vector<8x1xf32>
    %309 = vector.broadcast %308 : vector<8x1xf32> to vector<8x128xf32>
    %310 = arith.mulf %305, %309 : vector<8x128xf32>
    %311 = vector.broadcast %291 : vector<1x128xf32> to vector<8x128xf32>
    %312 = arith.mulf %310, %311 : vector<8x128xf32>
    %313 = vector.broadcast %292 : vector<1x128xf32> to vector<8x128xf32>
    %314 = arith.addf %312, %313 : vector<8x128xf32>
    %315 = arith.truncf %314 : vector<8x128xf32> to vector<8x128xbf16>
    %c0_102 = arith.constant 0 : index
    %c0_103 = arith.constant 0 : index
    %316 = vector.load %arg19[%c0_102, %c0_103] : memref<128x128xbf16, #tpu.memory_space<vmem>>, vector<128x128xbf16>
    %cst_104 = arith.constant dense<0.000000e+00> : vector<8x128xf32>
    %317 = tpu.matmul %315, %316, %cst_104 {dimension_numbers = #tpu.dot_dimension_numbers<[1], [0], [0], [1], [0, 0, 1, 1], [], []>} : vector<8x128xbf16>, vector<128x128xbf16>, vector<8x128xf32> -> vector<8x128xf32>
    %c0_105 = arith.constant 0 : index
    %c0_106 = arith.constant 0 : index
    %318 = vector.load %arg20[%c0_105, %c0_106] : memref<1x128xf32, #tpu.memory_space<vmem>>, vector<1x128xf32>
    %319 = vector.broadcast %318 : vector<1x128xf32> to vector<8x128xf32>
    %320 = arith.addf %317, %319 : vector<8x128xf32>
    %cst_107 = arith.constant 0.000000e+00 : f32
    %321 = vector.broadcast %cst_107 : f32 to vector<8x128xf32>
    %322 = arith.maximumf %320, %321 : vector<8x128xf32>
    %323 = arith.truncf %322 : vector<8x128xf32> to vector<8x128xbf16>
    %c0_108 = arith.constant 0 : index
    %c0_109 = arith.constant 0 : index
    %324 = vector.load %arg21[%c0_108, %c0_109] : memref<128x128xbf16, #tpu.memory_space<vmem>>, vector<128x128xbf16>
    %cst_110 = arith.constant dense<0.000000e+00> : vector<8x128xf32>
    %325 = tpu.matmul %323, %324, %cst_110 {dimension_numbers = #tpu.dot_dimension_numbers<[1], [0], [0], [1], [0, 0, 1, 1], [], []>} : vector<8x128xbf16>, vector<128x128xbf16>, vector<8x128xf32> -> vector<8x128xf32>
    %326 = arith.addf %290, %325 : vector<8x128xf32>
    %c0_111 = arith.constant 0 : index
    %c0_112 = arith.constant 0 : index
    %327 = vector.load %arg22[%c0_111, %c0_112] : memref<1x128xf32, #tpu.memory_space<vmem>>, vector<1x128xf32>
    %328 = vector.broadcast %327 : vector<1x128xf32> to vector<8x128xf32>
    %329 = arith.addf %326, %328 : vector<8x128xf32>
    %c0_113 = arith.constant 0 : index
    %c0_114 = arith.constant 0 : index
    %c0_115 = arith.constant 0 : index
    %330 = vector.load %arg23[%c0_113, %c0_114, %c0_115] : memref<1x8x128xf32, #tpu.memory_space<vmem>>, vector<1x8x128xf32>
    %331 = vector.shape_cast %330 : vector<1x8x128xf32> to vector<8x128xf32>
    %332 = vector.shape_cast %329 : vector<8x128xf32> to vector<1x8x128xf32>
    tpu.vector_store %arg23[%c0_113, %c0_114, %c0_115], %332 {strides = array<i32>} : memref<1x8x128xf32, #tpu.memory_space<vmem>>, vector<1x8x128xf32>,
    return
  }
  func.func @transform_0(%arg0: i32) -> (i32, i32, i32) {
    %c0_i32 = arith.constant 0 : i32
    %c0_i32_0 = arith.constant 0 : i32
    %c0_i32_1 = arith.constant 0 : i32
    return %arg0, %c0_i32, %c0_i32_0 : i32, i32, i32
  }
  func.func @transform_1(%arg0: i32) -> (i32, i32, i32) {
    %c0_i32 = arith.constant 0 : i32
    %c0_i32_0 = arith.constant 0 : i32
    %c0_i32_1 = arith.constant 0 : i32
    return %arg0, %c0_i32, %c0_i32_0 : i32, i32, i32
  }
  func.func @transform_2(%arg0: i32) -> (i32, i32) {
    %c0_i32 = arith.constant 0 : i32
    %c0_i32_0 = arith.constant 0 : i32
    %c0_i32_1 = arith.constant 0 : i32
    return %c0_i32, %c0_i32_0 : i32, i32
  }
  func.func @transform_3(%arg0: i32) -> (i32, i32) {
    %c0_i32 = arith.constant 0 : i32
    %c0_i32_0 = arith.constant 0 : i32
    %c0_i32_1 = arith.constant 0 : i32
    return %c0_i32, %c0_i32_0 : i32, i32
  }
  func.func @transform_4(%arg0: i32) -> (i32, i32) {
    %c0_i32 = arith.constant 0 : i32
    %c0_i32_0 = arith.constant 0 : i32
    %c0_i32_1 = arith.constant 0 : i32
    return %c0_i32, %c0_i32_0 : i32, i32
  }
  func.func @transform_5(%arg0: i32) -> (i32, i32) {
    %c0_i32 = arith.constant 0 : i32
    %c0_i32_0 = arith.constant 0 : i32
    %c0_i32_1 = arith.constant 0 : i32
    return %c0_i32, %c0_i32_0 : i32, i32
  }
  func.func @transform_6(%arg0: i32) -> (i32, i32) {
    %c0_i32 = arith.constant 0 : i32
    %c0_i32_0 = arith.constant 0 : i32
    %c0_i32_1 = arith.constant 0 : i32
    return %c0_i32, %c0_i32_0 : i32, i32
  }
  func.func @transform_7(%arg0: i32) -> (i32, i32) {
    %c0_i32 = arith.constant 0 : i32
    %c0_i32_0 = arith.constant 0 : i32
    %c0_i32_1 = arith.constant 0 : i32
    return %c0_i32, %c0_i32_0 : i32, i32
  }
  func.func @transform_8(%arg0: i32) -> (i32, i32) {
    %c0_i32 = arith.constant 0 : i32
    %c0_i32_0 = arith.constant 0 : i32
    %c0_i32_1 = arith.constant 0 : i32
    return %c0_i32, %c0_i32_0 : i32, i32
  }
  func.func @transform_9(%arg0: i32) -> (i32, i32) {
    %c0_i32 = arith.constant 0 : i32
    %c0_i32_0 = arith.constant 0 : i32
    %c0_i32_1 = arith.constant 0 : i32
    return %c0_i32, %c0_i32_0 : i32, i32
  }
  func.func @transform_10(%arg0: i32) -> (i32, i32) {
    %c0_i32 = arith.constant 0 : i32
    %c0_i32_0 = arith.constant 0 : i32
    %c0_i32_1 = arith.constant 0 : i32
    return %c0_i32, %c0_i32_0 : i32, i32
  }
  func.func @transform_11(%arg0: i32) -> (i32, i32) {
    %c0_i32 = arith.constant 0 : i32
    %c0_i32_0 = arith.constant 0 : i32
    %c0_i32_1 = arith.constant 0 : i32
    return %c0_i32, %c0_i32_0 : i32, i32
  }
  func.func @transform_12(%arg0: i32) -> (i32, i32) {
    %c0_i32 = arith.constant 0 : i32
    %c0_i32_0 = arith.constant 0 : i32
    %c0_i32_1 = arith.constant 0 : i32
    return %c0_i32, %c0_i32_0 : i32, i32
  }
  func.func @transform_13(%arg0: i32) -> (i32, i32) {
    %c0_i32 = arith.constant 0 : i32
    %c0_i32_0 = arith.constant 0 : i32
    %c0_i32_1 = arith.constant 0 : i32
    return %c0_i32, %c0_i32_0 : i32, i32
  }
  func.func @transform_14(%arg0: i32) -> (i32, i32) {
    %c0_i32 = arith.constant 0 : i32
    %c0_i32_0 = arith.constant 0 : i32
    %c0_i32_1 = arith.constant 0 : i32
    return %c0_i32, %c0_i32_0 : i32, i32
  }
  func.func @transform_15(%arg0: i32) -> (i32, i32) {
    %c0_i32 = arith.constant 0 : i32
    %c0_i32_0 = arith.constant 0 : i32
    %c0_i32_1 = arith.constant 0 : i32
    return %c0_i32, %c0_i32_0 : i32, i32
  }
  func.func @transform_16(%arg0: i32) -> (i32, i32) {
    %c0_i32 = arith.constant 0 : i32
    %c0_i32_0 = arith.constant 0 : i32
    %c0_i32_1 = arith.constant 0 : i32
    return %c0_i32, %c0_i32_0 : i32, i32
  }
  func.func @transform_17(%arg0: i32) -> (i32, i32) {
    %c0_i32 = arith.constant 0 : i32
    %c0_i32_0 = arith.constant 0 : i32
    %c0_i32_1 = arith.constant 0 : i32
    return %c0_i32, %c0_i32_0 : i32, i32
  }
  func.func @transform_18(%arg0: i32) -> (i32, i32) {
    %c0_i32 = arith.constant 0 : i32
    %c0_i32_0 = arith.constant 0 : i32
    %c0_i32_1 = arith.constant 0 : i32
    return %c0_i32, %c0_i32_0 : i32, i32
  }
  func.func @transform_19(%arg0: i32) -> (i32, i32) {
    %c0_i32 = arith.constant 0 : i32
    %c0_i32_0 = arith.constant 0 : i32
    %c0_i32_1 = arith.constant 0 : i32
    return %c0_i32, %c0_i32_0 : i32, i32
  }
  func.func @transform_20(%arg0: i32) -> (i32, i32) {
    %c0_i32 = arith.constant 0 : i32
    %c0_i32_0 = arith.constant 0 : i32
    %c0_i32_1 = arith.constant 0 : i32
    return %c0_i32, %c0_i32_0 : i32, i32
  }
  func.func @transform_21(%arg0: i32) -> (i32, i32) {
    %c0_i32 = arith.constant 0 : i32
    %c0_i32_0 = arith.constant 0 : i32
    %c0_i32_1 = arith.constant 0 : i32
    return %c0_i32, %c0_i32_0 : i32, i32
  }
  func.func @transform_22(%arg0: i32) -> (i32, i32, i32) {
    %c0_i32 = arith.constant 0 : i32
    %c0_i32_0 = arith.constant 0 : i32
    %c0_i32_1 = arith.constant 0 : i32
    return %arg0, %c0_i32, %c0_i32_0 : i32, i32, i32
  }
}

module attributes {stable_mosaic.version = 11 : i64} {
  func.func @_head_kernel(%arg0: i32, %arg1: memref<1x8x128xf32, #tpu.memory_space<vmem>>, %arg2: memref<1x128xf32, #tpu.memory_space<vmem>>, %arg3: memref<1x128xf32, #tpu.memory_space<vmem>>, %arg4: memref<128x128xbf16, #tpu.memory_space<vmem>>, %arg5: memref<1x128xf32, #tpu.memory_space<vmem>>, %arg6: memref<1x8x128xf32, #tpu.memory_space<vmem>>) attributes {dimension_semantics = [#tpu.dimension_semantics<parallel>], iteration_bounds = array<i64: 2>, scalar_prefetch = 0 : i64, scratch_operands = 0 : i64, tpu.core_type = #tpu.core_type<tc>, window_params = [{transform_indices = @transform_0, window_bounds = array<i64: 1, 8, 128>}, {pipeline_mode = #tpu.pipeline_mode<synchronous>, transform_indices = @transform_1, window_bounds = array<i64: 1, 128>}, {pipeline_mode = #tpu.pipeline_mode<synchronous>, transform_indices = @transform_2, window_bounds = array<i64: 1, 128>}, {pipeline_mode = #tpu.pipeline_mode<synchronous>, transform_indices = @transform_3, window_bounds = array<i64: 128, 128>}, {pipeline_mode = #tpu.pipeline_mode<synchronous>, transform_indices = @transform_4, window_bounds = array<i64: 1, 128>}, {transform_indices = @transform_5, window_bounds = array<i64: 1, 8, 128>}]} {
    %c0 = arith.constant 0 : index
    %c0_0 = arith.constant 0 : index
    %c0_1 = arith.constant 0 : index
    %0 = vector.load %arg1[%c0, %c0_0, %c0_1] : memref<1x8x128xf32, #tpu.memory_space<vmem>>, vector<1x8x128xf32>
    %1 = vector.shape_cast %0 : vector<1x8x128xf32> to vector<8x128xf32>
    %c0_2 = arith.constant 0 : index
    %c0_3 = arith.constant 0 : index
    %2 = vector.load %arg2[%c0_2, %c0_3] : memref<1x128xf32, #tpu.memory_space<vmem>>, vector<1x128xf32>
    %c0_4 = arith.constant 0 : index
    %c0_5 = arith.constant 0 : index
    %3 = vector.load %arg3[%c0_4, %c0_5] : memref<1x128xf32, #tpu.memory_space<vmem>>, vector<1x128xf32>
    %cst = arith.constant dense<0.000000e+00> : vector<8xf32>
    %4 = vector.multi_reduction <add>, %1, %cst [1] : vector<8x128xf32> to vector<8xf32>
    %5 = vector.shape_cast %4 : vector<8xf32> to vector<8x1xf32>
    %cst_6 = arith.constant 3.125000e-02 : f32
    %6 = vector.broadcast %cst_6 : f32 to vector<8x1xf32>
    %7 = arith.mulf %5, %6 : vector<8x1xf32>
    %8 = arith.mulf %1, %1 : vector<8x128xf32>
    %cst_7 = arith.constant dense<0.000000e+00> : vector<8xf32>
    %9 = vector.multi_reduction <add>, %8, %cst_7 [1] : vector<8x128xf32> to vector<8xf32>
    %10 = vector.shape_cast %9 : vector<8xf32> to vector<8x1xf32>
    %cst_8 = arith.constant 3.125000e-02 : f32
    %11 = vector.broadcast %cst_8 : f32 to vector<8x1xf32>
    %12 = arith.mulf %10, %11 : vector<8x1xf32>
    %13 = arith.mulf %7, %7 : vector<8x1xf32>
    %14 = arith.subf %12, %13 : vector<8x1xf32>
    %15 = vector.broadcast %7 : vector<8x1xf32> to vector<8x128xf32>
    %16 = arith.subf %1, %15 : vector<8x128xf32>
    %cst_9 = arith.constant 9.99999974E-6 : f32
    %17 = vector.broadcast %cst_9 : f32 to vector<8x1xf32>
    %18 = arith.addf %14, %17 : vector<8x1xf32>
    %19 = math.rsqrt %18 : vector<8x1xf32>
    %20 = vector.broadcast %19 : vector<8x1xf32> to vector<8x128xf32>
    %21 = arith.mulf %16, %20 : vector<8x128xf32>
    %22 = vector.broadcast %2 : vector<1x128xf32> to vector<8x128xf32>
    %23 = arith.mulf %21, %22 : vector<8x128xf32>
    %24 = vector.broadcast %3 : vector<1x128xf32> to vector<8x128xf32>
    %25 = arith.addf %23, %24 : vector<8x128xf32>
    %26 = arith.truncf %25 : vector<8x128xf32> to vector<8x128xbf16>
    %c0_10 = arith.constant 0 : index
    %c0_11 = arith.constant 0 : index
    %27 = vector.load %arg4[%c0_10, %c0_11] : memref<128x128xbf16, #tpu.memory_space<vmem>>, vector<128x128xbf16>
    %cst_12 = arith.constant dense<0.000000e+00> : vector<8x128xf32>
    %28 = tpu.matmul %26, %27, %cst_12 {dimension_numbers = #tpu.dot_dimension_numbers<[1], [0], [0], [1], [0, 0, 1, 1], [], []>} : vector<8x128xbf16>, vector<128x128xbf16>, vector<8x128xf32> -> vector<8x128xf32>
    %c0_13 = arith.constant 0 : index
    %c0_14 = arith.constant 0 : index
    %29 = vector.load %arg5[%c0_13, %c0_14] : memref<1x128xf32, #tpu.memory_space<vmem>>, vector<1x128xf32>
    %30 = vector.broadcast %29 : vector<1x128xf32> to vector<8x128xf32>
    %31 = arith.addf %28, %30 : vector<8x128xf32>
    %cst_15 = arith.constant dense<0xFF800000> : vector<8xf32>
    %32 = vector.multi_reduction <maximumf>, %31, %cst_15 [1] : vector<8x128xf32> to vector<8xf32>
    %33 = vector.shape_cast %32 : vector<8xf32> to vector<8x1xf32>
    %34 = vector.broadcast %33 : vector<8x1xf32> to vector<8x128xf32>
    %35 = arith.subf %31, %34 : vector<8x128xf32>
    %36 = math.exp %35 : vector<8x128xf32>
    %cst_16 = arith.constant dense<0.000000e+00> : vector<8xf32>
    %37 = vector.multi_reduction <add>, %36, %cst_16 [1] : vector<8x128xf32> to vector<8xf32>
    %38 = vector.shape_cast %37 : vector<8xf32> to vector<8x1xf32>
    %39 = vector.broadcast %38 : vector<8x1xf32> to vector<8x128xf32>
    %40 = arith.divf %36, %39 : vector<8x128xf32>
    %c0_17 = arith.constant 0 : index
    %c0_18 = arith.constant 0 : index
    %c0_19 = arith.constant 0 : index
    %41 = vector.load %arg6[%c0_17, %c0_18, %c0_19] : memref<1x8x128xf32, #tpu.memory_space<vmem>>, vector<1x8x128xf32>
    %42 = vector.shape_cast %41 : vector<1x8x128xf32> to vector<8x128xf32>
    %43 = vector.shape_cast %40 : vector<8x128xf32> to vector<1x8x128xf32>
    tpu.vector_store %arg6[%c0_17, %c0_18, %c0_19], %43 {strides = array<i32>} : memref<1x8x128xf32, #tpu.memory_space<vmem>>, vector<1x8x128xf32>,
    return
  }
  func.func @transform_0(%arg0: i32) -> (i32, i32, i32) {
    %c0_i32 = arith.constant 0 : i32
    %c0_i32_0 = arith.constant 0 : i32
    %c0_i32_1 = arith.constant 0 : i32
    return %arg0, %c0_i32, %c0_i32_0 : i32, i32, i32
  }
  func.func @transform_1(%arg0: i32) -> (i32, i32) {
    %c0_i32 = arith.constant 0 : i32
    %c0_i32_0 = arith.constant 0 : i32
    %c0_i32_1 = arith.constant 0 : i32
    return %c0_i32, %c0_i32_0 : i32, i32
  }
  func.func @transform_2(%arg0: i32) -> (i32, i32) {
    %c0_i32 = arith.constant 0 : i32
    %c0_i32_0 = arith.constant 0 : i32
    %c0_i32_1 = arith.constant 0 : i32
    return %c0_i32, %c0_i32_0 : i32, i32
  }
  func.func @transform_3(%arg0: i32) -> (i32, i32) {
    %c0_i32 = arith.constant 0 : i32
    %c0_i32_0 = arith.constant 0 : i32
    %c0_i32_1 = arith.constant 0 : i32
    return %c0_i32, %c0_i32_0 : i32, i32
  }
  func.func @transform_4(%arg0: i32) -> (i32, i32) {
    %c0_i32 = arith.constant 0 : i32
    %c0_i32_0 = arith.constant 0 : i32
    %c0_i32_1 = arith.constant 0 : i32
    return %c0_i32, %c0_i32_0 : i32, i32
  }
  func.func @transform_5(%arg0: i32) -> (i32, i32, i32) {
    %c0_i32 = arith.constant 0 : i32
    %c0_i32_0 = arith.constant 0 : i32
    %c0_i32_1 = arith.constant 0 : i32
    return %arg0, %c0_i32, %c0_i32_0 : i32, i32, i32
  }
}

</mosaic_0001>

<bundles_post_ra>
// kernel: transformer_forward.8
= control target key start
LH: loop header
LB: loop body
LE: loop exit
PB: predicated region body
PF: predicated region fallthrough
CT: control target
= control target key end

     0   :  { %s299_s12 = smov 0   ;;  %s322_s0 = inlined_call_operand.vmem [shape: f32[2,8,128], index: 0, kind: input, shape index: {}]   ;;  %s323_s1 = inlined_call_operand.vmem [shape: f32[1,128], index: 1, kind: input, shape index: {}]   ;;  %s324_s2 = inlined_call_operand.vmem [shape: f32[1,128], index: 2, kind: input, shape index: {}]   ;;  %s325_s3 = inlined_call_operand.vmem [shape: f32[2,8,128], index: 3, kind: output, shape index: {}]  }
   0x1 LB: > { %s250_s13 = sadd.s32 4294967295, %s277_s12   ;;  %p254_p0 = scmp.ge.s32.totalorder %s277_s12, 1  ;;  %s277_s12 = sphi %s299_s12, %s13_s12  }
   0x2   : > { %p136_p1 = scmp.lt.s32.totalorder %s277_s12, 3 }
   0x4   : > { %p137_p2 = pnand %p254_p0, %p136_p1 }
   0x5   : > { %p158_p3 = scmp.lt.s32.totalorder (!%p137_p2), %s250_s13, 1  ;;  %v257_v11 = vld [vmem:[%s323_s1] ss:$0 sm:$0xff] (!%p137_p2) }
   0x6   : > { %140 = sbr.rel (%p137_p2) target bundleno = 187 (0xbb), region = 32  ;;  %v258_v13 = vld [vmem:[%s324_s2] ss:$0 sm:$0xff] (!%p137_p2) }
   0xd   : > { %s327_s13 = smov (!%p158_p3, %s250_s13), 1 }
   0xe   : > { %s255_s14 = sshll.u32 %s327_s13, 3 }
   0xf   : > { %s161_s17 = scalar_lea.vmem %s322_s0, %s255_s14  ;;  %s165_s24 = scalar_lea.vmem %s325_s3, %s255_s14 }
  0x10   : > { %v166_v0 = vld [vmem:[%s161_s17] sm:$0xff] }
  0x11   : > { %169 = vadd.xlane.f32.xlu0 %v166_v0  ;;  %v172_v1 = vmul.f32 %v166_v0, %v166_v0 }
  0x15   : > { %173 = vadd.xlane.f32.xlu0 %v172_v1 }
  0x9e   : > { %v170_v2 = vpop.xlane.xlu0 %169 }
  0x9f   : > { %v171_v3 = vmul.f32 0.03125, %v170_v2 }
  0xa1   : > { %v176_v5 = vmul.f32 %v171_v3, %v171_v3  ;;  %v178_v9 = vsub.f32 %v166_v0, %v171_v3 }
  0xa2   : > { %v174_v4 = vpop.xlane.xlu0 %173 }
  0xa3   : > { %v175_v6 = vmul.f32 0.03125, %v174_v4 }
  0xa5   : > { %v177_v7 = vsub.f32 %v175_v6, %v176_v5 }
  0xa7   : > { %v179_v8 = vadd.f32 1e-05, %v177_v7 }
  0xa9   : > { %269 = vrsqrt.f32 %v179_v8 }
  0xb3   : > { %v270_v10 = vpop.eup %269 }
  0xb4   : > { %v181_v12 = vmul.f32 %v270_v10, %v178_v9 }
  0xb6   : > { %v188_v14 = vmul.f32 %v257_v11, %v181_v12 }
  0xb8   : > { %v195_v15 = vadd.f32 %v258_v13, %v188_v14 }
  0xba   : > { %196 = vst [vmem:[%s165_s24] sm:$0xff] %v195_v15 }
  0xbb PF: > { %s13_s12 = sadd.s32 1, %s277_s12  }
  0xbc   : > { %p10_p4 = scmp.ge.s32.totalorder %s13_s12, 4  }
  0xbe   :  { %12 = sbr.rel (!%p10_p4) target bundleno = 1 (0x1), region = 62 }

// kernel: transformer_forward.7
= control target key start
LH: loop header
LB: loop body
LE: loop exit
PB: predicated region body
PF: predicated region fallthrough
CT: control target
= control target key end

     0   :  { %s2106_s25 = smov 0   ;;  %s2428_s0 = inlined_call_operand.vmem [shape: f32[2,8,128], index: 0, kind: input, shape index: {}]   ;;  %s2429_s1 = inlined_call_operand.vmem [shape: f32[1,128], index: 1, kind: input, shape index: {}]   ;;  %s2430_s2 = inlined_call_operand.vmem [shape: f32[1,128], index: 2, kind: input, shape index: {}]   ;;  %s2431_s3 = inlined_call_operand.vmem [shape: bf16[128,384], index: 3, kind: input, shape index: {}]   ;;  %s2432_s4 = inlined_call_operand.vmem [shape: f32[1,384], index: 4, kind: input, shape index: {}]   ;;  %s2433_s5 = inlined_call_operand.vmem [shape: f32[128,128], index: 5, kind: input, shape index: {}]   ;;  %s2434_s6 = inlined_call_operand.vmem [shape: f32[1,128], index: 6, kind: input, shape index: {}]   ;;  %s2435_s7 = inlined_call_operand.vmem [shape: f32[1,128], index: 7, kind: input, shape index: {}]   ;;  %s2436_s8 = inlined_call_operand.vmem [shape: f32[1,128], index: 8, kind: input, shape index: {}]   ;;  %s2437_s9 = inlined_call_operand.vmem [shape: bf16[128,128], index: 9, kind: input, shape index: {}]   ;;  %s2438_s10 = inlined_call_operand.vmem [shape: f32[1,128], index: 10, kind: input, shape index: {}]   ;;  %s2439_s11 = inlined_call_operand.vmem [shape: bf16[128,128], index: 11, kind: input, shape index: {}]   ;;  %s2440_s12 = inlined_call_operand.vmem [shape: f32[1,128], index: 12, kind: input, shape index: {}]   ;;  %s2441_s13 = inlined_call_operand.vmem [shape: f32[2,8,128], index: 13, kind: output, shape index: {}]  }
   0x1 LB: > { %s1689_s26 = sadd.s32 4294967295, %s2028_s25   ;;  %p1693_p0 = scmp.ge.s32.totalorder %s2028_s25, 1  ;;  %s2028_s25 = sphi %s2106_s25, %s23_s25  }
   0x2   : > { %p386_p1 = scmp.lt.s32.totalorder %s2028_s25, 3 }
   0x4   : > { %p387_p2 = pnand %p1693_p0, %p386_p1 }
   0x5   : > { %p428_p3 = scmp.lt.s32.totalorder (!%p387_p2), %s1689_s26, 1  ;;  %v1954_v0 = vld [vmem:[%s2431_s3 + $0x4] ss:$12 sps:$4 sm:$0xff] (!%p387_p2)   ;;  %v2030_v1 = vmov (!%p387_p2), 0.0   ;;  %v1956_v2 = vld [vmem:[%s2431_s3] ss:$12 sps:$4 sm:$0xff] (!%p387_p2)   ;;  %v502_v43 = vlaneseq (!%p387_p2) }
   0x6   : > { %390 = sbr.rel (%p387_p2) target bundleno = 3386 (0xd3a), region = 72  ;;  %1808 = vmatprep.subr.bf16.mxu1 (!%p387_p2), %v2030_v1  ;;  %645 = vmatprep.subr.bf16.mxu0 (!%p387_p2), %v1954_v0  ;;  %v1957_v3 = vld [vmem:[%s2431_s3 + $0x8] ss:$12 sps:$4 sm:$0xff] (!%p387_p2)   ;;  %v1960_v7 = vld [vmem:[%s2431_s3 + $0x18] ss:$12 sps:$4 sm:$0xff] (!%p387_p2)   ;;  %v2031_v22 = vmov (!%p387_p2), 0  }
   0x7   : > { %646 = vmatpush1.bf16.msra.mxu0 (!%p387_p2), %v1956_v2  ;;  %1809 = vmatpush3.bf16.msra.mxu1 (!%p387_p2), %v1957_v3  ;;  %v1958_v6 = vld [vmem:[%s2431_s3 + $0x1c] ss:$12 sps:$4 sm:$0xff] (!%p387_p2)   ;;  %v1961_v8 = vld [vmem:[%s2431_s3 + $0x20] ss:$12 sps:$4 sm:$0xff] (!%p387_p2)   ;;  %v1965_v11 = vld [vmem:[%s2431_s3 + $0x38] ss:$12 sps:$4 sm:$0xff] (!%p387_p2)  }
   0x8   : > { %1810 = vmatprep.subr.bf16.mxu1 (!%p387_p2), %v2030_v1  ;;  %647 = vmatprep.subr.bf16.mxu0 (!%p387_p2), %v1958_v6  ;;  %v1962_v9 = vld [vmem:[%s2431_s3 + $0x34] ss:$12 sps:$4 sm:$0xff] (!%p387_p2)   ;;  %v1964_v10 = vld [vmem:[%s2431_s3 + $0x30] ss:$12 sps:$4 sm:$0xff] (!%p387_p2)   ;;  %v1966_v12 = vld [vmem:[%s2431_s3 + $0x4c] ss:$12 sps:$4 sm:$0xff] (!%p387_p2)  }
   0x9   : > { %v1968_v13 = vld [vmem:[%s2431_s3 + $0x48] ss:$12 sps:$4 sm:$0xff] (!%p387_p2)   ;;  %v1969_v14 = vld [vmem:[%s2431_s3 + $0x50] ss:$12 sps:$4 sm:$0xff] (!%p387_p2)   ;;  %v1972_v16 = vld [vmem:[%s2431_s3 + $0x60] ss:$12 sps:$4 sm:$0xff] (!%p387_p2)   ;;  %677 = vmatprep.mubr.bf16.mxu0 (!%p387_p2), %v2031_v22 }
   0xa   : > { %v1970_v15 = vld [vmem:[%s2431_s3 + $0x64] ss:$12 sps:$4 sm:$0xff] (!%p387_p2)   ;;  %v1973_v17 = vld [vmem:[%s2431_s3 + $0x68] ss:$12 sps:$4 sm:$0xff] (!%p387_p2)   ;;  %v1977_v20 = vld [vmem:[%s2431_s3 + $0x80] ss:$12 sps:$4 sm:$0xff] (!%p387_p2)  }
   0xb   : > { %648 = vmatpush1.bf16.msra.mxu0 (!%p387_p2), %v1960_v7  ;;  %1811 = vmatpush3.bf16.msra.mxu1 (!%p387_p2), %v1961_v8  ;;  %v1974_v18 = vld [vmem:[%s2431_s3 + $0x7c] ss:$12 sps:$4 sm:$0xff] (!%p387_p2)   ;;  %v1976_v19 = vld [vmem:[%s2431_s3 + $0x78] ss:$12 sps:$4 sm:$0xff] (!%p387_p2)   ;;  %v1978_v21 = vld [vmem:[%s2431_s3 + $0x94] ss:$12 sps:$4 sm:$0xff] (!%p387_p2)  }
   0xc   : > { %1812 = vmatprep.subr.bf16.mxu1 (!%p387_p2), %v2030_v1  ;;  %649 = vmatprep.subr.bf16.mxu0 (!%p387_p2), %v1962_v9  ;;  %vm2032_vm0 = vmmov (!%p387_p2), 0   ;;  %v1980_v23 = vld [vmem:[%s2431_s3 + $0x90] ss:$12 sps:$4 sm:$0xff] (!%p387_p2)   ;;  %v1981_v24 = vld [vmem:[%s2431_s3 + $0x98] ss:$12 sps:$4 sm:$0xff] (!%p387_p2)   ;;  %v503_v44 = vshrl.u32 (!%p387_p2), %v502_v43, 7 }
   0xd   : > { %s2443_s26 = smov (!%p428_p3, %s1689_s26), 1  ;;  %1824 = vmatprep.mubr.msk.bf16.mxu1 %vm2032_vm0, %v2030_v1  ;;  %v1982_v25 = vld [vmem:[%s2431_s3 + $0xac] ss:$12 sps:$4 sm:$0xff]   ;;  %v1984_v26 = vld [vmem:[%s2431_s3 + $0xa8] ss:$12 sps:$4 sm:$0xff]   ;;  %vm796_vm1 = vcmask 1043456  }
   0xe   : > { %s1694_s16 = sshll.u32 %s2443_s26, 3  ;;  %v1985_v27 = vld [vmem:[%s2431_s3 + $0xb0] ss:$12 sps:$4 sm:$0xff]   ;;  %v1696_v37 = vld [vmem:[%s2429_s1] ss:$0 sm:$0xff]  ;;  %v512_v45 = vsub.s32 2, %v503_v44 }
   0xf   : > { %s431_s19 = scalar_lea.vmem %s2428_s0, %s1694_s16  ;;  %650 = vmatpush1.bf16.msra.mxu0 %v1964_v10  ;;  %1813 = vmatpush3.bf16.msra.mxu1 %v1965_v11  ;;  %v1697_v39 = vld [vmem:[%s2430_s2] ss:$0 sm:$0xff]  ;;  %v508_v47 = vsub.s32 1, %v503_v44  ;;  %v504_v48 = vsub.s32 0, %v503_v44  ;;  %vm733_vm2 = vcmask 64512   ;;  %s2033_s28 = smov 120  }
  0x10   : > { %v2133_v4 = vld [vmem:[%s431_s19] sm:$0xff]  ;;  %1814 = vmatprep.subr.bf16.mxu1 %v2030_v1  ;;  %651 = vmatprep.subr.bf16.mxu0 %v1966_v12  ;;  %s2034_s29 = smov 112   ;;  %s2035_s18 = smov 104  }
  0x11   : > { %440 = vadd.xlane.f32.xlu0 %v2133_v4  ;;  %v443_v5 = vmul.f32 %v2133_v4, %v2133_v4  ;;  %v500_v46 = vld [vmem:[%s2432_s4] sm:$0x7]  ;;  %s435_s27 = scalar_lea.vmem %s2441_s13, %s1694_s16 }
  0x12   : > { %v513_v49 = vrot.slane %v500_v46, %v512_v45  ;;  %v509_v50 = vrot.slane %v500_v46, %v508_v47  ;;  %v505_v51 = vrot.slane %v500_v46, %v504_v48 }
  0x13   : > { %652 = vmatpush1.bf16.msra.mxu0 %v1968_v13  ;;  %1815 = vmatpush3.bf16.msra.mxu1 %v1969_v14 }
  0x14   : > { %1816 = vmatprep.subr.bf16.mxu1 %v2030_v1  ;;  %653 = vmatprep.subr.bf16.mxu0 %v1970_v15 }
  0x15   : > { %444 = vadd.xlane.f32.xlu0 %v443_v5 }
  0x17   : > { %654 = vmatpush1.bf16.msra.mxu0 %v1972_v16  ;;  %1817 = vmatpush3.bf16.msra.mxu1 %v1973_v17 }
  0x18   : > { %655 = vmatprep.subr.bf16.mxu0 %v1974_v18  ;;  %1818 = vmatprep.subr.bf16.mxu1 %v2030_v1 }
  0x1b   : > { %656 = vmatpush1.bf16.msra.mxu0 %v1976_v19  ;;  %1819 = vmatpush3.bf16.msra.mxu1 %v1977_v20 }
  0x1c   : > { %657 = vmatprep.subr.bf16.mxu0 %v1978_v21  ;;  %1820 = vmatprep.subr.bf16.mxu1 %v2030_v1 }
  0x1f   : > { %658 = vmatpush1.bf16.msra.mxu0 %v1980_v23  ;;  %1821 = vmatpush3.bf16.msra.mxu1 %v1981_v24 }
  0x20   : > { %659 = vmatprep.subr.bf16.mxu0 %v1982_v25  ;;  %1822 = vmatprep.subr.bf16.mxu1 %v2030_v1 }
  0x23   : > { %660 = vmatpush1.bf16.msra.mxu0 %v1984_v26  ;;  %1823 = vmatpush3.bf16.msra.mxu1 %v1985_v27 }
  0x24   : > { %1834 = vmatprep.subr.bf16.mxu1 %v2030_v1  ;;  %1828 = vmatprep.subr.bf16.mxu0 %v2030_v1 }
  0x9e   : > { %v441_v28 = vpop.xlane.xlu0 %440 }
  0x9f   : > { %v442_v29 = vmul.f32 0.03125, %v441_v28 }
  0xa1   : > { %v447_v31 = vmul.f32 %v442_v29, %v442_v29  ;;  %v449_v35 = vsub.f32 %v2133_v4, %v442_v29 }
  0xa2   : > { %v445_v30 = vpop.xlane.xlu0 %444 }
  0xa3   : > { %v446_v32 = vmul.f32 0.03125, %v445_v30 }
  0xa5   : > { %v448_v33 = vsub.f32 %v446_v32, %v447_v31 }
  0xa7   : > { %v450_v34 = vadd.f32 1e-05, %v448_v33 }
  0xa9   : > { %2002 = vrsqrt.f32 %v450_v34 }
  0xb3   : > { %v2003_v36 = vpop.eup %2002 }
  0xb4   : > { %v452_v38 = vmul.f32 %v2003_v36, %v449_v35  ;;  %v727_v35 = vld [vmem:[%s2433_s5 + $0x8] sm:$0xff] }
  0xb5   : > { %v957_v36 = vpack.c.bf16 %v727_v35, %v727_v35 }
  0xb6   : > { %v459_v40 = vmul.f32 %v1696_v37, %v452_v38 }
  0xb7   : > { %v962_v37 = vsel %vm796_vm1, %v957_v36, 0 }
  0xb8   : > { %v466_v41 = vadd.f32 %v1697_v39, %v459_v40 }
  0xba   : > { %v467_v42 = vpack.c.bf16 %v466_v41, %v466_v41  ;;  %v726_v41 = vld [vmem:[%s2433_s5] sm:$0xff] }
  0xbc   : > { %678 = vmatmul.mubr.bf16.vlgmr.msra.gmra.mrb[0].mxu0 %v467_v42  ;;  %1825 = vmatmul.mubr.bf16.vlgmr.msra.gmra.mrb[0].mxu1 %v467_v42  ;;  %v841_v42 = vpack.c.bf16 %v726_v41, %v726_v41 }
  0xbd   : > { %1830 = vmatprep.mubr.msk.bf16.mxu0 %vm2032_vm0, %v2030_v1  ;;  %1836 = vmatprep.mubr.msk.bf16.mxu1 %vm2032_vm0, %v2030_v1 }
  0xbe   : > { %v1008_v46 = vsel %vm796_vm1, %v841_v42, 0 }
 0x18f   : > { %v679_v52 = vpop.f32.mrb[0].mxu0  ;;  %v720_v53 = vpop.f32.mrb[0].mxu1 }
 0x190   : > { %v721_v54 = vadd.f32 %v720_v53, %v513_v49  ;;  %v681_v55 = vpop.f32.mrb[1].mxu0  ;;  %v1826_v56 = vpop.f32.mrb[1].mxu1  ;;  %v680_v63 = vadd.f32 %v679_v52, %v505_v51 }
 0x191   : > { %v682_v57 = vadd.f32 %v681_v55, %v509_v50  ;;  %v683_v58 = vpop.f32.mrb[2].mxu0  ;;  %v723_v59 = vpop.f32.mrb[2].mxu1 }
 0x192   : > { %v2225_v60 = vpack.c.bf16 %v721_v54, %v721_v54  ;;  %v684_v61 = vpop.f32.mrb[3].mxu0  ;;  %v1827_v62 = vpop.f32.mrb[3].mxu1  ;;  %v2236_v5 = vpack.c.bf16 %v680_v63, %v680_v63 }
 0x193   : > { %v2227_v0 = vpack.c.bf16 %v682_v57, %v682_v57 }
 0x194   : > { %v798_v2 = vsel %vm796_vm1, %v2225_v60, 0 }
 0x195   : > { %1835 = vmatpush3.bf16.msra.mxu1 %v798_v2  ;;  %846 = vrot.lane.b32.xlu1 %v2227_v0, %s2033_s28  ;;  %v738_v3 = vsel %vm733_vm2, %v2227_v0, 0 }
 0x196   : > { %1829 = vmatpush3.bf16.xpose.msra.mxu0 %v738_v3  ;;  %1846 = vmatprep.subr.bf16.mxu1 %v2030_v1 }
 0x197   : > { %1840 = vmatprep.subr.bf16.mxu0 %v2030_v1 }
 0x199   : > { %843 = vrot.lane.b32.xlu1 %v2236_v5, %s2033_s28 }
 0x19d   : > { %1831 = vmatmul.mubr.msk.bf16.vlgmr.msra.gmra.mrb[4].mxu0 %vm733_vm2, %v2236_v5 }
 0x19e   : > { %1842 = vmatprep.mubr.msk.bf16.mxu0 %vm2032_vm0, %v2030_v1 }
 0x207   : > { %v847_v6 = vpop.permute.xlu1 %846 }
 0x208   : > { %v852_v7 = vsel %vm733_vm2, %v847_v6, 0 }
 0x209   : > { %1841 = vmatpush3.bf16.xpose.msra.mxu0 %v852_v7 }
 0x20a   : > { %1852 = vmatprep.subr.bf16.mxu0 %v2030_v1 }
 0x20b   : > { %v844_v8 = vpop.permute.xlu1 %843 }
 0x210   : > { %1843 = vmatmul.mubr.msk.bf16.vlgmr.msra.gmra.mrb[8].mxu0 %vm733_vm2, %v844_v8 }
 0x211   : > { %1854 = vmatprep.mubr.msk.bf16.mxu0 %vm2032_vm0, %v2030_v1  ;;  %1853 = vmatpush3.bf16.msra.mxu0 %v962_v37 }
 0x212   : > { %1864 = vmatprep.subr.bf16.mxu0 %v2030_v1 }
 0x270   : > { %v774_v9 = vpop.f32.mrb[4].mxu0 }
 0x271   : > { %v780_v10 = vmul.f32 0.35355338, %v774_v9  ;;  %v1832_v11 = vpop.f32.mrb[5].mxu0 }
 0x272   : > { %v777_v12 = vpop.f32.mrb[6].mxu0 }
 0x273   : > { %v1833_v13 = vpop.f32.mrb[7].mxu0  ;;  %v781_v14 = vsel %vm733_vm2, %v780_v10, -inf }
 0x274   : > { %782 = vmax.xlane.f32.xlu0 %v781_v14 }
 0x2e3   : > { %v888_v15 = vpop.f32.mrb[8].mxu0 }
 0x2e4   : > { %v894_v16 = vmul.f32 0.35355338, %v888_v15  ;;  %v1844_v17 = vpop.f32.mrb[9].mxu0 }
 0x2e5   : > { %v891_v18 = vpop.f32.mrb[10].mxu0 }
 0x2e6   : > { %v1845_v19 = vpop.f32.mrb[11].mxu0  ;;  %v895_v20 = vsel %vm733_vm2, %v894_v16, -inf }
 0x2e7   : > { %896 = vmax.xlane.f32.xlu1 %v895_v20 }
 0x2f8   : > { %1050 = vrot.lane.b32.xlu1 %v2236_v5, %s2034_s29 }
 0x301   : > { %v783_v21 = vpop.xlane.xlu0 %782 }
 0x302   : > { %v784_v22 = vsub.f32 %v780_v10, %v783_v21 }
 0x304   : > { %v785_v23 = vmul.f32 1.442695, %v784_v22 }
 0x306   : > { %2004 = vpow2.f32 %v785_v23 }
 0x310   : > { %v2005_v24 = vpop.eup %2004 }
 0x311   : > { %v787_v25 = vsel %vm733_vm2, %v2005_v24, 0.0 }
 0x312   : > { %788 = vadd.xlane.f32.xlu0 %v787_v25 }
 0x374   : > { %v897_v26 = vpop.xlane.xlu1 %896 }
 0x375   : > { %v898_v27 = vsub.f32 %v894_v16, %v897_v26 }
 0x377   : > { %v899_v28 = vmul.f32 1.442695, %v898_v27 }
 0x378   : > { %v1051_v59 = vpop.permute.xlu1 %1050 }
 0x379   : > { %2006 = vpow2.f32 %v899_v28 }
 0x383   : > { %v2007_v29 = vpop.eup %2006 }
 0x384   : > { %v901_v30 = vsel %vm733_vm2, %v2007_v29, 0.0 }
 0x385   : > { %902 = vadd.xlane.f32.xlu0 %v901_v30 }
 0x39b   : > { %908 = vrot.lane.b32.xlu0 %v2225_v60, %s2033_s28 }
 0x39f   : > { %v789_v31 = vpop.xlane.xlu0 %788  ;;  %1052 = vrot.lane.b32.xlu0 %v2227_v0, %s2034_s29 }
 0x3a0   : > { %2008 = vrcp.f32 %v789_v31 }
 0x3aa   : > { %v2009_v32 = vpop.eup %2008 }
 0x3ab   : > { %v791_v33 = vmul.f32 %v2009_v32, %v2005_v24 }
 0x3ad   : > { %v792_v34 = vpack.c.bf16 %v791_v33, %v791_v33 }
 0x3af   : > { %1837 = vmatmul.mubr.msk.bf16.vlgmr.msra.gmra.mrb[4].mxu1 %vm733_vm2, %v792_v34 }
 0x3b0   : > { %1848 = vmatprep.mubr.msk.bf16.mxu1 %vm2032_vm0, %v2030_v1 }
 0x412   : > { %v903_v38 = vpop.xlane.xlu0 %902 }
 0x413   : > { %2010 = vrcp.f32 %v903_v38 }
 0x416   : > { %v909_v39 = vpop.permute.xlu0 %908 }
 0x417   : > { %v914_v40 = vsel %vm796_vm1, %v909_v39, 0 }
 0x418   : > { %1847 = vmatpush3.bf16.msra.mxu1 %v914_v40 }
 0x419   : > { %1858 = vmatprep.subr.bf16.mxu1 %v2030_v1 }
 0x41a   : > { %v1053_v52 = vpop.permute.xlu0 %1052 }
 0x41b   : > { %v1058_v57 = vsel %vm733_vm2, %v1053_v52, 0 }
 0x41d   : > { %v2011_v43 = vpop.eup %2010 }
 0x41e   : > { %v905_v44 = vmul.f32 %v2011_v43, %v2007_v29 }
 0x420   : > { %v906_v45 = vpack.c.bf16 %v905_v44, %v905_v44 }
 0x422   : > { %1849 = vmatmul.mubr.msk.bf16.vlgmr.msra.gmra.mrb[8].mxu1 %vm733_vm2, %v906_v45 }
 0x423   : > { %1859 = vmatpush3.bf16.msra.mxu1 %v1008_v46  ;;  %1860 = vmatprep.mubr.msk.bf16.mxu1 %vm2032_vm0, %v2030_v1 }
 0x424   : > { %1870 = vmatprep.subr.bf16.mxu1 %v2030_v1 }
 0x482   : > { %v834_v47 = vpop.f32.mrb[4].mxu1 }
 0x483   : > { %v840_v48 = vpack.c.bf16 %v834_v47, %v834_v47  ;;  %v1838_v49 = vpop.f32.mrb[5].mxu1 }
 0x484   : > { %v837_v50 = vpop.f32.mrb[6].mxu1  ;;  %v729_v49 = vld [vmem:[%s2433_s5 + $0x18] sm:$0xff] }
 0x485   : > { %v1839_v51 = vpop.f32.mrb[7].mxu1  ;;  %1861 = vmatmul.mubr.msk.bf16.vlgmr.msra.gmra.mrb[12].mxu1 %vm733_vm2, %v840_v48  ;;  %v1322_v50 = vpack.c.bf16 %v729_v49, %v729_v49 }
 0x486   : > { %1872 = vmatprep.mubr.msk.bf16.mxu1 %vm2032_vm0, %v2030_v1 }
 0x4f5   : > { %v950_v53 = vpop.f32.mrb[8].mxu1 }
 0x4f6   : > { %v956_v54 = vpack.c.bf16 %v950_v53, %v950_v53  ;;  %v1850_v55 = vpop.f32.mrb[9].mxu1 }
 0x4f7   : > { %v953_v56 = vpop.f32.mrb[10].mxu1 }
 0x4f8   : > { %v1851_v58 = vpop.f32.mrb[11].mxu1  ;;  %1855 = vmatmul.mubr.msk.bf16.vlgmr.msra.gmra.mrb[12].mxu0 %vm733_vm2, %v956_v54 }
 0x4f9   : > { %1865 = vmatpush3.bf16.xpose.msra.mxu0 %v1058_v57  ;;  %1866 = vmatprep.mubr.msk.bf16.mxu0 %vm2032_vm0, %v2030_v1 }
 0x4fa   : > { %1876 = vmatprep.subr.bf16.mxu0 %v2030_v1 }
 0x500   : > { %1867 = vmatmul.mubr.msk.bf16.vlgmr.msra.gmra.mrb[16].mxu0 %vm733_vm2, %v1051_v59 }
 0x501   : > { %1878 = vmatprep.mubr.msk.bf16.mxu0 %vm2032_vm0, %v2030_v1 }
 0x558   : > { %v1044_v61 = vpop.f32.mrb[12].mxu1 }
 0x559   : > { %v1862_v62 = vpop.f32.mrb[13].mxu1 }
 0x55a   : > { %v1047_v63 = vpop.f32.mrb[14].mxu1 }
 0x55b   : > { %v1863_v2 = vpop.f32.mrb[15].mxu1 }
 0x5cb   : > { %v998_v3 = vpop.f32.mrb[12].mxu0 }
 0x5cc   : > { %v2289_v6 = vadd.f32 %v1044_v61, %v998_v3  ;;  %v1856_v7 = vpop.f32.mrb[13].mxu0 }
 0x5cd   : > { %v1001_v8 = vpop.f32.mrb[14].mxu0 }
 0x5ce   : > { %v1857_v9 = vpop.f32.mrb[15].mxu0 }
 0x5d3   : > { %v1094_v10 = vpop.f32.mrb[16].mxu0 }
 0x5d4   : > { %v1100_v11 = vmul.f32 0.35355338, %v1094_v10  ;;  %v1868_v12 = vpop.f32.mrb[17].mxu0  ;;  %v1734_v10 = vld [vmem:[%s2434_s6] ss:$0 sm:$0xff] }
 0x5d5   : > { %v1097_v13 = vpop.f32.mrb[18].mxu0 }
 0x5d6   : > { %v1869_v14 = vpop.f32.mrb[19].mxu0  ;;  %v1101_v15 = vsel %vm733_vm2, %v1100_v11, -inf }
 0x5d7   : > { %1102 = vmax.xlane.f32.xlu0 %v1101_v15 }
 0x5ed   : > { %1113 = vrot.lane.b32.xlu0 %v2225_v60, %s2034_s29 }
 0x5f1   : > { %1210 = vrot.lane.b32.xlu0 %v2236_v5, %s2035_s18 }
 0x664   : > { %v1103_v16 = vpop.xlane.xlu0 %1102 }
 0x665   : > { %v1104_v17 = vsub.f32 %v1100_v11, %v1103_v16  ;;  %v1987_v16 = vld [vmem:[%s2437_s9 + $0x8] sm:$0xff]  }
 0x667   : > { %v1105_v18 = vmul.f32 1.442695, %v1104_v17  ;;  %v1989_v17 = vld [vmem:[%s2437_s9 + $0x18] sm:$0xff]  }
 0x668   : > { %v1114_v19 = vpop.permute.xlu0 %1113 }
 0x669   : > { %2012 = vpow2.f32 %v1105_v18  ;;  %v1119_v20 = vsel %vm796_vm1, %v1114_v19, 0  ;;  %v1990_v18 = vld [vmem:[%s2437_s9 + $0x20] sm:$0xff]   ;;  %v1991_v19 = vld [vmem:[%s2437_s9 + $0x28] sm:$0xff]  }
 0x66a   : > { %1871 = vmatpush3.bf16.msra.mxu1 %v1119_v20  ;;  %v1992_v20 = vld [vmem:[%s2437_s9 + $0x30] sm:$0xff]  }
 0x66b   : > { %1882 = vmatprep.subr.bf16.mxu1 %v2030_v1 }
 0x66c   : > { %v1211_v28 = vpop.permute.xlu0 %1210 }
 0x673   : > { %v2013_v21 = vpop.eup %2012 }
 0x674   : > { %v1107_v22 = vsel %vm733_vm2, %v2013_v21, 0.0 }
 0x675   : > { %1108 = vadd.xlane.f32.xlu1 %v1107_v22  ;;  %v1994_v22 = vld [vmem:[%s2439_s11] sm:$0xff]  }
 0x686   : > { %1212 = vrot.lane.b32.xlu1 %v2227_v0, %s2035_s18  ;;  %v728_v0 = vld [vmem:[%s2433_s5 + $0x10] sm:$0xff] }
 0x687   : > { %v1162_v29 = vpack.c.bf16 %v728_v0, %v728_v0 }
 0x689   : > { %v1167_v30 = vsel %vm796_vm1, %v1162_v29, 0 }
 0x68a   : > { %1877 = vmatpush3.bf16.msra.mxu0 %v1167_v30 }
 0x68b   : > { %1888 = vmatprep.subr.bf16.mxu0 %v2030_v1 }
 0x702   : > { %v1109_v23 = vpop.xlane.xlu1 %1108 }
 0x703   : > { %2014 = vrcp.f32 %v1109_v23  ;;  %v1995_v23 = vld [vmem:[%s2439_s11 + $0x8] sm:$0xff]  }
 0x706   : > { %v1213_v25 = vpop.permute.xlu1 %1212 }
 0x707   : > { %v1218_v27 = vsel %vm733_vm2, %v1213_v25, 0  ;;  %v1998_v25 = vld [vmem:[%s2439_s11 + $0x20] sm:$0xff]  }
 0x70d   : > { %v2015_v5 = vpop.eup %2014 }
 0x70e   : > { %v1111_v24 = vmul.f32 %v2015_v5, %v2013_v21  ;;  %v1993_v21 = vld [vmem:[%s2437_s9 + $0x38] sm:$0xff]   ;;  %v1996_v5 = vld [vmem:[%s2439_s11 + $0x10] sm:$0xff]  }
 0x710   : > { %v1112_v26 = vpack.c.bf16 %v1111_v24, %v1111_v24  ;;  %v1997_v24 = vld [vmem:[%s2439_s11 + $0x18] sm:$0xff]  }
 0x712   : > { %1873 = vmatmul.mubr.msk.bf16.vlgmr.msra.gmra.mrb[16].mxu1 %vm733_vm2, %v1112_v26  ;;  %v1999_v26 = vld [vmem:[%s2439_s11 + $0x28] sm:$0xff]  }
 0x713   : > { %1883 = vmatpush3.bf16.xpose.msra.mxu1 %v1218_v27  ;;  %1884 = vmatprep.mubr.msk.bf16.mxu1 %vm2032_vm0, %v2030_v1 }
 0x714   : > { %1894 = vmatprep.subr.bf16.mxu1 %v2030_v1 }
 0x71a   : > { %1885 = vmatmul.mubr.msk.bf16.vlgmr.msra.gmra.mrb[20].mxu1 %vm733_vm2, %v1211_v28 }
 0x71b   : > { %1896 = vmatprep.mubr.msk.bf16.mxu1 %vm2032_vm0, %v2030_v1 }
 0x7e5   : > { %v1155_v31 = vpop.f32.mrb[16].mxu1 }
 0x7e6   : > { %v1161_v32 = vpack.c.bf16 %v1155_v31, %v1155_v31  ;;  %v1874_v33 = vpop.f32.mrb[17].mxu1 }
 0x7e7   : > { %v1158_v34 = vpop.f32.mrb[18].mxu1 }
 0x7e8   : > { %v1875_v35 = vpop.f32.mrb[19].mxu1  ;;  %1879 = vmatmul.mubr.msk.bf16.vlgmr.msra.gmra.mrb[20].mxu0 %vm733_vm2, %v1161_v32 }
 0x7e9   : > { %1890 = vmatprep.mubr.msk.bf16.mxu0 %vm2032_vm0, %v2030_v1  ;;  %v1735_v35 = vld [vmem:[%s2435_s7] ss:$0 sm:$0xff] }
 0x7ed   : > { %v1254_v36 = vpop.f32.mrb[20].mxu1 }
 0x7ee   : > { %v1260_v37 = vmul.f32 0.35355338, %v1254_v36  ;;  %v1886_v38 = vpop.f32.mrb[21].mxu1 }
 0x7ef   : > { %v1257_v39 = vpop.f32.mrb[22].mxu1 }
 0x7f0   : > { %v1887_v40 = vpop.f32.mrb[23].mxu1  ;;  %v1261_v41 = vsel %vm733_vm2, %v1260_v37, -inf }
 0x7f1   : > { %1262 = vmax.xlane.f32.xlu0 %v1261_v41  ;;  %v2000_v41 = vld [vmem:[%s2439_s11 + $0x30] sm:$0xff]  }
 0x807   : > { %1273 = vrot.lane.b32.xlu0 %v2225_v60, %s2035_s18  ;;  %v1327_v60 = vsel %vm796_vm1, %v1322_v50, 0 }
 0x808   : > { %1895 = vmatpush3.bf16.msra.mxu1 %v1327_v60 }
 0x809   : > { %1920 = vmatprep.subr.bf16.mxu1 %v2030_v1 }
 0x87e   : > { %v1263_v42 = vpop.xlane.xlu0 %1262 }
 0x87f   : > { %v1264_v43 = vsub.f32 %v1260_v37, %v1263_v42  ;;  %v1736_v37 = vld [vmem:[%s2436_s8] ss:$0 sm:$0xff]  ;;  %v2001_v42 = vld [vmem:[%s2439_s11 + $0x38] sm:$0xff]  }
 0x881   : > { %v1265_v44 = vmul.f32 1.442695, %v1264_v43  ;;  %v1737_v43 = vld [vmem:[%s2438_s10] ss:$0 sm:$0xff] }
 0x882   : > { %v1274_v45 = vpop.permute.xlu0 %1273 }
 0x883   : > { %2016 = vpow2.f32 %v1265_v44  ;;  %v1279_v46 = vsel %vm796_vm1, %v1274_v45, 0 }
 0x884   : > { %1889 = vmatpush3.bf16.msra.mxu0 %v1279_v46 }
 0x885   : > { %1900 = vmatprep.subr.bf16.mxu0 %v2030_v1 }
 0x88d   : > { %v2017_v47 = vpop.eup %2016 }
 0x88e   : > { %v1267_v48 = vsel %vm733_vm2, %v2017_v47, 0.0 }
 0x88f   : > { %1268 = vadd.xlane.f32.xlu1 %v1267_v48 }
 0x8bb   : > { %v1203_v51 = vpop.f32.mrb[20].mxu0 }
 0x8bc   : > { %v1209_v52 = vadd.f32 %v1203_v51, %v2289_v6  ;;  %v1880_v53 = vpop.f32.mrb[21].mxu0  ;;  %v1986_v6 = vld [vmem:[%s2437_s9] sm:$0xff]  }
 0x8bd   : > { %v1206_v54 = vpop.f32.mrb[22].mxu0 }
 0x8be   : > { %v1881_v55 = vpop.f32.mrb[23].mxu0 }
 0x91c   : > { %v1269_v56 = vpop.xlane.xlu1 %1268 }
 0x91d   : > { %2018 = vrcp.f32 %v1269_v56 }
 0x927   : > { %v2019_v57 = vpop.eup %2018 }
 0x928   : > { %v1271_v58 = vmul.f32 %v2019_v57, %v2017_v47 }
 0x92a   : > { %v1272_v59 = vpack.c.bf16 %v1271_v58, %v1271_v58 }
 0x92c   : > { %1891 = vmatmul.mubr.msk.bf16.vlgmr.msra.gmra.mrb[24].mxu0 %vm733_vm2, %v1272_v59 }
 0x92d   : > { %1916 = vmatprep.mubr.msk.bf16.mxu0 %vm2032_vm0, %v2030_v1  ;;  %1901 = vmatpush3.bf16.msra.mxu0 %v1986_v6 }
 0x92e   : > { %1902 = vmatprep.subr.bf16.mxu0 %v2030_v1 }
 0x931   : > { %1903 = vmatpush3.bf16.msra.mxu0 %v1987_v16 }
 0x932   : > { %1904 = vmatprep.subr.bf16.mxu0 %v2030_v1 }
 0x9ff   : > { %v1315_v61 = vpop.f32.mrb[24].mxu0 }
 0xa00   : > { %v1321_v62 = vpack.c.bf16 %v1315_v61, %v1315_v61  ;;  %v1892_v63 = vpop.f32.mrb[25].mxu0 }
 0xa01   : > { %v1318_v2 = vpop.f32.mrb[26].mxu0 }
 0xa02   : > { %v1893_v3 = vpop.f32.mrb[27].mxu0  ;;  %1897 = vmatmul.mubr.msk.bf16.vlgmr.msra.gmra.mrb[24].mxu1 %vm733_vm2, %v1321_v62 }
 0xa03   : > { %1936 = vmatprep.mubr.msk.bf16.mxu1 %vm2032_vm0, %v2030_v1  ;;  %1921 = vmatpush3.bf16.msra.mxu1 %v1994_v22 }
 0xa04   : > { %1922 = vmatprep.subr.bf16.mxu1 %v2030_v1 }
 0xa07   : > { %1923 = vmatpush3.bf16.msra.mxu1 %v1995_v23 }
 0xa08   : > { %1924 = vmatprep.subr.bf16.mxu1 %v2030_v1 }
 0xa0b   : > { %1925 = vmatpush3.bf16.msra.mxu1 %v1996_v5 }
 0xa0c   : > { %1926 = vmatprep.subr.bf16.mxu1 %v2030_v1 }
 0xa0f   : > { %1927 = vmatpush3.bf16.msra.mxu1 %v1997_v24 }
 0xa10   : > { %1928 = vmatprep.subr.bf16.mxu1 %v2030_v1 }
 0xa13   : > { %1929 = vmatpush3.bf16.msra.mxu1 %v1998_v25 }
 0xa14   : > { %1930 = vmatprep.subr.bf16.mxu1 %v2030_v1 }
 0xa17   : > { %1931 = vmatpush3.bf16.msra.mxu1 %v1999_v26 }
 0xa18   : > { %1932 = vmatprep.subr.bf16.mxu1 %v2030_v1 }
 0xa1b   : > { %1933 = vmatpush3.bf16.msra.mxu1 %v2000_v41 }
 0xa1c   : > { %1934 = vmatprep.subr.bf16.mxu1 %v2030_v1 }
 0xa1f   : > { %1935 = vmatpush3.bf16.msra.mxu1 %v2001_v42 }
 0xad5   : > { %v1363_v7 = vpop.f32.mrb[24].mxu1 }
 0xad6   : > { %v1369_v8 = vadd.f32 %v1363_v7, %v1209_v52  ;;  %v1898_v9 = vpop.f32.mrb[25].mxu1 }
 0xad7   : > { %v1366_v11 = vpop.f32.mrb[26].mxu1 }
 0xad8   : > { %v1370_v12 = vadd.f32 %v1369_v8, %v2133_v4  ;;  %v1899_v13 = vpop.f32.mrb[27].mxu1  ;;  %v1988_v4 = vld [vmem:[%s2437_s9 + $0x10] sm:$0xff]  }
 0xad9   : > { %1905 = vmatpush3.bf16.msra.mxu0 %v1988_v4 }
 0xada   : > { %v2343_v14 = vadd.f32 %v1734_v10, %v1370_v12  ;;  %1906 = vmatprep.subr.bf16.mxu0 %v2030_v1 }
 0xadc   : > { %1381 = vadd.xlane.f32.xlu1 %v2343_v14  ;;  %v1384_v15 = vmul.f32 %v2343_v14, %v2343_v14 }
 0xadd   : > { %1907 = vmatpush3.bf16.msra.mxu0 %v1989_v17 }
 0xade   : > { %1908 = vmatprep.subr.bf16.mxu0 %v2030_v1 }
 0xae0   : > { %1385 = vadd.xlane.f32.xlu1 %v1384_v15 }
 0xae1   : > { %1909 = vmatpush3.bf16.msra.mxu0 %v1990_v18 }
 0xae2   : > { %1910 = vmatprep.subr.bf16.mxu0 %v2030_v1 }
 0xae5   : > { %1911 = vmatpush3.bf16.msra.mxu0 %v1991_v19 }
 0xae6   : > { %1912 = vmatprep.subr.bf16.mxu0 %v2030_v1 }
 0xae9   : > { %1913 = vmatpush3.bf16.msra.mxu0 %v1992_v20 }
 0xaea   : > { %1914 = vmatprep.subr.bf16.mxu0 %v2030_v1  ;;  %v1754_v1 = vld [vmem:[%s2440_s12] ss:$0 sm:$0xff] }
 0xaed   : > { %1915 = vmatpush3.bf16.msra.mxu0 %v1993_v21 }
 0xb69   : > { %v1382_v27 = vpop.xlane.xlu1 %1381 }
 0xb6a   : > { %v1383_v28 = vmul.f32 0.03125, %v1382_v27 }
 0xb6c   : > { %v1388_v29 = vmul.f32 %v1383_v28, %v1383_v28  ;;  %v1390_v33 = vsub.f32 %v2343_v14, %v1383_v28 }
 0xb6d   : > { %v1386_v0 = vpop.xlane.xlu1 %1385 }
 0xb6e   : > { %v1387_v30 = vmul.f32 0.03125, %v1386_v0 }
 0xb70   : > { %v1389_v31 = vsub.f32 %v1387_v30, %v1388_v29 }
 0xb72   : > { %v1391_v32 = vadd.f32 1e-05, %v1389_v31 }
 0xb74   : > { %2020 = vrsqrt.f32 %v1391_v32 }
 0xb7e   : > { %v2021_v34 = vpop.eup %2020 }
 0xb7f   : > { %v1393_v36 = vmul.f32 %v2021_v34, %v1390_v33 }
 0xb81   : > { %v1400_v38 = vmul.f32 %v1735_v35, %v1393_v36 }
 0xb83   : > { %v1407_v39 = vadd.f32 %v1736_v37, %v1400_v38 }
 0xb85   : > { %v1408_v40 = vpack.c.bf16 %v1407_v39, %v1407_v39 }
 0xb87   : > { %1917 = vmatmul.mubr.bf16.vlgmr.msra.gmra.mrb[28].mxu0 %v1408_v40 }
 0xc5a   : > { %v1514_v44 = vpop.f32.mrb[28].mxu0 }
 0xc5b   : > { %v1515_v45 = vadd.f32 %v1737_v43, %v1514_v44  ;;  %v1918_v46 = vpop.f32.mrb[29].mxu0 }
 0xc5c   : > { %v1517_v47 = vpop.f32.mrb[30].mxu0 }
 0xc5d   : > { %v1520_v48 = vmax.f32 %v1515_v45, 0.0  ;;  %v1919_v49 = vpop.f32.mrb[31].mxu0 }
 0xc5f   : > { %v1521_v50 = vpack.c.bf16 %v1520_v48, %v1520_v48 }
 0xc61   : > { %1937 = vmatmul.mubr.bf16.vlgmr.msra.gmra.mrb[28].mxu1 %v1521_v50 }
 0xd34   : > { %v1620_v60 = vpop.f32.mrb[28].mxu1 }
 0xd35   : > { %v1626_v51 = vadd.f32 %v1620_v60, %v2343_v14  ;;  %v1938_v52 = vpop.f32.mrb[29].mxu1 }
 0xd36   : > { %v1623_v53 = vpop.f32.mrb[30].mxu1 }
 0xd37   : > { %v1634_v54 = vadd.f32 %v1754_v1, %v1626_v51  ;;  %v1939_v55 = vpop.f32.mrb[31].mxu1 }
 0xd39   : > { %1635 = vst [vmem:[%s435_s27] sm:$0xff] %v1634_v54 }
 0xd3a PF: > { %s23_s25 = sadd.s32 1, %s2028_s25  }
 0xd3b   : > { %p20_p4 = scmp.ge.s32.totalorder %s23_s25, 4  }
 0xd3d   :  { %22 = sbr.rel (!%p20_p4) target bundleno = 1 (0x1), region = 102 }

// kernel: transformer_forward.6
= control target key start
LH: loop header
LB: loop body
LE: loop exit
PB: predicated region body
PF: predicated region fallthrough
CT: control target
= control target key end

     0   :  { %18 = vsyncpa [#allocation3], 0  ;;  %s2638_s0 = inlined_call_operand.vmem [shape: f32[2,8,128], index: 0, kind: input, shape index: {}]   ;;  %s2639_s1 = inlined_call_operand.vmem [shape: f32[1,128], index: 1, kind: input, shape index: {}]   ;;  %s2640_s2 = inlined_call_operand.vmem [shape: f32[1,128], index: 2, kind: input, shape index: {}]   ;;  %s2641_s3 = inlined_call_operand.vmem [shape: bf16[128,384], index: 3, kind: input, shape index: {}]   ;;  %s2642_s4 = inlined_call_operand.vmem [shape: f32[1,384], index: 4, kind: input, shape index: {}]   ;;  %s2643_s5 = inlined_call_operand.vmem [shape: f32[128,128], index: 5, kind: input, shape index: {}]   ;;  %s2644_s6 = inlined_call_operand.vmem [shape: f32[1,128], index: 6, kind: input, shape index: {}]   ;;  %s2645_s7 = inlined_call_operand.vmem [shape: f32[1,128], index: 7, kind: input, shape index: {}]   ;;  %s2646_s8 = inlined_call_operand.hbm [shape: f32[1,128], index: 8, kind: input, shape index: {}]   ;;  %s2647_s9 = inlined_call_operand.vmem [shape: bf16[128,128], index: 9, kind: input, shape index: {}]   ;;  %s2648_s10 = inlined_call_operand.hbm [shape: f32[1,128], index: 10, kind: input, shape index: {}]   ;;  %s2649_s11 = inlined_call_operand.vmem [shape: bf16[128,128], index: 11, kind: input, shape index: {}]   ;;  %s2650_s12 = inlined_call_operand.vmem [shape: f32[1,128], index: 12, kind: input, shape index: {}]   ;;  %s2651_s13 = inlined_call_operand.vmem [shape: f32[2,8,128], index: 13, kind: output, shape index: {}]  }
   0x1   :  { %19 = vsyncpa [#allocation5], 0  ;;  %s2245_s25 = smov 0  }
   0x2 LB: > { %s2251_s26 = sadd.s32 4294967295, %s2165_s25   ;;  %p1739_p0 = scmp.ge.s32.totalorder %s2165_s25, 1  ;;  %s2165_s25 = sphi %s2245_s25, %s25_s25  }
   0x3   : > { %p334_p1 = scmp.lt.s32.totalorder %s2165_s25, 3  ;;  %p2652_p2 = scmp.eq.s32.totalorder %s2251_s26, 0 }
   0x4   : > { %s2167_s28 = smov [#allocation2]   ;;  %s2168_s30 = smov [#allocation4]  }
   0x5   : > { %p2256_p3 = pnand %p1739_p0, %p334_p1  ;;  %s368_s29 = sshll.u32 %s2167_s28, 4  ;;  %s369_s29 = int_to_ptr.vmem [resolvable:$true] %s368_s29 }
   0x6   : > { %s382_s14 = sshll.u32 %s2168_s30, 4  ;;  %s2095_s18 = scalar_lea.hbm %s2646_s8, 16  ;;  %s2268_s14 = int_to_ptr.vmem [resolvable:$true] %s382_s14 }
   0x7   : > { %s2654_s27 = scalar_select %p2256_p3, 1, 0 }
   0x8   : > { %p2000_p4 = pneg %p2256_p3  ;;  %p2096_p6 = scmp.ne.s32.totalorder %s2646_s8, %s2095_s18 }
   0x9   : > { %p2102_p10 = scmp.lt.u32.totalorder %s2095_s18, %s2646_s8 }
   0xa   : > { %p2264_p5 = pnand %p2652_p2, %p2000_p4 }
   0xc   : > { %p2097_p7 = pneg %p2264_p5 }
   0xe   : > { %p2098_p8 = pnand %p2097_p7, %p2096_p6 }
  0x10   : > { %p2099_p9 = pneg %p2098_p8 }
  0x12   : > { %p2104_p11 = pnand %p2102_p10, %p2099_p9 }
  0x14   : > { %2107 = shalt.err (!%p2104_p11)
}
  0x15   : > { %s2108_s23 = scalar_lea.vmem %s369_s29, 16  ;;  %s2115_s24 = scalar_lea.vmem %s369_s29, 32 }
  0x16   : > { %p2109_p12 = scmp.ne.s32.totalorder %s369_s29, %s2108_s23  ;;  %p2116_p1 = scmp.lt.s32.totalorder %s369_s29, %s369_s29 }
  0x17   : > { %p2117_p4 = scmp.lt.s32.totalorder %s2115_s24, %s2108_s23 }
  0x18   : > { %p2111_p13 = pnand %p2109_p12, %p2097_p7 }
  0x19   : > { %p2118_p2 = por %p2117_p4, %p2116_p1 }
  0x1a   : > { %p2112_p0 = pneg %p2111_p13 }
  0x1c   : > { %p2119_p3 = pnand %p2118_p2, %p2112_p0 }
  0x1e   : > { %2122 = shalt.err (!%p2119_p3)
}
  0x1f   : > { %2003 = dma.hbm_to_vmem [thread:$0]  (!%p2264_p5), %s2646_s8, 16, %s369_s29, [#allocation3]  }
  0x20   : > { %s2123_s18 = scalar_lea.hbm %s2648_s10, 16 }
  0x21   : > { %p2124_p6 = scmp.ne.s32.totalorder %s2648_s10, %s2123_s18  ;;  %p2130_p3 = scmp.lt.u32.totalorder %s2123_s18, %s2648_s10 }
  0x23   : > { %p2126_p8 = pnand %p2124_p6, %p2097_p7 }
  0x25   : > { %p2127_p2 = pneg %p2126_p8 }
  0x27   : > { %p2132_p9 = pnand %p2130_p3, %p2127_p2 }
  0x29   : > { %2135 = shalt.err (!%p2132_p9)
}
  0x2a   : > { %s2136_s29 = scalar_lea.vmem %s2268_s14, 16  ;;  %s2143_s23 = scalar_lea.vmem %s2268_s14, 32 }
  0x2b   : > { %p2137_p10 = scmp.ne.s32.totalorder %s2268_s14, %s2136_s29  ;;  %p2144_p13 = scmp.lt.s32.totalorder %s2268_s14, %s2268_s14 }
  0x2c   : > { %p2145_p0 = scmp.lt.s32.totalorder %s2143_s23, %s2136_s29 }
  0x2d   : > { %p2139_p11 = pnand %p2137_p10, %p2097_p7 }
  0x2e   : > { %p2146_p1 = por %p2145_p0, %p2144_p13 }
  0x2f   : > { %p2140_p12 = pneg %p2139_p11 }
  0x31   : > { %p2147_p4 = pnand %p2146_p1, %p2140_p12 }
  0x33   : > { %2150 = shalt.err (!%p2147_p4)
}
  0x34   : > { %2006 = dma.hbm_to_vmem [thread:$0]  (!%p2264_p5), %s2648_s10, 16, %s2268_s14, [#allocation5]  }
  0x35   : > { %p2656_p6 = scmp.ne.s32.totalorder %s2654_s27, 0 }
  0x36   : > { %p2657_p7 = scmp.eq.s32.totalorder (!%p2656_p6), %s2251_s26, 0 }
  0x37   : > { %408 = sbr.rel (%p2656_p6) target bundleno = 3441 (0xd71), region = 72 }
  0x3e   : > { %2156 = dma.done.wait (%p2657_p7), [#allocation3], 16   ;;  %p2658_p8 = pmov %p2657_p7 }
  0x3f   : > { %p2659_p2 = pmov %p2657_p7 }
  0x40   : > { %2158 = vsyncadd (%p2658_p8), [#allocation3], 4294967280 }
  0x41   : > { %2160 = dma.done.wait (%p2659_p2), [#allocation5], 16   ;;  %p2660_p3 = pmov %p2659_p2 }
  0x42   : > { %p454_p9 = scmp.lt.s32.totalorder %s2251_s26, 1  ;;  %v2169_v0 = vmov 0.0   ;;  %v2027_v3 = vld [vmem:[%s2641_s3 + $0x4] ss:$12 sps:$4 sm:$0xff]   ;;  %v2029_v4 = vld [vmem:[%s2641_s3] ss:$12 sps:$4 sm:$0xff]   ;;  %v528_v43 = vlaneseq }
  0x43   : > { %2162 = vsyncadd (%p2660_p3), [#allocation5], 4294967280  ;;  %1860 = vmatprep.subr.bf16.mxu1 %v2169_v0  ;;  %v2030_v5 = vld [vmem:[%s2641_s3 + $0x8] ss:$12 sps:$4 sm:$0xff]   ;;  %671 = vmatprep.subr.bf16.mxu0 %v2027_v3  ;;  %v2033_v7 = vld [vmem:[%s2641_s3 + $0x18] ss:$12 sps:$4 sm:$0xff]  }
  0x44   : > { %s2662_s26 = smov (!%p454_p9, %s2251_s26), 1  ;;  %672 = vmatpush1.bf16.msra.mxu0 %v2029_v4  ;;  %1861 = vmatpush3.bf16.msra.mxu1 %v2030_v5  ;;  %v2031_v6 = vld [vmem:[%s2641_s3 + $0x1c] ss:$12 sps:$4 sm:$0xff]   ;;  %v2034_v8 = vld [vmem:[%s2641_s3 + $0x20] ss:$12 sps:$4 sm:$0xff]   ;;  %v2170_v22 = vmov 0  }
  0x45   : > { %s1746_s27 = sshll.u32 %s2662_s26, 3  ;;  %1862 = vmatprep.subr.bf16.mxu1 %v2169_v0  ;;  %673 = vmatprep.subr.bf16.mxu0 %v2031_v6  ;;  %v2035_v9 = vld [vmem:[%s2641_s3 + $0x34] ss:$12 sps:$4 sm:$0xff]   ;;  %v2037_v10 = vld [vmem:[%s2641_s3 + $0x30] ss:$12 sps:$4 sm:$0xff]   ;;  %vm2171_vm0 = vmmov 0  }
  0x46   : > { %s457_s30 = scalar_lea.vmem %s2638_s0, %s1746_s27  ;;  %v2038_v11 = vld [vmem:[%s2641_s3 + $0x38] ss:$12 sps:$4 sm:$0xff]   ;;  %v2041_v13 = vld [vmem:[%s2641_s3 + $0x48] ss:$12 sps:$4 sm:$0xff]   ;;  %v2042_v14 = vld [vmem:[%s2641_s3 + $0x50] ss:$12 sps:$4 sm:$0xff]   ;;  %703 = vmatprep.mubr.bf16.mxu0 %v2170_v22  ;;  %1876 = vmatprep.mubr.msk.bf16.mxu1 %vm2171_vm0, %v2169_v0  ;;  %s461_s29 = scalar_lea.vmem %s2651_s13, %s1746_s27 }
  0x47   : > { %v2339_v1 = vld [vmem:[%s457_s30] sm:$0xff]  ;;  %v2039_v12 = vld [vmem:[%s2641_s3 + $0x4c] ss:$12 sps:$4 sm:$0xff]   ;;  %v2046_v17 = vld [vmem:[%s2641_s3 + $0x68] ss:$12 sps:$4 sm:$0xff]   ;;  %v529_v44 = vshrl.u32 %v528_v43, 7 }
  0x48   : > { %466 = vadd.xlane.f32.xlu0 %v2339_v1  ;;  %v469_v2 = vmul.f32 %v2339_v1, %v2339_v1  ;;  %674 = vmatpush1.bf16.msra.mxu0 %v2033_v7  ;;  %v2043_v15 = vld [vmem:[%s2641_s3 + $0x64] ss:$12 sps:$4 sm:$0xff]   ;;  %v2045_v16 = vld [vmem:[%s2641_s3 + $0x60] ss:$12 sps:$4 sm:$0xff]   ;;  %v2047_v18 = vld [vmem:[%s2641_s3 + $0x7c] ss:$12 sps:$4 sm:$0xff]  }
  0x49   : > { %1863 = vmatpush3.bf16.msra.mxu1 %v2034_v8  ;;  %675 = vmatprep.subr.bf16.mxu0 %v2035_v9  ;;  %v2049_v19 = vld [vmem:[%s2641_s3 + $0x78] ss:$12 sps:$4 sm:$0xff]   ;;  %v2050_v20 = vld [vmem:[%s2641_s3 + $0x80] ss:$12 sps:$4 sm:$0xff]   ;;  %v2053_v23 = vld [vmem:[%s2641_s3 + $0x90] ss:$12 sps:$4 sm:$0xff]  }
  0x4a   : > { %1864 = vmatprep.subr.bf16.mxu1 %v2169_v0  ;;  %v2051_v21 = vld [vmem:[%s2641_s3 + $0x94] ss:$12 sps:$4 sm:$0xff]   ;;  %v2054_v24 = vld [vmem:[%s2641_s3 + $0x98] ss:$12 sps:$4 sm:$0xff]   ;;  %v2058_v27 = vld [vmem:[%s2641_s3 + $0xb0] ss:$12 sps:$4 sm:$0xff]  }
  0x4b   : > { %v2055_v25 = vld [vmem:[%s2641_s3 + $0xac] ss:$12 sps:$4 sm:$0xff]   ;;  %v2057_v26 = vld [vmem:[%s2641_s3 + $0xa8] ss:$12 sps:$4 sm:$0xff]   ;;  %v1748_v37 = vld [vmem:[%s2639_s1] ss:$0 sm:$0xff] }
  0x4c   : > { %470 = vadd.xlane.f32.xlu0 %v469_v2  ;;  %676 = vmatpush1.bf16.msra.mxu0 %v2037_v10  ;;  %v1749_v39 = vld [vmem:[%s2640_s2] ss:$0 sm:$0xff]  ;;  %v538_v45 = vsub.s32 2, %v529_v44  ;;  %v534_v47 = vsub.s32 1, %v529_v44  ;;  %v530_v48 = vsub.s32 0, %v529_v44  ;;  %vm822_vm1 = vcmask 1043456  }
  0x4d   : > { %1865 = vmatpush3.bf16.msra.mxu1 %v2038_v11  ;;  %677 = vmatprep.subr.bf16.mxu0 %v2039_v12  ;;  %v526_v46 = vld [vmem:[%s2642_s4] sm:$0x7]  ;;  %vm759_vm2 = vcmask 64512   ;;  %s2172_s15 = smov 120   ;;  %s2173_s30 = smov 112  }
  0x4e   : > { %1866 = vmatprep.subr.bf16.mxu1 %v2169_v0  ;;  %v539_v49 = vrot.slane %v526_v46, %v538_v45  ;;  %v535_v50 = vrot.slane %v526_v46, %v534_v47  ;;  %v531_v51 = vrot.slane %v526_v46, %v530_v48  ;;  %s2174_s20 = smov 104  }
  0x50   : > { %678 = vmatpush1.bf16.msra.mxu0 %v2041_v13 }
  0x51   : > { %1867 = vmatpush3.bf16.msra.mxu1 %v2042_v14  ;;  %679 = vmatprep.subr.bf16.mxu0 %v2043_v15 }
  0x52   : > { %1868 = vmatprep.subr.bf16.mxu1 %v2169_v0 }
  0x54   : > { %680 = vmatpush1.bf16.msra.mxu0 %v2045_v16 }
  0x55   : > { %1869 = vmatpush3.bf16.msra.mxu1 %v2046_v17  ;;  %681 = vmatprep.subr.bf16.mxu0 %v2047_v18 }
  0x56   : > { %1870 = vmatprep.subr.bf16.mxu1 %v2169_v0 }
  0x58   : > { %682 = vmatpush1.bf16.msra.mxu0 %v2049_v19 }
  0x59   : > { %1871 = vmatpush3.bf16.msra.mxu1 %v2050_v20  ;;  %683 = vmatprep.subr.bf16.mxu0 %v2051_v21 }
  0x5a   : > { %1872 = vmatprep.subr.bf16.mxu1 %v2169_v0 }
  0x5c   : > { %684 = vmatpush1.bf16.msra.mxu0 %v2053_v23 }
  0x5d   : > { %1873 = vmatpush3.bf16.msra.mxu1 %v2054_v24  ;;  %685 = vmatprep.subr.bf16.mxu0 %v2055_v25 }
  0x5e   : > { %1874 = vmatprep.subr.bf16.mxu1 %v2169_v0 }
  0x60   : > { %686 = vmatpush1.bf16.msra.mxu0 %v2057_v26 }
  0x61   : > { %1875 = vmatpush3.bf16.msra.mxu1 %v2058_v27  ;;  %1880 = vmatprep.subr.bf16.mxu0 %v2169_v0 }
  0x62   : > { %1886 = vmatprep.subr.bf16.mxu1 %v2169_v0 }
  0xd5   : > { %v467_v28 = vpop.xlane.xlu0 %466 }
  0xd6   : > { %v468_v29 = vmul.f32 0.03125, %v467_v28 }
  0xd8   : > { %v473_v31 = vmul.f32 %v468_v29, %v468_v29  ;;  %v475_v35 = vsub.f32 %v2339_v1, %v468_v29 }
  0xd9   : > { %v471_v30 = vpop.xlane.xlu0 %470 }
  0xda   : > { %v472_v32 = vmul.f32 0.03125, %v471_v30 }
  0xdc   : > { %v474_v33 = vsub.f32 %v472_v32, %v473_v31 }
  0xde   : > { %v476_v34 = vadd.f32 1e-05, %v474_v33 }
  0xe0   : > { %2075 = vrsqrt.f32 %v476_v34 }
  0xea   : > { %v2076_v36 = vpop.eup %2075 }
  0xeb   : > { %v478_v38 = vmul.f32 %v2076_v36, %v475_v35  ;;  %v753_v35 = vld [vmem:[%s2643_s5 + $0x8] sm:$0xff] }
  0xec   : > { %v983_v36 = vpack.c.bf16 %v753_v35, %v753_v35 }
  0xed   : > { %v485_v40 = vmul.f32 %v1748_v37, %v478_v38 }
  0xee   : > { %v988_v37 = vsel %vm822_vm1, %v983_v36, 0 }
  0xef   : > { %v492_v41 = vadd.f32 %v1749_v39, %v485_v40 }
  0xf1   : > { %v493_v42 = vpack.c.bf16 %v492_v41, %v492_v41  ;;  %v752_v41 = vld [vmem:[%s2643_s5] sm:$0xff] }
  0xf3   : > { %704 = vmatmul.mubr.bf16.vlgmr.msra.gmra.mrb[0].mxu0 %v493_v42  ;;  %1877 = vmatmul.mubr.bf16.vlgmr.msra.gmra.mrb[0].mxu1 %v493_v42  ;;  %v867_v42 = vpack.c.bf16 %v752_v41, %v752_v41 }
  0xf4   : > { %1882 = vmatprep.mubr.msk.bf16.mxu0 %vm2171_vm0, %v2169_v0  ;;  %1888 = vmatprep.mubr.msk.bf16.mxu1 %vm2171_vm0, %v2169_v0 }
  0xf5   : > { %v1034_v46 = vsel %vm822_vm1, %v867_v42, 0 }
 0x1c6   : > { %v705_v52 = vpop.f32.mrb[0].mxu0  ;;  %v746_v53 = vpop.f32.mrb[0].mxu1 }
 0x1c7   : > { %v747_v54 = vadd.f32 %v746_v53, %v539_v49  ;;  %v707_v55 = vpop.f32.mrb[1].mxu0  ;;  %v1878_v56 = vpop.f32.mrb[1].mxu1  ;;  %v706_v63 = vadd.f32 %v705_v52, %v531_v51 }
 0x1c8   : > { %v708_v57 = vadd.f32 %v707_v55, %v535_v50  ;;  %v709_v58 = vpop.f32.mrb[2].mxu0  ;;  %v749_v59 = vpop.f32.mrb[2].mxu1 }
 0x1c9   : > { %v2441_v60 = vpack.c.bf16 %v747_v54, %v747_v54  ;;  %v710_v61 = vpop.f32.mrb[3].mxu0  ;;  %v1879_v62 = vpop.f32.mrb[3].mxu1  ;;  %v2452_v5 = vpack.c.bf16 %v706_v63, %v706_v63 }
 0x1ca   : > { %v2443_v2 = vpack.c.bf16 %v708_v57, %v708_v57 }
 0x1cb   : > { %v824_v3 = vsel %vm822_vm1, %v2441_v60, 0 }
 0x1cc   : > { %1887 = vmatpush3.bf16.msra.mxu1 %v824_v3  ;;  %872 = vrot.lane.b32.xlu1 %v2443_v2, %s2172_s15  ;;  %v764_v4 = vsel %vm759_vm2, %v2443_v2, 0 }
 0x1cd   : > { %1881 = vmatpush3.bf16.xpose.msra.mxu0 %v764_v4  ;;  %1898 = vmatprep.subr.bf16.mxu1 %v2169_v0 }
 0x1ce   : > { %1892 = vmatprep.subr.bf16.mxu0 %v2169_v0 }
 0x1d0   : > { %869 = vrot.lane.b32.xlu1 %v2452_v5, %s2172_s15 }
 0x1d4   : > { %1883 = vmatmul.mubr.msk.bf16.vlgmr.msra.gmra.mrb[4].mxu0 %vm759_vm2, %v2452_v5 }
 0x1d5   : > { %1894 = vmatprep.mubr.msk.bf16.mxu0 %vm2171_vm0, %v2169_v0 }
 0x23e   : > { %v873_v6 = vpop.permute.xlu1 %872 }
 0x23f   : > { %v878_v7 = vsel %vm759_vm2, %v873_v6, 0 }
 0x240   : > { %1893 = vmatpush3.bf16.xpose.msra.mxu0 %v878_v7 }
 0x241   : > { %1904 = vmatprep.subr.bf16.mxu0 %v2169_v0 }
 0x242   : > { %v870_v8 = vpop.permute.xlu1 %869 }
 0x247   : > { %1895 = vmatmul.mubr.msk.bf16.vlgmr.msra.gmra.mrb[8].mxu0 %vm759_vm2, %v870_v8 }
 0x248   : > { %1906 = vmatprep.mubr.msk.bf16.mxu0 %vm2171_vm0, %v2169_v0  ;;  %1905 = vmatpush3.bf16.msra.mxu0 %v988_v37 }
 0x249   : > { %1916 = vmatprep.subr.bf16.mxu0 %v2169_v0 }
 0x2a7   : > { %v800_v9 = vpop.f32.mrb[4].mxu0 }
 0x2a8   : > { %v806_v10 = vmul.f32 0.35355338, %v800_v9  ;;  %v1884_v11 = vpop.f32.mrb[5].mxu0 }
 0x2a9   : > { %v803_v12 = vpop.f32.mrb[6].mxu0 }
 0x2aa   : > { %v1885_v13 = vpop.f32.mrb[7].mxu0  ;;  %v807_v14 = vsel %vm759_vm2, %v806_v10, -inf }
 0x2ab   : > { %808 = vmax.xlane.f32.xlu0 %v807_v14 }
 0x31a   : > { %v914_v15 = vpop.f32.mrb[8].mxu0 }
 0x31b   : > { %v920_v16 = vmul.f32 0.35355338, %v914_v15  ;;  %v1896_v17 = vpop.f32.mrb[9].mxu0 }
 0x31c   : > { %v917_v18 = vpop.f32.mrb[10].mxu0 }
 0x31d   : > { %v1897_v19 = vpop.f32.mrb[11].mxu0  ;;  %v921_v20 = vsel %vm759_vm2, %v920_v16, -inf }
 0x31e   : > { %922 = vmax.xlane.f32.xlu1 %v921_v20 }
 0x32f   : > { %1076 = vrot.lane.b32.xlu1 %v2452_v5, %s2173_s30 }
 0x338   : > { %v809_v21 = vpop.xlane.xlu0 %808 }
 0x339   : > { %v810_v22 = vsub.f32 %v806_v10, %v809_v21 }
 0x33b   : > { %v811_v23 = vmul.f32 1.442695, %v810_v22 }
 0x33d   : > { %2077 = vpow2.f32 %v811_v23 }
 0x347   : > { %v2078_v24 = vpop.eup %2077 }
 0x348   : > { %v813_v25 = vsel %vm759_vm2, %v2078_v24, 0.0 }
 0x349   : > { %814 = vadd.xlane.f32.xlu0 %v813_v25 }
 0x3ab   : > { %v923_v26 = vpop.xlane.xlu1 %922 }
 0x3ac   : > { %v924_v27 = vsub.f32 %v920_v16, %v923_v26 }
 0x3ae   : > { %v925_v28 = vmul.f32 1.442695, %v924_v27 }
 0x3af   : > { %v1077_v59 = vpop.permute.xlu1 %1076 }
 0x3b0   : > { %2079 = vpow2.f32 %v925_v28 }
 0x3ba   : > { %v2080_v29 = vpop.eup %2079 }
 0x3bb   : > { %v927_v30 = vsel %vm759_vm2, %v2080_v29, 0.0 }
 0x3bc   : > { %928 = vadd.xlane.f32.xlu0 %v927_v30 }
 0x3d2   : > { %934 = vrot.lane.b32.xlu0 %v2441_v60, %s2172_s15 }
 0x3d6   : > { %v815_v31 = vpop.xlane.xlu0 %814  ;;  %1078 = vrot.lane.b32.xlu0 %v2443_v2, %s2173_s30 }
 0x3d7   : > { %2081 = vrcp.f32 %v815_v31 }
 0x3e1   : > { %v2082_v32 = vpop.eup %2081 }
 0x3e2   : > { %v817_v33 = vmul.f32 %v2082_v32, %v2078_v24 }
 0x3e4   : > { %v818_v34 = vpack.c.bf16 %v817_v33, %v817_v33 }
 0x3e6   : > { %1889 = vmatmul.mubr.msk.bf16.vlgmr.msra.gmra.mrb[4].mxu1 %vm759_vm2, %v818_v34 }
 0x3e7   : > { %1900 = vmatprep.mubr.msk.bf16.mxu1 %vm2171_vm0, %v2169_v0 }
 0x449   : > { %v929_v38 = vpop.xlane.xlu0 %928 }
 0x44a   : > { %2083 = vrcp.f32 %v929_v38 }
 0x44d   : > { %v935_v39 = vpop.permute.xlu0 %934 }
 0x44e   : > { %v940_v40 = vsel %vm822_vm1, %v935_v39, 0 }
 0x44f   : > { %1899 = vmatpush3.bf16.msra.mxu1 %v940_v40 }
 0x450   : > { %1910 = vmatprep.subr.bf16.mxu1 %v2169_v0 }
 0x451   : > { %v1079_v52 = vpop.permute.xlu0 %1078 }
 0x452   : > { %v1084_v57 = vsel %vm759_vm2, %v1079_v52, 0 }
 0x454   : > { %v2084_v43 = vpop.eup %2083 }
 0x455   : > { %v931_v44 = vmul.f32 %v2084_v43, %v2080_v29 }
 0x457   : > { %v932_v45 = vpack.c.bf16 %v931_v44, %v931_v44 }
 0x459   : > { %1901 = vmatmul.mubr.msk.bf16.vlgmr.msra.gmra.mrb[8].mxu1 %vm759_vm2, %v932_v45 }
 0x45a   : > { %1911 = vmatpush3.bf16.msra.mxu1 %v1034_v46  ;;  %1912 = vmatprep.mubr.msk.bf16.mxu1 %vm2171_vm0, %v2169_v0 }
 0x45b   : > { %1922 = vmatprep.subr.bf16.mxu1 %v2169_v0 }
 0x4b9   : > { %v860_v47 = vpop.f32.mrb[4].mxu1 }
 0x4ba   : > { %v866_v48 = vpack.c.bf16 %v860_v47, %v860_v47  ;;  %v1890_v49 = vpop.f32.mrb[5].mxu1 }
 0x4bb   : > { %v863_v50 = vpop.f32.mrb[6].mxu1  ;;  %v755_v49 = vld [vmem:[%s2643_s5 + $0x18] sm:$0xff] }
 0x4bc   : > { %v1891_v51 = vpop.f32.mrb[7].mxu1  ;;  %1913 = vmatmul.mubr.msk.bf16.vlgmr.msra.gmra.mrb[12].mxu1 %vm759_vm2, %v866_v48  ;;  %v1348_v50 = vpack.c.bf16 %v755_v49, %v755_v49 }
 0x4bd   : > { %1924 = vmatprep.mubr.msk.bf16.mxu1 %vm2171_vm0, %v2169_v0 }
 0x52c   : > { %v976_v53 = vpop.f32.mrb[8].mxu1 }
 0x52d   : > { %v982_v54 = vpack.c.bf16 %v976_v53, %v976_v53  ;;  %v1902_v55 = vpop.f32.mrb[9].mxu1 }
 0x52e   : > { %v979_v56 = vpop.f32.mrb[10].mxu1 }
 0x52f   : > { %v1903_v58 = vpop.f32.mrb[11].mxu1  ;;  %1907 = vmatmul.mubr.msk.bf16.vlgmr.msra.gmra.mrb[12].mxu0 %vm759_vm2, %v982_v54 }
 0x530   : > { %1917 = vmatpush3.bf16.xpose.msra.mxu0 %v1084_v57  ;;  %1918 = vmatprep.mubr.msk.bf16.mxu0 %vm2171_vm0, %v2169_v0 }
 0x531   : > { %1928 = vmatprep.subr.bf16.mxu0 %v2169_v0 }
 0x537   : > { %1919 = vmatmul.mubr.msk.bf16.vlgmr.msra.gmra.mrb[16].mxu0 %vm759_vm2, %v1077_v59 }
 0x538   : > { %1930 = vmatprep.mubr.msk.bf16.mxu0 %vm2171_vm0, %v2169_v0 }
 0x58f   : > { %v1070_v61 = vpop.f32.mrb[12].mxu1 }
 0x590   : > { %v1914_v62 = vpop.f32.mrb[13].mxu1 }
 0x591   : > { %v1073_v63 = vpop.f32.mrb[14].mxu1 }
 0x592   : > { %v1915_v3 = vpop.f32.mrb[15].mxu1 }
 0x602   : > { %v1024_v4 = vpop.f32.mrb[12].mxu0 }
 0x603   : > { %v2505_v6 = vadd.f32 %v1070_v61, %v1024_v4  ;;  %v1908_v7 = vpop.f32.mrb[13].mxu0 }
 0x604   : > { %v1027_v8 = vpop.f32.mrb[14].mxu0 }
 0x605   : > { %v1909_v9 = vpop.f32.mrb[15].mxu0 }
 0x60a   : > { %v1120_v10 = vpop.f32.mrb[16].mxu0 }
 0x60b   : > { %v1126_v11 = vmul.f32 0.35355338, %v1120_v10  ;;  %v1920_v12 = vpop.f32.mrb[17].mxu0  ;;  %v1786_v10 = vld [vmem:[%s2644_s6] ss:$0 sm:$0xff] }
 0x60c   : > { %v1123_v13 = vpop.f32.mrb[18].mxu0 }
 0x60d   : > { %v1921_v14 = vpop.f32.mrb[19].mxu0  ;;  %v1127_v15 = vsel %vm759_vm2, %v1126_v11, -inf }
 0x60e   : > { %1128 = vmax.xlane.f32.xlu0 %v1127_v15 }
 0x624   : > { %1139 = vrot.lane.b32.xlu0 %v2441_v60, %s2173_s30 }
 0x628   : > { %1236 = vrot.lane.b32.xlu0 %v2452_v5, %s2174_s20 }
 0x69b   : > { %v1129_v16 = vpop.xlane.xlu0 %1128 }
 0x69c   : > { %v1130_v17 = vsub.f32 %v1126_v11, %v1129_v16  ;;  %v2060_v16 = vld [vmem:[%s2647_s9 + $0x8] sm:$0xff]  }
 0x69e   : > { %v1131_v18 = vmul.f32 1.442695, %v1130_v17  ;;  %v2062_v17 = vld [vmem:[%s2647_s9 + $0x18] sm:$0xff]  }
 0x69f   : > { %v1140_v19 = vpop.permute.xlu0 %1139 }
 0x6a0   : > { %2085 = vpow2.f32 %v1131_v18  ;;  %v1145_v20 = vsel %vm822_vm1, %v1140_v19, 0  ;;  %v2063_v18 = vld [vmem:[%s2647_s9 + $0x20] sm:$0xff]   ;;  %v2064_v19 = vld [vmem:[%s2647_s9 + $0x28] sm:$0xff]  }
 0x6a1   : > { %1923 = vmatpush3.bf16.msra.mxu1 %v1145_v20  ;;  %v2065_v20 = vld [vmem:[%s2647_s9 + $0x30] sm:$0xff]  }
 0x6a2   : > { %1934 = vmatprep.subr.bf16.mxu1 %v2169_v0 }
 0x6a3   : > { %v1237_v28 = vpop.permute.xlu0 %1236 }
 0x6aa   : > { %v2086_v21 = vpop.eup %2085 }
 0x6ab   : > { %v1133_v22 = vsel %vm759_vm2, %v2086_v21, 0.0 }
 0x6ac   : > { %1134 = vadd.xlane.f32.xlu1 %v1133_v22  ;;  %v2067_v22 = vld [vmem:[%s2649_s11] sm:$0xff]  }
 0x6bd   : > { %1238 = vrot.lane.b32.xlu1 %v2443_v2, %s2174_s20  ;;  %v754_v2 = vld [vmem:[%s2643_s5 + $0x10] sm:$0xff] }
 0x6be   : > { %v1188_v29 = vpack.c.bf16 %v754_v2, %v754_v2 }
 0x6c0   : > { %v1193_v30 = vsel %vm822_vm1, %v1188_v29, 0 }
 0x6c1   : > { %1929 = vmatpush3.bf16.msra.mxu0 %v1193_v30 }
 0x6c2   : > { %1940 = vmatprep.subr.bf16.mxu0 %v2169_v0 }
 0x739   : > { %v1135_v23 = vpop.xlane.xlu1 %1134 }
 0x73a   : > { %2087 = vrcp.f32 %v1135_v23  ;;  %v2068_v23 = vld [vmem:[%s2649_s11 + $0x8] sm:$0xff]  }
 0x73d   : > { %v1239_v25 = vpop.permute.xlu1 %1238 }
 0x73e   : > { %v1244_v27 = vsel %vm759_vm2, %v1239_v25, 0  ;;  %v2071_v25 = vld [vmem:[%s2649_s11 + $0x20] sm:$0xff]  }
 0x744   : > { %v2088_v5 = vpop.eup %2087 }
 0x745   : > { %v1137_v24 = vmul.f32 %v2088_v5, %v2086_v21  ;;  %v2066_v21 = vld [vmem:[%s2647_s9 + $0x38] sm:$0xff]   ;;  %v2069_v5 = vld [vmem:[%s2649_s11 + $0x10] sm:$0xff]  }
 0x747   : > { %v1138_v26 = vpack.c.bf16 %v1137_v24, %v1137_v24  ;;  %v2070_v24 = vld [vmem:[%s2649_s11 + $0x18] sm:$0xff]  }
 0x749   : > { %1925 = vmatmul.mubr.msk.bf16.vlgmr.msra.gmra.mrb[16].mxu1 %vm759_vm2, %v1138_v26  ;;  %v2072_v26 = vld [vmem:[%s2649_s11 + $0x28] sm:$0xff]  }
 0x74a   : > { %1935 = vmatpush3.bf16.xpose.msra.mxu1 %v1244_v27  ;;  %1936 = vmatprep.mubr.msk.bf16.mxu1 %vm2171_vm0, %v2169_v0 }
 0x74b   : > { %1946 = vmatprep.subr.bf16.mxu1 %v2169_v0 }
 0x751   : > { %1937 = vmatmul.mubr.msk.bf16.vlgmr.msra.gmra.mrb[20].mxu1 %vm759_vm2, %v1237_v28 }
 0x752   : > { %1948 = vmatprep.mubr.msk.bf16.mxu1 %vm2171_vm0, %v2169_v0 }
 0x81c   : > { %v1181_v31 = vpop.f32.mrb[16].mxu1 }
 0x81d   : > { %v1187_v32 = vpack.c.bf16 %v1181_v31, %v1181_v31  ;;  %v1926_v33 = vpop.f32.mrb[17].mxu1 }
 0x81e   : > { %v1184_v34 = vpop.f32.mrb[18].mxu1 }
 0x81f   : > { %v1927_v35 = vpop.f32.mrb[19].mxu1  ;;  %1931 = vmatmul.mubr.msk.bf16.vlgmr.msra.gmra.mrb[20].mxu0 %vm759_vm2, %v1187_v32 }
 0x820   : > { %1942 = vmatprep.mubr.msk.bf16.mxu0 %vm2171_vm0, %v2169_v0  ;;  %v1787_v35 = vld [vmem:[%s2645_s7] ss:$0 sm:$0xff] }
 0x824   : > { %v1280_v36 = vpop.f32.mrb[20].mxu1 }
 0x825   : > { %v1286_v37 = vmul.f32 0.35355338, %v1280_v36  ;;  %v1938_v38 = vpop.f32.mrb[21].mxu1 }
 0x826   : > { %v1283_v39 = vpop.f32.mrb[22].mxu1 }
 0x827   : > { %v1939_v40 = vpop.f32.mrb[23].mxu1  ;;  %v1287_v41 = vsel %vm759_vm2, %v1286_v37, -inf }
 0x828   : > { %1288 = vmax.xlane.f32.xlu0 %v1287_v41  ;;  %v2073_v41 = vld [vmem:[%s2649_s11 + $0x30] sm:$0xff]  }
 0x83e   : > { %1299 = vrot.lane.b32.xlu0 %v2441_v60, %s2174_s20  ;;  %v1353_v60 = vsel %vm822_vm1, %v1348_v50, 0 }
 0x83f   : > { %1947 = vmatpush3.bf16.msra.mxu1 %v1353_v60 }
 0x840   : > { %1972 = vmatprep.subr.bf16.mxu1 %v2169_v0 }
 0x8b5   : > { %v1289_v42 = vpop.xlane.xlu0 %1288 }
 0x8b6   : > { %v1290_v43 = vsub.f32 %v1286_v37, %v1289_v42  ;;  %v1788_v37 = vld [vmem:[#allocation2] ss:$0 sm:$0xff]  ;;  %v2074_v42 = vld [vmem:[%s2649_s11 + $0x38] sm:$0xff]  }
 0x8b8   : > { %v1291_v44 = vmul.f32 1.442695, %v1290_v43  ;;  %v1789_v43 = vld [vmem:[#allocation4] ss:$0 sm:$0xff] }
 0x8b9   : > { %v1300_v45 = vpop.permute.xlu0 %1299 }
 0x8ba   : > { %2089 = vpow2.f32 %v1291_v44  ;;  %v1305_v46 = vsel %vm822_vm1, %v1300_v45, 0 }
 0x8bb   : > { %1941 = vmatpush3.bf16.msra.mxu0 %v1305_v46 }
 0x8bc   : > { %1952 = vmatprep.subr.bf16.mxu0 %v2169_v0 }
 0x8c4   : > { %v2090_v47 = vpop.eup %2089 }
 0x8c5   : > { %v1293_v48 = vsel %vm759_vm2, %v2090_v47, 0.0 }
 0x8c6   : > { %1294 = vadd.xlane.f32.xlu1 %v1293_v48 }
 0x8f2   : > { %v1229_v51 = vpop.f32.mrb[20].mxu0 }
 0x8f3   : > { %v1235_v52 = vadd.f32 %v1229_v51, %v2505_v6  ;;  %v1932_v53 = vpop.f32.mrb[21].mxu0  ;;  %v2059_v6 = vld [vmem:[%s2647_s9] sm:$0xff]  }
 0x8f4   : > { %v1232_v54 = vpop.f32.mrb[22].mxu0 }
 0x8f5   : > { %v1933_v55 = vpop.f32.mrb[23].mxu0 }
 0x953   : > { %v1295_v56 = vpop.xlane.xlu1 %1294 }
 0x954   : > { %2091 = vrcp.f32 %v1295_v56 }
 0x95e   : > { %v2092_v57 = vpop.eup %2091 }
 0x95f   : > { %v1297_v58 = vmul.f32 %v2092_v57, %v2090_v47 }
 0x961   : > { %v1298_v59 = vpack.c.bf16 %v1297_v58, %v1297_v58 }
 0x963   : > { %1943 = vmatmul.mubr.msk.bf16.vlgmr.msra.gmra.mrb[24].mxu0 %vm759_vm2, %v1298_v59 }
 0x964   : > { %1968 = vmatprep.mubr.msk.bf16.mxu0 %vm2171_vm0, %v2169_v0  ;;  %1953 = vmatpush3.bf16.msra.mxu0 %v2059_v6 }
 0x965   : > { %1954 = vmatprep.subr.bf16.mxu0 %v2169_v0 }
 0x968   : > { %1955 = vmatpush3.bf16.msra.mxu0 %v2060_v16 }
 0x969   : > { %1956 = vmatprep.subr.bf16.mxu0 %v2169_v0 }
 0xa36   : > { %v1341_v61 = vpop.f32.mrb[24].mxu0 }
 0xa37   : > { %v1347_v62 = vpack.c.bf16 %v1341_v61, %v1341_v61  ;;  %v1944_v63 = vpop.f32.mrb[25].mxu0 }
 0xa38   : > { %v1344_v3 = vpop.f32.mrb[26].mxu0 }
 0xa39   : > { %v1945_v4 = vpop.f32.mrb[27].mxu0  ;;  %1949 = vmatmul.mubr.msk.bf16.vlgmr.msra.gmra.mrb[24].mxu1 %vm759_vm2, %v1347_v62 }
 0xa3a   : > { %1988 = vmatprep.mubr.msk.bf16.mxu1 %vm2171_vm0, %v2169_v0  ;;  %1973 = vmatpush3.bf16.msra.mxu1 %v2067_v22 }
 0xa3b   : > { %1974 = vmatprep.subr.bf16.mxu1 %v2169_v0 }
 0xa3e   : > { %1975 = vmatpush3.bf16.msra.mxu1 %v2068_v23 }
 0xa3f   : > { %1976 = vmatprep.subr.bf16.mxu1 %v2169_v0 }
 0xa42   : > { %1977 = vmatpush3.bf16.msra.mxu1 %v2069_v5 }
 0xa43   : > { %1978 = vmatprep.subr.bf16.mxu1 %v2169_v0 }
 0xa46   : > { %1979 = vmatpush3.bf16.msra.mxu1 %v2070_v24 }
 0xa47   : > { %1980 = vmatprep.subr.bf16.mxu1 %v2169_v0 }
 0xa4a   : > { %1981 = vmatpush3.bf16.msra.mxu1 %v2071_v25 }
 0xa4b   : > { %1982 = vmatprep.subr.bf16.mxu1 %v2169_v0 }
 0xa4e   : > { %1983 = vmatpush3.bf16.msra.mxu1 %v2072_v26 }
 0xa4f   : > { %1984 = vmatprep.subr.bf16.mxu1 %v2169_v0 }
 0xa52   : > { %1985 = vmatpush3.bf16.msra.mxu1 %v2073_v41 }
 0xa53   : > { %1986 = vmatprep.subr.bf16.mxu1 %v2169_v0 }
 0xa56   : > { %1987 = vmatpush3.bf16.msra.mxu1 %v2074_v42 }
 0xb0c   : > { %v1389_v7 = vpop.f32.mrb[24].mxu1 }
 0xb0d   : > { %v1395_v8 = vadd.f32 %v1389_v7, %v1235_v52  ;;  %v1950_v9 = vpop.f32.mrb[25].mxu1 }
 0xb0e   : > { %v1392_v11 = vpop.f32.mrb[26].mxu1 }
 0xb0f   : > { %v1396_v12 = vadd.f32 %v1395_v8, %v2339_v1  ;;  %v1951_v13 = vpop.f32.mrb[27].mxu1  ;;  %v2061_v1 = vld [vmem:[%s2647_s9 + $0x10] sm:$0xff]  }
 0xb10   : > { %1957 = vmatpush3.bf16.msra.mxu0 %v2061_v1 }
 0xb11   : > { %v2559_v14 = vadd.f32 %v1786_v10, %v1396_v12  ;;  %1958 = vmatprep.subr.bf16.mxu0 %v2169_v0 }
 0xb13   : > { %1407 = vadd.xlane.f32.xlu1 %v2559_v14  ;;  %v1410_v15 = vmul.f32 %v2559_v14, %v2559_v14 }
 0xb14   : > { %1959 = vmatpush3.bf16.msra.mxu0 %v2062_v17 }
 0xb15   : > { %1960 = vmatprep.subr.bf16.mxu0 %v2169_v0 }
 0xb17   : > { %1411 = vadd.xlane.f32.xlu1 %v1410_v15 }
 0xb18   : > { %1961 = vmatpush3.bf16.msra.mxu0 %v2063_v18 }
 0xb19   : > { %1962 = vmatprep.subr.bf16.mxu0 %v2169_v0 }
 0xb1c   : > { %1963 = vmatpush3.bf16.msra.mxu0 %v2064_v19 }
 0xb1d   : > { %1964 = vmatprep.subr.bf16.mxu0 %v2169_v0 }
 0xb20   : > { %1965 = vmatpush3.bf16.msra.mxu0 %v2065_v20 }
 0xb21   : > { %1966 = vmatprep.subr.bf16.mxu0 %v2169_v0  ;;  %v1806_v0 = vld [vmem:[%s2650_s12] ss:$0 sm:$0xff] }
 0xb24   : > { %1967 = vmatpush3.bf16.msra.mxu0 %v2066_v21 }
 0xba0   : > { %v1408_v27 = vpop.xlane.xlu1 %1407 }
 0xba1   : > { %v1409_v28 = vmul.f32 0.03125, %v1408_v27 }
 0xba3   : > { %v1414_v29 = vmul.f32 %v1409_v28, %v1409_v28  ;;  %v1416_v33 = vsub.f32 %v2559_v14, %v1409_v28 }
 0xba4   : > { %v1412_v2 = vpop.xlane.xlu1 %1411 }
 0xba5   : > { %v1413_v30 = vmul.f32 0.03125, %v1412_v2 }
 0xba7   : > { %v1415_v31 = vsub.f32 %v1413_v30, %v1414_v29 }
 0xba9   : > { %v1417_v32 = vadd.f32 1e-05, %v1415_v31 }
 0xbab   : > { %2093 = vrsqrt.f32 %v1417_v32 }
 0xbb5   : > { %v2094_v34 = vpop.eup %2093 }
 0xbb6   : > { %v1419_v36 = vmul.f32 %v2094_v34, %v1416_v33 }
 0xbb8   : > { %v1426_v38 = vmul.f32 %v1787_v35, %v1419_v36 }
 0xbba   : > { %v1433_v39 = vadd.f32 %v1788_v37, %v1426_v38 }
 0xbbc   : > { %v1434_v40 = vpack.c.bf16 %v1433_v39, %v1433_v39 }
 0xbbe   : > { %1969 = vmatmul.mubr.bf16.vlgmr.msra.gmra.mrb[28].mxu0 %v1434_v40 }
 0xc91   : > { %v1540_v44 = vpop.f32.mrb[28].mxu0 }
 0xc92   : > { %v1541_v45 = vadd.f32 %v1789_v43, %v1540_v44  ;;  %v1970_v46 = vpop.f32.mrb[29].mxu0 }
 0xc93   : > { %v1543_v47 = vpop.f32.mrb[30].mxu0 }
 0xc94   : > { %v1546_v48 = vmax.f32 %v1541_v45, 0.0  ;;  %v1971_v49 = vpop.f32.mrb[31].mxu0 }
 0xc96   : > { %v1547_v50 = vpack.c.bf16 %v1546_v48, %v1546_v48 }
 0xc98   : > { %1989 = vmatmul.mubr.bf16.vlgmr.msra.gmra.mrb[28].mxu1 %v1547_v50 }
 0xd6b   : > { %v1646_v60 = vpop.f32.mrb[28].mxu1 }
 0xd6c   : > { %v1652_v51 = vadd.f32 %v1646_v60, %v2559_v14  ;;  %v1990_v52 = vpop.f32.mrb[29].mxu1 }
 0xd6d   : > { %v1649_v53 = vpop.f32.mrb[30].mxu1 }
 0xd6e   : > { %v1660_v54 = vadd.f32 %v1806_v0, %v1652_v51  ;;  %v1991_v55 = vpop.f32.mrb[31].mxu1 }
 0xd70   : > { %1661 = vst [vmem:[%s461_s29] sm:$0xff] %v1660_v54 }
 0xd71 PF: > { %s25_s25 = sadd.s32 1, %s2165_s25  }
 0xd72   : > { %p22_p5 = scmp.ge.s32.totalorder %s25_s25, 4  }
 0xd74   :  { %24 = sbr.rel (!%p22_p5) target bundleno = 2 (0x2), region = 111 }
 0xd7b   :  { %1681 = vsyncpa [#allocation3], 1 }
 0xd7c   :  { %1683 = vsyncpa [#allocation3 + $0x1], 1 }
 0xd7d   :  { %1684 = vsyncpa [#allocation5], 1 }

// kernel: transformer_forward.9
= control target key start
LH: loop header
LB: loop body
LE: loop exit
PB: predicated region body
PF: predicated region fallthrough
CT: control target
= control target key end

     0   :  { %s4329_s0 = inlined_call_operand.vmem [shape: f32[2,8,128], index: 0, kind: input, shape index: {}]   ;;  %s4330_s1 = inlined_call_operand.vmem [shape: f32[2,8,128], index: 1, kind: input, shape index: {}]   ;;  %s4331_s2 = inlined_call_operand.vmem [shape: f32[1,128], index: 2, kind: input, shape index: {}]   ;;  %s4332_s3 = inlined_call_operand.vmem [shape: f32[1,128], index: 3, kind: input, shape index: {}]   ;;  %s4333_s4 = inlined_call_operand.vmem [shape: bf16[128,384], index: 4, kind: input, shape index: {}]   ;;  %s4334_s5 = inlined_call_operand.vmem [shape: f32[1,384], index: 5, kind: input, shape index: {}]   ;;  %s4335_s6 = inlined_call_operand.vmem [shape: f32[128,128], index: 6, kind: input, shape index: {}]   ;;  %s4336_s7 = inlined_call_operand.vmem [shape: f32[1,128], index: 7, kind: input, shape index: {}]   ;;  %s4337_s8 = inlined_call_operand.vmem [shape: f32[1,128], index: 8, kind: input, shape index: {}]   ;;  %s4338_s9 = inlined_call_operand.vmem [shape: f32[1,128], index: 9, kind: input, shape index: {}]   ;;  %s4339_s10 = inlined_call_operand.vmem [shape: bf16[128,128], index: 10, kind: input, shape index: {}]   ;;  %s4340_s11 = inlined_call_operand.vmem [shape: f32[1,128], index: 11, kind: input, shape index: {}]   ;;  %s4341_s12 = inlined_call_operand.vmem [shape: bf16[128,256], index: 12, kind: input, shape index: {}]   ;;  %s4342_s13 = inlined_call_operand.vmem [shape: f32[1,256], index: 13, kind: input, shape index: {}]   ;;  %s4343_s14 = inlined_call_operand.vmem [shape: f32[128,128], index: 14, kind: input, shape index: {}]   ;;  %s4344_s15 = inlined_call_operand.vmem [shape: f32[1,128], index: 15, kind: input, shape index: {}]   ;;  %s4345_s16 = inlined_call_operand.vmem [shape: f32[1,128], index: 16, kind: input, shape index: {}]   ;;  %s4346_s17 = inlined_call_operand.vmem [shape: f32[1,128], index: 17, kind: input, shape index: {}]   ;;  %s4347_s18 = inlined_call_operand.vmem [shape: bf16[128,128], index: 18, kind: input, shape index: {}]   ;;  %s4348_s19 = inlined_call_operand.vmem [shape: f32[1,128], index: 19, kind: input, shape index: {}]   ;;  %s4349_s20 = inlined_call_operand.hbm [shape: bf16[128,128], index: 20, kind: input, shape index: {}]   ;;  %s4350_s21 = inlined_call_operand.hbm [shape: f32[1,128], index: 21, kind: input, shape index: {}]   ;;  %s4351_s22 = inlined_call_operand.vmem [shape: f32[2,8,128], index: 22, kind: output, shape index: {}]  }
   0x1   :  { %4361 = sst [smem:[#allocation9_spill]] %s4329_s0 }
   0x2   :  { %4362 = sst [smem:[#allocation10_spill]] %s4330_s1 }
   0x3   :  { %4363 = sst [smem:[#allocation11_spill]] %s4331_s2 }
   0x4   :  { %4364 = sst [smem:[#allocation12_spill]] %s4332_s3 }
   0x5   :  { %4365 = sst [smem:[#allocation13_spill]] %s4333_s4 }
   0x6   :  { %4366 = sst [smem:[#allocation14_spill]] %s4334_s5 }
   0x7   :  { %4367 = sst [smem:[#allocation15_spill]] %s4335_s6 }
   0x8   :  { %4368 = sst [smem:[#allocation16_spill]] %s4351_s22 }
   0x9   :  { %27 = vsyncpa [#allocation3], 0 }
   0xa   :  { %28 = vsyncpa [#allocation5], 0  ;;  %s3727_s3 = smov 0  }
   0xb LB: > { %4369 = sst [smem:[#allocation8_spill]] %s3600_s3  ;;  %s3733_s28 = sadd.s32 4294967295, %s3600_s3   ;;  %s3600_s3 = sphi %s3727_s3, %s34_s3  }
   0xc   : > { %p2956_p0 = scmp.ge.s32.totalorder %s3600_s3, 1  ;;  %p537_p1 = scmp.lt.s32.totalorder %s3600_s3, 3 }
   0xd   : > { %s3602_s29 = smov [#allocation2]   ;;  %p4354_p3 = scmp.eq.s32.totalorder %s3733_s28, 0 }
   0xe   : > { %s603_s30 = sshll.u32 %s3602_s29, 4  ;;  %p3737_p2 = pnand %p2956_p0, %p537_p1  ;;  %s604_s30 = int_to_ptr.vmem [resolvable:$true] %s603_s30 }
   0xf   : > { %s3603_s0 = smov [#allocation4]   ;;  %s3530_s6 = scalar_lea.hbm %s4349_s20, 1024 }
  0x10   : > { %s4370_s4 = scalar_select %p3737_p2, 1, 0 }
  0x11   : > { %p3383_p4 = pneg %p3737_p2  ;;  %s617_s23 = sshll.u32 %s3603_s0, 4  ;;  %s3750_s23 = int_to_ptr.vmem [resolvable:$true] %s617_s23 }
  0x12   : > { %p3531_p6 = scmp.ne.s32.totalorder %s4349_s20, %s3530_s6  ;;  %p3537_p10 = scmp.lt.u32.totalorder %s3530_s6, %s4349_s20 }
  0x13   : > { %p3746_p5 = pnand %p4354_p3, %p3383_p4 }
  0x15   : > { %p3532_p7 = pneg %p3746_p5 }
  0x17   : > { %p3533_p8 = pnand %p3532_p7, %p3531_p6 }
  0x19   : > { %p3534_p9 = pneg %p3533_p8 }
  0x1b   : > { %p3539_p11 = pnand %p3537_p10, %p3534_p9 }
  0x1d   : > { %3542 = shalt.err (!%p3539_p11)
}
  0x1e   : > { %s3543_s29 = scalar_lea.vmem %s604_s30, 1024  ;;  %p3551_p1 = scmp.lt.s32.totalorder %s604_s30, %s604_s30 }
  0x1f   : > { %p3544_p12 = scmp.ne.s32.totalorder %s604_s30, %s3543_s29  ;;  %p3552_p4 = scmp.lt.s32.totalorder %s3543_s29, %s3543_s29 }
  0x21   : > { %p3546_p13 = pnand %p3544_p12, %p3532_p7  ;;  %p3553_p3 = por %p3552_p4, %p3551_p1 }
  0x23   : > { %p3547_p0 = pneg %p3546_p13 }
  0x25   : > { %p3554_p2 = pnand %p3553_p3, %p3547_p0 }
  0x27   : > { %3557 = shalt.err (!%p3554_p2)
}
  0x28   : > { %s3604_s0 = smov 64   ;;  %s3605_s5 = smov 4  }
  0x29   : > { %3386 = dma.hbm_to_vmem [thread:$0]  (!%p3746_p5), %s4349_s20, 1024, %s604_s30, [#allocation3], %s3604_s0, %s3604_s0, %s3605_s5  }
  0x2a   : > { %s3558_s2 = scalar_lea.hbm %s4350_s21, 16 }
  0x2b   : > { %p3559_p6 = scmp.ne.s32.totalorder %s4350_s21, %s3558_s2  ;;  %p3565_p8 = scmp.lt.u32.totalorder %s3558_s2, %s4350_s21 }
  0x2d   : > { %p3561_p2 = pnand %p3559_p6, %p3532_p7 }
  0x2f   : > { %p3562_p3 = pneg %p3561_p2 }
  0x31   : > { %p3567_p9 = pnand %p3565_p8, %p3562_p3 }
  0x33   : > { %3570 = shalt.err (!%p3567_p9)
}
  0x34   : > { %s3571_s30 = scalar_lea.vmem %s3750_s23, 16  ;;  %s3578_s3 = scalar_lea.vmem %s3750_s23, 32 }
  0x35   : > { %p3572_p10 = scmp.ne.s32.totalorder %s3750_s23, %s3571_s30  ;;  %p3579_p13 = scmp.lt.s32.totalorder %s3750_s23, %s3750_s23 }
  0x36   : > { %p3580_p0 = scmp.lt.s32.totalorder %s3578_s3, %s3571_s30 }
  0x37   : > { %p3574_p11 = pnand %p3572_p10, %p3532_p7 }
  0x38   : > { %p3581_p1 = por %p3580_p0, %p3579_p13 }
  0x39   : > { %p3575_p12 = pneg %p3574_p11 }
  0x3b   : > { %p3582_p4 = pnand %p3581_p1, %p3575_p12 }
  0x3d   : > { %3585 = shalt.err (!%p3582_p4)
}
  0x3e   : > { %3389 = dma.hbm_to_vmem [thread:$0]  (!%p3746_p5), %s4350_s21, 16, %s3750_s23, [#allocation5]  }
  0x3f   : > { %p4372_p6 = scmp.ne.s32.totalorder %s4370_s4, 0 }
  0x40   : > { %p4373_p7 = scmp.eq.s32.totalorder (!%p4372_p6), %s3733_s28, 0 }
  0x41   : > { %644 = sbr.rel (%p4372_p6) target bundleno = 6208 (0x1840), region = 108 }
  0x48   : > { %3591 = dma.done.wait (%p4373_p7), [#allocation3], 1024   ;;  %p4374_p2 = pmov %p4373_p7 }
  0x4a   : > { %3593 = vsyncadd (%p4374_p2), [#allocation3], 4294966272  ;;  %p4375_p3 = pmov %p4374_p2 }
  0x4b   : > { %p4376_p8 = pmov %p4374_p2 }
  0x4c   : > { %3595 = dma.done.wait (%p4375_p3), [#allocation5], 16  }
  0x4d   : > { %3597 = vsyncadd (%p4376_p8), [#allocation5], 4294967280  ;;  %p712_p9 = scmp.lt.s32.totalorder %s3733_s28, 1  ;;  %v3606_v0 = vmov 0.0   ;;  %s4377_s5 = sld [smem:[#allocation9_spill]]  ;;  %v3607_v24 = vmov 0   ;;  %v791_v43 = vlaneseq }
  0x4e   : > { %3151 = vmatprep.subr.bf16.mxu1 %v3606_v0  ;;  %s4378_s26 = sld [smem:[#allocation13_spill]]  ;;  %966 = vmatprep.mubr.bf16.mxu0 %v3607_v24  ;;  %vm3608_vm0 = vmmov 0   ;;  %s4379_s22 = sld [smem:[#allocation11_spill]]  ;;  %vm1085_vm1 = vcmask 1043456   ;;  %vm1022_vm2 = vcmask 64512  }
  0x4f   : > { %s4389_s28 = smov (!%p712_p9, %s3733_s28), 1  ;;  %3167 = vmatprep.mubr.msk.bf16.mxu1 %vm3608_vm0, %v3606_v0  ;;  %s4380_s1 = sld [smem:[#allocation12_spill]]  ;;  %v3919_v44 = vshrl.u32 %v791_v43, 7 }
  0x50   : > { %s3813_s4 = sshll.u32 %s4389_s28, 3  ;;  %s4381_s6 = sld [smem:[#allocation14_spill]] }
  0x51   : > { %v801_v45 = vsub.s32 2, %v3919_v44  ;;  %v797_v47 = vsub.s32 1, %v3919_v44  ;;  %v793_v48 = vsub.s32 0, %v3919_v44  ;;  %s3609_s25 = smov 120   ;;  %s4359_s2 = smov 112  }
  0x52   : > { %s4382_s29 = sld [smem:[#allocation15_spill]]  ;;  %s4386_s3 = sld [smem:[#allocation16_spill]] }
  0x53   : > { %s715_s24 = scalar_lea.vmem %s4377_s5, %s3813_s4 }
  0x54   : > { %v3819_v1 = vld [vmem:[%s715_s24] sm:$0xff]  ;;  %v3415_v5 = vld [vmem:[%s4378_s26 + $0x8] ss:$12 sps:$4 sm:$0xff]   ;;  %v3422_v10 = vld [vmem:[%s4378_s26 + $0x30] ss:$12 sps:$4 sm:$0xff]   ;;  %s4383_s24 = sld [smem:[#allocation10_spill]] }
  0x55   : > { %729 = vadd.xlane.f32.xlu0 %v3819_v1  ;;  %v732_v2 = vmul.f32 %v3819_v1, %v3819_v1  ;;  %v3412_v3 = vld [vmem:[%s4378_s26 + $0x4] ss:$12 sps:$4 sm:$0xff]   ;;  %v3414_v4 = vld [vmem:[%s4378_s26] ss:$12 sps:$4 sm:$0xff]   ;;  %3152 = vmatpush3.bf16.msra.mxu1 %v3415_v5  ;;  %v3416_v6 = vld [vmem:[%s4378_s26 + $0x1c] ss:$12 sps:$4 sm:$0xff]  }
  0x56   : > { %934 = vmatprep.subr.bf16.mxu0 %v3412_v3  ;;  %3153 = vmatprep.subr.bf16.mxu1 %v3606_v0  ;;  %v3418_v7 = vld [vmem:[%s4378_s26 + $0x18] ss:$12 sps:$4 sm:$0xff]   ;;  %v3419_v8 = vld [vmem:[%s4378_s26 + $0x20] ss:$12 sps:$4 sm:$0xff]   ;;  %v3426_v13 = vld [vmem:[%s4378_s26 + $0x48] ss:$12 sps:$4 sm:$0xff]  }
  0x57   : > { %935 = vmatpush1.bf16.msra.mxu0 %v3414_v4  ;;  %v3420_v9 = vld [vmem:[%s4378_s26 + $0x34] ss:$12 sps:$4 sm:$0xff]   ;;  %v3423_v11 = vld [vmem:[%s4378_s26 + $0x38] ss:$12 sps:$4 sm:$0xff]   ;;  %v3427_v14 = vld [vmem:[%s4378_s26 + $0x50] ss:$12 sps:$4 sm:$0xff]  }
  0x58   : > { %936 = vmatprep.subr.bf16.mxu0 %v3416_v6  ;;  %v3424_v12 = vld [vmem:[%s4378_s26 + $0x4c] ss:$12 sps:$4 sm:$0xff]   ;;  %v3428_v15 = vld [vmem:[%s4378_s26 + $0x64] ss:$12 sps:$4 sm:$0xff]   ;;  %v3431_v17 = vld [vmem:[%s4378_s26 + $0x68] ss:$12 sps:$4 sm:$0xff]   ;;  %s723_s0 = scalar_lea.vmem %s4386_s3, %s3813_s4 }
  0x59   : > { %733 = vadd.xlane.f32.xlu0 %v732_v2  ;;  %3154 = vmatpush3.bf16.msra.mxu1 %v3419_v8  ;;  %v3430_v16 = vld [vmem:[%s4378_s26 + $0x60] ss:$12 sps:$4 sm:$0xff]   ;;  %v3432_v18 = vld [vmem:[%s4378_s26 + $0x7c] ss:$12 sps:$4 sm:$0xff]   ;;  %v3434_v19 = vld [vmem:[%s4378_s26 + $0x78] ss:$12 sps:$4 sm:$0xff]  }
  0x5a   : > { %3155 = vmatprep.subr.bf16.mxu1 %v3606_v0  ;;  %v3435_v20 = vld [vmem:[%s4378_s26 + $0x80] ss:$12 sps:$4 sm:$0xff]   ;;  %v3438_v22 = vld [vmem:[%s4378_s26 + $0x90] ss:$12 sps:$4 sm:$0xff]   ;;  %v3439_v23 = vld [vmem:[%s4378_s26 + $0x98] ss:$12 sps:$4 sm:$0xff]  }
  0x5b   : > { %937 = vmatpush1.bf16.msra.mxu0 %v3418_v7  ;;  %v3436_v21 = vld [vmem:[%s4378_s26 + $0x94] ss:$12 sps:$4 sm:$0xff]   ;;  %v3440_v25 = vld [vmem:[%s4378_s26 + $0xac] ss:$12 sps:$4 sm:$0xff]   ;;  %v3443_v27 = vld [vmem:[%s4378_s26 + $0xb0] ss:$12 sps:$4 sm:$0xff]  }
  0x5c   : > { %938 = vmatprep.subr.bf16.mxu0 %v3420_v9  ;;  %v3442_v26 = vld [vmem:[%s4378_s26 + $0xa8] ss:$12 sps:$4 sm:$0xff]   ;;  %v2966_v37 = vld [vmem:[%s4379_s22] ss:$0 sm:$0xff]  ;;  %s4357_s22 = smov 104  }
  0x5d   : > { %3156 = vmatpush3.bf16.msra.mxu1 %v3423_v11  ;;  %v2967_v39 = vld [vmem:[%s4380_s1] ss:$0 sm:$0xff] }
  0x5e   : > { %3157 = vmatprep.subr.bf16.mxu1 %v3606_v0  ;;  %v789_v46 = vld [vmem:[%s4381_s6] sm:$0x7]  ;;  %s719_s6 = scalar_lea.vmem %s4383_s24, %s3813_s4  ;;  %s4385_s24 = smov 104  }
  0x5f   : > { %939 = vmatpush1.bf16.msra.mxu0 %v3422_v10  ;;  %v802_v49 = vrot.slane %v789_v46, %v801_v45  ;;  %v798_v50 = vrot.slane %v789_v46, %v797_v47  ;;  %v794_v51 = vrot.slane %v789_v46, %v793_v48 }
  0x60   : > { %940 = vmatprep.subr.bf16.mxu0 %v3424_v12 }
  0x61   : > { %3158 = vmatpush3.bf16.msra.mxu1 %v3427_v14 }
  0x62   : > { %3159 = vmatprep.subr.bf16.mxu1 %v3606_v0 }
  0x63   : > { %941 = vmatpush1.bf16.msra.mxu0 %v3426_v13 }
  0x64   : > { %942 = vmatprep.subr.bf16.mxu0 %v3428_v15 }
  0x65   : > { %3160 = vmatpush3.bf16.msra.mxu1 %v3431_v17 }
  0x66   : > { %3161 = vmatprep.subr.bf16.mxu1 %v3606_v0 }
  0x67   : > { %943 = vmatpush1.bf16.msra.mxu0 %v3430_v16 }
  0x68   : > { %944 = vmatprep.subr.bf16.mxu0 %v3432_v18 }
  0x69   : > { %3162 = vmatpush3.bf16.msra.mxu1 %v3435_v20 }
  0x6a   : > { %3163 = vmatprep.subr.bf16.mxu1 %v3606_v0 }
  0x6b   : > { %945 = vmatpush1.bf16.msra.mxu0 %v3434_v19 }
  0x6c   : > { %946 = vmatprep.subr.bf16.mxu0 %v3436_v21 }
  0x6d   : > { %3164 = vmatpush3.bf16.msra.mxu1 %v3439_v23 }
  0x6e   : > { %3165 = vmatprep.subr.bf16.mxu1 %v3606_v0 }
  0x6f   : > { %947 = vmatpush1.bf16.msra.mxu0 %v3438_v22 }
  0x70   : > { %948 = vmatprep.subr.bf16.mxu0 %v3440_v25 }
  0x71   : > { %3166 = vmatpush3.bf16.msra.mxu1 %v3443_v27 }
  0x72   : > { %3177 = vmatprep.subr.bf16.mxu1 %v3606_v0 }
  0x73   : > { %949 = vmatpush1.bf16.msra.mxu0 %v3442_v26 }
  0x74   : > { %3171 = vmatprep.subr.bf16.mxu0 %v3606_v0 }
  0xe2   : > { %v730_v28 = vpop.xlane.xlu0 %729 }
  0xe3   : > { %v731_v29 = vmul.f32 0.03125, %v730_v28 }
  0xe5   : > { %v736_v31 = vmul.f32 %v731_v29, %v731_v29  ;;  %v738_v35 = vsub.f32 %v3819_v1, %v731_v29 }
  0xe6   : > { %v734_v30 = vpop.xlane.xlu0 %733 }
  0xe7   : > { %v735_v32 = vmul.f32 0.03125, %v734_v30 }
  0xe9   : > { %v737_v33 = vsub.f32 %v735_v32, %v736_v31 }
  0xeb   : > { %v739_v34 = vadd.f32 1e-05, %v737_v33 }
  0xed   : > { %3492 = vrsqrt.f32 %v739_v34 }
  0xf7   : > { %v3493_v36 = vpop.eup %3492 }
  0xf8   : > { %v741_v38 = vmul.f32 %v3493_v36, %v738_v35  ;;  %v1016_v36 = vld [vmem:[%s4382_s29 + $0x8] sm:$0xff] }
  0xfa   : > { %v748_v40 = vmul.f32 %v2966_v37, %v741_v38  ;;  %v1246_v37 = vpack.c.bf16 %v1016_v36, %v1016_v36 }
  0xfc   : > { %v755_v41 = vadd.f32 %v2967_v39, %v748_v40  ;;  %v1251_v38 = vsel %vm1085_vm1, %v1246_v37, 0 }
  0xfe   : > { %v756_v42 = vpack.c.bf16 %v755_v41, %v755_v41 }
 0x100   : > { %967 = vmatmul.mubr.bf16.vlgmr.msra.gmra.mrb[0].mxu0 %v756_v42  ;;  %3168 = vmatmul.mubr.bf16.vlgmr.msra.gmra.mrb[0].mxu1 %v756_v42  ;;  %v1015_v42 = vld [vmem:[%s4382_s29] sm:$0xff] }
 0x101   : > { %3173 = vmatprep.mubr.msk.bf16.mxu0 %vm3608_vm0, %v3606_v0  ;;  %3179 = vmatprep.mubr.msk.bf16.mxu1 %vm3608_vm0, %v3606_v0  ;;  %v1130_v43 = vpack.c.bf16 %v1015_v42, %v1015_v42 }
 0x1d3   : > { %v968_v52 = vpop.f32.mrb[0].mxu0  ;;  %v1009_v53 = vpop.f32.mrb[0].mxu1 }
 0x1d4   : > { %v1010_v54 = vadd.f32 %v1009_v53, %v802_v49  ;;  %v970_v55 = vpop.f32.mrb[1].mxu0  ;;  %v3169_v56 = vpop.f32.mrb[1].mxu1  ;;  %v969_v63 = vadd.f32 %v968_v52, %v794_v51 }
 0x1d5   : > { %v971_v57 = vadd.f32 %v970_v55, %v798_v50  ;;  %v972_v58 = vpop.f32.mrb[2].mxu0  ;;  %v1012_v59 = vpop.f32.mrb[2].mxu1  ;;  %v1297_v50 = vsel %vm1085_vm1, %v1130_v43, 0 }
 0x1d6   : > { %v3931_v60 = vpack.c.bf16 %v1010_v54, %v1010_v54  ;;  %v973_v61 = vpop.f32.mrb[3].mxu0  ;;  %v3170_v62 = vpop.f32.mrb[3].mxu1  ;;  %v3942_v5 = vpack.c.bf16 %v969_v63, %v969_v63 }
 0x1d7   : > { %v3933_v2 = vpack.c.bf16 %v971_v57, %v971_v57 }
 0x1d8   : > { %v1087_v3 = vsel %vm1085_vm1, %v3931_v60, 0 }
 0x1d9   : > { %3178 = vmatpush3.bf16.msra.mxu1 %v1087_v3  ;;  %1135 = vrot.lane.b32.xlu1 %v3933_v2, %s3609_s25  ;;  %v1027_v4 = vsel %vm1022_vm2, %v3933_v2, 0 }
 0x1da   : > { %3172 = vmatpush3.bf16.xpose.msra.mxu0 %v1027_v4  ;;  %3189 = vmatprep.subr.bf16.mxu1 %v3606_v0 }
 0x1db   : > { %3183 = vmatprep.subr.bf16.mxu0 %v3606_v0 }
 0x1dd   : > { %1132 = vrot.lane.b32.xlu1 %v3942_v5, %s3609_s25 }
 0x1e1   : > { %3174 = vmatmul.mubr.msk.bf16.vlgmr.msra.gmra.mrb[4].mxu0 %vm1022_vm2, %v3942_v5 }
 0x1e2   : > { %3185 = vmatprep.mubr.msk.bf16.mxu0 %vm3608_vm0, %v3606_v0 }
 0x24b   : > { %v1136_v6 = vpop.permute.xlu1 %1135 }
 0x24c   : > { %v1141_v7 = vsel %vm1022_vm2, %v1136_v6, 0 }
 0x24d   : > { %3184 = vmatpush3.bf16.xpose.msra.mxu0 %v1141_v7 }
 0x24e   : > { %3195 = vmatprep.subr.bf16.mxu0 %v3606_v0 }
 0x24f   : > { %v1133_v8 = vpop.permute.xlu1 %1132 }
 0x254   : > { %3186 = vmatmul.mubr.msk.bf16.vlgmr.msra.gmra.mrb[8].mxu0 %vm1022_vm2, %v1133_v8 }
 0x255   : > { %3197 = vmatprep.mubr.msk.bf16.mxu0 %vm3608_vm0, %v3606_v0  ;;  %3196 = vmatpush3.bf16.msra.mxu0 %v1251_v38 }
 0x256   : > { %3207 = vmatprep.subr.bf16.mxu0 %v3606_v0 }
 0x2b4   : > { %v1063_v9 = vpop.f32.mrb[4].mxu0 }
 0x2b5   : > { %v1069_v10 = vmul.f32 0.35355338, %v1063_v9  ;;  %v3175_v11 = vpop.f32.mrb[5].mxu0 }
 0x2b6   : > { %v1066_v12 = vpop.f32.mrb[6].mxu0 }
 0x2b7   : > { %v3176_v13 = vpop.f32.mrb[7].mxu0  ;;  %v1070_v14 = vsel %vm1022_vm2, %v1069_v10, -inf }
 0x2b8   : > { %1071 = vmax.xlane.f32.xlu0 %v1070_v14 }
 0x327   : > { %v1177_v15 = vpop.f32.mrb[8].mxu0 }
 0x328   : > { %v1183_v16 = vmul.f32 0.35355338, %v1177_v15  ;;  %v3187_v17 = vpop.f32.mrb[9].mxu0 }
 0x329   : > { %v1180_v18 = vpop.f32.mrb[10].mxu0 }
 0x32a   : > { %v3188_v19 = vpop.f32.mrb[11].mxu0  ;;  %v1184_v20 = vsel %vm1022_vm2, %v1183_v16, -inf }
 0x32b   : > { %1185 = vmax.xlane.f32.xlu1 %v1184_v20 }
 0x33c   : > { %1339 = vrot.lane.b32.xlu1 %v3942_v5, %s4359_s2 }
 0x345   : > { %v1072_v21 = vpop.xlane.xlu0 %1071 }
 0x346   : > { %v1073_v22 = vsub.f32 %v1069_v10, %v1072_v21 }
 0x348   : > { %v1074_v23 = vmul.f32 1.442695, %v1073_v22 }
 0x34a   : > { %3494 = vpow2.f32 %v1074_v23 }
 0x354   : > { %v3495_v25 = vpop.eup %3494 }
 0x355   : > { %v1076_v26 = vsel %vm1022_vm2, %v3495_v25, 0.0 }
 0x356   : > { %1077 = vadd.xlane.f32.xlu0 %v1076_v26 }
 0x3b8   : > { %v1186_v27 = vpop.xlane.xlu1 %1185 }
 0x3b9   : > { %v1187_v28 = vsub.f32 %v1183_v16, %v1186_v27 }
 0x3bb   : > { %v1188_v29 = vmul.f32 1.442695, %v1187_v28 }
 0x3bc   : > { %v1340_v3 = vpop.permute.xlu1 %1339 }
 0x3bd   : > { %3496 = vpow2.f32 %v1188_v29 }
 0x3c7   : > { %v3497_v30 = vpop.eup %3496 }
 0x3c8   : > { %v1190_v31 = vsel %vm1022_vm2, %v3497_v30, 0.0 }
 0x3c9   : > { %1191 = vadd.xlane.f32.xlu0 %v1190_v31 }
 0x3df   : > { %1197 = vrot.lane.b32.xlu0 %v3931_v60, %s3609_s25 }
 0x3e3   : > { %v1078_v32 = vpop.xlane.xlu0 %1077  ;;  %1341 = vrot.lane.b32.xlu0 %v3933_v2, %s4359_s2 }
 0x3e4   : > { %3498 = vrcp.f32 %v1078_v32 }
 0x3ee   : > { %v3499_v33 = vpop.eup %3498 }
 0x3ef   : > { %v1080_v34 = vmul.f32 %v3499_v33, %v3495_v25 }
 0x3f1   : > { %v1081_v35 = vpack.c.bf16 %v1080_v34, %v1080_v34 }
 0x3f3   : > { %3180 = vmatmul.mubr.msk.bf16.vlgmr.msra.gmra.mrb[4].mxu1 %vm1022_vm2, %v1081_v35 }
 0x3f4   : > { %3191 = vmatprep.mubr.msk.bf16.mxu1 %vm3608_vm0, %v3606_v0 }
 0x456   : > { %v1192_v39 = vpop.xlane.xlu0 %1191 }
 0x457   : > { %3500 = vrcp.f32 %v1192_v39 }
 0x45a   : > { %v1198_v40 = vpop.permute.xlu0 %1197 }
 0x45b   : > { %v1203_v41 = vsel %vm1085_vm1, %v1198_v40, 0 }
 0x45c   : > { %3190 = vmatpush3.bf16.msra.mxu1 %v1203_v41 }
 0x45d   : > { %3201 = vmatprep.subr.bf16.mxu1 %v3606_v0 }
 0x45e   : > { %v1342_v56 = vpop.permute.xlu0 %1341 }
 0x45f   : > { %v1347_v62 = vsel %vm1022_vm2, %v1342_v56, 0 }
 0x461   : > { %v3501_v45 = vpop.eup %3500 }
 0x462   : > { %v1194_v46 = vmul.f32 %v3501_v45, %v3497_v30 }
 0x464   : > { %v1195_v49 = vpack.c.bf16 %v1194_v46, %v1194_v46 }
 0x466   : > { %3192 = vmatmul.mubr.msk.bf16.vlgmr.msra.gmra.mrb[8].mxu1 %vm1022_vm2, %v1195_v49 }
 0x467   : > { %3202 = vmatpush3.bf16.msra.mxu1 %v1297_v50  ;;  %3203 = vmatprep.mubr.msk.bf16.mxu1 %vm3608_vm0, %v3606_v0 }
 0x468   : > { %3213 = vmatprep.subr.bf16.mxu1 %v3606_v0 }
 0x4c6   : > { %v1123_v51 = vpop.f32.mrb[4].mxu1 }
 0x4c7   : > { %v1129_v52 = vpack.c.bf16 %v1123_v51, %v1123_v51  ;;  %v3181_v53 = vpop.f32.mrb[5].mxu1 }
 0x4c8   : > { %v1126_v54 = vpop.f32.mrb[6].mxu1 }
 0x4c9   : > { %v3182_v55 = vpop.f32.mrb[7].mxu1  ;;  %3204 = vmatmul.mubr.msk.bf16.vlgmr.msra.gmra.mrb[12].mxu1 %vm1022_vm2, %v1129_v52 }
 0x4ca   : > { %3215 = vmatprep.mubr.msk.bf16.mxu1 %vm3608_vm0, %v3606_v0 }
 0x539   : > { %v1239_v57 = vpop.f32.mrb[8].mxu1 }
 0x53a   : > { %v1245_v58 = vpack.c.bf16 %v1239_v57, %v1239_v57  ;;  %v3193_v59 = vpop.f32.mrb[9].mxu1  ;;  %v1018_v57 = vld [vmem:[%s4382_s29 + $0x18] sm:$0xff] }
 0x53b   : > { %v1242_v61 = vpop.f32.mrb[10].mxu1 }
 0x53c   : > { %v3194_v63 = vpop.f32.mrb[11].mxu1  ;;  %3198 = vmatmul.mubr.msk.bf16.vlgmr.msra.gmra.mrb[12].mxu0 %vm1022_vm2, %v1245_v58  ;;  %v1611_v58 = vpack.c.bf16 %v1018_v57, %v1018_v57 }
 0x53d   : > { %3208 = vmatpush3.bf16.xpose.msra.mxu0 %v1347_v62  ;;  %3209 = vmatprep.mubr.msk.bf16.mxu0 %vm3608_vm0, %v3606_v0 }
 0x53e   : > { %3219 = vmatprep.subr.bf16.mxu0 %v3606_v0 }
 0x544   : > { %3210 = vmatmul.mubr.msk.bf16.vlgmr.msra.gmra.mrb[16].mxu0 %vm1022_vm2, %v1340_v3 }
 0x545   : > { %3221 = vmatprep.mubr.msk.bf16.mxu0 %vm3608_vm0, %v3606_v0 }
 0x59c   : > { %v1333_v4 = vpop.f32.mrb[12].mxu1 }
 0x59d   : > { %v3205_v6 = vpop.f32.mrb[13].mxu1 }
 0x59e   : > { %v1336_v7 = vpop.f32.mrb[14].mxu1 }
 0x59f   : > { %v3206_v8 = vpop.f32.mrb[15].mxu1 }
 0x60f   : > { %v1287_v9 = vpop.f32.mrb[12].mxu0 }
 0x610   : > { %v3995_v10 = vadd.f32 %v1333_v4, %v1287_v9  ;;  %v3199_v11 = vpop.f32.mrb[13].mxu0 }
 0x611   : > { %v1290_v12 = vpop.f32.mrb[14].mxu0 }
 0x612   : > { %v3200_v13 = vpop.f32.mrb[15].mxu0 }
 0x617   : > { %v1383_v14 = vpop.f32.mrb[16].mxu0 }
 0x618   : > { %v1389_v15 = vmul.f32 0.35355338, %v1383_v14  ;;  %v3211_v16 = vpop.f32.mrb[17].mxu0 }
 0x619   : > { %v1386_v17 = vpop.f32.mrb[18].mxu0  ;;  %v3449_v16 = vld [vmem:[%s4341_s12 + $0x14] ss:$8 sps:$4 sm:$0xff]  }
 0x61a   : > { %v3212_v18 = vpop.f32.mrb[19].mxu0  ;;  %v1390_v19 = vsel %vm1022_vm2, %v1389_v15, -inf  ;;  %v3453_v17 = vld [vmem:[%s4339_s10] sm:$0xff]  }
 0x61b   : > { %1391 = vmax.xlane.f32.xlu0 %v1390_v19  ;;  %v3452_v18 = vld [vmem:[%s4341_s12 + $0x24] ss:$8 sps:$4 sm:$0xff]   ;;  %v3450_v19 = vld [vmem:[%s4341_s12 + $0x20] ss:$8 sps:$4 sm:$0xff]  }
 0x631   : > { %1402 = vrot.lane.b32.xlu0 %v3931_v60, %s4359_s2  ;;  %s4384_s2 = smov 112  }
 0x635   : > { %1499 = vrot.lane.b32.xlu0 %v3942_v5, %s4357_s22 }
 0x6a8   : > { %v1392_v20 = vpop.xlane.xlu0 %1391 }
 0x6a9   : > { %v1393_v21 = vsub.f32 %v1389_v15, %v1392_v20  ;;  %v3446_v15 = vld [vmem:[%s4341_s12 + $0x4] ss:$8 sps:$4 sm:$0xff]   ;;  %v3456_v20 = vld [vmem:[%s4341_s12 + $0x34] ss:$8 sps:$4 sm:$0xff]  }
 0x6ab   : > { %v1394_v22 = vmul.f32 1.442695, %v1393_v21  ;;  %v3454_v21 = vld [vmem:[%s4341_s12 + $0x30] ss:$8 sps:$4 sm:$0xff]  }
 0x6ac   : > { %v1403_v23 = vpop.permute.xlu0 %1402 }
 0x6ad   : > { %3502 = vpow2.f32 %v1394_v22  ;;  %v1408_v25 = vsel %vm1085_vm1, %v1403_v23, 0 }
 0x6ae   : > { %3214 = vmatpush3.bf16.msra.mxu1 %v1408_v25 }
 0x6af   : > { %3225 = vmatprep.subr.bf16.mxu1 %v3606_v0 }
 0x6b0   : > { %v1500_v33 = vpop.permute.xlu0 %1499 }
 0x6b7   : > { %v3503_v26 = vpop.eup %3502 }
 0x6b8   : > { %v1396_v27 = vsel %vm1022_vm2, %v3503_v26, 0.0 }
 0x6b9   : > { %1397 = vadd.xlane.f32.xlu1 %v1396_v27 }
 0x6ca   : > { %1501 = vrot.lane.b32.xlu1 %v3933_v2, %s4357_s22  ;;  %v1017_v2 = vld [vmem:[%s4382_s29 + $0x10] sm:$0xff] }
 0x6cb   : > { %v1451_v34 = vpack.c.bf16 %v1017_v2, %v1017_v2  ;;  %v3464_v2 = vld [vmem:[%s4341_s12 + $0x54] ss:$8 sps:$4 sm:$0xff]  }
 0x6cd   : > { %v1456_v35 = vsel %vm1085_vm1, %v1451_v34, 0  ;;  %v3462_v34 = vld [vmem:[%s4341_s12 + $0x50] ss:$8 sps:$4 sm:$0xff]  }
 0x6ce   : > { %3220 = vmatpush3.bf16.msra.mxu0 %v1456_v35  ;;  %v3465_v35 = vld [vmem:[%s4339_s10 + $0x18] sm:$0xff]  }
 0x6cf   : > { %3231 = vmatprep.subr.bf16.mxu0 %v3606_v0 }
 0x746   : > { %v1398_v28 = vpop.xlane.xlu1 %1397 }
 0x747   : > { %3504 = vrcp.f32 %v1398_v28 }
 0x74a   : > { %v1502_v30 = vpop.permute.xlu1 %1501 }
 0x74b   : > { %v1507_v32 = vsel %vm1022_vm2, %v1502_v30, 0 }
 0x751   : > { %v3505_v5 = vpop.eup %3504 }
 0x752   : > { %v1400_v29 = vmul.f32 %v3505_v5, %v3503_v26  ;;  %v3004_v26 = vld [vmem:[%s4336_s7] ss:$0 sm:$0xff] }
 0x754   : > { %v1401_v31 = vpack.c.bf16 %v1400_v29, %v1400_v29 }
 0x756   : > { %3216 = vmatmul.mubr.msk.bf16.vlgmr.msra.gmra.mrb[16].mxu1 %vm1022_vm2, %v1401_v31  ;;  %v3457_v31 = vld [vmem:[%s4339_s10 + $0x8] sm:$0xff]  }
 0x757   : > { %3226 = vmatpush3.bf16.xpose.msra.mxu1 %v1507_v32  ;;  %3227 = vmatprep.mubr.msk.bf16.mxu1 %vm3608_vm0, %v3606_v0  ;;  %v3460_v32 = vld [vmem:[%s4341_s12 + $0x44] ss:$8 sps:$4 sm:$0xff]  }
 0x758   : > { %3237 = vmatprep.subr.bf16.mxu1 %v3606_v0 }
 0x75e   : > { %3228 = vmatmul.mubr.msk.bf16.vlgmr.msra.gmra.mrb[20].mxu1 %vm1022_vm2, %v1500_v33  ;;  %v3461_v33 = vld [vmem:[%s4339_s10 + $0x10] sm:$0xff]  }
 0x75f   : > { %3239 = vmatprep.mubr.msk.bf16.mxu1 %vm3608_vm0, %v3606_v0 }
 0x829   : > { %v1444_v36 = vpop.f32.mrb[16].mxu1 }
 0x82a   : > { %v1450_v37 = vpack.c.bf16 %v1444_v36, %v1444_v36  ;;  %v3217_v38 = vpop.f32.mrb[17].mxu1  ;;  %v3468_v36 = vld [vmem:[%s4341_s12 + $0x64] ss:$8 sps:$4 sm:$0xff]  }
 0x82b   : > { %v1447_v39 = vpop.f32.mrb[18].mxu1  ;;  %v3469_v38 = vld [vmem:[%s4339_s10 + $0x20] sm:$0xff]  }
 0x82c   : > { %v3218_v40 = vpop.f32.mrb[19].mxu1  ;;  %3222 = vmatmul.mubr.msk.bf16.vlgmr.msra.gmra.mrb[20].mxu0 %vm1022_vm2, %v1450_v37  ;;  %v3466_v37 = vld [vmem:[%s4341_s12 + $0x60] ss:$8 sps:$4 sm:$0xff]   ;;  %v3472_v39 = vld [vmem:[%s4341_s12 + $0x74] ss:$8 sps:$4 sm:$0xff]  }
 0x82d   : > { %3233 = vmatprep.mubr.msk.bf16.mxu0 %vm3608_vm0, %v3606_v0  ;;  %v3470_v40 = vld [vmem:[%s4341_s12 + $0x70] ss:$8 sps:$4 sm:$0xff]  }
 0x831   : > { %v1543_v41 = vpop.f32.mrb[20].mxu1 }
 0x832   : > { %v1549_v42 = vmul.f32 0.35355338, %v1543_v41  ;;  %v3229_v43 = vpop.f32.mrb[21].mxu1  ;;  %v726_v41 = vld [vmem:[%s719_s6] sm:$0xff] }
 0x833   : > { %v1546_v45 = vpop.f32.mrb[22].mxu1  ;;  %v1809_v43 = vpack.c.bf16 %v726_v41, %v726_v41 }
 0x834   : > { %v3230_v46 = vpop.f32.mrb[23].mxu1  ;;  %v1550_v49 = vsel %vm1022_vm2, %v1549_v42, -inf  ;;  %v3474_v45 = vld [vmem:[%s4339_s10 + $0x30] sm:$0xff]  }
 0x835   : > { %1551 = vmax.xlane.f32.xlu0 %v1550_v49  ;;  %v3475_v46 = vld [vmem:[%s4339_s10 + $0x38] sm:$0xff]  }
 0x84b   : > { %1562 = vrot.lane.b32.xlu0 %v3931_v60, %s4357_s22  ;;  %v1616_v60 = vsel %vm1085_vm1, %v1611_v58, 0  ;;  %v3005_v58 = vld [vmem:[%s4337_s8] ss:$0 sm:$0xff] }
 0x84c   : > { %3238 = vmatpush3.bf16.msra.mxu1 %v1616_v60 }
 0x84d   : > { %1918 = vmatprep.subr.bf16.mxu1 %v3446_v15 }
 0x8c2   : > { %v1552_v50 = vpop.xlane.xlu0 %1551 }
 0x8c3   : > { %v1553_v51 = vsub.f32 %v1549_v42, %v1552_v50  ;;  %v3473_v42 = vld [vmem:[%s4339_s10 + $0x28] sm:$0xff]  }
 0x8c5   : > { %v1554_v52 = vmul.f32 1.442695, %v1553_v51 }
 0x8c6   : > { %v1563_v53 = vpop.permute.xlu0 %1562 }
 0x8c7   : > { %3506 = vpow2.f32 %v1554_v52  ;;  %v1568_v54 = vsel %vm1085_vm1, %v1563_v53, 0 }
 0x8c8   : > { %3232 = vmatpush3.bf16.msra.mxu0 %v1568_v54 }
 0x8c9   : > { %3243 = vmatprep.subr.bf16.mxu0 %v3606_v0 }
 0x8d1   : > { %v3507_v55 = vpop.eup %3506 }
 0x8d2   : > { %v1556_v56 = vsel %vm1022_vm2, %v3507_v55, 0.0 }
 0x8d3   : > { %1557 = vadd.xlane.f32.xlu1 %v1556_v56 }
 0x8ff   : > { %v1492_v59 = vpop.f32.mrb[20].mxu0 }
 0x900   : > { %v1498_v61 = vadd.f32 %v1492_v59, %v3995_v10  ;;  %v3223_v62 = vpop.f32.mrb[21].mxu0  ;;  %v3444_v10 = vld [vmem:[%s4341_s12] ss:$8 sps:$4 sm:$0xff]  }
 0x901   : > { %v1495_v63 = vpop.f32.mrb[22].mxu0  ;;  %v3006_v59 = vld [vmem:[%s4338_s9] ss:$0 sm:$0xff] }
 0x902   : > { %v3224_v3 = vpop.f32.mrb[23].mxu0 }
 0x903   : > { %v1826_v3 = vld [vmem:[%s4342_s13] sm:$0x3] }
 0x960   : > { %v1558_v4 = vpop.xlane.xlu1 %1557 }
 0x961   : > { %3508 = vrcp.f32 %v1558_v4  ;;  %v1831_v4 = vrot.slane %v1826_v3, %v793_v48 }
 0x96b   : > { %v3509_v6 = vpop.eup %3508 }
 0x96c   : > { %v1560_v7 = vmul.f32 %v3509_v6, %v3507_v55  ;;  %v1835_v6 = vrot.slane %v1826_v3, %v797_v47  ;;  %v3007_v47 = vld [vmem:[%s4340_s11] ss:$0 sm:$0xff] }
 0x96e   : > { %v1561_v8 = vpack.c.bf16 %v1560_v7, %v1560_v7 }
 0x970   : > { %3234 = vmatmul.mubr.msk.bf16.vlgmr.msra.gmra.mrb[24].mxu0 %vm1022_vm2, %v1561_v8 }
 0x971   : > { %3259 = vmatprep.mubr.msk.bf16.mxu0 %vm3608_vm0, %v3606_v0  ;;  %3244 = vmatpush3.bf16.msra.mxu0 %v3453_v17 }
 0x972   : > { %3245 = vmatprep.subr.bf16.mxu0 %v3606_v0 }
 0x975   : > { %3246 = vmatpush3.bf16.msra.mxu0 %v3457_v31 }
 0x976   : > { %3247 = vmatprep.subr.bf16.mxu0 %v3606_v0 }
 0x979   : > { %3248 = vmatpush3.bf16.msra.mxu0 %v3461_v33 }
 0x97a   : > { %3249 = vmatprep.subr.bf16.mxu0 %v3606_v0 }
 0x97d   : > { %3250 = vmatpush3.bf16.msra.mxu0 %v3465_v35 }
 0x97e   : > { %3251 = vmatprep.subr.bf16.mxu0 %v3606_v0 }
 0x981   : > { %3252 = vmatpush3.bf16.msra.mxu0 %v3469_v38 }
 0x982   : > { %3253 = vmatprep.subr.bf16.mxu0 %v3606_v0 }
 0x985   : > { %3254 = vmatpush3.bf16.msra.mxu0 %v3473_v42 }
 0x986   : > { %3255 = vmatprep.subr.bf16.mxu0 %v3606_v0 }
 0x989   : > { %3256 = vmatpush3.bf16.msra.mxu0 %v3474_v45 }
 0x98a   : > { %3257 = vmatprep.subr.bf16.mxu0 %v3606_v0 }
 0x98d   : > { %3258 = vmatpush3.bf16.msra.mxu0 %v3475_v46 }
 0x98e   : > { %3263 = vmatprep.subr.bf16.mxu0 %v3606_v0 }
 0xa43   : > { %v1604_v9 = vpop.f32.mrb[24].mxu0 }
 0xa44   : > { %v1610_v11 = vpack.c.bf16 %v1604_v9, %v1604_v9  ;;  %v3235_v12 = vpop.f32.mrb[25].mxu0 }
 0xa45   : > { %v1607_v13 = vpop.f32.mrb[26].mxu0 }
 0xa46   : > { %v3236_v14 = vpop.f32.mrb[27].mxu0  ;;  %3240 = vmatmul.mubr.msk.bf16.vlgmr.msra.gmra.mrb[24].mxu1 %vm1022_vm2, %v1610_v11 }
 0xa47   : > { %1950 = vmatprep.mubr.bf16.mxu1 %v3607_v24  ;;  %1919 = vmatpush1.bf16.msra.mxu1 %v3444_v10  ;;  %v3447_v24 = vld [vmem:[%s4341_s12 + $0x10] ss:$8 sps:$4 sm:$0xff]  }
 0xa48   : > { %1920 = vmatprep.subr.bf16.mxu1 %v3449_v16 }
 0xa4b   : > { %1921 = vmatpush1.bf16.msra.mxu1 %v3447_v24 }
 0xa4c   : > { %1922 = vmatprep.subr.bf16.mxu1 %v3452_v18 }
 0xa4f   : > { %1923 = vmatpush1.bf16.msra.mxu1 %v3450_v19 }
 0xa50   : > { %1924 = vmatprep.subr.bf16.mxu1 %v3456_v20 }
 0xa53   : > { %1925 = vmatpush1.bf16.msra.mxu1 %v3454_v21 }
 0xa54   : > { %1926 = vmatprep.subr.bf16.mxu1 %v3460_v32 }
 0xb19   : > { %v1652_v22 = vpop.f32.mrb[24].mxu1 }
 0xb1a   : > { %v1658_v23 = vadd.f32 %v1652_v22, %v1498_v61  ;;  %v3241_v25 = vpop.f32.mrb[25].mxu1 }
 0xb1b   : > { %v1655_v27 = vpop.f32.mrb[26].mxu1 }
 0xb1c   : > { %v1659_v28 = vadd.f32 %v1658_v23, %v3819_v1  ;;  %v3242_v5 = vpop.f32.mrb[27].mxu1  ;;  %v3458_v1 = vld [vmem:[%s4341_s12 + $0x40] ss:$8 sps:$4 sm:$0xff]  }
 0xb1d   : > { %1927 = vmatpush1.bf16.msra.mxu1 %v3458_v1 }
 0xb1e   : > { %v4071_v29 = vadd.f32 %v3004_v26, %v1659_v28  ;;  %1928 = vmatprep.subr.bf16.mxu1 %v3464_v2 }
 0xb20   : > { %1670 = vadd.xlane.f32.xlu1 %v4071_v29  ;;  %v1673_v30 = vmul.f32 %v4071_v29, %v4071_v29 }
 0xb21   : > { %1929 = vmatpush1.bf16.msra.mxu1 %v3462_v34 }
 0xb22   : > { %1930 = vmatprep.subr.bf16.mxu1 %v3468_v36 }
 0xb24   : > { %1674 = vadd.xlane.f32.xlu1 %v1673_v30 }
 0xb25   : > { %1931 = vmatpush1.bf16.msra.mxu1 %v3466_v37 }
 0xb26   : > { %1932 = vmatprep.subr.bf16.mxu1 %v3472_v39 }
 0xb29   : > { %1933 = vmatpush1.bf16.msra.mxu1 %v3470_v40 }
 0xb2a   : > { %3269 = vmatprep.subr.bf16.mxu1 %v3606_v0 }
 0xb2c   : > { %1951 = vmatmul.mubr.bf16.vlgmr.msra.gmra.mrb[28].mxu1 %v1809_v43 }
 0xb2d   : > { %3271 = vmatprep.mubr.msk.bf16.mxu1 %vm3608_vm0, %v3606_v0 }
 0xbad   : > { %v1671_v49 = vpop.xlane.xlu1 %1670 }
 0xbae   : > { %v1672_v50 = vmul.f32 0.03125, %v1671_v49 }
 0xbb0   : > { %v1677_v52 = vmul.f32 %v1672_v50, %v1672_v50  ;;  %v1679_v56 = vsub.f32 %v4071_v29, %v1672_v50 }
 0xbb1   : > { %v1675_v51 = vpop.xlane.xlu1 %1674 }
 0xbb2   : > { %v1676_v53 = vmul.f32 0.03125, %v1675_v51  ;;  %v1960_v51 = vld [vmem:[%s4343_s14 + $0x8] sm:$0xff] }
 0xbb4   : > { %v1678_v54 = vsub.f32 %v1676_v53, %v1677_v52  ;;  %v2188_v52 = vpack.c.bf16 %v1960_v51, %v1960_v51 }
 0xbb6   : > { %v1680_v55 = vadd.f32 1e-05, %v1678_v54  ;;  %v2193_v53 = vsel %vm1085_vm1, %v2188_v52, 0 }
 0xbb8   : > { %3510 = vrsqrt.f32 %v1680_v55 }
 0xbc2   : > { %v3511_v57 = vpop.eup %3510 }
 0xbc3   : > { %v1682_v60 = vmul.f32 %v3511_v57, %v1679_v56  ;;  %v1959_v57 = vld [vmem:[%s4343_s14] sm:$0xff] }
 0xbc5   : > { %v1689_v61 = vmul.f32 %v3005_v58, %v1682_v60  ;;  %v2072_v58 = vpack.c.bf16 %v1959_v57, %v1959_v57 }
 0xbc7   : > { %v1696_v62 = vadd.f32 %v3006_v59, %v1689_v61 }
 0xbc9   : > { %v1697_v63 = vpack.c.bf16 %v1696_v62, %v1696_v62  ;;  %v2239_v62 = vsel %vm1085_vm1, %v2072_v58, 0 }
 0xbcb   : > { %3260 = vmatmul.mubr.bf16.vlgmr.msra.gmra.mrb[28].mxu0 %v1697_v63 }
 0xbcc   : > { %3265 = vmatprep.mubr.msk.bf16.mxu0 %vm3608_vm0, %v3606_v0 }
 0xbff   : > { %v1952_v7 = vpop.f32.mrb[28].mxu1 }
 0xc00   : > { %v1953_v8 = vadd.f32 %v1952_v7, %v1831_v4  ;;  %v1954_v9 = vpop.f32.mrb[29].mxu1 }
 0xc01   : > { %v1955_v11 = vadd.f32 %v1954_v9, %v1835_v6  ;;  %v1956_v12 = vpop.f32.mrb[30].mxu1 }
 0xc02   : > { %v4151_v13 = vpack.c.bf16 %v1953_v8, %v1953_v8  ;;  %v1957_v14 = vpop.f32.mrb[31].mxu1 }
 0xc03   : > { %v4153_v10 = vpack.c.bf16 %v1955_v11, %v1955_v11 }
 0xc04   : > { %2077 = vrot.lane.b32.xlu0 %v4151_v13, %s3609_s25  ;;  %v1970_v15 = vsel %vm1022_vm2, %v4151_v13, 0 }
 0xc05   : > { %3264 = vmatpush3.bf16.xpose.msra.mxu0 %v1970_v15  ;;  %v2029_v44 = vsel %vm1085_vm1, %v4153_v10, 0 }
 0xc06   : > { %3270 = vmatpush3.bf16.msra.mxu1 %v2029_v44  ;;  %3275 = vmatprep.subr.bf16.mxu0 %v3606_v0 }
 0xc07   : > { %3281 = vmatprep.subr.bf16.mxu1 %v3606_v0 }
 0xc76   : > { %v2078_v16 = vpop.permute.xlu0 %2077 }
 0xc77   : > { %v2083_v21 = vsel %vm1022_vm2, %v2078_v16, 0 }
 0xc9e   : > { %v1803_v48 = vpop.f32.mrb[28].mxu0 }
 0xc9f   : > { %v1804_v17 = vadd.f32 %v3007_v47, %v1803_v48  ;;  %v3261_v24 = vpop.f32.mrb[29].mxu0 }
 0xca0   : > { %v1806_v18 = vpop.f32.mrb[30].mxu0 }
 0xca1   : > { %v4166_v19 = vpack.c.bf16 %v1804_v17, %v1804_v17  ;;  %v3262_v20 = vpop.f32.mrb[31].mxu0 }
 0xca3   : > { %2074 = vrot.lane.b32.xlu1 %v4166_v19, %s3609_s25  ;;  %3266 = vmatmul.mubr.msk.bf16.vlgmr.msra.gmra.mrb[32].mxu0 %vm1022_vm2, %v4166_v19 }
 0xca4   : > { %3276 = vmatpush3.bf16.xpose.msra.mxu0 %v2083_v21  ;;  %3277 = vmatprep.mubr.msk.bf16.mxu0 %vm3608_vm0, %v3606_v0 }
 0xca5   : > { %3287 = vmatprep.subr.bf16.mxu0 %v3606_v0 }
 0xd15   : > { %v2075_v22 = vpop.permute.xlu1 %2074 }
 0xd16   : > { %3278 = vmatmul.mubr.msk.bf16.vlgmr.msra.gmra.mrb[36].mxu0 %vm1022_vm2, %v2075_v22 }
 0xd17   : > { %3289 = vmatprep.mubr.msk.bf16.mxu0 %vm3608_vm0, %v3606_v0  ;;  %3288 = vmatpush3.bf16.msra.mxu0 %v2193_v53 }
 0xd18   : > { %3299 = vmatprep.subr.bf16.mxu0 %v3606_v0 }
 0xd76   : > { %v2006_v23 = vpop.f32.mrb[32].mxu0 }
 0xd77   : > { %v2012_v25 = vmul.f32 0.35355338, %v2006_v23  ;;  %v3267_v26 = vpop.f32.mrb[33].mxu0 }
 0xd78   : > { %v2009_v27 = vpop.f32.mrb[34].mxu0 }
 0xd79   : > { %v3268_v28 = vpop.f32.mrb[35].mxu0  ;;  %v2013_v5 = vsel %vm1022_vm2, %v2012_v25, -inf }
 0xd7a   : > { %2014 = vmax.xlane.f32.xlu0 %v2013_v5 }
 0xde9   : > { %v2119_v30 = vpop.f32.mrb[36].mxu0 }
 0xdea   : > { %v2125_v31 = vmul.f32 0.35355338, %v2119_v30  ;;  %v3279_v32 = vpop.f32.mrb[37].mxu0 }
 0xdeb   : > { %v2122_v1 = vpop.f32.mrb[38].mxu0 }
 0xdec   : > { %v3280_v33 = vpop.f32.mrb[39].mxu0  ;;  %v2126_v2 = vsel %vm1022_vm2, %v2125_v31, -inf }
 0xded   : > { %2127 = vmax.xlane.f32.xlu1 %v2126_v2 }
 0xdfe   : > { %2283 = vrot.lane.b32.xlu1 %v4151_v13, %s4384_s2 }
 0xe07   : > { %v2015_v34 = vpop.xlane.xlu0 %2014 }
 0xe08   : > { %v2016_v35 = vsub.f32 %v2012_v25, %v2015_v34 }
 0xe0a   : > { %v2017_v36 = vmul.f32 1.442695, %v2016_v35 }
 0xe0c   : > { %3512 = vpow2.f32 %v2017_v36 }
 0xe16   : > { %v3513_v37 = vpop.eup %3512 }
 0xe17   : > { %v2019_v38 = vsel %vm1022_vm2, %v3513_v37, 0.0 }
 0xe18   : > { %2020 = vadd.xlane.f32.xlu0 %v2019_v38 }
 0xe7a   : > { %v2128_v39 = vpop.xlane.xlu1 %2127 }
 0xe7b   : > { %v2129_v40 = vsub.f32 %v2125_v31, %v2128_v39 }
 0xe7d   : > { %v2130_v41 = vmul.f32 1.442695, %v2129_v40 }
 0xe7e   : > { %v2284_v8 = vpop.permute.xlu1 %2283 }
 0xe7f   : > { %3514 = vpow2.f32 %v2130_v41  ;;  %v2289_v15 = vsel %vm1022_vm2, %v2284_v8, 0 }
 0xe89   : > { %v3515_v42 = vpop.eup %3514 }
 0xe8a   : > { %v2132_v43 = vsel %vm1022_vm2, %v3515_v42, 0.0 }
 0xe8b   : > { %2133 = vadd.xlane.f32.xlu0 %v2132_v43 }
 0xea1   : > { %2139 = vrot.lane.b32.xlu0 %v4153_v10, %s3609_s25 }
 0xea5   : > { %v2021_v45 = vpop.xlane.xlu0 %2020  ;;  %2281 = vrot.lane.b32.xlu0 %v4166_v19, %s4384_s2 }
 0xea6   : > { %3516 = vrcp.f32 %v2021_v45 }
 0xeb0   : > { %v3517_v46 = vpop.eup %3516 }
 0xeb1   : > { %v2023_v49 = vmul.f32 %v3517_v46, %v3513_v37 }
 0xeb3   : > { %v2024_v50 = vpack.c.bf16 %v2023_v49, %v2023_v49 }
 0xeb5   : > { %3272 = vmatmul.mubr.msk.bf16.vlgmr.msra.gmra.mrb[32].mxu1 %vm1022_vm2, %v2024_v50 }
 0xeb6   : > { %3283 = vmatprep.mubr.msk.bf16.mxu1 %vm3608_vm0, %v3606_v0 }
 0xf18   : > { %v2134_v54 = vpop.xlane.xlu0 %2133 }
 0xf19   : > { %3518 = vrcp.f32 %v2134_v54 }
 0xf1c   : > { %v2140_v55 = vpop.permute.xlu0 %2139 }
 0xf1d   : > { %v2145_v56 = vsel %vm1085_vm1, %v2140_v55, 0 }
 0xf1e   : > { %3282 = vmatpush3.bf16.msra.mxu1 %v2145_v56 }
 0xf1f   : > { %3293 = vmatprep.subr.bf16.mxu1 %v3606_v0 }
 0xf20   : > { %v2282_v47 = vpop.permute.xlu0 %2281 }
 0xf23   : > { %v3519_v60 = vpop.eup %3518 }
 0xf24   : > { %v2136_v59 = vmul.f32 %v3519_v60, %v3515_v42 }
 0xf26   : > { %v2137_v61 = vpack.c.bf16 %v2136_v59, %v2136_v59 }
 0xf28   : > { %3284 = vmatmul.mubr.msk.bf16.vlgmr.msra.gmra.mrb[36].mxu1 %vm1022_vm2, %v2137_v61 }
 0xf29   : > { %3294 = vmatpush3.bf16.msra.mxu1 %v2239_v62  ;;  %3295 = vmatprep.mubr.msk.bf16.mxu1 %vm3608_vm0, %v3606_v0 }
 0xf2a   : > { %3305 = vmatprep.subr.bf16.mxu1 %v3606_v0 }
 0xf88   : > { %v2065_v63 = vpop.f32.mrb[32].mxu1 }
 0xf89   : > { %v2071_v3 = vpack.c.bf16 %v2065_v63, %v2065_v63  ;;  %v3273_v4 = vpop.f32.mrb[33].mxu1  ;;  %v1962_v63 = vld [vmem:[%s4343_s14 + $0x18] sm:$0xff] }
 0xf8a   : > { %v2068_v6 = vpop.f32.mrb[34].mxu1 }
 0xf8b   : > { %v3274_v7 = vpop.f32.mrb[35].mxu1  ;;  %3296 = vmatmul.mubr.msk.bf16.vlgmr.msra.gmra.mrb[40].mxu1 %vm1022_vm2, %v2071_v3  ;;  %v2553_v3 = vpack.c.bf16 %v1962_v63, %v1962_v63 }
 0xf8c   : > { %3307 = vmatprep.mubr.msk.bf16.mxu1 %vm3608_vm0, %v3606_v0 }
 0xf8d   : > { %v2558_v4 = vsel %vm1085_vm1, %v2553_v3, 0 }
 0xffb   : > { %v2181_v9 = vpop.f32.mrb[36].mxu1 }
 0xffc   : > { %v2187_v11 = vpack.c.bf16 %v2181_v9, %v2181_v9  ;;  %v3285_v12 = vpop.f32.mrb[37].mxu1 }
 0xffd   : > { %v2184_v14 = vpop.f32.mrb[38].mxu1 }
 0xffe   : > { %v3286_v44 = vpop.f32.mrb[39].mxu1  ;;  %3290 = vmatmul.mubr.msk.bf16.vlgmr.msra.gmra.mrb[40].mxu0 %vm1022_vm2, %v2187_v11 }
 0xfff   : > { %3300 = vmatpush3.bf16.xpose.msra.mxu0 %v2289_v15  ;;  %3301 = vmatprep.mubr.msk.bf16.mxu0 %vm3608_vm0, %v3606_v0 }
0x1000   : > { %3311 = vmatprep.subr.bf16.mxu0 %v3606_v0 }
0x1006   : > { %3302 = vmatmul.mubr.msk.bf16.vlgmr.msra.gmra.mrb[44].mxu0 %vm1022_vm2, %v2282_v47 }
0x1007   : > { %3313 = vmatprep.mubr.msk.bf16.mxu0 %vm3608_vm0, %v3606_v0 }
0x105e   : > { %v2275_v48 = vpop.f32.mrb[40].mxu1 }
0x105f   : > { %v3297_v16 = vpop.f32.mrb[41].mxu1 }
0x1060   : > { %v2278_v17 = vpop.f32.mrb[42].mxu1 }
0x1061   : > { %v3298_v24 = vpop.f32.mrb[43].mxu1 }
0x10d1   : > { %v2229_v18 = vpop.f32.mrb[40].mxu0 }
0x10d2   : > { %v4218_v20 = vadd.f32 %v2275_v48, %v2229_v18  ;;  %v3291_v21 = vpop.f32.mrb[41].mxu0 }
0x10d3   : > { %v2232_v22 = vpop.f32.mrb[42].mxu0 }
0x10d4   : > { %v3292_v23 = vpop.f32.mrb[43].mxu0 }
0x10d9   : > { %v2325_v25 = vpop.f32.mrb[44].mxu0 }
0x10da   : > { %v2331_v26 = vmul.f32 0.35355338, %v2325_v25  ;;  %v3303_v27 = vpop.f32.mrb[45].mxu0  ;;  %v3044_v25 = vld [vmem:[%s4344_s15] ss:$0 sm:$0xff] }
0x10db   : > { %v2328_v28 = vpop.f32.mrb[46].mxu0 }
0x10dc   : > { %v3304_v5 = vpop.f32.mrb[47].mxu0  ;;  %v2332_v30 = vsel %vm1022_vm2, %v2331_v26, -inf }
0x10dd   : > { %2333 = vmax.xlane.f32.xlu0 %v2332_v30 }
0x10f3   : > { %2344 = vrot.lane.b32.xlu0 %v4153_v10, %s4384_s2 }
0x10f7   : > { %2441 = vrot.lane.b32.xlu0 %v4166_v19, %s4385_s24 }
0x116a   : > { %v2334_v31 = vpop.xlane.xlu0 %2333 }
0x116b   : > { %v2335_v32 = vsub.f32 %v2331_v26, %v2334_v31  ;;  %v3477_v31 = vld [vmem:[%s4347_s18 + $0x8] sm:$0xff]  }
0x116d   : > { %v2336_v1 = vmul.f32 1.442695, %v2335_v32  ;;  %v3479_v32 = vld [vmem:[%s4347_s18 + $0x18] sm:$0xff]  }
0x116e   : > { %v2345_v33 = vpop.permute.xlu0 %2344 }
0x116f   : > { %3520 = vpow2.f32 %v2336_v1  ;;  %v2350_v2 = vsel %vm1085_vm1, %v2345_v33, 0  ;;  %v3480_v1 = vld [vmem:[%s4347_s18 + $0x20] sm:$0xff]   ;;  %v3481_v33 = vld [vmem:[%s4347_s18 + $0x28] sm:$0xff]  }
0x1170   : > { %3306 = vmatpush3.bf16.msra.mxu1 %v2350_v2  ;;  %v3482_v2 = vld [vmem:[%s4347_s18 + $0x30] sm:$0xff]  }
0x1171   : > { %3317 = vmatprep.subr.bf16.mxu1 %v3606_v0 }
0x1172   : > { %v2442_v41 = vpop.permute.xlu0 %2441 }
0x1179   : > { %v3521_v34 = vpop.eup %3520 }
0x117a   : > { %v2338_v35 = vsel %vm1022_vm2, %v3521_v34, 0.0 }
0x117b   : > { %2339 = vadd.xlane.f32.xlu1 %v2338_v35  ;;  %v3484_v35 = vld [vmem:[#allocation2] sm:$0xff]  }
0x118c   : > { %2443 = vrot.lane.b32.xlu1 %v4151_v13, %s4385_s24  ;;  %v1961_v13 = vld [vmem:[%s4343_s14 + $0x10] sm:$0xff] }
0x118d   : > { %v2393_v42 = vpack.c.bf16 %v1961_v13, %v1961_v13 }
0x118f   : > { %v2398_v43 = vsel %vm1085_vm1, %v2393_v42, 0 }
0x1190   : > { %3312 = vmatpush3.bf16.msra.mxu0 %v2398_v43 }
0x1191   : > { %3323 = vmatprep.subr.bf16.mxu0 %v3606_v0 }
0x1208   : > { %v2340_v36 = vpop.xlane.xlu1 %2339 }
0x1209   : > { %3522 = vrcp.f32 %v2340_v36  ;;  %v3485_v36 = vld [vmem:[#allocation2 + $0x8] sm:$0xff]  }
0x120c   : > { %v2444_v38 = vpop.permute.xlu1 %2443 }
0x120d   : > { %v2449_v40 = vsel %vm1022_vm2, %v2444_v38, 0  ;;  %v3488_v38 = vld [vmem:[#allocation2 + $0x20] sm:$0xff]  }
0x1213   : > { %v3523_v19 = vpop.eup %3522 }
0x1214   : > { %v2342_v37 = vmul.f32 %v3523_v19, %v3521_v34  ;;  %v3483_v34 = vld [vmem:[%s4347_s18 + $0x38] sm:$0xff]   ;;  %v3486_v19 = vld [vmem:[#allocation2 + $0x10] sm:$0xff]  }
0x1216   : > { %v2343_v39 = vpack.c.bf16 %v2342_v37, %v2342_v37  ;;  %v3487_v37 = vld [vmem:[#allocation2 + $0x18] sm:$0xff]  }
0x1218   : > { %3308 = vmatmul.mubr.msk.bf16.vlgmr.msra.gmra.mrb[44].mxu1 %vm1022_vm2, %v2343_v39  ;;  %v3489_v39 = vld [vmem:[#allocation2 + $0x28] sm:$0xff]  }
0x1219   : > { %3318 = vmatpush3.bf16.xpose.msra.mxu1 %v2449_v40  ;;  %3319 = vmatprep.mubr.msk.bf16.mxu1 %vm3608_vm0, %v3606_v0 }
0x121a   : > { %3329 = vmatprep.subr.bf16.mxu1 %v3606_v0 }
0x1220   : > { %3320 = vmatmul.mubr.msk.bf16.vlgmr.msra.gmra.mrb[48].mxu1 %vm1022_vm2, %v2442_v41 }
0x1221   : > { %3331 = vmatprep.mubr.msk.bf16.mxu1 %vm3608_vm0, %v3606_v0  ;;  %3330 = vmatpush3.bf16.msra.mxu1 %v2558_v4 }
0x1222   : > { %3355 = vmatprep.subr.bf16.mxu1 %v3606_v0 }
0x12eb   : > { %v2386_v45 = vpop.f32.mrb[44].mxu1 }
0x12ec   : > { %v2392_v46 = vpack.c.bf16 %v2386_v45, %v2386_v45  ;;  %v3309_v49 = vpop.f32.mrb[45].mxu1 }
0x12ed   : > { %v2389_v50 = vpop.f32.mrb[46].mxu1 }
0x12ee   : > { %v3310_v51 = vpop.f32.mrb[47].mxu1  ;;  %3314 = vmatmul.mubr.msk.bf16.vlgmr.msra.gmra.mrb[48].mxu0 %vm1022_vm2, %v2392_v46 }
0x12ef   : > { %3325 = vmatprep.mubr.msk.bf16.mxu0 %vm3608_vm0, %v3606_v0  ;;  %v3045_v51 = vld [vmem:[%s4345_s16] ss:$0 sm:$0xff] }
0x12f3   : > { %v2485_v52 = vpop.f32.mrb[48].mxu1 }
0x12f4   : > { %v2491_v53 = vmul.f32 0.35355338, %v2485_v52  ;;  %v3321_v54 = vpop.f32.mrb[49].mxu1 }
0x12f5   : > { %v2488_v55 = vpop.f32.mrb[50].mxu1 }
0x12f6   : > { %v3322_v56 = vpop.f32.mrb[51].mxu1  ;;  %v2492_v57 = vsel %vm1022_vm2, %v2491_v53, -inf }
0x12f7   : > { %2493 = vmax.xlane.f32.xlu1 %v2492_v57  ;;  %v3490_v57 = vld [vmem:[#allocation2 + $0x30] sm:$0xff]  }
0x1384   : > { %v2494_v58 = vpop.xlane.xlu1 %2493 }
0x1385   : > { %v2495_v60 = vsub.f32 %v2491_v53, %v2494_v58  ;;  %v3046_v53 = vld [vmem:[%s4346_s17] ss:$0 sm:$0xff]  ;;  %v3491_v58 = vld [vmem:[#allocation2 + $0x38] sm:$0xff]  }
0x1387   : > { %v2496_v59 = vmul.f32 1.442695, %v2495_v60  ;;  %v3047_v60 = vld [vmem:[%s4348_s19] ss:$0 sm:$0xff] }
0x1389   : > { %3524 = vpow2.f32 %v2496_v59 }
0x1393   : > { %v3525_v61 = vpop.eup %3524 }
0x1394   : > { %v2498_v62 = vsel %vm1022_vm2, %v3525_v61, 0.0 }
0x1395   : > { %2499 = vadd.xlane.f32.xlu0 %v2498_v62 }
0x13ab   : > { %2504 = vrot.lane.b32.xlu0 %v4153_v10, %s4385_s24 }
0x13c1   : > { %v2434_v6 = vpop.f32.mrb[48].mxu0 }
0x13c2   : > { %v2440_v7 = vadd.f32 %v2434_v6, %v4218_v20  ;;  %v3315_v8 = vpop.f32.mrb[49].mxu0  ;;  %v3476_v20 = vld [vmem:[%s4347_s18] sm:$0xff]  }
0x13c3   : > { %v2437_v9 = vpop.f32.mrb[50].mxu0  ;;  %v3064_v8 = vld [vmem:[#allocation4] ss:$0 sm:$0xff] }
0x13c4   : > { %v3316_v11 = vpop.f32.mrb[51].mxu0 }
0x1422   : > { %v2500_v12 = vpop.xlane.xlu0 %2499 }
0x1423   : > { %3526 = vrcp.f32 %v2500_v12 }
0x1426   : > { %v2505_v14 = vpop.permute.xlu0 %2504 }
0x1427   : > { %v2510_v10 = vsel %vm1085_vm1, %v2505_v14, 0 }
0x1428   : > { %3324 = vmatpush3.bf16.msra.mxu0 %v2510_v10 }
0x1429   : > { %3335 = vmatprep.subr.bf16.mxu0 %v3606_v0 }
0x142d   : > { %v3527_v15 = vpop.eup %3526 }
0x142e   : > { %v2502_v44 = vmul.f32 %v3527_v15, %v3525_v61 }
0x1430   : > { %v2503_v47 = vpack.c.bf16 %v2502_v44, %v2502_v44 }
0x1432   : > { %3326 = vmatmul.mubr.msk.bf16.vlgmr.msra.gmra.mrb[52].mxu0 %vm1022_vm2, %v2503_v47 }
0x1433   : > { %3351 = vmatprep.mubr.msk.bf16.mxu0 %vm3608_vm0, %v3606_v0  ;;  %3336 = vmatpush3.bf16.msra.mxu0 %v3476_v20 }
0x1434   : > { %3337 = vmatprep.subr.bf16.mxu0 %v3606_v0 }
0x1437   : > { %3338 = vmatpush3.bf16.msra.mxu0 %v3477_v31 }
0x1438   : > { %3339 = vmatprep.subr.bf16.mxu0 %v3606_v0 }
0x1505   : > { %v2546_v48 = vpop.f32.mrb[52].mxu0 }
0x1506   : > { %v2552_v16 = vpack.c.bf16 %v2546_v48, %v2546_v48  ;;  %v3327_v17 = vpop.f32.mrb[53].mxu0 }
0x1507   : > { %v2549_v24 = vpop.f32.mrb[54].mxu0 }
0x1508   : > { %v3328_v18 = vpop.f32.mrb[55].mxu0  ;;  %3332 = vmatmul.mubr.msk.bf16.vlgmr.msra.gmra.mrb[52].mxu1 %vm1022_vm2, %v2552_v16 }
0x1509   : > { %3371 = vmatprep.mubr.msk.bf16.mxu1 %vm3608_vm0, %v3606_v0  ;;  %3356 = vmatpush3.bf16.msra.mxu1 %v3484_v35 }
0x150a   : > { %3357 = vmatprep.subr.bf16.mxu1 %v3606_v0 }
0x150d   : > { %3358 = vmatpush3.bf16.msra.mxu1 %v3485_v36 }
0x150e   : > { %3359 = vmatprep.subr.bf16.mxu1 %v3606_v0 }
0x1511   : > { %3360 = vmatpush3.bf16.msra.mxu1 %v3486_v19 }
0x1512   : > { %3361 = vmatprep.subr.bf16.mxu1 %v3606_v0 }
0x1515   : > { %3362 = vmatpush3.bf16.msra.mxu1 %v3487_v37 }
0x1516   : > { %3363 = vmatprep.subr.bf16.mxu1 %v3606_v0 }
0x1519   : > { %3364 = vmatpush3.bf16.msra.mxu1 %v3488_v38 }
0x151a   : > { %3365 = vmatprep.subr.bf16.mxu1 %v3606_v0 }
0x151d   : > { %3366 = vmatpush3.bf16.msra.mxu1 %v3489_v39 }
0x151e   : > { %3367 = vmatprep.subr.bf16.mxu1 %v3606_v0 }
0x1521   : > { %3368 = vmatpush3.bf16.msra.mxu1 %v3490_v57 }
0x1522   : > { %3369 = vmatprep.subr.bf16.mxu1 %v3606_v0 }
0x1525   : > { %3370 = vmatpush3.bf16.msra.mxu1 %v3491_v58 }
0x15db   : > { %v2594_v21 = vpop.f32.mrb[52].mxu1 }
0x15dc   : > { %v2600_v22 = vadd.f32 %v2594_v21, %v2440_v7  ;;  %v3333_v23 = vpop.f32.mrb[53].mxu1 }
0x15dd   : > { %v2597_v26 = vpop.f32.mrb[54].mxu1 }
0x15de   : > { %v2601_v27 = vadd.f32 %v2600_v22, %v4071_v29  ;;  %v3334_v28 = vpop.f32.mrb[55].mxu1  ;;  %v3478_v29 = vld [vmem:[%s4347_s18 + $0x10] sm:$0xff]  }
0x15df   : > { %3340 = vmatpush3.bf16.msra.mxu0 %v3478_v29 }
0x15e0   : > { %v4272_v5 = vadd.f32 %v3044_v25, %v2601_v27  ;;  %3341 = vmatprep.subr.bf16.mxu0 %v3606_v0 }
0x15e2   : > { %2612 = vadd.xlane.f32.xlu1 %v4272_v5  ;;  %v2615_v30 = vmul.f32 %v4272_v5, %v4272_v5 }
0x15e3   : > { %3342 = vmatpush3.bf16.msra.mxu0 %v3479_v32 }
0x15e4   : > { %3343 = vmatprep.subr.bf16.mxu0 %v3606_v0 }
0x15e6   : > { %2616 = vadd.xlane.f32.xlu1 %v2615_v30 }
0x15e7   : > { %3344 = vmatpush3.bf16.msra.mxu0 %v3480_v1 }
0x15e8   : > { %3345 = vmatprep.subr.bf16.mxu0 %v3606_v0 }
0x15eb   : > { %3346 = vmatpush3.bf16.msra.mxu0 %v3481_v33 }
0x15ec   : > { %3347 = vmatprep.subr.bf16.mxu0 %v3606_v0 }
0x15ef   : > { %3348 = vmatpush3.bf16.msra.mxu0 %v3482_v2 }
0x15f0   : > { %3349 = vmatprep.subr.bf16.mxu0 %v3606_v0 }
0x15f3   : > { %3350 = vmatpush3.bf16.msra.mxu0 %v3483_v34 }
0x166f   : > { %v2613_v40 = vpop.xlane.xlu1 %2612 }
0x1670   : > { %v2614_v41 = vmul.f32 0.03125, %v2613_v40 }
0x1672   : > { %v2619_v42 = vmul.f32 %v2614_v41, %v2614_v41  ;;  %v2621_v49 = vsub.f32 %v4272_v5, %v2614_v41 }
0x1673   : > { %v2617_v13 = vpop.xlane.xlu1 %2616 }
0x1674   : > { %v2618_v43 = vmul.f32 0.03125, %v2617_v13 }
0x1676   : > { %v2620_v45 = vsub.f32 %v2618_v43, %v2619_v42 }
0x1678   : > { %v2622_v46 = vadd.f32 1e-05, %v2620_v45 }
0x167a   : > { %3528 = vrsqrt.f32 %v2622_v46 }
0x1684   : > { %v3529_v50 = vpop.eup %3528 }
0x1685   : > { %v2624_v52 = vmul.f32 %v3529_v50, %v2621_v49 }
0x1687   : > { %v2631_v54 = vmul.f32 %v3045_v51, %v2624_v52 }
0x1689   : > { %v2638_v55 = vadd.f32 %v3046_v53, %v2631_v54 }
0x168b   : > { %v2639_v56 = vpack.c.bf16 %v2638_v55, %v2638_v55 }
0x168d   : > { %3352 = vmatmul.mubr.bf16.vlgmr.msra.gmra.mrb[56].mxu0 %v2639_v56 }
0x1760   : > { %v2745_v59 = vpop.f32.mrb[56].mxu0 }
0x1761   : > { %v2746_v61 = vadd.f32 %v3047_v60, %v2745_v59  ;;  %v3353_v62 = vpop.f32.mrb[57].mxu0 }
0x1762   : > { %v2748_v63 = vpop.f32.mrb[58].mxu0 }
0x1763   : > { %v2751_v3 = vmax.f32 %v2746_v61, 0.0  ;;  %v3354_v4 = vpop.f32.mrb[59].mxu0 }
0x1765   : > { %v2752_v6 = vpack.c.bf16 %v2751_v3, %v2751_v3 }
0x1767   : > { %3372 = vmatmul.mubr.bf16.vlgmr.msra.gmra.mrb[56].mxu1 %v2752_v6 }
0x183a   : > { %v2851_v7 = vpop.f32.mrb[56].mxu1 }
0x183b   : > { %v2857_v9 = vadd.f32 %v2851_v7, %v4272_v5  ;;  %v3373_v0 = vpop.f32.mrb[57].mxu1 }
0x183c   : > { %v2854_v11 = vpop.f32.mrb[58].mxu1 }
0x183d   : > { %v2865_v12 = vadd.f32 %v3064_v8, %v2857_v9  ;;  %v3374_v14 = vpop.f32.mrb[59].mxu1 }
0x183f   : > { %2866 = vst [vmem:[%s723_s0] sm:$0xff] %v2865_v12 }
0x1840 PF: > { %s4387_s23 = sld [smem:[#allocation8_spill]] }
0x1846   : > { %s34_s3 = sadd.s32 1, %s4387_s23  }
0x1847   : > { %p31_p5 = scmp.ge.s32.totalorder %s34_s3, 4  }
0x1849   :  { %33 = sbr.rel (!%p31_p5) target bundleno = 11 (0xb), region = 150 }
0x1850   :  { %2886 = vsyncpa [#allocation3], 1 }
0x1851   :  { %2888 = vsyncpa [#allocation3 + $0x1], 1 }
0x1852   :  { %2889 = vsyncpa [#allocation5], 1 }

// kernel: transformer_forward.11
= control target key start
LH: loop header
LB: loop body
LE: loop exit
PB: predicated region body
PF: predicated region fallthrough
CT: control target
= control target key end

     0   :  { %10 = vsyncpa [#allocation3], 0  ;;  %s987_s0 = inlined_call_operand.vmem [shape: f32[2,8,128], index: 0, kind: input, shape index: {}]   ;;  %s988_s1 = inlined_call_operand.vmem [shape: f32[1,128], index: 1, kind: input, shape index: {}]   ;;  %s989_s2 = inlined_call_operand.hbm [shape: f32[1,128], index: 2, kind: input, shape index: {}]   ;;  %s990_s3 = inlined_call_operand.vmem [shape: bf16[128,128], index: 3, kind: input, shape index: {}]   ;;  %s991_s4 = inlined_call_operand.hbm [shape: f32[1,128], index: 4, kind: input, shape index: {}]   ;;  %s992_s5 = inlined_call_operand.hbm [shape: f32[2,8,128], index: 5, kind: output, shape index: {}]  }
   0x1   :  { %11 = vsyncpa [#allocation6], 0 }
   0x2   :  { %12 = vsyncpa [#allocation4], 0 }
   0x3   :  { %14 = vsyncpa [#allocation4 + $0x1], 0  ;;  %s787_s18 = smov 0   ;;  %s789_s19 = smov 0  }
   0x4   :  { %s791_s20 = smov 0   ;;  %s793_s21 = smov 0  }
   0x5 LB: > { %s808_s22 = sadd.s32 4294967295, %s750_s21   ;;  %s494_s23 = sadd.s32 4294967294, %s750_s21   ;;  %s750_s21 = sphi %s793_s21, %s1010_s21   ;;  %s746_s20 = sphi %s791_s20, %s1009_s20   ;;  %s742_s19 = sphi %s789_s19, %s1008_s19   ;;  %s738_s18 = sphi %s787_s18, %s1007_s18  }
   0x6   : > { %s812_s24 = sadd.s32 1, %s750_s21   ;;  %s137_s25 = sadd.s32 1, %s746_s20 }
   0x7   : > { %s134_s26 = ssub.s32 %s750_s21, %s812_s24  ;;  %p147_p0 = scmp.ne.s32.totalorder %s746_s20, %s742_s19 }
   0x8   : > { %p135_p1 = scmp.eq.s32.totalorder %s134_s26, 0  ;;  %p148_p2 = scmp.eq.s32.totalorder %s808_s22, 1 }
   0x9   : > { %p153_p3 = scmp.ne.s32.totalorder %s742_s19, %s738_s18  ;;  %p154_p4 = scmp.eq.s32.totalorder %s494_s23, 1 }
   0xa   : > { %s823_s27 = scalar_select %p135_p1, %s746_s20, %s137_s25  }
   0xb   : > { %p825_p5 = por %p148_p2, %p147_p0  ;;  %p829_p6 = por %p154_p4, %p153_p3 }
   0xc   : > { %p495_p7 = scmp.ge.s32.totalorder %s750_s21, 1  ;;  %p161_p8 = scmp.lt.s32.totalorder %s750_s21, 3 }
   0xd   : > { %s996_s28 = scalar_select %p825_p5, 1, 0 }
   0xe   : > { %s997_s29 = scalar_select %p829_p6, 1, 0 }
   0xf   : > { %p993_p9 = scmp.eq.s32.totalorder %s808_s22, 0  ;;  %p836_p10 = pnand %p495_p7, %p161_p8 }
  0x10   : > { %s752_s6 = smov [#allocation2]   ;;  %s753_s8 = smov [#allocation5]  }
  0x11   : > { %s998_s30 = scalar_select %p836_p10, 1, 0 }
  0x12   : > { %s177_s7 = sshll.u32 %s752_s6, 4  ;;  %p558_p11 = pneg %p836_p10  ;;  %s178_s7 = int_to_ptr.vmem [resolvable:$true] %s177_s7 }
  0x13   : > { %s191_s9 = sshll.u32 %s753_s8, 4  ;;  %s624_s13 = scalar_lea.hbm %s989_s2, 16  ;;  %s848_s9 = int_to_ptr.vmem [resolvable:$true] %s191_s9 }
  0x14   : > { %p844_p12 = pnand %p993_p9, %p558_p11  ;;  %p625_p13 = scmp.ne.s32.totalorder %s989_s2, %s624_s13 }
  0x15   : > { %p631_p3 = scmp.lt.u32.totalorder %s624_s13, %s989_s2 }
  0x16   : > { %p626_p0 = pneg %p844_p12 }
  0x18   : > { %p627_p1 = pnand %p626_p0, %p625_p13 }
  0x1a   : > { %p628_p2 = pneg %p627_p1 }
  0x1c   : > { %p633_p4 = pnand %p631_p3, %p628_p2 }
  0x1e   : > { %636 = shalt.err (!%p633_p4)
}
  0x1f   : > { %s637_s23 = scalar_lea.vmem %s178_s7, 16  ;;  %s644_s25 = scalar_lea.vmem %s178_s7, 32 }
  0x20   : > { %p638_p7 = scmp.ne.s32.totalorder %s178_s7, %s637_s23  ;;  %p645_p9 = scmp.lt.s32.totalorder %s178_s7, %s178_s7 }
  0x21   : > { %p646_p6 = scmp.lt.s32.totalorder %s644_s25, %s637_s23 }
  0x22   : > { %p640_p8 = pnand %p638_p7, %p626_p0 }
  0x23   : > { %p647_p5 = por %p646_p6, %p645_p9 }
  0x24   : > { %p641_p11 = pneg %p640_p8 }
  0x26   : > { %p648_p10 = pnand %p647_p5, %p641_p11 }
  0x28   : > { %651 = shalt.err (!%p648_p10)
}
  0x29   : > { %561 = dma.hbm_to_vmem [thread:$0]  (!%p844_p12), %s989_s2, 16, %s178_s7, [#allocation3]  }
  0x2a   : > { %s652_s12 = scalar_lea.hbm %s991_s4, 16 }
  0x2b   : > { %p653_p13 = scmp.ne.s32.totalorder %s991_s4, %s652_s12  ;;  %p659_p9 = scmp.lt.u32.totalorder %s652_s12, %s991_s4 }
  0x2d   : > { %p655_p6 = pnand %p653_p13, %p626_p0 }
  0x2f   : > { %p656_p5 = pneg %p655_p6 }
  0x31   : > { %p661_p10 = pnand %p659_p9, %p656_p5 }
  0x33   : > { %664 = shalt.err (!%p661_p10)
}
  0x34   : > { %s665_s7 = scalar_lea.vmem %s848_s9, 16  ;;  %s672_s17 = scalar_lea.vmem %s848_s9, 32 }
  0x35   : > { %p666_p1 = scmp.ne.s32.totalorder %s848_s9, %s665_s7  ;;  %p673_p4 = scmp.lt.s32.totalorder %s848_s9, %s848_s9 }
  0x36   : > { %p674_p7 = scmp.lt.s32.totalorder %s672_s17, %s665_s7 }
  0x37   : > { %p668_p2 = pnand %p666_p1, %p626_p0 }
  0x38   : > { %p675_p8 = por %p674_p7, %p673_p4 }
  0x39   : > { %p669_p3 = pneg %p668_p2 }
  0x3b   : > { %p676_p11 = pnand %p675_p8, %p669_p3 }
  0x3d   : > { %679 = shalt.err (!%p676_p11)
}
  0x3e   : > { %564 = dma.hbm_to_vmem [thread:$0]  (!%p844_p12), %s991_s4, 16, %s848_s9, [#allocation6]  }
  0x3f   : > { %p1000_p13 = scmp.ne.s32.totalorder %s998_s30, 0 }
  0x40   : > { %p1001_p0 = scmp.eq.s32.totalorder (!%p1000_p13), %s808_s22, 0 }
  0x41   : > { %211 = sbr.rel (%p1000_p13) target bundleno = 794 (0x31a), region = 40 }
  0x48   : > { %725 = dma.done.wait (%p1001_p0), [#allocation3], 16   ;;  %p1002_p6 = pmov %p1001_p0 }
  0x49   : > { %p1003_p5 = pmov %p1001_p0 }
  0x4a   : > { %727 = vsyncadd (%p1002_p6), [#allocation3], 4294967280 }
  0x4b   : > { %729 = dma.done.wait (%p1003_p5), [#allocation6], 16   ;;  %p1004_p9 = pmov %p1001_p0 }
  0x4c   : > { %p242_p10 = scmp.lt.s32.totalorder %s808_s22, 1  ;;  %v754_v0 = vmov 0.0   ;;  %v610_v3 = vld [vmem:[%s990_s3] sm:$0xff]   ;;  %v611_v4 = vld [vmem:[%s990_s3 + $0x8] sm:$0xff]   ;;  %v612_v5 = vld [vmem:[%s990_s3 + $0x10] sm:$0xff]   ;;  %vm755_vm0 = vmmov 0  }
  0x4d   : > { %731 = vsyncadd (%p1004_p9), [#allocation6], 4294967280  ;;  %528 = vmatprep.subr.bf16.mxu0 %v754_v0  ;;  %v613_v6 = vld [vmem:[%s990_s3 + $0x18] sm:$0xff]   ;;  %v614_v7 = vld [vmem:[%s990_s3 + $0x20] sm:$0xff]   ;;  %544 = vmatprep.mubr.msk.bf16.mxu0 %vm755_vm0, %v754_v0  ;;  %s239_s12 = sand.u32 1, %s742_s19   ;;  %s516_s14 = sshll.u32 %s808_s22, 7 }
  0x4e   : > { %s243_s9 = scalar_select %p242_p10, %s808_s22, 1  ;;  %529 = vmatpush3.bf16.msra.mxu0 %v610_v3  ;;  %v615_v8 = vld [vmem:[%s990_s3 + $0x28] sm:$0xff]   ;;  %v616_v9 = vld [vmem:[%s990_s3 + $0x30] sm:$0xff]   ;;  %v617_v10 = vld [vmem:[%s990_s3 + $0x38] sm:$0xff]  }
  0x4f   : > { %530 = vmatprep.subr.bf16.mxu0 %v754_v0  ;;  %v504_v20 = vld [vmem:[%s988_s1] ss:$0 sm:$0xff]  ;;  %v506_v26 = vld [vmem:[#allocation5] ss:$0 sm:$0xff]  ;;  %s502_s13 = sshll.u32 %s239_s12, 3  ;;  %s945_s23 = scalar_lea.hbm %s992_s5, %s516_s14 }
  0x50   : > { %s503_s30 = sshll.u32 %s243_s9, 3  ;;  %v505_v22 = vld [vmem:[#allocation2] ss:$0 sm:$0xff]  ;;  %s241_s15 = scalar_lea.vmem [#allocation7], %s502_s13 }
  0x51   : > { %s245_s6 = scalar_lea.vmem %s987_s0, %s503_s30  ;;  %s413_s16 = sshll.u32 %s241_s15, 4  ;;  %s947_s16 = int_to_ptr.vmem [resolvable:$true] %s413_s16 }
  0x52   : > { %v247_v1 = vld [vmem:[%s245_s6] sm:$0xff]  ;;  %531 = vmatpush3.bf16.msra.mxu0 %v611_v4  ;;  %s400_s25 = scalar_lea.sflag [#allocation4], %s239_s12  ;;  %s680_s9 = scalar_lea.vmem %s947_s16, 128 }
  0x53   : > { %250 = vadd.xlane.f32.xlu0 %v247_v1  ;;  %v253_v2 = vmul.f32 %v247_v1, %v247_v1  ;;  %532 = vmatprep.subr.bf16.mxu0 %v754_v0  ;;  %p681_p12 = scmp.ne.s32.totalorder %s947_s16, %s680_s9  ;;  %p1005_p1 = scmp.ne.s32.totalorder %s996_s28, 0 }
  0x54   : > { %s756_s22 = smov [#allocation7]  }
  0x55   : > { %p682_p2 = pnand %p681_p12, %p1005_p1  ;;  %s684_s30 = sshll.u32 %s756_s22, 4  ;;  %s685_s30 = int_to_ptr.vmem [resolvable:$false] %s684_s30 }
  0x56   : > { %533 = vmatpush3.bf16.msra.mxu0 %v612_v5  ;;  %s686_s10 = scalar_lea.vmem %s685_s30, 256  ;;  %p687_p4 = scmp.lt.s32.totalorder %s947_s16, %s685_s30 }
  0x57   : > { %254 = vadd.xlane.f32.xlu0 %v253_v2  ;;  %534 = vmatprep.subr.bf16.mxu0 %v754_v0  ;;  %p683_p3 = pneg %p682_p2  ;;  %p688_p7 = scmp.lt.s32.totalorder %s686_s10, %s680_s9 }
  0x59   : > { %p689_p8 = por %p688_p7, %p687_p4 }
  0x5a   : > { %535 = vmatpush3.bf16.msra.mxu0 %v613_v6 }
  0x5b   : > { %536 = vmatprep.subr.bf16.mxu0 %v754_v0  ;;  %p690_p11 = pnand %p689_p8, %p683_p3 }
  0x5e   : > { %537 = vmatpush3.bf16.msra.mxu0 %v614_v7 }
  0x5f   : > { %538 = vmatprep.subr.bf16.mxu0 %v754_v0 }
  0x62   : > { %539 = vmatpush3.bf16.msra.mxu0 %v615_v8 }
  0x63   : > { %540 = vmatprep.subr.bf16.mxu0 %v754_v0 }
  0x66   : > { %541 = vmatpush3.bf16.msra.mxu0 %v616_v9 }
  0x67   : > { %542 = vmatprep.subr.bf16.mxu0 %v754_v0 }
  0x6a   : > { %543 = vmatpush3.bf16.msra.mxu0 %v617_v10 }
  0xe0   : > { %v251_v11 = vpop.xlane.xlu0 %250 }
  0xe1   : > { %v252_v12 = vmul.f32 0.03125, %v251_v11 }
  0xe3   : > { %v257_v14 = vmul.f32 %v252_v12, %v252_v12  ;;  %v259_v18 = vsub.f32 %v247_v1, %v252_v12 }
  0xe4   : > { %v255_v13 = vpop.xlane.xlu0 %254 }
  0xe5   : > { %v256_v15 = vmul.f32 0.03125, %v255_v13 }
  0xe7   : > { %v258_v16 = vsub.f32 %v256_v15, %v257_v14 }
  0xe9   : > { %v260_v17 = vadd.f32 1e-05, %v258_v16 }
  0xeb   : > { %618 = vrsqrt.f32 %v260_v17 }
  0xf5   : > { %v619_v19 = vpop.eup %618 }
  0xf6   : > { %v262_v21 = vmul.f32 %v619_v19, %v259_v18 }
  0xf8   : > { %v269_v23 = vmul.f32 %v504_v20, %v262_v21 }
  0xfa   : > { %v276_v24 = vadd.f32 %v505_v22, %v269_v23 }
  0xfc   : > { %v277_v25 = vpack.c.bf16 %v276_v24, %v276_v24 }
  0xfe   : > { %545 = vmatmul.mubr.bf16.vlgmr.msra.gmra.mrb[0].mxu0 %v277_v25 }
 0x1d1   : > { %v383_v27 = vpop.f32.mrb[0].mxu0 }
 0x1d2   : > { %v384_v28 = vadd.f32 %v506_v26, %v383_v27  ;;  %v546_v29 = vpop.f32.mrb[1].mxu0 }
 0x1d3   : > { %v386_v30 = vpop.f32.mrb[2].mxu0 }
 0x1d4   : > { %389 = vmax.xlane.f32.xlu1 %v384_v28  ;;  %v547_v31 = vpop.f32.mrb[3].mxu0 }
 0x261   : > { %v390_v32 = vpop.xlane.xlu1 %389 }
 0x262   : > { %v391_v33 = vsub.f32 %v384_v28, %v390_v32 }
 0x264   : > { %v392_v34 = vmul.f32 1.442695, %v391_v33 }
 0x266   : > { %620 = vpow2.f32 %v392_v34 }
 0x270   : > { %v621_v35 = vpop.eup %620 }
 0x271   : > { %394 = vadd.xlane.f32.xlu1 %v621_v35 }
 0x2fe   : > { %v395_v36 = vpop.xlane.xlu1 %394 }
 0x2ff   : > { %622 = vrcp.f32 %v395_v36 }
 0x309   : > { %v623_v37 = vpop.eup %622 }
 0x30a   : > { %v397_v38 = vmul.f32 %v623_v37, %v621_v35 }
 0x30c   : > { %398 = vst [vmem:[%s241_s15] sm:$0xff] %v397_v38 }
 0x30d   : > { %693 = shalt.err (!%p690_p11)
}
 0x30e   : > { %s694_s26 = scalar_lea.hbm %s945_s23, 128  ;;  %s698_s11 = scalar_lea.hbm %s992_s5, 256 }
 0x30f   : > { %p695_p13 = scmp.ne.s32.totalorder %s945_s23, %s694_s26  ;;  %p699_p5 = scmp.lt.u32.totalorder %s945_s23, %s992_s5 }
 0x310   : > { %p700_p9 = scmp.lt.u32.totalorder %s698_s11, %s694_s26  ;;  %p702_p12 = scmp.lt.u32.totalorder %s694_s26, %s945_s23 }
 0x311   : > { %p696_p0 = pnand %p695_p13, %p1005_p1 }
 0x312   : > { %p701_p10 = por %p700_p9, %p699_p5 }
 0x313   : > { %p697_p6 = pneg %p696_p0 }
 0x314   : > { %p703_p2 = por %p702_p12, %p701_p10 }
 0x316   : > { %p704_p3 = pnand %p703_p2, %p697_p6 }
 0x318   : > { %707 = shalt.err (!%p704_p3)
}
 0x319   : > { %556 = dma.vmem_to_hbm [thread:$0]  (%p1005_p1), %s947_s16, 128, %s945_s23, %s400_s25  }
 0x31a PF: > { %p573_p4 = scmp.ge.s32.totalorder %s750_s21, 2  ;;  %s425_s14 = sand.u32 1, %s738_s18  }
 0x31b   : > { %p1006_p7 = scmp.ne.s32.totalorder %s997_s29, 0  ;;  %s426_s15 = scalar_lea.sflag [#allocation4], %s425_s14 }
 0x31d   : > { %p566_p8 = pnand %p573_p4, %p1006_p7 }
 0x31f   : > { %733 = dma.done.wait (!%p566_p8), %s426_s15, 128  }
 0x320   : > { %735 = vsyncadd (!%p566_p8), %s426_s15, 4294967168  ;;  %p17_p11 = scmp.ge.s32.totalorder %s812_s24, 4   ;;  %s1007_s18 = smov %s742_s19 }
 0x321   : > { %s1008_s19 = smov %s746_s20  ;;  %s1009_s20 = smov %s823_s27 }
 0x322   : > { %s1010_s21 = smov %s812_s24  ;;  %19 = sbr.rel (!%p17_p11) target bundleno = 5 (0x5), region = 84 }
 0x329   :  { %431 = vsyncpa [#allocation3], 1 }
 0x32a   :  { %433 = vsyncpa [#allocation3 + $0x1], 1 }
 0x32b   :  { %434 = vsyncpa [#allocation6], 1 }
 0x32c   :  { %435 = vsyncpa [#allocation4], 1 }
 0x32d   :  { %437 = vsyncpa [#allocation4 + $0x1], 1 }

// kernel: transformer_forward.10
= control target key start
LH: loop header
LB: loop body
LE: loop exit
PB: predicated region body
PF: predicated region fallthrough
CT: control target
= control target key end

     0   :  { %s4134_s0 = inlined_call_operand.vmem [shape: f32[2,8,128], index: 0, kind: input, shape index: {}]   ;;  %s4135_s1 = inlined_call_operand.vmem [shape: f32[2,8,128], index: 1, kind: input, shape index: {}]   ;;  %s4136_s2 = inlined_call_operand.vmem [shape: f32[1,128], index: 2, kind: input, shape index: {}]   ;;  %s4137_s3 = inlined_call_operand.vmem [shape: f32[1,128], index: 3, kind: input, shape index: {}]   ;;  %s4138_s4 = inlined_call_operand.vmem [shape: bf16[128,384], index: 4, kind: input, shape index: {}]   ;;  %s4139_s5 = inlined_call_operand.vmem [shape: f32[1,384], index: 5, kind: input, shape index: {}]   ;;  %s4140_s6 = inlined_call_operand.vmem [shape: f32[128,128], index: 6, kind: input, shape index: {}]   ;;  %s4141_s7 = inlined_call_operand.vmem [shape: f32[1,128], index: 7, kind: input, shape index: {}]   ;;  %s4142_s8 = inlined_call_operand.vmem [shape: f32[1,128], index: 8, kind: input, shape index: {}]   ;;  %s4143_s9 = inlined_call_operand.vmem [shape: f32[1,128], index: 9, kind: input, shape index: {}]   ;;  %s4144_s10 = inlined_call_operand.vmem [shape: bf16[128,128], index: 10, kind: input, shape index: {}]   ;;  %s4145_s11 = inlined_call_operand.vmem [shape: f32[1,128], index: 11, kind: input, shape index: {}]   ;;  %s4146_s12 = inlined_call_operand.vmem [shape: bf16[128,256], index: 12, kind: input, shape index: {}]   ;;  %s4147_s13 = inlined_call_operand.vmem [shape: f32[1,256], index: 13, kind: input, shape index: {}]   ;;  %s4148_s14 = inlined_call_operand.vmem [shape: f32[128,128], index: 14, kind: input, shape index: {}]   ;;  %s4149_s15 = inlined_call_operand.vmem [shape: f32[1,128], index: 15, kind: input, shape index: {}]   ;;  %s4150_s16 = inlined_call_operand.vmem [shape: f32[1,128], index: 16, kind: input, shape index: {}]   ;;  %s4151_s17 = inlined_call_operand.vmem [shape: f32[1,128], index: 17, kind: input, shape index: {}]   ;;  %s4152_s18 = inlined_call_operand.vmem [shape: bf16[128,128], index: 18, kind: input, shape index: {}]   ;;  %s4153_s19 = inlined_call_operand.vmem [shape: f32[1,128], index: 19, kind: input, shape index: {}]   ;;  %s4154_s20 = inlined_call_operand.vmem [shape: bf16[128,128], index: 20, kind: input, shape index: {}]   ;;  %s4155_s21 = inlined_call_operand.vmem [shape: f32[1,128], index: 21, kind: input, shape index: {}]   ;;  %s4156_s22 = inlined_call_operand.vmem [shape: f32[2,8,128], index: 22, kind: output, shape index: {}]  }
   0x1   :  { %4166 = sst [smem:[#allocation2_spill]] %s4134_s0 }
   0x2   :  { %4167 = sst [smem:[#allocation3_spill]] %s4135_s1 }
   0x3   :  { %4168 = sst [smem:[#allocation4_spill]] %s4136_s2 }
   0x4   :  { %4169 = sst [smem:[#allocation5_spill]] %s4137_s3  ;;  %s3582_s3 = smov 0  }
   0x5   :  { %4170 = sst [smem:[#allocation6_spill]] %s4138_s4 }
   0x6   :  { %4171 = sst [smem:[#allocation7_spill]] %s4139_s5 }
   0x7   :  { %4172 = sst [smem:[#allocation8_spill]] %s4140_s6 }
   0x8 LB: > { %s2904_s28 = sadd.s32 4294967295, %s3459_s3   ;;  %p2908_p0 = scmp.ge.s32.totalorder %s3459_s3, 1  ;;  %s3459_s3 = sphi %s3582_s3, %s32_s3  }
   0x9   : > { %p620_p1 = scmp.lt.s32.totalorder %s3459_s3, 3 }
   0xb   : > { %p621_p2 = pnand %p2908_p0, %p620_p1 }
   0xc   : > { %p684_p3 = scmp.lt.s32.totalorder (!%p621_p2), %s2904_s28, 1  ;;  %s4173_s4 = sld [smem:[#allocation6_spill]] (!%p621_p2)  ;;  %v3461_v1 = vmov (!%p621_p2), 0.0   ;;  %v3462_v24 = vmov (!%p621_p2), 0   ;;  %vm3463_vm0 = vmmov (!%p621_p2), 0   ;;  %v763_v43 = vlaneseq (!%p621_p2) }
   0xd   : > { %624 = sbr.rel (%p621_p2) target bundleno = 6147 (0x1803), region = 108  ;;  %3097 = vmatprep.subr.bf16.mxu1 (!%p621_p2), %v3461_v1  ;;  %s4174_s26 = sld [smem:[#allocation2_spill]] (!%p621_p2)  ;;  %938 = vmatprep.mubr.bf16.mxu0 (!%p621_p2), %v3462_v24  ;;  %vm1057_vm1 = vcmask (!%p621_p2), 1043456   ;;  %vm994_vm2 = vcmask (!%p621_p2), 64512  }
   0xe   : > { %3113 = vmatprep.mubr.msk.bf16.mxu1 (!%p621_p2), %vm3463_vm0, %v3461_v1  ;;  %s4175_s6 = sld [smem:[#allocation4_spill]] (!%p621_p2)  ;;  %v3697_v44 = vshrl.u32 (!%p621_p2), %v763_v43, 7  ;;  %s4163_s30 = smov (!%p621_p2), 120  }
   0xf   : > { %s4161_s0 = smov (!%p621_p2), 112   ;;  %s4178_s5 = sld [smem:[#allocation8_spill]] (!%p621_p2) }
  0x10   : > { %v773_v45 = vsub.s32 (!%p621_p2), 2, %v3697_v44  ;;  %v769_v47 = vsub.s32 (!%p621_p2), 1, %v3697_v44  ;;  %v765_v48 = vsub.s32 (!%p621_p2), 0, %v3697_v44  ;;  %s4179_s23 = sld [smem:[#allocation3_spill]] (!%p621_p2) }
  0x12   : > { %v3335_v0 = vld [vmem:[%s4173_s4 + $0x4] ss:$12 sps:$4 sm:$0xff] (!%p621_p2)   ;;  %v3337_v2 = vld [vmem:[%s4173_s4] ss:$12 sps:$4 sm:$0xff] (!%p621_p2)   ;;  %v3338_v3 = vld [vmem:[%s4173_s4 + $0x8] ss:$12 sps:$4 sm:$0xff] (!%p621_p2)  }
  0x13   : > { %906 = vmatprep.subr.bf16.mxu0 (!%p621_p2), %v3335_v0  ;;  %3098 = vmatpush3.bf16.msra.mxu1 (!%p621_p2), %v3338_v3  ;;  %v3339_v6 = vld [vmem:[%s4173_s4 + $0x1c] ss:$12 sps:$4 sm:$0xff] (!%p621_p2)   ;;  %v3341_v7 = vld [vmem:[%s4173_s4 + $0x18] ss:$12 sps:$4 sm:$0xff] (!%p621_p2)   ;;  %v3342_v8 = vld [vmem:[%s4173_s4 + $0x20] ss:$12 sps:$4 sm:$0xff] (!%p621_p2)  }
  0x14   : > { %s4184_s28 = smov (!%p684_p3, %s2904_s28), 1  ;;  %907 = vmatpush1.bf16.msra.mxu0 %v3337_v2  ;;  %3099 = vmatprep.subr.bf16.mxu1 %v3461_v1  ;;  %v3343_v9 = vld [vmem:[%s4173_s4 + $0x34] ss:$12 sps:$4 sm:$0xff]   ;;  %v3345_v10 = vld [vmem:[%s4173_s4 + $0x30] ss:$12 sps:$4 sm:$0xff]  }
  0x15   : > { %s3600_s24 = sshll.u32 %s4184_s28, 3  ;;  %908 = vmatprep.subr.bf16.mxu0 %v3339_v6  ;;  %v3346_v11 = vld [vmem:[%s4173_s4 + $0x38] ss:$12 sps:$4 sm:$0xff]   ;;  %v3349_v13 = vld [vmem:[%s4173_s4 + $0x48] ss:$12 sps:$4 sm:$0xff]   ;;  %s4177_s28 = sld [smem:[#allocation7_spill]] }
  0x16   : > { %s687_s2 = scalar_lea.vmem %s4174_s26, %s3600_s24  ;;  %v3347_v12 = vld [vmem:[%s4173_s4 + $0x4c] ss:$12 sps:$4 sm:$0xff]   ;;  %v3350_v14 = vld [vmem:[%s4173_s4 + $0x50] ss:$12 sps:$4 sm:$0xff]   ;;  %v3354_v17 = vld [vmem:[%s4173_s4 + $0x68] ss:$12 sps:$4 sm:$0xff]   ;;  %s691_s1 = scalar_lea.vmem %s4179_s23, %s3600_s24 }
  0x17   : > { %v3607_v4 = vld [vmem:[%s687_s2] sm:$0xff]  ;;  %3100 = vmatpush3.bf16.msra.mxu1 %v3342_v8  ;;  %v3355_v18 = vld [vmem:[%s4173_s4 + $0x7c] ss:$12 sps:$4 sm:$0xff]   ;;  %v3363_v25 = vld [vmem:[%s4173_s4 + $0xac] ss:$12 sps:$4 sm:$0xff]   ;;  %s4176_s2 = sld [smem:[#allocation5_spill]]  ;;  %s695_s25 = scalar_lea.vmem %s4156_s22, %s3600_s24 }
  0x18   : > { %701 = vadd.xlane.f32.xlu0 %v3607_v4  ;;  %v704_v5 = vmul.f32 %v3607_v4, %v3607_v4  ;;  %909 = vmatpush1.bf16.msra.mxu0 %v3341_v7  ;;  %v3351_v15 = vld [vmem:[%s4173_s4 + $0x64] ss:$12 sps:$4 sm:$0xff]   ;;  %v3353_v16 = vld [vmem:[%s4173_s4 + $0x60] ss:$12 sps:$4 sm:$0xff]   ;;  %v3365_v26 = vld [vmem:[%s4173_s4 + $0xa8] ss:$12 sps:$4 sm:$0xff]  }
  0x19   : > { %3101 = vmatprep.subr.bf16.mxu1 %v3461_v1  ;;  %910 = vmatprep.subr.bf16.mxu0 %v3343_v9  ;;  %v3357_v19 = vld [vmem:[%s4173_s4 + $0x78] ss:$12 sps:$4 sm:$0xff]   ;;  %v3358_v20 = vld [vmem:[%s4173_s4 + $0x80] ss:$12 sps:$4 sm:$0xff]   ;;  %v3361_v22 = vld [vmem:[%s4173_s4 + $0x90] ss:$12 sps:$4 sm:$0xff]  }
  0x1a   : > { %v3359_v21 = vld [vmem:[%s4173_s4 + $0x94] ss:$12 sps:$4 sm:$0xff]   ;;  %v3362_v23 = vld [vmem:[%s4173_s4 + $0x98] ss:$12 sps:$4 sm:$0xff]   ;;  %v3366_v27 = vld [vmem:[%s4173_s4 + $0xb0] ss:$12 sps:$4 sm:$0xff]  }
  0x1b   : > { %3102 = vmatpush3.bf16.msra.mxu1 %v3346_v11  ;;  %v2912_v37 = vld [vmem:[%s4175_s6] ss:$0 sm:$0xff]  ;;  %s4159_s26 = smov 104   ;;  %s4182_s6 = smov 104  }
  0x1c   : > { %705 = vadd.xlane.f32.xlu0 %v704_v5  ;;  %911 = vmatpush1.bf16.msra.mxu0 %v3345_v10  ;;  %v761_v46 = vld [vmem:[%s4177_s28] sm:$0x7] }
  0x1d   : > { %3103 = vmatprep.subr.bf16.mxu1 %v3461_v1  ;;  %912 = vmatprep.subr.bf16.mxu0 %v3347_v12  ;;  %v2913_v39 = vld [vmem:[%s4176_s2] ss:$0 sm:$0xff]  ;;  %v774_v49 = vrot.slane %v761_v46, %v773_v45  ;;  %v770_v50 = vrot.slane %v761_v46, %v769_v47  ;;  %v766_v51 = vrot.slane %v761_v46, %v765_v48 }
  0x1f   : > { %3104 = vmatpush3.bf16.msra.mxu1 %v3350_v14 }
  0x20   : > { %913 = vmatpush1.bf16.msra.mxu0 %v3349_v13  ;;  %3105 = vmatprep.subr.bf16.mxu1 %v3461_v1 }
  0x21   : > { %914 = vmatprep.subr.bf16.mxu0 %v3351_v15 }
  0x23   : > { %3106 = vmatpush3.bf16.msra.mxu1 %v3354_v17 }
  0x24   : > { %915 = vmatpush1.bf16.msra.mxu0 %v3353_v16  ;;  %3107 = vmatprep.subr.bf16.mxu1 %v3461_v1 }
  0x25   : > { %916 = vmatprep.subr.bf16.mxu0 %v3355_v18 }
  0x27   : > { %3108 = vmatpush3.bf16.msra.mxu1 %v3358_v20 }
  0x28   : > { %917 = vmatpush1.bf16.msra.mxu0 %v3357_v19  ;;  %3109 = vmatprep.subr.bf16.mxu1 %v3461_v1 }
  0x29   : > { %918 = vmatprep.subr.bf16.mxu0 %v3359_v21 }
  0x2b   : > { %3110 = vmatpush3.bf16.msra.mxu1 %v3362_v23 }
  0x2c   : > { %919 = vmatpush1.bf16.msra.mxu0 %v3361_v22  ;;  %3111 = vmatprep.subr.bf16.mxu1 %v3461_v1 }
  0x2d   : > { %920 = vmatprep.subr.bf16.mxu0 %v3363_v25 }
  0x2f   : > { %3112 = vmatpush3.bf16.msra.mxu1 %v3366_v27 }
  0x30   : > { %921 = vmatpush1.bf16.msra.mxu0 %v3365_v26  ;;  %3123 = vmatprep.subr.bf16.mxu1 %v3461_v1 }
  0x31   : > { %3117 = vmatprep.subr.bf16.mxu0 %v3461_v1 }
  0xa5   : > { %v702_v28 = vpop.xlane.xlu0 %701 }
  0xa6   : > { %v703_v29 = vmul.f32 0.03125, %v702_v28 }
  0xa8   : > { %v708_v31 = vmul.f32 %v703_v29, %v703_v29  ;;  %v710_v35 = vsub.f32 %v3607_v4, %v703_v29 }
  0xa9   : > { %v706_v30 = vpop.xlane.xlu0 %705 }
  0xaa   : > { %v707_v32 = vmul.f32 0.03125, %v706_v30 }
  0xac   : > { %v709_v33 = vsub.f32 %v707_v32, %v708_v31 }
  0xae   : > { %v711_v34 = vadd.f32 1e-05, %v709_v33 }
  0xb0   : > { %3415 = vrsqrt.f32 %v711_v34 }
  0xba   : > { %v3416_v36 = vpop.eup %3415 }
  0xbb   : > { %v713_v38 = vmul.f32 %v3416_v36, %v710_v35  ;;  %v988_v36 = vld [vmem:[%s4178_s5 + $0x8] sm:$0xff] }
  0xbd   : > { %v720_v40 = vmul.f32 %v2912_v37, %v713_v38  ;;  %v1218_v37 = vpack.c.bf16 %v988_v36, %v988_v36 }
  0xbf   : > { %v727_v41 = vadd.f32 %v2913_v39, %v720_v40  ;;  %v1223_v38 = vsel %vm1057_vm1, %v1218_v37, 0 }
  0xc1   : > { %v728_v42 = vpack.c.bf16 %v727_v41, %v727_v41 }
  0xc3   : > { %939 = vmatmul.mubr.bf16.vlgmr.msra.gmra.mrb[0].mxu0 %v728_v42  ;;  %3114 = vmatmul.mubr.bf16.vlgmr.msra.gmra.mrb[0].mxu1 %v728_v42  ;;  %v987_v42 = vld [vmem:[%s4178_s5] sm:$0xff] }
  0xc4   : > { %3119 = vmatprep.mubr.msk.bf16.mxu0 %vm3463_vm0, %v3461_v1  ;;  %3125 = vmatprep.mubr.msk.bf16.mxu1 %vm3463_vm0, %v3461_v1  ;;  %v1102_v43 = vpack.c.bf16 %v987_v42, %v987_v42 }
 0x196   : > { %v940_v52 = vpop.f32.mrb[0].mxu0  ;;  %v981_v53 = vpop.f32.mrb[0].mxu1 }
 0x197   : > { %v982_v54 = vadd.f32 %v981_v53, %v774_v49  ;;  %v942_v55 = vpop.f32.mrb[1].mxu0  ;;  %v3115_v56 = vpop.f32.mrb[1].mxu1  ;;  %v941_v63 = vadd.f32 %v940_v52, %v766_v51 }
 0x198   : > { %v943_v57 = vadd.f32 %v942_v55, %v770_v50  ;;  %v944_v58 = vpop.f32.mrb[2].mxu0  ;;  %v984_v59 = vpop.f32.mrb[2].mxu1  ;;  %v1269_v50 = vsel %vm1057_vm1, %v1102_v43, 0 }
 0x199   : > { %v3709_v60 = vpack.c.bf16 %v982_v54, %v982_v54  ;;  %v945_v61 = vpop.f32.mrb[3].mxu0  ;;  %v3116_v62 = vpop.f32.mrb[3].mxu1  ;;  %v3720_v5 = vpack.c.bf16 %v941_v63, %v941_v63 }
 0x19a   : > { %v3711_v0 = vpack.c.bf16 %v943_v57, %v943_v57 }
 0x19b   : > { %v1059_v2 = vsel %vm1057_vm1, %v3709_v60, 0 }
 0x19c   : > { %3124 = vmatpush3.bf16.msra.mxu1 %v1059_v2  ;;  %1107 = vrot.lane.b32.xlu1 %v3711_v0, %s4163_s30  ;;  %v999_v3 = vsel %vm994_vm2, %v3711_v0, 0 }
 0x19d   : > { %3118 = vmatpush3.bf16.xpose.msra.mxu0 %v999_v3  ;;  %3135 = vmatprep.subr.bf16.mxu1 %v3461_v1 }
 0x19e   : > { %3129 = vmatprep.subr.bf16.mxu0 %v3461_v1 }
 0x1a0   : > { %1104 = vrot.lane.b32.xlu1 %v3720_v5, %s4163_s30 }
 0x1a4   : > { %3120 = vmatmul.mubr.msk.bf16.vlgmr.msra.gmra.mrb[4].mxu0 %vm994_vm2, %v3720_v5 }
 0x1a5   : > { %3131 = vmatprep.mubr.msk.bf16.mxu0 %vm3463_vm0, %v3461_v1 }
 0x20e   : > { %v1108_v6 = vpop.permute.xlu1 %1107 }
 0x20f   : > { %v1113_v7 = vsel %vm994_vm2, %v1108_v6, 0 }
 0x210   : > { %3130 = vmatpush3.bf16.xpose.msra.mxu0 %v1113_v7 }
 0x211   : > { %3141 = vmatprep.subr.bf16.mxu0 %v3461_v1 }
 0x212   : > { %v1105_v8 = vpop.permute.xlu1 %1104 }
 0x217   : > { %3132 = vmatmul.mubr.msk.bf16.vlgmr.msra.gmra.mrb[8].mxu0 %vm994_vm2, %v1105_v8 }
 0x218   : > { %3143 = vmatprep.mubr.msk.bf16.mxu0 %vm3463_vm0, %v3461_v1  ;;  %3142 = vmatpush3.bf16.msra.mxu0 %v1223_v38 }
 0x219   : > { %3153 = vmatprep.subr.bf16.mxu0 %v3461_v1 }
 0x277   : > { %v1035_v9 = vpop.f32.mrb[4].mxu0 }
 0x278   : > { %v1041_v10 = vmul.f32 0.35355338, %v1035_v9  ;;  %v3121_v11 = vpop.f32.mrb[5].mxu0 }
 0x279   : > { %v1038_v12 = vpop.f32.mrb[6].mxu0 }
 0x27a   : > { %v3122_v13 = vpop.f32.mrb[7].mxu0  ;;  %v1042_v14 = vsel %vm994_vm2, %v1041_v10, -inf }
 0x27b   : > { %1043 = vmax.xlane.f32.xlu0 %v1042_v14 }
 0x2ea   : > { %v1149_v15 = vpop.f32.mrb[8].mxu0 }
 0x2eb   : > { %v1155_v16 = vmul.f32 0.35355338, %v1149_v15  ;;  %v3133_v17 = vpop.f32.mrb[9].mxu0 }
 0x2ec   : > { %v1152_v18 = vpop.f32.mrb[10].mxu0 }
 0x2ed   : > { %v3134_v19 = vpop.f32.mrb[11].mxu0  ;;  %v1156_v20 = vsel %vm994_vm2, %v1155_v16, -inf }
 0x2ee   : > { %1157 = vmax.xlane.f32.xlu1 %v1156_v20 }
 0x2ff   : > { %1311 = vrot.lane.b32.xlu1 %v3720_v5, %s4161_s0 }
 0x308   : > { %v1044_v21 = vpop.xlane.xlu0 %1043 }
 0x309   : > { %v1045_v22 = vsub.f32 %v1041_v10, %v1044_v21 }
 0x30b   : > { %v1046_v23 = vmul.f32 1.442695, %v1045_v22 }
 0x30d   : > { %3417 = vpow2.f32 %v1046_v23 }
 0x317   : > { %v3418_v25 = vpop.eup %3417 }
 0x318   : > { %v1048_v26 = vsel %vm994_vm2, %v3418_v25, 0.0 }
 0x319   : > { %1049 = vadd.xlane.f32.xlu0 %v1048_v26 }
 0x37b   : > { %v1158_v27 = vpop.xlane.xlu1 %1157 }
 0x37c   : > { %v1159_v28 = vsub.f32 %v1155_v16, %v1158_v27 }
 0x37e   : > { %v1160_v29 = vmul.f32 1.442695, %v1159_v28 }
 0x37f   : > { %v1312_v2 = vpop.permute.xlu1 %1311 }
 0x380   : > { %3419 = vpow2.f32 %v1160_v29 }
 0x38a   : > { %v3420_v30 = vpop.eup %3419 }
 0x38b   : > { %v1162_v31 = vsel %vm994_vm2, %v3420_v30, 0.0 }
 0x38c   : > { %1163 = vadd.xlane.f32.xlu0 %v1162_v31 }
 0x3a2   : > { %1169 = vrot.lane.b32.xlu0 %v3709_v60, %s4163_s30  ;;  %s4181_s30 = smov 112  }
 0x3a6   : > { %v1050_v32 = vpop.xlane.xlu0 %1049  ;;  %1313 = vrot.lane.b32.xlu0 %v3711_v0, %s4161_s0 }
 0x3a7   : > { %3421 = vrcp.f32 %v1050_v32 }
 0x3b1   : > { %v3422_v33 = vpop.eup %3421 }
 0x3b2   : > { %v1052_v34 = vmul.f32 %v3422_v33, %v3418_v25 }
 0x3b4   : > { %v1053_v35 = vpack.c.bf16 %v1052_v34, %v1052_v34 }
 0x3b6   : > { %3126 = vmatmul.mubr.msk.bf16.vlgmr.msra.gmra.mrb[4].mxu1 %vm994_vm2, %v1053_v35 }
 0x3b7   : > { %3137 = vmatprep.mubr.msk.bf16.mxu1 %vm3463_vm0, %v3461_v1 }
 0x419   : > { %v1164_v39 = vpop.xlane.xlu0 %1163 }
 0x41a   : > { %3423 = vrcp.f32 %v1164_v39 }
 0x41d   : > { %v1170_v40 = vpop.permute.xlu0 %1169 }
 0x41e   : > { %v1175_v41 = vsel %vm1057_vm1, %v1170_v40, 0 }
 0x41f   : > { %3136 = vmatpush3.bf16.msra.mxu1 %v1175_v41 }
 0x420   : > { %3147 = vmatprep.subr.bf16.mxu1 %v3461_v1 }
 0x421   : > { %v1314_v56 = vpop.permute.xlu0 %1313 }
 0x422   : > { %v1319_v62 = vsel %vm994_vm2, %v1314_v56, 0 }
 0x424   : > { %v3424_v45 = vpop.eup %3423 }
 0x425   : > { %v1166_v46 = vmul.f32 %v3424_v45, %v3420_v30 }
 0x427   : > { %v1167_v49 = vpack.c.bf16 %v1166_v46, %v1166_v46 }
 0x429   : > { %3138 = vmatmul.mubr.msk.bf16.vlgmr.msra.gmra.mrb[8].mxu1 %vm994_vm2, %v1167_v49 }
 0x42a   : > { %3148 = vmatpush3.bf16.msra.mxu1 %v1269_v50  ;;  %3149 = vmatprep.mubr.msk.bf16.mxu1 %vm3463_vm0, %v3461_v1 }
 0x42b   : > { %3159 = vmatprep.subr.bf16.mxu1 %v3461_v1 }
 0x489   : > { %v1095_v51 = vpop.f32.mrb[4].mxu1 }
 0x48a   : > { %v1101_v52 = vpack.c.bf16 %v1095_v51, %v1095_v51  ;;  %v3127_v53 = vpop.f32.mrb[5].mxu1 }
 0x48b   : > { %v1098_v54 = vpop.f32.mrb[6].mxu1 }
 0x48c   : > { %v3128_v55 = vpop.f32.mrb[7].mxu1  ;;  %3150 = vmatmul.mubr.msk.bf16.vlgmr.msra.gmra.mrb[12].mxu1 %vm994_vm2, %v1101_v52 }
 0x48d   : > { %3161 = vmatprep.mubr.msk.bf16.mxu1 %vm3463_vm0, %v3461_v1 }
 0x4fc   : > { %v1211_v57 = vpop.f32.mrb[8].mxu1 }
 0x4fd   : > { %v1217_v58 = vpack.c.bf16 %v1211_v57, %v1211_v57  ;;  %v3139_v59 = vpop.f32.mrb[9].mxu1  ;;  %v990_v57 = vld [vmem:[%s4178_s5 + $0x18] sm:$0xff] }
 0x4fe   : > { %v1214_v61 = vpop.f32.mrb[10].mxu1 }
 0x4ff   : > { %v3140_v63 = vpop.f32.mrb[11].mxu1  ;;  %3144 = vmatmul.mubr.msk.bf16.vlgmr.msra.gmra.mrb[12].mxu0 %vm994_vm2, %v1217_v58  ;;  %v1583_v58 = vpack.c.bf16 %v990_v57, %v990_v57 }
 0x500   : > { %3154 = vmatpush3.bf16.xpose.msra.mxu0 %v1319_v62  ;;  %3155 = vmatprep.mubr.msk.bf16.mxu0 %vm3463_vm0, %v3461_v1 }
 0x501   : > { %3165 = vmatprep.subr.bf16.mxu0 %v3461_v1 }
 0x507   : > { %3156 = vmatmul.mubr.msk.bf16.vlgmr.msra.gmra.mrb[16].mxu0 %vm994_vm2, %v1312_v2 }
 0x508   : > { %3167 = vmatprep.mubr.msk.bf16.mxu0 %vm3463_vm0, %v3461_v1 }
 0x55f   : > { %v1305_v3 = vpop.f32.mrb[12].mxu1 }
 0x560   : > { %v3151_v6 = vpop.f32.mrb[13].mxu1 }
 0x561   : > { %v1308_v7 = vpop.f32.mrb[14].mxu1 }
 0x562   : > { %v3152_v8 = vpop.f32.mrb[15].mxu1 }
 0x5d2   : > { %v1259_v9 = vpop.f32.mrb[12].mxu0 }
 0x5d3   : > { %v3773_v10 = vadd.f32 %v1305_v3, %v1259_v9  ;;  %v3145_v11 = vpop.f32.mrb[13].mxu0 }
 0x5d4   : > { %v1262_v12 = vpop.f32.mrb[14].mxu0 }
 0x5d5   : > { %v3146_v13 = vpop.f32.mrb[15].mxu0 }
 0x5da   : > { %v1355_v14 = vpop.f32.mrb[16].mxu0 }
 0x5db   : > { %v1361_v15 = vmul.f32 0.35355338, %v1355_v14  ;;  %v3157_v16 = vpop.f32.mrb[17].mxu0 }
 0x5dc   : > { %v1358_v17 = vpop.f32.mrb[18].mxu0  ;;  %v3372_v16 = vld [vmem:[%s4146_s12 + $0x14] ss:$8 sps:$4 sm:$0xff]  }
 0x5dd   : > { %v3158_v18 = vpop.f32.mrb[19].mxu0  ;;  %v1362_v19 = vsel %vm994_vm2, %v1361_v15, -inf  ;;  %v3376_v17 = vld [vmem:[%s4144_s10] sm:$0xff]  }
 0x5de   : > { %1363 = vmax.xlane.f32.xlu0 %v1362_v19  ;;  %v3375_v18 = vld [vmem:[%s4146_s12 + $0x24] ss:$8 sps:$4 sm:$0xff]   ;;  %v3373_v19 = vld [vmem:[%s4146_s12 + $0x20] ss:$8 sps:$4 sm:$0xff]  }
 0x5f4   : > { %1374 = vrot.lane.b32.xlu0 %v3709_v60, %s4161_s0  ;;  %s4180_s0 = smov 120  }
 0x5f8   : > { %1471 = vrot.lane.b32.xlu0 %v3720_v5, %s4159_s26 }
 0x66b   : > { %v1364_v20 = vpop.xlane.xlu0 %1363 }
 0x66c   : > { %v1365_v21 = vsub.f32 %v1361_v15, %v1364_v20  ;;  %v3369_v15 = vld [vmem:[%s4146_s12 + $0x4] ss:$8 sps:$4 sm:$0xff]   ;;  %v3379_v20 = vld [vmem:[%s4146_s12 + $0x34] ss:$8 sps:$4 sm:$0xff]  }
 0x66e   : > { %v1366_v22 = vmul.f32 1.442695, %v1365_v21  ;;  %v3377_v21 = vld [vmem:[%s4146_s12 + $0x30] ss:$8 sps:$4 sm:$0xff]  }
 0x66f   : > { %v1375_v23 = vpop.permute.xlu0 %1374 }
 0x670   : > { %3425 = vpow2.f32 %v1366_v22  ;;  %v1380_v25 = vsel %vm1057_vm1, %v1375_v23, 0 }
 0x671   : > { %3160 = vmatpush3.bf16.msra.mxu1 %v1380_v25 }
 0x672   : > { %3171 = vmatprep.subr.bf16.mxu1 %v3461_v1 }
 0x673   : > { %v1472_v33 = vpop.permute.xlu0 %1471 }
 0x67a   : > { %v3426_v26 = vpop.eup %3425 }
 0x67b   : > { %v1368_v27 = vsel %vm994_vm2, %v3426_v26, 0.0 }
 0x67c   : > { %1369 = vadd.xlane.f32.xlu1 %v1368_v27 }
 0x68d   : > { %1473 = vrot.lane.b32.xlu1 %v3711_v0, %s4159_s26  ;;  %v989_v0 = vld [vmem:[%s4178_s5 + $0x10] sm:$0xff] }
 0x68e   : > { %v1423_v34 = vpack.c.bf16 %v989_v0, %v989_v0  ;;  %v3387_v0 = vld [vmem:[%s4146_s12 + $0x54] ss:$8 sps:$4 sm:$0xff]  }
 0x690   : > { %v1428_v35 = vsel %vm1057_vm1, %v1423_v34, 0  ;;  %v3385_v34 = vld [vmem:[%s4146_s12 + $0x50] ss:$8 sps:$4 sm:$0xff]  }
 0x691   : > { %3166 = vmatpush3.bf16.msra.mxu0 %v1428_v35  ;;  %v3388_v35 = vld [vmem:[%s4144_s10 + $0x18] sm:$0xff]  }
 0x692   : > { %3177 = vmatprep.subr.bf16.mxu0 %v3461_v1 }
 0x709   : > { %v1370_v28 = vpop.xlane.xlu1 %1369 }
 0x70a   : > { %3427 = vrcp.f32 %v1370_v28 }
 0x70d   : > { %v1474_v30 = vpop.permute.xlu1 %1473 }
 0x70e   : > { %v1479_v32 = vsel %vm994_vm2, %v1474_v30, 0 }
 0x714   : > { %v3428_v5 = vpop.eup %3427 }
 0x715   : > { %v1372_v29 = vmul.f32 %v3428_v5, %v3426_v26  ;;  %v2950_v26 = vld [vmem:[%s4141_s7] ss:$0 sm:$0xff] }
 0x717   : > { %v1373_v31 = vpack.c.bf16 %v1372_v29, %v1372_v29 }
 0x719   : > { %3162 = vmatmul.mubr.msk.bf16.vlgmr.msra.gmra.mrb[16].mxu1 %vm994_vm2, %v1373_v31  ;;  %v3380_v31 = vld [vmem:[%s4144_s10 + $0x8] sm:$0xff]  }
 0x71a   : > { %3172 = vmatpush3.bf16.xpose.msra.mxu1 %v1479_v32  ;;  %3173 = vmatprep.mubr.msk.bf16.mxu1 %vm3463_vm0, %v3461_v1  ;;  %v3383_v32 = vld [vmem:[%s4146_s12 + $0x44] ss:$8 sps:$4 sm:$0xff]  }
 0x71b   : > { %3183 = vmatprep.subr.bf16.mxu1 %v3461_v1 }
 0x721   : > { %3174 = vmatmul.mubr.msk.bf16.vlgmr.msra.gmra.mrb[20].mxu1 %vm994_vm2, %v1472_v33  ;;  %v3384_v33 = vld [vmem:[%s4144_s10 + $0x10] sm:$0xff]  }
 0x722   : > { %3185 = vmatprep.mubr.msk.bf16.mxu1 %vm3463_vm0, %v3461_v1 }
 0x7ec   : > { %v1416_v36 = vpop.f32.mrb[16].mxu1 }
 0x7ed   : > { %v1422_v37 = vpack.c.bf16 %v1416_v36, %v1416_v36  ;;  %v3163_v38 = vpop.f32.mrb[17].mxu1  ;;  %v3391_v36 = vld [vmem:[%s4146_s12 + $0x64] ss:$8 sps:$4 sm:$0xff]  }
 0x7ee   : > { %v1419_v39 = vpop.f32.mrb[18].mxu1  ;;  %v3392_v38 = vld [vmem:[%s4144_s10 + $0x20] sm:$0xff]  }
 0x7ef   : > { %v3164_v40 = vpop.f32.mrb[19].mxu1  ;;  %3168 = vmatmul.mubr.msk.bf16.vlgmr.msra.gmra.mrb[20].mxu0 %vm994_vm2, %v1422_v37  ;;  %v3389_v37 = vld [vmem:[%s4146_s12 + $0x60] ss:$8 sps:$4 sm:$0xff]   ;;  %v3395_v39 = vld [vmem:[%s4146_s12 + $0x74] ss:$8 sps:$4 sm:$0xff]  }
 0x7f0   : > { %3179 = vmatprep.mubr.msk.bf16.mxu0 %vm3463_vm0, %v3461_v1  ;;  %v3393_v40 = vld [vmem:[%s4146_s12 + $0x70] ss:$8 sps:$4 sm:$0xff]  }
 0x7f4   : > { %v1515_v41 = vpop.f32.mrb[20].mxu1 }
 0x7f5   : > { %v1521_v42 = vmul.f32 0.35355338, %v1515_v41  ;;  %v3175_v43 = vpop.f32.mrb[21].mxu1  ;;  %v698_v41 = vld [vmem:[%s691_s1] sm:$0xff] }
 0x7f6   : > { %v1518_v45 = vpop.f32.mrb[22].mxu1  ;;  %v1781_v43 = vpack.c.bf16 %v698_v41, %v698_v41 }
 0x7f7   : > { %v3176_v46 = vpop.f32.mrb[23].mxu1  ;;  %v1522_v49 = vsel %vm994_vm2, %v1521_v42, -inf  ;;  %v3397_v45 = vld [vmem:[%s4144_s10 + $0x30] sm:$0xff]  }
 0x7f8   : > { %1523 = vmax.xlane.f32.xlu0 %v1522_v49  ;;  %v3398_v46 = vld [vmem:[%s4144_s10 + $0x38] sm:$0xff]  }
 0x80e   : > { %1534 = vrot.lane.b32.xlu0 %v3709_v60, %s4159_s26  ;;  %v1588_v60 = vsel %vm1057_vm1, %v1583_v58, 0  ;;  %v2951_v58 = vld [vmem:[%s4142_s8] ss:$0 sm:$0xff] }
 0x80f   : > { %3184 = vmatpush3.bf16.msra.mxu1 %v1588_v60 }
 0x810   : > { %1890 = vmatprep.subr.bf16.mxu1 %v3369_v15 }
 0x885   : > { %v1524_v50 = vpop.xlane.xlu0 %1523 }
 0x886   : > { %v1525_v51 = vsub.f32 %v1521_v42, %v1524_v50  ;;  %v3396_v42 = vld [vmem:[%s4144_s10 + $0x28] sm:$0xff]  }
 0x888   : > { %v1526_v52 = vmul.f32 1.442695, %v1525_v51 }
 0x889   : > { %v1535_v53 = vpop.permute.xlu0 %1534 }
 0x88a   : > { %3429 = vpow2.f32 %v1526_v52  ;;  %v1540_v54 = vsel %vm1057_vm1, %v1535_v53, 0 }
 0x88b   : > { %3178 = vmatpush3.bf16.msra.mxu0 %v1540_v54 }
 0x88c   : > { %3189 = vmatprep.subr.bf16.mxu0 %v3461_v1 }
 0x894   : > { %v3430_v55 = vpop.eup %3429 }
 0x895   : > { %v1528_v56 = vsel %vm994_vm2, %v3430_v55, 0.0 }
 0x896   : > { %1529 = vadd.xlane.f32.xlu1 %v1528_v56 }
 0x8c2   : > { %v1464_v59 = vpop.f32.mrb[20].mxu0 }
 0x8c3   : > { %v1470_v61 = vadd.f32 %v1464_v59, %v3773_v10  ;;  %v3169_v62 = vpop.f32.mrb[21].mxu0  ;;  %v3367_v10 = vld [vmem:[%s4146_s12] ss:$8 sps:$4 sm:$0xff]  }
 0x8c4   : > { %v1467_v63 = vpop.f32.mrb[22].mxu0  ;;  %v2952_v59 = vld [vmem:[%s4143_s9] ss:$0 sm:$0xff] }
 0x8c5   : > { %v3170_v2 = vpop.f32.mrb[23].mxu0 }
 0x8c6   : > { %v1798_v2 = vld [vmem:[%s4147_s13] sm:$0x3] }
 0x923   : > { %v1530_v3 = vpop.xlane.xlu1 %1529 }
 0x924   : > { %3431 = vrcp.f32 %v1530_v3  ;;  %v1803_v3 = vrot.slane %v1798_v2, %v765_v48 }
 0x92e   : > { %v3432_v6 = vpop.eup %3431 }
 0x92f   : > { %v1532_v7 = vmul.f32 %v3432_v6, %v3430_v55  ;;  %v1807_v6 = vrot.slane %v1798_v2, %v769_v47  ;;  %v2953_v47 = vld [vmem:[%s4145_s11] ss:$0 sm:$0xff] }
 0x931   : > { %v1533_v8 = vpack.c.bf16 %v1532_v7, %v1532_v7 }
 0x933   : > { %3180 = vmatmul.mubr.msk.bf16.vlgmr.msra.gmra.mrb[24].mxu0 %vm994_vm2, %v1533_v8 }
 0x934   : > { %3205 = vmatprep.mubr.msk.bf16.mxu0 %vm3463_vm0, %v3461_v1  ;;  %3190 = vmatpush3.bf16.msra.mxu0 %v3376_v17 }
 0x935   : > { %3191 = vmatprep.subr.bf16.mxu0 %v3461_v1 }
 0x938   : > { %3192 = vmatpush3.bf16.msra.mxu0 %v3380_v31 }
 0x939   : > { %3193 = vmatprep.subr.bf16.mxu0 %v3461_v1 }
 0x93c   : > { %3194 = vmatpush3.bf16.msra.mxu0 %v3384_v33 }
 0x93d   : > { %3195 = vmatprep.subr.bf16.mxu0 %v3461_v1 }
 0x940   : > { %3196 = vmatpush3.bf16.msra.mxu0 %v3388_v35 }
 0x941   : > { %3197 = vmatprep.subr.bf16.mxu0 %v3461_v1 }
 0x944   : > { %3198 = vmatpush3.bf16.msra.mxu0 %v3392_v38 }
 0x945   : > { %3199 = vmatprep.subr.bf16.mxu0 %v3461_v1 }
 0x948   : > { %3200 = vmatpush3.bf16.msra.mxu0 %v3396_v42 }
 0x949   : > { %3201 = vmatprep.subr.bf16.mxu0 %v3461_v1 }
 0x94c   : > { %3202 = vmatpush3.bf16.msra.mxu0 %v3397_v45 }
 0x94d   : > { %3203 = vmatprep.subr.bf16.mxu0 %v3461_v1 }
 0x950   : > { %3204 = vmatpush3.bf16.msra.mxu0 %v3398_v46 }
 0x951   : > { %3209 = vmatprep.subr.bf16.mxu0 %v3461_v1 }
 0xa06   : > { %v1576_v9 = vpop.f32.mrb[24].mxu0 }
 0xa07   : > { %v1582_v11 = vpack.c.bf16 %v1576_v9, %v1576_v9  ;;  %v3181_v12 = vpop.f32.mrb[25].mxu0 }
 0xa08   : > { %v1579_v13 = vpop.f32.mrb[26].mxu0 }
 0xa09   : > { %v3182_v14 = vpop.f32.mrb[27].mxu0  ;;  %3186 = vmatmul.mubr.msk.bf16.vlgmr.msra.gmra.mrb[24].mxu1 %vm994_vm2, %v1582_v11 }
 0xa0a   : > { %1922 = vmatprep.mubr.bf16.mxu1 %v3462_v24  ;;  %1891 = vmatpush1.bf16.msra.mxu1 %v3367_v10  ;;  %v3370_v24 = vld [vmem:[%s4146_s12 + $0x10] ss:$8 sps:$4 sm:$0xff]  }
 0xa0b   : > { %1892 = vmatprep.subr.bf16.mxu1 %v3372_v16 }
 0xa0e   : > { %1893 = vmatpush1.bf16.msra.mxu1 %v3370_v24 }
 0xa0f   : > { %1894 = vmatprep.subr.bf16.mxu1 %v3375_v18 }
 0xa12   : > { %1895 = vmatpush1.bf16.msra.mxu1 %v3373_v19 }
 0xa13   : > { %1896 = vmatprep.subr.bf16.mxu1 %v3379_v20 }
 0xa16   : > { %1897 = vmatpush1.bf16.msra.mxu1 %v3377_v21 }
 0xa17   : > { %1898 = vmatprep.subr.bf16.mxu1 %v3383_v32 }
 0xadc   : > { %v1624_v22 = vpop.f32.mrb[24].mxu1 }
 0xadd   : > { %v1630_v23 = vadd.f32 %v1624_v22, %v1470_v61  ;;  %v3187_v25 = vpop.f32.mrb[25].mxu1 }
 0xade   : > { %v1627_v27 = vpop.f32.mrb[26].mxu1 }
 0xadf   : > { %v1631_v28 = vadd.f32 %v1630_v23, %v3607_v4  ;;  %v3188_v5 = vpop.f32.mrb[27].mxu1  ;;  %v3381_v4 = vld [vmem:[%s4146_s12 + $0x40] ss:$8 sps:$4 sm:$0xff]  }
 0xae0   : > { %1899 = vmatpush1.bf16.msra.mxu1 %v3381_v4 }
 0xae1   : > { %v3849_v29 = vadd.f32 %v2950_v26, %v1631_v28  ;;  %1900 = vmatprep.subr.bf16.mxu1 %v3387_v0 }
 0xae3   : > { %1642 = vadd.xlane.f32.xlu1 %v3849_v29  ;;  %v1645_v30 = vmul.f32 %v3849_v29, %v3849_v29 }
 0xae4   : > { %1901 = vmatpush1.bf16.msra.mxu1 %v3385_v34 }
 0xae5   : > { %1902 = vmatprep.subr.bf16.mxu1 %v3391_v36 }
 0xae7   : > { %1646 = vadd.xlane.f32.xlu1 %v1645_v30 }
 0xae8   : > { %1903 = vmatpush1.bf16.msra.mxu1 %v3389_v37 }
 0xae9   : > { %1904 = vmatprep.subr.bf16.mxu1 %v3395_v39 }
 0xaec   : > { %1905 = vmatpush1.bf16.msra.mxu1 %v3393_v40 }
 0xaed   : > { %3215 = vmatprep.subr.bf16.mxu1 %v3461_v1 }
 0xaef   : > { %1923 = vmatmul.mubr.bf16.vlgmr.msra.gmra.mrb[28].mxu1 %v1781_v43 }
 0xaf0   : > { %3217 = vmatprep.mubr.msk.bf16.mxu1 %vm3463_vm0, %v3461_v1 }
 0xb70   : > { %v1643_v49 = vpop.xlane.xlu1 %1642 }
 0xb71   : > { %v1644_v50 = vmul.f32 0.03125, %v1643_v49 }
 0xb73   : > { %v1649_v52 = vmul.f32 %v1644_v50, %v1644_v50  ;;  %v1651_v56 = vsub.f32 %v3849_v29, %v1644_v50 }
 0xb74   : > { %v1647_v51 = vpop.xlane.xlu1 %1646 }
 0xb75   : > { %v1648_v53 = vmul.f32 0.03125, %v1647_v51  ;;  %v1932_v51 = vld [vmem:[%s4148_s14 + $0x8] sm:$0xff] }
 0xb77   : > { %v1650_v54 = vsub.f32 %v1648_v53, %v1649_v52  ;;  %v2160_v52 = vpack.c.bf16 %v1932_v51, %v1932_v51 }
 0xb79   : > { %v1652_v55 = vadd.f32 1e-05, %v1650_v54  ;;  %v2165_v53 = vsel %vm1057_vm1, %v2160_v52, 0 }
 0xb7b   : > { %3433 = vrsqrt.f32 %v1652_v55 }
 0xb85   : > { %v3434_v57 = vpop.eup %3433 }
 0xb86   : > { %v1654_v60 = vmul.f32 %v3434_v57, %v1651_v56  ;;  %v1931_v57 = vld [vmem:[%s4148_s14] sm:$0xff] }
 0xb88   : > { %v1661_v61 = vmul.f32 %v2951_v58, %v1654_v60  ;;  %v2044_v58 = vpack.c.bf16 %v1931_v57, %v1931_v57 }
 0xb8a   : > { %v1668_v62 = vadd.f32 %v2952_v59, %v1661_v61 }
 0xb8c   : > { %v1669_v63 = vpack.c.bf16 %v1668_v62, %v1668_v62  ;;  %v2211_v62 = vsel %vm1057_vm1, %v2044_v58, 0 }
 0xb8e   : > { %3206 = vmatmul.mubr.bf16.vlgmr.msra.gmra.mrb[28].mxu0 %v1669_v63 }
 0xb8f   : > { %3211 = vmatprep.mubr.msk.bf16.mxu0 %vm3463_vm0, %v3461_v1 }
 0xbc2   : > { %v1924_v7 = vpop.f32.mrb[28].mxu1 }
 0xbc3   : > { %v1925_v8 = vadd.f32 %v1924_v7, %v1803_v3  ;;  %v1926_v9 = vpop.f32.mrb[29].mxu1 }
 0xbc4   : > { %v1927_v11 = vadd.f32 %v1926_v9, %v1807_v6  ;;  %v1928_v12 = vpop.f32.mrb[30].mxu1 }
 0xbc5   : > { %v3929_v13 = vpack.c.bf16 %v1925_v8, %v1925_v8  ;;  %v1929_v14 = vpop.f32.mrb[31].mxu1 }
 0xbc6   : > { %v3931_v10 = vpack.c.bf16 %v1927_v11, %v1927_v11 }
 0xbc7   : > { %2049 = vrot.lane.b32.xlu0 %v3929_v13, %s4180_s0  ;;  %v1942_v15 = vsel %vm994_vm2, %v3929_v13, 0 }
 0xbc8   : > { %3210 = vmatpush3.bf16.xpose.msra.mxu0 %v1942_v15  ;;  %v2001_v44 = vsel %vm1057_vm1, %v3931_v10, 0 }
 0xbc9   : > { %3216 = vmatpush3.bf16.msra.mxu1 %v2001_v44  ;;  %3221 = vmatprep.subr.bf16.mxu0 %v3461_v1 }
 0xbca   : > { %3227 = vmatprep.subr.bf16.mxu1 %v3461_v1 }
 0xc39   : > { %v2050_v16 = vpop.permute.xlu0 %2049 }
 0xc3a   : > { %v2055_v21 = vsel %vm994_vm2, %v2050_v16, 0 }
 0xc61   : > { %v1775_v48 = vpop.f32.mrb[28].mxu0 }
 0xc62   : > { %v1776_v17 = vadd.f32 %v2953_v47, %v1775_v48  ;;  %v3207_v24 = vpop.f32.mrb[29].mxu0 }
 0xc63   : > { %v1778_v18 = vpop.f32.mrb[30].mxu0 }
 0xc64   : > { %v3944_v19 = vpack.c.bf16 %v1776_v17, %v1776_v17  ;;  %v3208_v20 = vpop.f32.mrb[31].mxu0 }
 0xc66   : > { %2046 = vrot.lane.b32.xlu1 %v3944_v19, %s4180_s0  ;;  %3212 = vmatmul.mubr.msk.bf16.vlgmr.msra.gmra.mrb[32].mxu0 %vm994_vm2, %v3944_v19 }
 0xc67   : > { %3222 = vmatpush3.bf16.xpose.msra.mxu0 %v2055_v21  ;;  %3223 = vmatprep.mubr.msk.bf16.mxu0 %vm3463_vm0, %v3461_v1 }
 0xc68   : > { %3233 = vmatprep.subr.bf16.mxu0 %v3461_v1 }
 0xcd8   : > { %v2047_v22 = vpop.permute.xlu1 %2046 }
 0xcd9   : > { %3224 = vmatmul.mubr.msk.bf16.vlgmr.msra.gmra.mrb[36].mxu0 %vm994_vm2, %v2047_v22 }
 0xcda   : > { %3235 = vmatprep.mubr.msk.bf16.mxu0 %vm3463_vm0, %v3461_v1  ;;  %3234 = vmatpush3.bf16.msra.mxu0 %v2165_v53 }
 0xcdb   : > { %3245 = vmatprep.subr.bf16.mxu0 %v3461_v1 }
 0xd39   : > { %v1978_v23 = vpop.f32.mrb[32].mxu0 }
 0xd3a   : > { %v1984_v25 = vmul.f32 0.35355338, %v1978_v23  ;;  %v3213_v26 = vpop.f32.mrb[33].mxu0 }
 0xd3b   : > { %v1981_v27 = vpop.f32.mrb[34].mxu0 }
 0xd3c   : > { %v3214_v28 = vpop.f32.mrb[35].mxu0  ;;  %v1985_v5 = vsel %vm994_vm2, %v1984_v25, -inf }
 0xd3d   : > { %1986 = vmax.xlane.f32.xlu0 %v1985_v5 }
 0xdac   : > { %v2091_v30 = vpop.f32.mrb[36].mxu0 }
 0xdad   : > { %v2097_v31 = vmul.f32 0.35355338, %v2091_v30  ;;  %v3225_v32 = vpop.f32.mrb[37].mxu0 }
 0xdae   : > { %v2094_v4 = vpop.f32.mrb[38].mxu0 }
 0xdaf   : > { %v3226_v33 = vpop.f32.mrb[39].mxu0  ;;  %v2098_v0 = vsel %vm994_vm2, %v2097_v31, -inf }
 0xdb0   : > { %2099 = vmax.xlane.f32.xlu1 %v2098_v0 }
 0xdc1   : > { %2255 = vrot.lane.b32.xlu1 %v3929_v13, %s4181_s30 }
 0xdca   : > { %v1987_v34 = vpop.xlane.xlu0 %1986 }
 0xdcb   : > { %v1988_v35 = vsub.f32 %v1984_v25, %v1987_v34 }
 0xdcd   : > { %v1989_v36 = vmul.f32 1.442695, %v1988_v35 }
 0xdcf   : > { %3435 = vpow2.f32 %v1989_v36 }
 0xdd9   : > { %v3436_v37 = vpop.eup %3435 }
 0xdda   : > { %v1991_v38 = vsel %vm994_vm2, %v3436_v37, 0.0 }
 0xddb   : > { %1992 = vadd.xlane.f32.xlu0 %v1991_v38 }
 0xe3d   : > { %v2100_v39 = vpop.xlane.xlu1 %2099 }
 0xe3e   : > { %v2101_v40 = vsub.f32 %v2097_v31, %v2100_v39 }
 0xe40   : > { %v2102_v41 = vmul.f32 1.442695, %v2101_v40 }
 0xe41   : > { %v2256_v8 = vpop.permute.xlu1 %2255 }
 0xe42   : > { %3437 = vpow2.f32 %v2102_v41  ;;  %v2261_v15 = vsel %vm994_vm2, %v2256_v8, 0 }
 0xe4c   : > { %v3438_v42 = vpop.eup %3437 }
 0xe4d   : > { %v2104_v43 = vsel %vm994_vm2, %v3438_v42, 0.0 }
 0xe4e   : > { %2105 = vadd.xlane.f32.xlu0 %v2104_v43 }
 0xe64   : > { %2111 = vrot.lane.b32.xlu0 %v3931_v10, %s4180_s0 }
 0xe68   : > { %v1993_v45 = vpop.xlane.xlu0 %1992  ;;  %2253 = vrot.lane.b32.xlu0 %v3944_v19, %s4181_s30 }
 0xe69   : > { %3439 = vrcp.f32 %v1993_v45 }
 0xe73   : > { %v3440_v46 = vpop.eup %3439 }
 0xe74   : > { %v1995_v49 = vmul.f32 %v3440_v46, %v3436_v37 }
 0xe76   : > { %v1996_v50 = vpack.c.bf16 %v1995_v49, %v1995_v49 }
 0xe78   : > { %3218 = vmatmul.mubr.msk.bf16.vlgmr.msra.gmra.mrb[32].mxu1 %vm994_vm2, %v1996_v50 }
 0xe79   : > { %3229 = vmatprep.mubr.msk.bf16.mxu1 %vm3463_vm0, %v3461_v1 }
 0xedb   : > { %v2106_v54 = vpop.xlane.xlu0 %2105 }
 0xedc   : > { %3441 = vrcp.f32 %v2106_v54 }
 0xedf   : > { %v2112_v55 = vpop.permute.xlu0 %2111 }
 0xee0   : > { %v2117_v56 = vsel %vm1057_vm1, %v2112_v55, 0 }
 0xee1   : > { %3228 = vmatpush3.bf16.msra.mxu1 %v2117_v56 }
 0xee2   : > { %3239 = vmatprep.subr.bf16.mxu1 %v3461_v1 }
 0xee3   : > { %v2254_v47 = vpop.permute.xlu0 %2253 }
 0xee6   : > { %v3442_v60 = vpop.eup %3441 }
 0xee7   : > { %v2108_v59 = vmul.f32 %v3442_v60, %v3438_v42 }
 0xee9   : > { %v2109_v61 = vpack.c.bf16 %v2108_v59, %v2108_v59 }
 0xeeb   : > { %3230 = vmatmul.mubr.msk.bf16.vlgmr.msra.gmra.mrb[36].mxu1 %vm994_vm2, %v2109_v61 }
 0xeec   : > { %3240 = vmatpush3.bf16.msra.mxu1 %v2211_v62  ;;  %3241 = vmatprep.mubr.msk.bf16.mxu1 %vm3463_vm0, %v3461_v1 }
 0xeed   : > { %3251 = vmatprep.subr.bf16.mxu1 %v3461_v1 }
 0xf4b   : > { %v2037_v63 = vpop.f32.mrb[32].mxu1 }
 0xf4c   : > { %v2043_v2 = vpack.c.bf16 %v2037_v63, %v2037_v63  ;;  %v3219_v3 = vpop.f32.mrb[33].mxu1  ;;  %v1934_v63 = vld [vmem:[%s4148_s14 + $0x18] sm:$0xff] }
 0xf4d   : > { %v2040_v6 = vpop.f32.mrb[34].mxu1 }
 0xf4e   : > { %v3220_v7 = vpop.f32.mrb[35].mxu1  ;;  %3242 = vmatmul.mubr.msk.bf16.vlgmr.msra.gmra.mrb[40].mxu1 %vm994_vm2, %v2043_v2  ;;  %v2525_v2 = vpack.c.bf16 %v1934_v63, %v1934_v63 }
 0xf4f   : > { %3253 = vmatprep.mubr.msk.bf16.mxu1 %vm3463_vm0, %v3461_v1 }
 0xf50   : > { %v2530_v3 = vsel %vm1057_vm1, %v2525_v2, 0 }
 0xfbe   : > { %v2153_v9 = vpop.f32.mrb[36].mxu1 }
 0xfbf   : > { %v2159_v11 = vpack.c.bf16 %v2153_v9, %v2153_v9  ;;  %v3231_v12 = vpop.f32.mrb[37].mxu1 }
 0xfc0   : > { %v2156_v14 = vpop.f32.mrb[38].mxu1 }
 0xfc1   : > { %v3232_v44 = vpop.f32.mrb[39].mxu1  ;;  %3236 = vmatmul.mubr.msk.bf16.vlgmr.msra.gmra.mrb[40].mxu0 %vm994_vm2, %v2159_v11 }
 0xfc2   : > { %3246 = vmatpush3.bf16.xpose.msra.mxu0 %v2261_v15  ;;  %3247 = vmatprep.mubr.msk.bf16.mxu0 %vm3463_vm0, %v3461_v1 }
 0xfc3   : > { %3257 = vmatprep.subr.bf16.mxu0 %v3461_v1 }
 0xfc9   : > { %3248 = vmatmul.mubr.msk.bf16.vlgmr.msra.gmra.mrb[44].mxu0 %vm994_vm2, %v2254_v47 }
 0xfca   : > { %3259 = vmatprep.mubr.msk.bf16.mxu0 %vm3463_vm0, %v3461_v1 }
0x1021   : > { %v2247_v48 = vpop.f32.mrb[40].mxu1 }
0x1022   : > { %v3243_v16 = vpop.f32.mrb[41].mxu1 }
0x1023   : > { %v2250_v17 = vpop.f32.mrb[42].mxu1 }
0x1024   : > { %v3244_v24 = vpop.f32.mrb[43].mxu1 }
0x1094   : > { %v2201_v18 = vpop.f32.mrb[40].mxu0 }
0x1095   : > { %v3996_v20 = vadd.f32 %v2247_v48, %v2201_v18  ;;  %v3237_v21 = vpop.f32.mrb[41].mxu0 }
0x1096   : > { %v2204_v22 = vpop.f32.mrb[42].mxu0 }
0x1097   : > { %v3238_v23 = vpop.f32.mrb[43].mxu0 }
0x109c   : > { %v2297_v25 = vpop.f32.mrb[44].mxu0 }
0x109d   : > { %v2303_v26 = vmul.f32 0.35355338, %v2297_v25  ;;  %v3249_v27 = vpop.f32.mrb[45].mxu0  ;;  %v2990_v25 = vld [vmem:[%s4149_s15] ss:$0 sm:$0xff] }
0x109e   : > { %v2300_v28 = vpop.f32.mrb[46].mxu0 }
0x109f   : > { %v3250_v5 = vpop.f32.mrb[47].mxu0  ;;  %v2304_v30 = vsel %vm994_vm2, %v2303_v26, -inf }
0x10a0   : > { %2305 = vmax.xlane.f32.xlu0 %v2304_v30 }
0x10b6   : > { %2316 = vrot.lane.b32.xlu0 %v3931_v10, %s4181_s30 }
0x10ba   : > { %2413 = vrot.lane.b32.xlu0 %v3944_v19, %s4182_s6 }
0x112d   : > { %v2306_v31 = vpop.xlane.xlu0 %2305 }
0x112e   : > { %v2307_v32 = vsub.f32 %v2303_v26, %v2306_v31  ;;  %v3400_v31 = vld [vmem:[%s4152_s18 + $0x8] sm:$0xff]  }
0x1130   : > { %v2308_v4 = vmul.f32 1.442695, %v2307_v32  ;;  %v3402_v32 = vld [vmem:[%s4152_s18 + $0x18] sm:$0xff]  }
0x1131   : > { %v2317_v33 = vpop.permute.xlu0 %2316 }
0x1132   : > { %3443 = vpow2.f32 %v2308_v4  ;;  %v2322_v0 = vsel %vm1057_vm1, %v2317_v33, 0  ;;  %v3403_v4 = vld [vmem:[%s4152_s18 + $0x20] sm:$0xff]   ;;  %v3404_v33 = vld [vmem:[%s4152_s18 + $0x28] sm:$0xff]  }
0x1133   : > { %3252 = vmatpush3.bf16.msra.mxu1 %v2322_v0  ;;  %v3405_v0 = vld [vmem:[%s4152_s18 + $0x30] sm:$0xff]  }
0x1134   : > { %3263 = vmatprep.subr.bf16.mxu1 %v3461_v1 }
0x1135   : > { %v2414_v41 = vpop.permute.xlu0 %2413 }
0x113c   : > { %v3444_v34 = vpop.eup %3443 }
0x113d   : > { %v2310_v35 = vsel %vm994_vm2, %v3444_v34, 0.0 }
0x113e   : > { %2311 = vadd.xlane.f32.xlu1 %v2310_v35  ;;  %v3407_v35 = vld [vmem:[%s4154_s20] sm:$0xff]  }
0x114f   : > { %2415 = vrot.lane.b32.xlu1 %v3929_v13, %s4182_s6  ;;  %v1933_v13 = vld [vmem:[%s4148_s14 + $0x10] sm:$0xff] }
0x1150   : > { %v2365_v42 = vpack.c.bf16 %v1933_v13, %v1933_v13 }
0x1152   : > { %v2370_v43 = vsel %vm1057_vm1, %v2365_v42, 0 }
0x1153   : > { %3258 = vmatpush3.bf16.msra.mxu0 %v2370_v43 }
0x1154   : > { %3269 = vmatprep.subr.bf16.mxu0 %v3461_v1 }
0x11cb   : > { %v2312_v36 = vpop.xlane.xlu1 %2311 }
0x11cc   : > { %3445 = vrcp.f32 %v2312_v36  ;;  %v3408_v36 = vld [vmem:[%s4154_s20 + $0x8] sm:$0xff]  }
0x11cf   : > { %v2416_v38 = vpop.permute.xlu1 %2415 }
0x11d0   : > { %v2421_v40 = vsel %vm994_vm2, %v2416_v38, 0  ;;  %v3411_v38 = vld [vmem:[%s4154_s20 + $0x20] sm:$0xff]  }
0x11d6   : > { %v3446_v19 = vpop.eup %3445 }
0x11d7   : > { %v2314_v37 = vmul.f32 %v3446_v19, %v3444_v34  ;;  %v3406_v34 = vld [vmem:[%s4152_s18 + $0x38] sm:$0xff]   ;;  %v3409_v19 = vld [vmem:[%s4154_s20 + $0x10] sm:$0xff]  }
0x11d9   : > { %v2315_v39 = vpack.c.bf16 %v2314_v37, %v2314_v37  ;;  %v3410_v37 = vld [vmem:[%s4154_s20 + $0x18] sm:$0xff]  }
0x11db   : > { %3254 = vmatmul.mubr.msk.bf16.vlgmr.msra.gmra.mrb[44].mxu1 %vm994_vm2, %v2315_v39  ;;  %v3412_v39 = vld [vmem:[%s4154_s20 + $0x28] sm:$0xff]  }
0x11dc   : > { %3264 = vmatpush3.bf16.xpose.msra.mxu1 %v2421_v40  ;;  %3265 = vmatprep.mubr.msk.bf16.mxu1 %vm3463_vm0, %v3461_v1 }
0x11dd   : > { %3275 = vmatprep.subr.bf16.mxu1 %v3461_v1 }
0x11e3   : > { %3266 = vmatmul.mubr.msk.bf16.vlgmr.msra.gmra.mrb[48].mxu1 %vm994_vm2, %v2414_v41 }
0x11e4   : > { %3277 = vmatprep.mubr.msk.bf16.mxu1 %vm3463_vm0, %v3461_v1  ;;  %3276 = vmatpush3.bf16.msra.mxu1 %v2530_v3 }
0x11e5   : > { %3301 = vmatprep.subr.bf16.mxu1 %v3461_v1 }
0x12ae   : > { %v2358_v45 = vpop.f32.mrb[44].mxu1 }
0x12af   : > { %v2364_v46 = vpack.c.bf16 %v2358_v45, %v2358_v45  ;;  %v3255_v49 = vpop.f32.mrb[45].mxu1 }
0x12b0   : > { %v2361_v50 = vpop.f32.mrb[46].mxu1 }
0x12b1   : > { %v3256_v51 = vpop.f32.mrb[47].mxu1  ;;  %3260 = vmatmul.mubr.msk.bf16.vlgmr.msra.gmra.mrb[48].mxu0 %vm994_vm2, %v2364_v46 }
0x12b2   : > { %3271 = vmatprep.mubr.msk.bf16.mxu0 %vm3463_vm0, %v3461_v1  ;;  %v2991_v51 = vld [vmem:[%s4150_s16] ss:$0 sm:$0xff] }
0x12b6   : > { %v2457_v52 = vpop.f32.mrb[48].mxu1 }
0x12b7   : > { %v2463_v53 = vmul.f32 0.35355338, %v2457_v52  ;;  %v3267_v54 = vpop.f32.mrb[49].mxu1 }
0x12b8   : > { %v2460_v55 = vpop.f32.mrb[50].mxu1 }
0x12b9   : > { %v3268_v56 = vpop.f32.mrb[51].mxu1  ;;  %v2464_v57 = vsel %vm994_vm2, %v2463_v53, -inf }
0x12ba   : > { %2465 = vmax.xlane.f32.xlu1 %v2464_v57  ;;  %v3413_v57 = vld [vmem:[%s4154_s20 + $0x30] sm:$0xff]  }
0x1347   : > { %v2466_v58 = vpop.xlane.xlu1 %2465 }
0x1348   : > { %v2467_v60 = vsub.f32 %v2463_v53, %v2466_v58  ;;  %v2992_v53 = vld [vmem:[%s4151_s17] ss:$0 sm:$0xff]  ;;  %v3414_v58 = vld [vmem:[%s4154_s20 + $0x38] sm:$0xff]  }
0x134a   : > { %v2468_v59 = vmul.f32 1.442695, %v2467_v60  ;;  %v2993_v60 = vld [vmem:[%s4153_s19] ss:$0 sm:$0xff] }
0x134c   : > { %3447 = vpow2.f32 %v2468_v59 }
0x1356   : > { %v3448_v61 = vpop.eup %3447 }
0x1357   : > { %v2470_v62 = vsel %vm994_vm2, %v3448_v61, 0.0 }
0x1358   : > { %2471 = vadd.xlane.f32.xlu0 %v2470_v62 }
0x136e   : > { %2476 = vrot.lane.b32.xlu0 %v3931_v10, %s4182_s6 }
0x1384   : > { %v2406_v6 = vpop.f32.mrb[48].mxu0 }
0x1385   : > { %v2412_v7 = vadd.f32 %v2406_v6, %v3996_v20  ;;  %v3261_v8 = vpop.f32.mrb[49].mxu0  ;;  %v3399_v20 = vld [vmem:[%s4152_s18] sm:$0xff]  }
0x1386   : > { %v2409_v9 = vpop.f32.mrb[50].mxu0 }
0x1387   : > { %v3262_v11 = vpop.f32.mrb[51].mxu0 }
0x13e5   : > { %v2472_v12 = vpop.xlane.xlu0 %2471 }
0x13e6   : > { %3449 = vrcp.f32 %v2472_v12 }
0x13e9   : > { %v2477_v14 = vpop.permute.xlu0 %2476 }
0x13ea   : > { %v2482_v10 = vsel %vm1057_vm1, %v2477_v14, 0 }
0x13eb   : > { %3270 = vmatpush3.bf16.msra.mxu0 %v2482_v10 }
0x13ec   : > { %3281 = vmatprep.subr.bf16.mxu0 %v3461_v1 }
0x13f0   : > { %v3450_v15 = vpop.eup %3449 }
0x13f1   : > { %v2474_v44 = vmul.f32 %v3450_v15, %v3448_v61 }
0x13f3   : > { %v2475_v47 = vpack.c.bf16 %v2474_v44, %v2474_v44 }
0x13f5   : > { %3272 = vmatmul.mubr.msk.bf16.vlgmr.msra.gmra.mrb[52].mxu0 %vm994_vm2, %v2475_v47 }
0x13f6   : > { %3297 = vmatprep.mubr.msk.bf16.mxu0 %vm3463_vm0, %v3461_v1  ;;  %3282 = vmatpush3.bf16.msra.mxu0 %v3399_v20 }
0x13f7   : > { %3283 = vmatprep.subr.bf16.mxu0 %v3461_v1 }
0x13fa   : > { %3284 = vmatpush3.bf16.msra.mxu0 %v3400_v31 }
0x13fb   : > { %3285 = vmatprep.subr.bf16.mxu0 %v3461_v1 }
0x14c8   : > { %v2518_v48 = vpop.f32.mrb[52].mxu0 }
0x14c9   : > { %v2524_v16 = vpack.c.bf16 %v2518_v48, %v2518_v48  ;;  %v3273_v17 = vpop.f32.mrb[53].mxu0 }
0x14ca   : > { %v2521_v24 = vpop.f32.mrb[54].mxu0 }
0x14cb   : > { %v3274_v18 = vpop.f32.mrb[55].mxu0  ;;  %3278 = vmatmul.mubr.msk.bf16.vlgmr.msra.gmra.mrb[52].mxu1 %vm994_vm2, %v2524_v16 }
0x14cc   : > { %3317 = vmatprep.mubr.msk.bf16.mxu1 %vm3463_vm0, %v3461_v1  ;;  %3302 = vmatpush3.bf16.msra.mxu1 %v3407_v35 }
0x14cd   : > { %3303 = vmatprep.subr.bf16.mxu1 %v3461_v1 }
0x14d0   : > { %3304 = vmatpush3.bf16.msra.mxu1 %v3408_v36 }
0x14d1   : > { %3305 = vmatprep.subr.bf16.mxu1 %v3461_v1 }
0x14d4   : > { %3306 = vmatpush3.bf16.msra.mxu1 %v3409_v19 }
0x14d5   : > { %3307 = vmatprep.subr.bf16.mxu1 %v3461_v1 }
0x14d8   : > { %3308 = vmatpush3.bf16.msra.mxu1 %v3410_v37 }
0x14d9   : > { %3309 = vmatprep.subr.bf16.mxu1 %v3461_v1 }
0x14dc   : > { %3310 = vmatpush3.bf16.msra.mxu1 %v3411_v38 }
0x14dd   : > { %3311 = vmatprep.subr.bf16.mxu1 %v3461_v1 }
0x14e0   : > { %3312 = vmatpush3.bf16.msra.mxu1 %v3412_v39 }
0x14e1   : > { %3313 = vmatprep.subr.bf16.mxu1 %v3461_v1 }
0x14e4   : > { %3314 = vmatpush3.bf16.msra.mxu1 %v3413_v57 }
0x14e5   : > { %3315 = vmatprep.subr.bf16.mxu1 %v3461_v1 }
0x14e8   : > { %3316 = vmatpush3.bf16.msra.mxu1 %v3414_v58 }
0x159e   : > { %v2566_v21 = vpop.f32.mrb[52].mxu1 }
0x159f   : > { %v2572_v22 = vadd.f32 %v2566_v21, %v2412_v7  ;;  %v3279_v23 = vpop.f32.mrb[53].mxu1 }
0x15a0   : > { %v2569_v26 = vpop.f32.mrb[54].mxu1 }
0x15a1   : > { %v2573_v27 = vadd.f32 %v2572_v22, %v3849_v29  ;;  %v3280_v28 = vpop.f32.mrb[55].mxu1  ;;  %v3401_v29 = vld [vmem:[%s4152_s18 + $0x10] sm:$0xff]  }
0x15a2   : > { %3286 = vmatpush3.bf16.msra.mxu0 %v3401_v29 }
0x15a3   : > { %v4050_v5 = vadd.f32 %v2990_v25, %v2573_v27  ;;  %3287 = vmatprep.subr.bf16.mxu0 %v3461_v1 }
0x15a5   : > { %2584 = vadd.xlane.f32.xlu1 %v4050_v5  ;;  %v2587_v30 = vmul.f32 %v4050_v5, %v4050_v5 }
0x15a6   : > { %3288 = vmatpush3.bf16.msra.mxu0 %v3402_v32 }
0x15a7   : > { %3289 = vmatprep.subr.bf16.mxu0 %v3461_v1 }
0x15a9   : > { %2588 = vadd.xlane.f32.xlu1 %v2587_v30 }
0x15aa   : > { %3290 = vmatpush3.bf16.msra.mxu0 %v3403_v4 }
0x15ab   : > { %3291 = vmatprep.subr.bf16.mxu0 %v3461_v1 }
0x15ae   : > { %3292 = vmatpush3.bf16.msra.mxu0 %v3404_v33 }
0x15af   : > { %3293 = vmatprep.subr.bf16.mxu0 %v3461_v1 }
0x15b2   : > { %3294 = vmatpush3.bf16.msra.mxu0 %v3405_v0 }
0x15b3   : > { %3295 = vmatprep.subr.bf16.mxu0 %v3461_v1  ;;  %v3010_v1 = vld [vmem:[%s4155_s21] ss:$0 sm:$0xff] }
0x15b6   : > { %3296 = vmatpush3.bf16.msra.mxu0 %v3406_v34 }
0x1632   : > { %v2585_v40 = vpop.xlane.xlu1 %2584 }
0x1633   : > { %v2586_v41 = vmul.f32 0.03125, %v2585_v40 }
0x1635   : > { %v2591_v42 = vmul.f32 %v2586_v41, %v2586_v41  ;;  %v2593_v49 = vsub.f32 %v4050_v5, %v2586_v41 }
0x1636   : > { %v2589_v13 = vpop.xlane.xlu1 %2588 }
0x1637   : > { %v2590_v43 = vmul.f32 0.03125, %v2589_v13 }
0x1639   : > { %v2592_v45 = vsub.f32 %v2590_v43, %v2591_v42 }
0x163b   : > { %v2594_v46 = vadd.f32 1e-05, %v2592_v45 }
0x163d   : > { %3451 = vrsqrt.f32 %v2594_v46 }
0x1647   : > { %v3452_v50 = vpop.eup %3451 }
0x1648   : > { %v2596_v52 = vmul.f32 %v3452_v50, %v2593_v49 }
0x164a   : > { %v2603_v54 = vmul.f32 %v2991_v51, %v2596_v52 }
0x164c   : > { %v2610_v55 = vadd.f32 %v2992_v53, %v2603_v54 }
0x164e   : > { %v2611_v56 = vpack.c.bf16 %v2610_v55, %v2610_v55 }
0x1650   : > { %3298 = vmatmul.mubr.bf16.vlgmr.msra.gmra.mrb[56].mxu0 %v2611_v56 }
0x1723   : > { %v2717_v59 = vpop.f32.mrb[56].mxu0 }
0x1724   : > { %v2718_v61 = vadd.f32 %v2993_v60, %v2717_v59  ;;  %v3299_v62 = vpop.f32.mrb[57].mxu0 }
0x1725   : > { %v2720_v63 = vpop.f32.mrb[58].mxu0 }
0x1726   : > { %v2723_v2 = vmax.f32 %v2718_v61, 0.0  ;;  %v3300_v3 = vpop.f32.mrb[59].mxu0 }
0x1728   : > { %v2724_v6 = vpack.c.bf16 %v2723_v2, %v2723_v2 }
0x172a   : > { %3318 = vmatmul.mubr.bf16.vlgmr.msra.gmra.mrb[56].mxu1 %v2724_v6 }
0x17fd   : > { %v2823_v7 = vpop.f32.mrb[56].mxu1 }
0x17fe   : > { %v2829_v8 = vadd.f32 %v2823_v7, %v4050_v5  ;;  %v3319_v9 = vpop.f32.mrb[57].mxu1 }
0x17ff   : > { %v2826_v11 = vpop.f32.mrb[58].mxu1 }
0x1800   : > { %v2837_v12 = vadd.f32 %v3010_v1, %v2829_v8  ;;  %v3320_v14 = vpop.f32.mrb[59].mxu1 }
0x1802   : > { %2838 = vst [vmem:[%s695_s25] sm:$0xff] %v2837_v12 }
0x1803 PF: > { %s32_s3 = sadd.s32 1, %s3459_s3  }
0x1804   : > { %p29_p4 = scmp.ge.s32.totalorder %s32_s3, 4  }
0x1806   :  { %31 = sbr.rel (!%p29_p4) target bundleno = 8 (0x8), region = 141 }

</bundles_post_ra>
